<compile_context>
chip_gen: v7x
topology: tpu7x:2x2x1
jax: 0.10.0
libtpu: 0.0.40
codegen_flags: <defaults>
</compile_context>

<pallas_src>
import functools

import jax
import jax.numpy as jnp
from jax.experimental import pallas as pl
from jax.experimental.pallas import tpu as pltpu

EPS = 1e-5
SLOPE = 0.2
L4_OUT_CHANNELS = 6   # fixed by the module spec (ConvTranspose1d(64, 6, ...))
L4_CPAD = 8           # channels padded to 8 for aligned sublanes in the tail kernel

_VMEM = pl.BlockSpec(memory_space=pltpu.MemorySpace.VMEM)


# ----------------------- layers 1-3: fused Pallas kernel ---------------------

def _convt_bn_lrelu_kernel(x_ref, w_ref, g_ref, b_ref, o_ref,
                           s_ref, ss_ref, scale_ref, shift_ref,
                           *, K, cout, n_rows, eps, slope):
    """ConvTranspose1d(stride == kernel_size) + BatchNorm1d + LeakyReLU.

    grid = (2, n_row_tiles): phase 0 accumulates per-channel batch statistics,
    phase 1 recomputes the matmul and writes the normalized/activated tile.
    x: (tm, Cin) bf16, w: (Cin, K*Cout) bf16 with column = k*Cout + c,
    g/b: (1, Cout) f32, out: (tm, K*Cout) bf16.
    """
    phase = pl.program_id(0)
    i = pl.program_id(1)

    # MXU: bf16 x bf16 -> f32 accumulation.
    y = jnp.dot(x_ref[...], w_ref[...], preferred_element_type=jnp.float32)

    @pl.when(jnp.logical_and(phase == 0, i == 0))
    def _init():
        s_ref[...] = jnp.zeros_like(s_ref)
        ss_ref[...] = jnp.zeros_like(ss_ref)

    @pl.when(phase == 0)
    def _accumulate():
        # Full-lane-width column sums; the fold over taps happens once later.
        s_ref[...] += jnp.sum(y, axis=0, keepdims=True)
        ss_ref[...] += jnp.sum(y * y, axis=0, keepdims=True)

    @pl.when(jnp.logical_and(phase == 1, i == 0))
    def _finalize_stats():
        # Fold the K taps of each channel (column layout: k*cout + c).
        s_c = s_ref[:, 0:cout]
        ss_c = ss_ref[:, 0:cout]
        for k in range(1, K):
            s_c = s_c + s_ref[:, k * cout:(k + 1) * cout]
            ss_c = ss_c + ss_ref[:, k * cout:(k + 1) * cout]
        n = float(n_rows * K)
        mean = s_c / n
        # Biased variance (BatchNorm training mode); clamp against cancellation.
        var = jnp.maximum(ss_c / n - mean * mean, 0.0)
        sc = jax.lax.rsqrt(var + eps) * g_ref[...]
        sh = b_ref[...] - mean * sc
        # Broadcast scale/shift back to the K*Cout column layout so the apply
        # phase is a single full-lane-width fused multiply-add + store.
        for k in range(K):
            scale_ref[:, k * cout:(k + 1) * cout] = sc
            shift_ref[:, k * cout:(k + 1) * cout] = sh

    @pl.when(phase == 1)
    def _apply():
        z = y * scale_ref[...] + shift_ref[...]
        o_ref[...] = jnp.where(z >= 0, z, slope * z).astype(o_ref.dtype)


def _pick_tm(m):
    # 256-row tiles match the v6e/v7x MXU and keep per-tile VMEM small enough
    # for v7x (64 MiB); tiny inputs fall back to a single full-height tile.
    return 256 if m % 256 == 0 else m


def convt_bn_lrelu(x, w2, g, b):
    """x: (M, Cin) bf16, w2: (Cin, K*Cout) bf16, g/b: (1, Cout) f32."""
    M, cin = x.shape
    cout = g.shape[1]
    N = w2.shape[1]
    K = N // cout
    tm = _pick_tm(M)
    n_m = M // tm

    vmem_limit = (2 * tm * cin * 2       # double-buffered bf16 input tiles
                  + cin * N * 2          # resident packed bf16 weight
                  + 2 * tm * N * 2       # double-buffered bf16 output tiles
                  + tm * N * 4           # f32 matmul result
                  + 4 * N * 4            # stats / scale / shift scratch
                  + (16 << 20))          # headroom for compiler temporaries

    kern = functools.partial(_convt_bn_lrelu_kernel, K=K, cout=cout,
                             n_rows=M, eps=EPS, slope=SLOPE)
    return pl.pallas_call(
        kern,
        out_shape=jax.ShapeDtypeStruct((M, N), jnp.bfloat16),
        grid_spec=pltpu.PrefetchScalarGridSpec(
            num_scalar_prefetch=0,
            grid=(2, n_m),                          # (phase, row tile)
            in_specs=[
                pl.BlockSpec((tm, cin), lambda p, i: (i, 0)),
                pl.BlockSpec((cin, N), lambda p, i: (0, 0)),
                pl.BlockSpec((1, cout), lambda p, i: (0, 0)),
                pl.BlockSpec((1, cout), lambda p, i: (0, 0)),
            ],
            # All phase-0 steps park on block 0 (never written there), so no
            # garbage write-backs occur; phase 1 writes each block exactly once.
            out_specs=pl.BlockSpec((tm, N), lambda p, i: (p * i, 0)),
            scratch_shapes=[pltpu.VMEM((1, N), jnp.float32)] * 4,
        ),
        compiler_params=pltpu.CompilerParams(
            # Row tiles share the stats scratch accumulator -> keep sequential.
            dimension_semantics=("arbitrary", "arbitrary"),
            vmem_limit_bytes=int(vmem_limit)),
    )(x, w2, g, b)


# -------------------------- layer 4: fully fused tail ------------------------

def _l4_fused_kernel(he_ref, ho_ref, we_ref, wo_ref, g_ref, b_ref, o_ref, *, eps):
    """ConvTranspose1d(64->6, k=4, s=2, p=1) + BatchNorm1d + tanh, channel-major.

    The overlap-add is folded into the matmuls:
      out[b, c, 2m]   = h[b, m] . w[:, c, 1] + h[b, m-1] . w[:, c, 3]
      out[b, c, 2m+1] = h[b, m] . w[:, c, 2] + h[b, m+1] . w[:, c, 0]
    he/ho = [h, h_shifted] (M, 2*Cin) bf16; we/wo = (Cp, 2*Cin) bf16;
    g/b: (Cp, 1) f32; o: (2, Cp, M) f32 with o[0]=even, o[1]=odd positions.
    Cp = channels padded to 8 (pad rows are zero and are dropped by the caller).
    """
    nt = (((1,), (1,)), ((), ()))         # contract last dims: A @ B^T on the MXU
    even = jax.lax.dot_general(we_ref[...], he_ref[...], nt,
                               preferred_element_type=jnp.float32)    # (Cp, M)
    odd = jax.lax.dot_general(wo_ref[...], ho_ref[...], nt,
                              preferred_element_type=jnp.float32)     # (Cp, M)

    # BatchNorm1d batch statistics over all B * 2L output positions; positions
    # live on the lane axis, so reductions and stores are lane-dense.
    n = 2.0 * even.shape[1]
    s = jnp.sum(even, axis=1, keepdims=True) + jnp.sum(odd, axis=1, keepdims=True)
    ss = (jnp.sum(even * even, axis=1, keepdims=True)
          + jnp.sum(odd * odd, axis=1, keepdims=True))
    mean = s / n
    var = jnp.maximum(ss / n - mean * mean, 0.0)
    scale = jax.lax.rsqrt(var + eps) * g_ref[...]
    shift = b_ref[...] - mean * scale
    o_ref[0] = jnp.tanh(even * scale + shift)
    o_ref[1] = jnp.tanh(odd * scale + shift)


def l4_fused(h_even, h_odd, w_even, w_odd, g, b):
    M = h_even.shape[0]
    cpad = w_even.shape[0]
    vmem_limit = (2 * h_even.size * 2        # he + ho (bf16, whole-array resident)
                  + 2 * w_even.size * 2
                  + 8 * cpad * M * 4         # even/odd + f32 temporaries + output
                  + (16 << 20))
    # TODO(synk): for very long sequences this tail kernel should get the same
    # 2-phase row-tiled grid as layers 1-3 instead of whole-array VMEM residency.
    return pl.pallas_call(
        functools.partial(_l4_fused_kernel, eps=EPS),
        out_shape=jax.ShapeDtypeStruct((2, cpad, M), jnp.float32),
        in_specs=[_VMEM] * 6,
        out_specs=_VMEM,
        compiler_params=pltpu.CompilerParams(vmem_limit_bytes=int(vmem_limit)),
    )(h_even, h_odd, w_even, w_odd, g, b)


# ------------------------------ parameter packing ----------------------------

def pack_params(params):
    """One-time weight relayout + bf16 cast (kept outside the jitted forward)."""
    packed = {"layers123": []}
    for (w, g, b) in params["layers123"]:
        cin, cout, K = w.shape
        # column = k*cout + c
        w2 = jnp.transpose(w, (0, 2, 1)).reshape(cin, K * cout).astype(jnp.bfloat16)
        packed["layers123"].append(
            (w2,
             g.reshape(1, cout).astype(jnp.float32),
             b.reshape(1, cout).astype(jnp.float32)))

    w4, g4, b4 = params["layer4"]
    cin4, cout4, K4 = w4.shape
    assert K4 == 4 and cout4 == L4_OUT_CHANNELS
    wk = [jnp.zeros((L4_CPAD, cin4), jnp.float32).at[:cout4].set(w4[:, :, k].T)
          for k in range(K4)]
    w_even = jnp.concatenate([wk[1], wk[3]], axis=1).astype(jnp.bfloat16)  # (8, 2Cin)
    w_odd = jnp.concatenate([wk[2], wk[0]], axis=1).astype(jnp.bfloat16)   # (8, 2Cin)
    g4p = jnp.ones((L4_CPAD, 1), jnp.float32).at[:cout4, 0].set(g4.astype(jnp.float32))
    b4p = jnp.zeros((L4_CPAD, 1), jnp.float32).at[:cout4, 0].set(b4.astype(jnp.float32))
    packed["layer4"] = (w_even, w_odd, g4p, b4p)
    return packed


# ------------------------------ Generator forward ----------------------------

def generator_forward(x, packed):
    """x: (B, 128, L0) f32 -> (B, 6, 128 * L0) f32."""
    B, cin0, L0 = x.shape
    h = jnp.transpose(x, (0, 2, 1)).reshape(B * L0, cin0).astype(jnp.bfloat16)
    L = L0

    # Layers 1-3: ConvTranspose1d(k=4, s=4) + BN + LeakyReLU, fused kernels.
    for (w2, g, b) in packed["layers123"]:
        cout = g.shape[1]
        K = w2.shape[1] // cout
        y = convt_bn_lrelu(h, w2, g, b)               # (B*L, K*cout) bf16
        # stride == kernel_size: the NCL scatter is a pure reshape (pos = l*K+k).
        h = y.reshape(B * L * K, cout)
        L = L * K

    # Layer 4: ConvTranspose1d(64->6, k=4, s=2, p=1) + BN + tanh, fully fused.
    w_even, w_odd, g4p, b4p = packed["layer4"]
    cin4 = w_even.shape[1] // 2
    h3 = h.reshape(B, L, cin4)
    zrow = jnp.zeros((B, 1, cin4), h.dtype)
    h_prev = jnp.concatenate([zrow, h3[:, :-1, :]], axis=1)   # h[b, l-1], 0 at l=0
    h_next = jnp.concatenate([h3[:, 1:, :], zrow], axis=1)    # h[b, l+1], 0 at l=L-1
    h_e = jnp.concatenate([h3, h_prev], axis=2).reshape(B * L, 2 * cin4)
    h_o = jnp.concatenate([h3, h_next], axis=2).reshape(B * L, 2 * cin4)

    o = l4_fused(h_e, h_o, w_even, w_odd, g4p, b4p)           # (2, 8, B*L)
    o = o[:, :L4_OUT_CHANNELS, :]                             # drop channel padding
    # Interleave even/odd positions: (2, 6, B, L) -> (B, 6, L, 2) -> (B, 6, 2L).
    out = (o.reshape(2, L4_OUT_CHANNELS, B, L)
             .transpose(2, 1, 3, 0)
             .reshape(B, L4_OUT_CHANNELS, 2 * L))
    return out


# ------------------------------ references -----------------------------------

def _convT_ref(x, w, stride, padding):
    # ConvTranspose1d == dilated conv with flipped, transposed kernel.
    K = w.shape[2]
    w_conv = jnp.flip(w, axis=2).transpose(1, 0, 2)           # (Cout, Cin, K)
    return jax.lax.conv_general_dilated(
        x, w_conv, window_strides=(1,),
        padding=[(K - 1 - padding, K - 1 - padding)],
        lhs_dilation=(stride,),
        dimension_numbers=("NCH", "OIH", "NCH"))


def _bn_ref(x, g, b):
    mean = x.mean(axis=(0, 2), keepdims=True)
    var = ((x - mean) ** 2).mean(axis=(0, 2), keepdims=True)
    return (x - mean) / jnp.sqrt(var + EPS) * g.reshape(1, -1, 1) + b.reshape(1, -1, 1)


def generator_ref_f32(x, params):
    """Full-f32 reference (matches the PyTorch module semantics)."""
    h = x
    for (w, g, b), s in zip(params["layers123"], (4, 4, 4)):
        h = _convT_ref(h, w, s, 0)
        h = _bn_ref(h, g, b)
        h = jnp.where(h >= 0, h, SLOPE * h)
    w4, g4, b4 = params["layer4"]
    h = _convT_ref(h, w4, 2, 1)
    h = _bn_ref(h, g4, b4)
    return jnp.tanh(h)


def generator_ref_bf16(x, params):
    """Pure-JAX mirror of the kernel math (bf16 matmul operands, f32 accum)."""
    B, cin0, L0 = x.shape
    h = jnp.transpose(x, (0, 2, 1)).reshape(B * L0, cin0).astype(jnp.bfloat16)
    L = L0
    for (w, g, b) in params["layers123"]:
        cin, cout, K = w.shape
        w2 = jnp.transpose(w, (0, 2, 1)).reshape(cin, K * cout).astype(jnp.bfloat16)
        y = jnp.dot(h, w2, preferred_element_type=jnp.float32).reshape(B * L, K, cout)
        mean = jnp.mean(y, axis=(0, 1))
        var = jnp.maximum(jnp.mean(y * y, axis=(0, 1)) - mean * mean, 0.0)
        z = (y - mean) * jax.lax.rsqrt(var + EPS) * g + b
        z = jnp.where(z >= 0, z, SLOPE * z)
        h = z.reshape(B * L * K, cout).astype(jnp.bfloat16)
        L = L * K
    w4, g4, b4 = params["layer4"]
    cin4, cout4, K4 = w4.shape
    w42 = jnp.transpose(w4, (0, 2, 1)).reshape(cin4, K4 * cout4).astype(jnp.bfloat16)
    y = jnp.dot(h, w42, preferred_element_type=jnp.float32)
    contrib = y.reshape(B, L, K4, cout4).transpose(0, 3, 1, 2)   # (B, 6, L, K4)
    stride, pad = 2, 1
    Lout = (L - 1) * stride + K4 - 2 * pad
    full = jnp.zeros((B, cout4, (L - 1) * stride + K4), jnp.float32)
    for k in range(K4):
        full = full.at[:, :, k:k + stride * L:stride].add(contrib[:, :, :, k])
    yc = full[:, :, pad:pad + Lout]
    mean = yc.mean(axis=(0, 2), keepdims=True)
    var = jnp.maximum((yc * yc).mean(axis=(0, 2), keepdims=True) - mean * mean, 0.0)
    z = ((yc - mean) * jax.lax.rsqrt(var + EPS)
         * g4.reshape(1, -1, 1) + b4.reshape(1, -1, 1))
    return jnp.tanh(z)


# ------------------------------------ main ------------------------------------

if __name__ == "__main__":
    key = jax.random.PRNGKey(0)
    kx, k1, k2, k3, k4, kg, kb = jax.random.split(key, 7)

    B, L0 = 2, 16
    x = jax.random.normal(kx, (B, 128, L0), jnp.float32)

    def _w(k, shape):
        return 0.05 * jax.random.normal(k, shape, jnp.float32)

    gk = jax.random.split(kg, 4)
    bk = jax.random.split(kb, 4)

    def _g(k, n):
        return 1.0 + 0.1 * jax.random.normal(k, (n,), jnp.float32)

    def _b(k, n):
        return 0.1 * jax.random.normal(k, (n,), jnp.float32)

    params = {
        "layers123": [
            (_w(k1, (128, 256, 4)), _g(gk[0], 256), _b(bk[0], 256)),
            (_w(k2, (256, 128, 4)), _g(gk[1], 128), _b(bk[1], 128)),
            (_w(k3, (128, 64, 4)), _g(gk[2], 64), _b(bk[2], 64)),
        ],
        "layer4": (_w(k4, (64, 6, 4)), _g(gk[3], 6), _b(bk[3], 6)),
    }

    packed = pack_params(params)
    fwd = jax.jit(generator_forward)
    out = jax.block_until_ready(fwd(x, packed))

    Lout = L0 * 4 * 4 * 4 * 2
    assert out.shape == (B, 6, Lout), out.shape
    assert bool(jnp.all(jnp.isfinite(out)))

    # Tight check: kernel math vs. a pure-JAX mirror using the same bf16 MXU
    # operands (validates conv-as-matmul layout, overlap-add fold, BN fusion).
    ref_bf16 = generator_ref_bf16(x, params)
    err_bf16 = float(jnp.max(jnp.abs(out - ref_bf16)))
    assert bool(jnp.allclose(out, ref_bf16, atol=2e-3, rtol=2e-3)), err_bf16

    # Fidelity check vs. the full-f32 ConvTranspose/BatchNorm reference; the
    # difference is the bf16 rounding of the MXU operands.
    ref_f32 = generator_ref_f32(x, params)
    err_f32 = float(jnp.max(jnp.abs(out - ref_f32)))
    assert bool(jnp.allclose(out, ref_f32, atol=5e-2, rtol=5e-2)), err_f32

    print("KERNEL_OK")
</pallas_src>

<mosaic_0001>
module attributes {stable_mosaic.version = 11 : i64} {
  func.func @_convt_bn_lrelu_kernel(%arg0: i32, %arg1: i32, %arg2: memref<32x128xbf16, #tpu.memory_space<vmem>>, %arg3: memref<128x1024xbf16, #tpu.memory_space<vmem>>, %arg4: memref<1x256xf32, #tpu.memory_space<vmem>>, %arg5: memref<1x256xf32, #tpu.memory_space<vmem>>, %arg6: memref<32x1024xbf16, #tpu.memory_space<vmem>>, %arg7: memref<1x1024xf32, #tpu.memory_space<vmem>>, %arg8: memref<1x1024xf32, #tpu.memory_space<vmem>>, %arg9: memref<1x1024xf32, #tpu.memory_space<vmem>>, %arg10: memref<1x1024xf32, #tpu.memory_space<vmem>>) attributes {dimension_semantics = [#tpu.dimension_semantics<arbitrary>, #tpu.dimension_semantics<arbitrary>], iteration_bounds = array<i64: 2, 1>, scalar_prefetch = 0 : i64, scratch_operands = 4 : i64, tpu.core_type = #tpu.core_type<tc>, window_params = [{transform_indices = @transform_0, window_bounds = array<i64: 32, 128>}, {pipeline_mode = #tpu.pipeline_mode<synchronous>, transform_indices = @transform_1, window_bounds = array<i64: 128, 1024>}, {pipeline_mode = #tpu.pipeline_mode<synchronous>, transform_indices = @transform_2, window_bounds = array<i64: 1, 256>}, {pipeline_mode = #tpu.pipeline_mode<synchronous>, transform_indices = @transform_3, window_bounds = array<i64: 1, 256>}, {transform_indices = @transform_4, window_bounds = array<i64: 32, 1024>}]} {
    %c0 = arith.constant 0 : index
    %c0_0 = arith.constant 0 : index
    %0 = vector.load %arg2[%c0, %c0_0] : memref<32x128xbf16, #tpu.memory_space<vmem>>, vector<32x128xbf16>
    %c0_1 = arith.constant 0 : index
    %c0_2 = arith.constant 0 : index
    %1 = vector.load %arg3[%c0_1, %c0_2] : memref<128x1024xbf16, #tpu.memory_space<vmem>>, vector<128x1024xbf16>
    %cst = arith.constant dense<0.000000e+00> : vector<32x1024xf32>
    %2 = tpu.matmul %0, %1, %cst {dimension_numbers = #tpu.dot_dimension_numbers<[1], [0], [0], [1], [0, 0, 1, 1], [], []>} : vector<32x128xbf16>, vector<128x1024xbf16>, vector<32x1024xf32> -> vector<32x1024xf32>
    %c0_i32 = arith.constant 0 : i32
    %3 = arith.cmpi eq, %arg0, %c0_i32 : i32
    %c0_i32_3 = arith.constant 0 : i32
    %4 = arith.cmpi eq, %arg1, %c0_i32_3 : i32
    %5 = arith.andi %3, %4 : i1
    %6 = arith.extui %5 : i1 to i32
    %c0_i32_4 = arith.constant 0 : i32
    %7 = arith.cmpi ne, %6, %c0_i32_4 : i32
    scf.if %7 {
      %cst_11 = arith.constant 0.000000e+00 : f32
      %19 = vector.broadcast %cst_11 : f32 to vector<1x1024xf32>
      %c0_12 = arith.constant 0 : index
      %c0_13 = arith.constant 0 : index
      %20 = vector.load %arg7[%c0_12, %c0_13] : memref<1x1024xf32, #tpu.memory_space<vmem>>, vector<1x1024xf32>
      tpu.vector_store %arg7[%c0_12, %c0_13], %19 {strides = array<i32>} : memref<1x1024xf32, #tpu.memory_space<vmem>>, vector<1x1024xf32>,
      %cst_14 = arith.constant 0.000000e+00 : f32
      %21 = vector.broadcast %cst_14 : f32 to vector<1x1024xf32>
      %c0_15 = arith.constant 0 : index
      %c0_16 = arith.constant 0 : index
      %22 = vector.load %arg8[%c0_15, %c0_16] : memref<1x1024xf32, #tpu.memory_space<vmem>>, vector<1x1024xf32>
      tpu.vector_store %arg8[%c0_15, %c0_16], %21 {strides = array<i32>} : memref<1x1024xf32, #tpu.memory_space<vmem>>, vector<1x1024xf32>,
    } else {
    }
    %c0_i32_5 = arith.constant 0 : i32
    %8 = arith.cmpi eq, %arg0, %c0_i32_5 : i32
    %9 = arith.extui %8 : i1 to i32
    %c0_i32_6 = arith.constant 0 : i32
    %10 = arith.cmpi ne, %9, %c0_i32_6 : i32
    scf.if %10 {
      %c0_11 = arith.constant 0 : index
      %c0_12 = arith.constant 0 : index
      %19 = vector.load %arg7[%c0_11, %c0_12] : memref<1x1024xf32, #tpu.memory_space<vmem>>, vector<1x1024xf32>
      %cst_13 = arith.constant dense<0.000000e+00> : vector<1024xf32>
      %20 = vector.multi_reduction <add>, %2, %cst_13 [0] : vector<32x1024xf32> to vector<1024xf32>
      %21 = vector.shape_cast %20 : vector<1024xf32> to vector<1x1024xf32>
      %22 = arith.addf %19, %21 : vector<1x1024xf32>
      %c0_14 = arith.constant 0 : index
      %c0_15 = arith.constant 0 : index
      %23 = vector.load %arg7[%c0_14, %c0_15] : memref<1x1024xf32, #tpu.memory_space<vmem>>, vector<1x1024xf32>
      tpu.vector_store %arg7[%c0_14, %c0_15], %22 {strides = array<i32>} : memref<1x1024xf32, #tpu.memory_space<vmem>>, vector<1x1024xf32>,
      %c0_16 = arith.constant 0 : index
      %c0_17 = arith.constant 0 : index
      %24 = vector.load %arg8[%c0_16, %c0_17] : memref<1x1024xf32, #tpu.memory_space<vmem>>, vector<1x1024xf32>
      %25 = arith.mulf %2, %2 : vector<32x1024xf32>
      %cst_18 = arith.constant dense<0.000000e+00> : vector<1024xf32>
      %26 = vector.multi_reduction <add>, %25, %cst_18 [0] : vector<32x1024xf32> to vector<1024xf32>
      %27 = vector.shape_cast %26 : vector<1024xf32> to vector<1x1024xf32>
      %28 = arith.addf %24, %27 : vector<1x1024xf32>
      %c0_19 = arith.constant 0 : index
      %c0_20 = arith.constant 0 : index
      %29 = vector.load %arg8[%c0_19, %c0_20] : memref<1x1024xf32, #tpu.memory_space<vmem>>, vector<1x1024xf32>
      tpu.vector_store %arg8[%c0_19, %c0_20], %28 {strides = array<i32>} : memref<1x1024xf32, #tpu.memory_space<vmem>>, vector<1x1024xf32>,
    } else {
    }
    %c1_i32 = arith.constant 1 : i32
    %11 = arith.cmpi eq, %arg0, %c1_i32 : i32
    %c0_i32_7 = arith.constant 0 : i32
    %12 = arith.cmpi eq, %arg1, %c0_i32_7 : i32
    %13 = arith.andi %11, %12 : i1
    %14 = arith.extui %13 : i1 to i32
    %c0_i32_8 = arith.constant 0 : i32
    %15 = arith.cmpi ne, %14, %c0_i32_8 : i32
    scf.if %15 {
      %c0_11 = arith.constant 0 : index
      %c0_12 = arith.constant 0 : index
      %19 = vector.load %arg7[%c0_11, %c0_12] : memref<1x1024xf32, #tpu.memory_space<vmem>>, vector<1x256xf32>
      %c0_13 = arith.constant 0 : index
      %c0_14 = arith.constant 0 : index
      %20 = vector.load %arg8[%c0_13, %c0_14] : memref<1x1024xf32, #tpu.memory_space<vmem>>, vector<1x256xf32>
      %c0_15 = arith.constant 0 : index
      %c256 = arith.constant 256 : index
      %21 = vector.load %arg7[%c0_15, %c256] : memref<1x1024xf32, #tpu.memory_space<vmem>>, vector<1x256xf32>
      %22 = arith.addf %19, %21 : vector<1x256xf32>
      %c0_16 = arith.constant 0 : index
      %c256_17 = arith.constant 256 : index
      %23 = vector.load %arg8[%c0_16, %c256_17] : memref<1x1024xf32, #tpu.memory_space<vmem>>, vector<1x256xf32>
      %24 = arith.addf %20, %23 : vector<1x256xf32>
      %c0_18 = arith.constant 0 : index
      %c512 = arith.constant 512 : index
      %25 = vector.load %arg7[%c0_18, %c512] : memref<1x1024xf32, #tpu.memory_space<vmem>>, vector<1x256xf32>
      %26 = arith.addf %22, %25 : vector<1x256xf32>
      %c0_19 = arith.constant 0 : index
      %c512_20 = arith.constant 512 : index
      %27 = vector.load %arg8[%c0_19, %c512_20] : memref<1x1024xf32, #tpu.memory_space<vmem>>, vector<1x256xf32>
      %28 = arith.addf %24, %27 : vector<1x256xf32>
      %c0_21 = arith.constant 0 : index
      %c768 = arith.constant 768 : index
      %29 = vector.load %arg7[%c0_21, %c768] : memref<1x1024xf32, #tpu.memory_space<vmem>>, vector<1x256xf32>
      %30 = arith.addf %26, %29 : vector<1x256xf32>
      %c0_22 = arith.constant 0 : index
      %c768_23 = arith.constant 768 : index
      %31 = vector.load %arg8[%c0_22, %c768_23] : memref<1x1024xf32, #tpu.memory_space<vmem>>, vector<1x256xf32>
      %32 = arith.addf %28, %31 : vector<1x256xf32>
      %cst_24 = arith.constant 1.280000e+02 : f32
      %33 = vector.broadcast %cst_24 : f32 to vector<1x256xf32>
      %34 = arith.divf %30, %33 : vector<1x256xf32>
      %cst_25 = arith.constant 1.280000e+02 : f32
      %35 = vector.broadcast %cst_25 : f32 to vector<1x256xf32>
      %36 = arith.divf %32, %35 : vector<1x256xf32>
      %37 = arith.mulf %34, %34 : vector<1x256xf32>
      %38 = arith.subf %36, %37 : vector<1x256xf32>
      %cst_26 = arith.constant 0.000000e+00 : f32
      %39 = vector.broadcast %cst_26 : f32 to vector<1x256xf32>
      %40 = arith.maximumf %38, %39 : vector<1x256xf32>
      %cst_27 = arith.constant 9.99999974E-6 : f32
      %41 = vector.broadcast %cst_27 : f32 to vector<1x256xf32>
      %42 = arith.addf %40, %41 : vector<1x256xf32>
      %43 = math.rsqrt %42 : vector<1x256xf32>
      %c0_28 = arith.constant 0 : index
      %c0_29 = arith.constant 0 : index
      %44 = vector.load %arg4[%c0_28, %c0_29] : memref<1x256xf32, #tpu.memory_space<vmem>>, vector<1x256xf32>
      %45 = arith.mulf %43, %44 : vector<1x256xf32>
      %c0_30 = arith.constant 0 : index
      %c0_31 = arith.constant 0 : index
      %46 = vector.load %arg5[%c0_30, %c0_31] : memref<1x256xf32, #tpu.memory_space<vmem>>, vector<1x256xf32>
      %47 = arith.mulf %34, %45 : vector<1x256xf32>
      %48 = arith.subf %46, %47 : vector<1x256xf32>
      %c0_32 = arith.constant 0 : index
      %c0_33 = arith.constant 0 : index
      %49 = vector.load %arg9[%c0_32, %c0_33] : memref<1x1024xf32, #tpu.memory_space<vmem>>, vector<1x256xf32>
      tpu.vector_store %arg9[%c0_32, %c0_33], %45 {strides = array<i32>} : memref<1x1024xf32, #tpu.memory_space<vmem>>, vector<1x256xf32>,
      %c0_34 = arith.constant 0 : index
      %c0_35 = arith.constant 0 : index
      %50 = vector.load %arg10[%c0_34, %c0_35] : memref<1x1024xf32, #tpu.memory_space<vmem>>, vector<1x256xf32>
      tpu.vector_store %arg10[%c0_34, %c0_35], %48 {strides = array<i32>} : memref<1x1024xf32, #tpu.memory_space<vmem>>, vector<1x256xf32>,
      %c0_36 = arith.constant 0 : index
      %c256_37 = arith.constant 256 : index
      %51 = vector.load %arg9[%c0_36, %c256_37] : memref<1x1024xf32, #tpu.memory_space<vmem>>, vector<1x256xf32>
      tpu.vector_store %arg9[%c0_36, %c256_37], %45 {strides = array<i32>} : memref<1x1024xf32, #tpu.memory_space<vmem>>, vector<1x256xf32>,
      %c0_38 = arith.constant 0 : index
      %c256_39 = arith.constant 256 : index
      %52 = vector.load %arg10[%c0_38, %c256_39] : memref<1x1024xf32, #tpu.memory_space<vmem>>, vector<1x256xf32>
      tpu.vector_store %arg10[%c0_38, %c256_39], %48 {strides = array<i32>} : memref<1x1024xf32, #tpu.memory_space<vmem>>, vector<1x256xf32>,
      %c0_40 = arith.constant 0 : index
      %c512_41 = arith.constant 512 : index
      %53 = vector.load %arg9[%c0_40, %c512_41] : memref<1x1024xf32, #tpu.memory_space<vmem>>, vector<1x256xf32>
      tpu.vector_store %arg9[%c0_40, %c512_41], %45 {strides = array<i32>} : memref<1x1024xf32, #tpu.memory_space<vmem>>, vector<1x256xf32>,
      %c0_42 = arith.constant 0 : index
      %c512_43 = arith.constant 512 : index
      %54 = vector.load %arg10[%c0_42, %c512_43] : memref<1x1024xf32, #tpu.memory_space<vmem>>, vector<1x256xf32>
      tpu.vector_store %arg10[%c0_42, %c512_43], %48 {strides = array<i32>} : memref<1x1024xf32, #tpu.memory_space<vmem>>, vector<1x256xf32>,
      %c0_44 = arith.constant 0 : index
      %c768_45 = arith.constant 768 : index
      %55 = vector.load %arg9[%c0_44, %c768_45] : memref<1x1024xf32, #tpu.memory_space<vmem>>, vector<1x256xf32>
      tpu.vector_store %arg9[%c0_44, %c768_45], %45 {strides = array<i32>} : memref<1x1024xf32, #tpu.memory_space<vmem>>, vector<1x256xf32>,
      %c0_46 = arith.constant 0 : index
      %c768_47 = arith.constant 768 : index
      %56 = vector.load %arg10[%c0_46, %c768_47] : memref<1x1024xf32, #tpu.memory_space<vmem>>, vector<1x256xf32>
      tpu.vector_store %arg10[%c0_46, %c768_47], %48 {strides = array<i32>} : memref<1x1024xf32, #tpu.memory_space<vmem>>, vector<1x256xf32>,
    } else {
    }
    %c1_i32_9 = arith.constant 1 : i32
    %16 = arith.cmpi eq, %arg0, %c1_i32_9 : i32
    %17 = arith.extui %16 : i1 to i32
    %c0_i32_10 = arith.constant 0 : i32
    %18 = arith.cmpi ne, %17, %c0_i32_10 : i32
    scf.if %18 {
      %c0_11 = arith.constant 0 : index
      %c0_12 = arith.constant 0 : index
      %19 = vector.load %arg9[%c0_11, %c0_12] : memref<1x1024xf32, #tpu.memory_space<vmem>>, vector<1x1024xf32>
      %20 = vector.broadcast %19 : vector<1x1024xf32> to vector<32x1024xf32>
      %21 = arith.mulf %2, %20 : vector<32x1024xf32>
      %c0_13 = arith.constant 0 : index
      %c0_14 = arith.constant 0 : index
      %22 = vector.load %arg10[%c0_13, %c0_14] : memref<1x1024xf32, #tpu.memory_space<vmem>>, vector<1x1024xf32>
      %23 = vector.broadcast %22 : vector<1x1024xf32> to vector<32x1024xf32>
      %24 = arith.addf %21, %23 : vector<32x1024xf32>
      %cst_15 = arith.constant 0.000000e+00 : f32
      %25 = vector.broadcast %cst_15 : f32 to vector<32x1024xf32>
      %26 = arith.cmpf oge, %24, %25 : vector<32x1024xf32>
      %cst_16 = arith.constant 2.000000e-01 : f32
      %27 = vector.broadcast %cst_16 : f32 to vector<32x1024xf32>
      %28 = arith.mulf %27, %24 : vector<32x1024xf32>
      %29 = arith.select %26, %24, %28 : vector<32x1024xi1>, vector<32x1024xf32>
      %30 = arith.truncf %29 : vector<32x1024xf32> to vector<32x1024xbf16>
      %c0_17 = arith.constant 0 : index
      %c0_18 = arith.constant 0 : index
      %31 = vector.load %arg6[%c0_17, %c0_18] : memref<32x1024xbf16, #tpu.memory_space<vmem>>, vector<32x1024xbf16>
      tpu.vector_store %arg6[%c0_17, %c0_18], %30 {strides = array<i32>} : memref<32x1024xbf16, #tpu.memory_space<vmem>>, vector<32x1024xbf16>,
    } else {
    }
    return
  }
  func.func @transform_0(%arg0: i32, %arg1: i32) -> (i32, i32) {
    %c0_i32 = arith.constant 0 : i32
    %c0_i32_0 = arith.constant 0 : i32
    return %arg1, %c0_i32 : i32, i32
  }
  func.func @transform_1(%arg0: i32, %arg1: i32) -> (i32, i32) {
    %c0_i32 = arith.constant 0 : i32
    %c0_i32_0 = arith.constant 0 : i32
    %c0_i32_1 = arith.constant 0 : i32
    return %c0_i32, %c0_i32_0 : i32, i32
  }
  func.func @transform_2(%arg0: i32, %arg1: i32) -> (i32, i32) {
    %c0_i32 = arith.constant 0 : i32
    %c0_i32_0 = arith.constant 0 : i32
    %c0_i32_1 = arith.constant 0 : i32
    return %c0_i32, %c0_i32_0 : i32, i32
  }
  func.func @transform_3(%arg0: i32, %arg1: i32) -> (i32, i32) {
    %c0_i32 = arith.constant 0 : i32
    %c0_i32_0 = arith.constant 0 : i32
    %c0_i32_1 = arith.constant 0 : i32
    return %c0_i32, %c0_i32_0 : i32, i32
  }
  func.func @transform_4(%arg0: i32, %arg1: i32) -> (i32, i32) {
    %0 = arith.muli %arg0, %arg1 : i32
    %c0_i32 = arith.constant 0 : i32
    %c0_i32_0 = arith.constant 0 : i32
    return %0, %c0_i32 : i32, i32
  }
}

module attributes {stable_mosaic.version = 11 : i64} {
  func.func @_convt_bn_lrelu_kernel(%arg0: i32, %arg1: i32, %arg2: memref<128x256xbf16, #tpu.memory_space<vmem>>, %arg3: memref<256x512xbf16, #tpu.memory_space<vmem>>, %arg4: memref<1x128xf32, #tpu.memory_space<vmem>>, %arg5: memref<1x128xf32, #tpu.memory_space<vmem>>, %arg6: memref<128x512xbf16, #tpu.memory_space<vmem>>, %arg7: memref<1x512xf32, #tpu.memory_space<vmem>>, %arg8: memref<1x512xf32, #tpu.memory_space<vmem>>, %arg9: memref<1x512xf32, #tpu.memory_space<vmem>>, %arg10: memref<1x512xf32, #tpu.memory_space<vmem>>) attributes {dimension_semantics = [#tpu.dimension_semantics<arbitrary>, #tpu.dimension_semantics<arbitrary>], iteration_bounds = array<i64: 2, 1>, scalar_prefetch = 0 : i64, scratch_operands = 4 : i64, tpu.core_type = #tpu.core_type<tc>, window_params = [{transform_indices = @transform_0, window_bounds = array<i64: 128, 256>}, {pipeline_mode = #tpu.pipeline_mode<synchronous>, transform_indices = @transform_1, window_bounds = array<i64: 256, 512>}, {pipeline_mode = #tpu.pipeline_mode<synchronous>, transform_indices = @transform_2, window_bounds = array<i64: 1, 128>}, {pipeline_mode = #tpu.pipeline_mode<synchronous>, transform_indices = @transform_3, window_bounds = array<i64: 1, 128>}, {transform_indices = @transform_4, window_bounds = array<i64: 128, 512>}]} {
    %c0 = arith.constant 0 : index
    %c0_0 = arith.constant 0 : index
    %0 = vector.load %arg2[%c0, %c0_0] : memref<128x256xbf16, #tpu.memory_space<vmem>>, vector<128x256xbf16>
    %c0_1 = arith.constant 0 : index
    %c0_2 = arith.constant 0 : index
    %1 = vector.load %arg3[%c0_1, %c0_2] : memref<256x512xbf16, #tpu.memory_space<vmem>>, vector<256x512xbf16>
    %cst = arith.constant dense<0.000000e+00> : vector<128x512xf32>
    %2 = tpu.matmul %0, %1, %cst {dimension_numbers = #tpu.dot_dimension_numbers<[1], [0], [0], [1], [0, 0, 1, 1], [], []>} : vector<128x256xbf16>, vector<256x512xbf16>, vector<128x512xf32> -> vector<128x512xf32>
    %c0_i32 = arith.constant 0 : i32
    %3 = arith.cmpi eq, %arg0, %c0_i32 : i32
    %c0_i32_3 = arith.constant 0 : i32
    %4 = arith.cmpi eq, %arg1, %c0_i32_3 : i32
    %5 = arith.andi %3, %4 : i1
    %6 = arith.extui %5 : i1 to i32
    %c0_i32_4 = arith.constant 0 : i32
    %7 = arith.cmpi ne, %6, %c0_i32_4 : i32
    scf.if %7 {
      %cst_11 = arith.constant 0.000000e+00 : f32
      %19 = vector.broadcast %cst_11 : f32 to vector<1x512xf32>
      %c0_12 = arith.constant 0 : index
      %c0_13 = arith.constant 0 : index
      %20 = vector.load %arg7[%c0_12, %c0_13] : memref<1x512xf32, #tpu.memory_space<vmem>>, vector<1x512xf32>
      tpu.vector_store %arg7[%c0_12, %c0_13], %19 {strides = array<i32>} : memref<1x512xf32, #tpu.memory_space<vmem>>, vector<1x512xf32>,
      %cst_14 = arith.constant 0.000000e+00 : f32
      %21 = vector.broadcast %cst_14 : f32 to vector<1x512xf32>
      %c0_15 = arith.constant 0 : index
      %c0_16 = arith.constant 0 : index
      %22 = vector.load %arg8[%c0_15, %c0_16] : memref<1x512xf32, #tpu.memory_space<vmem>>, vector<1x512xf32>
      tpu.vector_store %arg8[%c0_15, %c0_16], %21 {strides = array<i32>} : memref<1x512xf32, #tpu.memory_space<vmem>>, vector<1x512xf32>,
    } else {
    }
    %c0_i32_5 = arith.constant 0 : i32
    %8 = arith.cmpi eq, %arg0, %c0_i32_5 : i32
    %9 = arith.extui %8 : i1 to i32
    %c0_i32_6 = arith.constant 0 : i32
    %10 = arith.cmpi ne, %9, %c0_i32_6 : i32
    scf.if %10 {
      %c0_11 = arith.constant 0 : index
      %c0_12 = arith.constant 0 : index
      %19 = vector.load %arg7[%c0_11, %c0_12] : memref<1x512xf32, #tpu.memory_space<vmem>>, vector<1x512xf32>
      %cst_13 = arith.constant dense<0.000000e+00> : vector<512xf32>
      %20 = vector.multi_reduction <add>, %2, %cst_13 [0] : vector<128x512xf32> to vector<512xf32>
      %21 = vector.shape_cast %20 : vector<512xf32> to vector<1x512xf32>
      %22 = arith.addf %19, %21 : vector<1x512xf32>
      %c0_14 = arith.constant 0 : index
      %c0_15 = arith.constant 0 : index
      %23 = vector.load %arg7[%c0_14, %c0_15] : memref<1x512xf32, #tpu.memory_space<vmem>>, vector<1x512xf32>
      tpu.vector_store %arg7[%c0_14, %c0_15], %22 {strides = array<i32>} : memref<1x512xf32, #tpu.memory_space<vmem>>, vector<1x512xf32>,
      %c0_16 = arith.constant 0 : index
      %c0_17 = arith.constant 0 : index
      %24 = vector.load %arg8[%c0_16, %c0_17] : memref<1x512xf32, #tpu.memory_space<vmem>>, vector<1x512xf32>
      %25 = arith.mulf %2, %2 : vector<128x512xf32>
      %cst_18 = arith.constant dense<0.000000e+00> : vector<512xf32>
      %26 = vector.multi_reduction <add>, %25, %cst_18 [0] : vector<128x512xf32> to vector<512xf32>
      %27 = vector.shape_cast %26 : vector<512xf32> to vector<1x512xf32>
      %28 = arith.addf %24, %27 : vector<1x512xf32>
      %c0_19 = arith.constant 0 : index
      %c0_20 = arith.constant 0 : index
      %29 = vector.load %arg8[%c0_19, %c0_20] : memref<1x512xf32, #tpu.memory_space<vmem>>, vector<1x512xf32>
      tpu.vector_store %arg8[%c0_19, %c0_20], %28 {strides = array<i32>} : memref<1x512xf32, #tpu.memory_space<vmem>>, vector<1x512xf32>,
    } else {
    }
    %c1_i32 = arith.constant 1 : i32
    %11 = arith.cmpi eq, %arg0, %c1_i32 : i32
    %c0_i32_7 = arith.constant 0 : i32
    %12 = arith.cmpi eq, %arg1, %c0_i32_7 : i32
    %13 = arith.andi %11, %12 : i1
    %14 = arith.extui %13 : i1 to i32
    %c0_i32_8 = arith.constant 0 : i32
    %15 = arith.cmpi ne, %14, %c0_i32_8 : i32
    scf.if %15 {
      %c0_11 = arith.constant 0 : index
      %c0_12 = arith.constant 0 : index
      %19 = vector.load %arg7[%c0_11, %c0_12] : memref<1x512xf32, #tpu.memory_space<vmem>>, vector<1x128xf32>
      %c0_13 = arith.constant 0 : index
      %c0_14 = arith.constant 0 : index
      %20 = vector.load %arg8[%c0_13, %c0_14] : memref<1x512xf32, #tpu.memory_space<vmem>>, vector<1x128xf32>
      %c0_15 = arith.constant 0 : index
      %c128 = arith.constant 128 : index
      %21 = vector.load %arg7[%c0_15, %c128] : memref<1x512xf32, #tpu.memory_space<vmem>>, vector<1x128xf32>
      %22 = arith.addf %19, %21 : vector<1x128xf32>
      %c0_16 = arith.constant 0 : index
      %c128_17 = arith.constant 128 : index
      %23 = vector.load %arg8[%c0_16, %c128_17] : memref<1x512xf32, #tpu.memory_space<vmem>>, vector<1x128xf32>
      %24 = arith.addf %20, %23 : vector<1x128xf32>
      %c0_18 = arith.constant 0 : index
      %c256 = arith.constant 256 : index
      %25 = vector.load %arg7[%c0_18, %c256] : memref<1x512xf32, #tpu.memory_space<vmem>>, vector<1x128xf32>
      %26 = arith.addf %22, %25 : vector<1x128xf32>
      %c0_19 = arith.constant 0 : index
      %c256_20 = arith.constant 256 : index
      %27 = vector.load %arg8[%c0_19, %c256_20] : memref<1x512xf32, #tpu.memory_space<vmem>>, vector<1x128xf32>
      %28 = arith.addf %24, %27 : vector<1x128xf32>
      %c0_21 = arith.constant 0 : index
      %c384 = arith.constant 384 : index
      %29 = vector.load %arg7[%c0_21, %c384] : memref<1x512xf32, #tpu.memory_space<vmem>>, vector<1x128xf32>
      %30 = arith.addf %26, %29 : vector<1x128xf32>
      %c0_22 = arith.constant 0 : index
      %c384_23 = arith.constant 384 : index
      %31 = vector.load %arg8[%c0_22, %c384_23] : memref<1x512xf32, #tpu.memory_space<vmem>>, vector<1x128xf32>
      %32 = arith.addf %28, %31 : vector<1x128xf32>
      %cst_24 = arith.constant 5.120000e+02 : f32
      %33 = vector.broadcast %cst_24 : f32 to vector<1x128xf32>
      %34 = arith.divf %30, %33 : vector<1x128xf32>
      %cst_25 = arith.constant 5.120000e+02 : f32
      %35 = vector.broadcast %cst_25 : f32 to vector<1x128xf32>
      %36 = arith.divf %32, %35 : vector<1x128xf32>
      %37 = arith.mulf %34, %34 : vector<1x128xf32>
      %38 = arith.subf %36, %37 : vector<1x128xf32>
      %cst_26 = arith.constant 0.000000e+00 : f32
      %39 = vector.broadcast %cst_26 : f32 to vector<1x128xf32>
      %40 = arith.maximumf %38, %39 : vector<1x128xf32>
      %cst_27 = arith.constant 9.99999974E-6 : f32
      %41 = vector.broadcast %cst_27 : f32 to vector<1x128xf32>
      %42 = arith.addf %40, %41 : vector<1x128xf32>
      %43 = math.rsqrt %42 : vector<1x128xf32>
      %c0_28 = arith.constant 0 : index
      %c0_29 = arith.constant 0 : index
      %44 = vector.load %arg4[%c0_28, %c0_29] : memref<1x128xf32, #tpu.memory_space<vmem>>, vector<1x128xf32>
      %45 = arith.mulf %43, %44 : vector<1x128xf32>
      %c0_30 = arith.constant 0 : index
      %c0_31 = arith.constant 0 : index
      %46 = vector.load %arg5[%c0_30, %c0_31] : memref<1x128xf32, #tpu.memory_space<vmem>>, vector<1x128xf32>
      %47 = arith.mulf %34, %45 : vector<1x128xf32>
      %48 = arith.subf %46, %47 : vector<1x128xf32>
      %c0_32 = arith.constant 0 : index
      %c0_33 = arith.constant 0 : index
      %49 = vector.load %arg9[%c0_32, %c0_33] : memref<1x512xf32, #tpu.memory_space<vmem>>, vector<1x128xf32>
      tpu.vector_store %arg9[%c0_32, %c0_33], %45 {strides = array<i32>} : memref<1x512xf32, #tpu.memory_space<vmem>>, vector<1x128xf32>,
      %c0_34 = arith.constant 0 : index
      %c0_35 = arith.constant 0 : index
      %50 = vector.load %arg10[%c0_34, %c0_35] : memref<1x512xf32, #tpu.memory_space<vmem>>, vector<1x128xf32>
      tpu.vector_store %arg10[%c0_34, %c0_35], %48 {strides = array<i32>} : memref<1x512xf32, #tpu.memory_space<vmem>>, vector<1x128xf32>,
      %c0_36 = arith.constant 0 : index
      %c128_37 = arith.constant 128 : index
      %51 = vector.load %arg9[%c0_36, %c128_37] : memref<1x512xf32, #tpu.memory_space<vmem>>, vector<1x128xf32>
      tpu.vector_store %arg9[%c0_36, %c128_37], %45 {strides = array<i32>} : memref<1x512xf32, #tpu.memory_space<vmem>>, vector<1x128xf32>,
      %c0_38 = arith.constant 0 : index
      %c128_39 = arith.constant 128 : index
      %52 = vector.load %arg10[%c0_38, %c128_39] : memref<1x512xf32, #tpu.memory_space<vmem>>, vector<1x128xf32>
      tpu.vector_store %arg10[%c0_38, %c128_39], %48 {strides = array<i32>} : memref<1x512xf32, #tpu.memory_space<vmem>>, vector<1x128xf32>,
      %c0_40 = arith.constant 0 : index
      %c256_41 = arith.constant 256 : index
      %53 = vector.load %arg9[%c0_40, %c256_41] : memref<1x512xf32, #tpu.memory_space<vmem>>, vector<1x128xf32>
      tpu.vector_store %arg9[%c0_40, %c256_41], %45 {strides = array<i32>} : memref<1x512xf32, #tpu.memory_space<vmem>>, vector<1x128xf32>,
      %c0_42 = arith.constant 0 : index
      %c256_43 = arith.constant 256 : index
      %54 = vector.load %arg10[%c0_42, %c256_43] : memref<1x512xf32, #tpu.memory_space<vmem>>, vector<1x128xf32>
      tpu.vector_store %arg10[%c0_42, %c256_43], %48 {strides = array<i32>} : memref<1x512xf32, #tpu.memory_space<vmem>>, vector<1x128xf32>,
      %c0_44 = arith.constant 0 : index
      %c384_45 = arith.constant 384 : index
      %55 = vector.load %arg9[%c0_44, %c384_45] : memref<1x512xf32, #tpu.memory_space<vmem>>, vector<1x128xf32>
      tpu.vector_store %arg9[%c0_44, %c384_45], %45 {strides = array<i32>} : memref<1x512xf32, #tpu.memory_space<vmem>>, vector<1x128xf32>,
      %c0_46 = arith.constant 0 : index
      %c384_47 = arith.constant 384 : index
      %56 = vector.load %arg10[%c0_46, %c384_47] : memref<1x512xf32, #tpu.memory_space<vmem>>, vector<1x128xf32>
      tpu.vector_store %arg10[%c0_46, %c384_47], %48 {strides = array<i32>} : memref<1x512xf32, #tpu.memory_space<vmem>>, vector<1x128xf32>,
    } else {
    }
    %c1_i32_9 = arith.constant 1 : i32
    %16 = arith.cmpi eq, %arg0, %c1_i32_9 : i32
    %17 = arith.extui %16 : i1 to i32
    %c0_i32_10 = arith.constant 0 : i32
    %18 = arith.cmpi ne, %17, %c0_i32_10 : i32
    scf.if %18 {
      %c0_11 = arith.constant 0 : index
      %c0_12 = arith.constant 0 : index
      %19 = vector.load %arg9[%c0_11, %c0_12] : memref<1x512xf32, #tpu.memory_space<vmem>>, vector<1x512xf32>
      %20 = vector.broadcast %19 : vector<1x512xf32> to vector<128x512xf32>
      %21 = arith.mulf %2, %20 : vector<128x512xf32>
      %c0_13 = arith.constant 0 : index
      %c0_14 = arith.constant 0 : index
      %22 = vector.load %arg10[%c0_13, %c0_14] : memref<1x512xf32, #tpu.memory_space<vmem>>, vector<1x512xf32>
      %23 = vector.broadcast %22 : vector<1x512xf32> to vector<128x512xf32>
      %24 = arith.addf %21, %23 : vector<128x512xf32>
      %cst_15 = arith.constant 0.000000e+00 : f32
      %25 = vector.broadcast %cst_15 : f32 to vector<128x512xf32>
      %26 = arith.cmpf oge, %24, %25 : vector<128x512xf32>
      %cst_16 = arith.constant 2.000000e-01 : f32
      %27 = vector.broadcast %cst_16 : f32 to vector<128x512xf32>
      %28 = arith.mulf %27, %24 : vector<128x512xf32>
      %29 = arith.select %26, %24, %28 : vector<128x512xi1>, vector<128x512xf32>
      %30 = arith.truncf %29 : vector<128x512xf32> to vector<128x512xbf16>
      %c0_17 = arith.constant 0 : index
      %c0_18 = arith.constant 0 : index
      %31 = vector.load %arg6[%c0_17, %c0_18] : memref<128x512xbf16, #tpu.memory_space<vmem>>, vector<128x512xbf16>
      tpu.vector_store %arg6[%c0_17, %c0_18], %30 {strides = array<i32>} : memref<128x512xbf16, #tpu.memory_space<vmem>>, vector<128x512xbf16>,
    } else {
    }
    return
  }
  func.func @transform_0(%arg0: i32, %arg1: i32) -> (i32, i32) {
    %c0_i32 = arith.constant 0 : i32
    %c0_i32_0 = arith.constant 0 : i32
    return %arg1, %c0_i32 : i32, i32
  }
  func.func @transform_1(%arg0: i32, %arg1: i32) -> (i32, i32) {
    %c0_i32 = arith.constant 0 : i32
    %c0_i32_0 = arith.constant 0 : i32
    %c0_i32_1 = arith.constant 0 : i32
    return %c0_i32, %c0_i32_0 : i32, i32
  }
  func.func @transform_2(%arg0: i32, %arg1: i32) -> (i32, i32) {
    %c0_i32 = arith.constant 0 : i32
    %c0_i32_0 = arith.constant 0 : i32
    %c0_i32_1 = arith.constant 0 : i32
    return %c0_i32, %c0_i32_0 : i32, i32
  }
  func.func @transform_3(%arg0: i32, %arg1: i32) -> (i32, i32) {
    %c0_i32 = arith.constant 0 : i32
    %c0_i32_0 = arith.constant 0 : i32
    %c0_i32_1 = arith.constant 0 : i32
    return %c0_i32, %c0_i32_0 : i32, i32
  }
  func.func @transform_4(%arg0: i32, %arg1: i32) -> (i32, i32) {
    %0 = arith.muli %arg0, %arg1 : i32
    %c0_i32 = arith.constant 0 : i32
    %c0_i32_0 = arith.constant 0 : i32
    return %0, %c0_i32 : i32, i32
  }
}

module attributes {stable_mosaic.version = 11 : i64} {
  func.func @_convt_bn_lrelu_kernel(%arg0: i32, %arg1: i32, %arg2: memref<256x128xbf16, #tpu.memory_space<vmem>>, %arg3: memref<128x256xbf16, #tpu.memory_space<vmem>>, %arg4: memref<1x64xf32, #tpu.memory_space<vmem>>, %arg5: memref<1x64xf32, #tpu.memory_space<vmem>>, %arg6: memref<256x256xbf16, #tpu.memory_space<vmem>>, %arg7: memref<1x256xf32, #tpu.memory_space<vmem>>, %arg8: memref<1x256xf32, #tpu.memory_space<vmem>>, %arg9: memref<1x256xf32, #tpu.memory_space<vmem>>, %arg10: memref<1x256xf32, #tpu.memory_space<vmem>>) attributes {dimension_semantics = [#tpu.dimension_semantics<arbitrary>, #tpu.dimension_semantics<arbitrary>], iteration_bounds = array<i64: 2, 2>, scalar_prefetch = 0 : i64, scratch_operands = 4 : i64, tpu.core_type = #tpu.core_type<tc>, window_params = [{transform_indices = @transform_0, window_bounds = array<i64: 256, 128>}, {pipeline_mode = #tpu.pipeline_mode<synchronous>, transform_indices = @transform_1, window_bounds = array<i64: 128, 256>}, {pipeline_mode = #tpu.pipeline_mode<synchronous>, transform_indices = @transform_2, window_bounds = array<i64: 1, 64>}, {pipeline_mode = #tpu.pipeline_mode<synchronous>, transform_indices = @transform_3, window_bounds = array<i64: 1, 64>}, {transform_indices = @transform_4, window_bounds = array<i64: 256, 256>}]} {
    %c0 = arith.constant 0 : index
    %c0_0 = arith.constant 0 : index
    %0 = vector.load %arg2[%c0, %c0_0] : memref<256x128xbf16, #tpu.memory_space<vmem>>, vector<256x128xbf16>
    %c0_1 = arith.constant 0 : index
    %c0_2 = arith.constant 0 : index
    %1 = vector.load %arg3[%c0_1, %c0_2] : memref<128x256xbf16, #tpu.memory_space<vmem>>, vector<128x256xbf16>
    %cst = arith.constant dense<0.000000e+00> : vector<256x256xf32>
    %2 = tpu.matmul %0, %1, %cst {dimension_numbers = #tpu.dot_dimension_numbers<[1], [0], [0], [1], [0, 0, 1, 1], [], []>} : vector<256x128xbf16>, vector<128x256xbf16>, vector<256x256xf32> -> vector<256x256xf32>
    %c0_i32 = arith.constant 0 : i32
    %3 = arith.cmpi eq, %arg0, %c0_i32 : i32
    %c0_i32_3 = arith.constant 0 : i32
    %4 = arith.cmpi eq, %arg1, %c0_i32_3 : i32
    %5 = arith.andi %3, %4 : i1
    %6 = arith.extui %5 : i1 to i32
    %c0_i32_4 = arith.constant 0 : i32
    %7 = arith.cmpi ne, %6, %c0_i32_4 : i32
    scf.if %7 {
      %cst_11 = arith.constant 0.000000e+00 : f32
      %19 = vector.broadcast %cst_11 : f32 to vector<1x256xf32>
      %c0_12 = arith.constant 0 : index
      %c0_13 = arith.constant 0 : index
      %20 = vector.load %arg7[%c0_12, %c0_13] : memref<1x256xf32, #tpu.memory_space<vmem>>, vector<1x256xf32>
      tpu.vector_store %arg7[%c0_12, %c0_13], %19 {strides = array<i32>} : memref<1x256xf32, #tpu.memory_space<vmem>>, vector<1x256xf32>,
      %cst_14 = arith.constant 0.000000e+00 : f32
      %21 = vector.broadcast %cst_14 : f32 to vector<1x256xf32>
      %c0_15 = arith.constant 0 : index
      %c0_16 = arith.constant 0 : index
      %22 = vector.load %arg8[%c0_15, %c0_16] : memref<1x256xf32, #tpu.memory_space<vmem>>, vector<1x256xf32>
      tpu.vector_store %arg8[%c0_15, %c0_16], %21 {strides = array<i32>} : memref<1x256xf32, #tpu.memory_space<vmem>>, vector<1x256xf32>,
    } else {
    }
    %c0_i32_5 = arith.constant 0 : i32
    %8 = arith.cmpi eq, %arg0, %c0_i32_5 : i32
    %9 = arith.extui %8 : i1 to i32
    %c0_i32_6 = arith.constant 0 : i32
    %10 = arith.cmpi ne, %9, %c0_i32_6 : i32
    scf.if %10 {
      %c0_11 = arith.constant 0 : index
      %c0_12 = arith.constant 0 : index
      %19 = vector.load %arg7[%c0_11, %c0_12] : memref<1x256xf32, #tpu.memory_space<vmem>>, vector<1x256xf32>
      %cst_13 = arith.constant dense<0.000000e+00> : vector<256xf32>
      %20 = vector.multi_reduction <add>, %2, %cst_13 [0] : vector<256x256xf32> to vector<256xf32>
      %21 = vector.shape_cast %20 : vector<256xf32> to vector<1x256xf32>
      %22 = arith.addf %19, %21 : vector<1x256xf32>
      %c0_14 = arith.constant 0 : index
      %c0_15 = arith.constant 0 : index
      %23 = vector.load %arg7[%c0_14, %c0_15] : memref<1x256xf32, #tpu.memory_space<vmem>>, vector<1x256xf32>
      tpu.vector_store %arg7[%c0_14, %c0_15], %22 {strides = array<i32>} : memref<1x256xf32, #tpu.memory_space<vmem>>, vector<1x256xf32>,
      %c0_16 = arith.constant 0 : index
      %c0_17 = arith.constant 0 : index
      %24 = vector.load %arg8[%c0_16, %c0_17] : memref<1x256xf32, #tpu.memory_space<vmem>>, vector<1x256xf32>
      %25 = arith.mulf %2, %2 : vector<256x256xf32>
      %cst_18 = arith.constant dense<0.000000e+00> : vector<256xf32>
      %26 = vector.multi_reduction <add>, %25, %cst_18 [0] : vector<256x256xf32> to vector<256xf32>
      %27 = vector.shape_cast %26 : vector<256xf32> to vector<1x256xf32>
      %28 = arith.addf %24, %27 : vector<1x256xf32>
      %c0_19 = arith.constant 0 : index
      %c0_20 = arith.constant 0 : index
      %29 = vector.load %arg8[%c0_19, %c0_20] : memref<1x256xf32, #tpu.memory_space<vmem>>, vector<1x256xf32>
      tpu.vector_store %arg8[%c0_19, %c0_20], %28 {strides = array<i32>} : memref<1x256xf32, #tpu.memory_space<vmem>>, vector<1x256xf32>,
    } else {
    }
    %c1_i32 = arith.constant 1 : i32
    %11 = arith.cmpi eq, %arg0, %c1_i32 : i32
    %c0_i32_7 = arith.constant 0 : i32
    %12 = arith.cmpi eq, %arg1, %c0_i32_7 : i32
    %13 = arith.andi %11, %12 : i1
    %14 = arith.extui %13 : i1 to i32
    %c0_i32_8 = arith.constant 0 : i32
    %15 = arith.cmpi ne, %14, %c0_i32_8 : i32
    scf.if %15 {
      %c0_11 = arith.constant 0 : index
      %c0_12 = arith.constant 0 : index
      %19 = vector.load %arg7[%c0_11, %c0_12] : memref<1x256xf32, #tpu.memory_space<vmem>>, vector<1x64xf32>
      %c0_13 = arith.constant 0 : index
      %c0_14 = arith.constant 0 : index
      %20 = vector.load %arg8[%c0_13, %c0_14] : memref<1x256xf32, #tpu.memory_space<vmem>>, vector<1x64xf32>
      %c0_15 = arith.constant 0 : index
      %c64 = arith.constant 64 : index
      %21 = vector.load %arg7[%c0_15, %c64] : memref<1x256xf32, #tpu.memory_space<vmem>>, vector<1x64xf32>
      %22 = arith.addf %19, %21 : vector<1x64xf32>
      %c0_16 = arith.constant 0 : index
      %c64_17 = arith.constant 64 : index
      %23 = vector.load %arg8[%c0_16, %c64_17] : memref<1x256xf32, #tpu.memory_space<vmem>>, vector<1x64xf32>
      %24 = arith.addf %20, %23 : vector<1x64xf32>
      %c0_18 = arith.constant 0 : index
      %c128 = arith.constant 128 : index
      %25 = vector.load %arg7[%c0_18, %c128] : memref<1x256xf32, #tpu.memory_space<vmem>>, vector<1x64xf32>
      %26 = arith.addf %22, %25 : vector<1x64xf32>
      %c0_19 = arith.constant 0 : index
      %c128_20 = arith.constant 128 : index
      %27 = vector.load %arg8[%c0_19, %c128_20] : memref<1x256xf32, #tpu.memory_space<vmem>>, vector<1x64xf32>
      %28 = arith.addf %24, %27 : vector<1x64xf32>
      %c0_21 = arith.constant 0 : index
      %c192 = arith.constant 192 : index
      %29 = vector.load %arg7[%c0_21, %c192] : memref<1x256xf32, #tpu.memory_space<vmem>>, vector<1x64xf32>
      %30 = arith.addf %26, %29 : vector<1x64xf32>
      %c0_22 = arith.constant 0 : index
      %c192_23 = arith.constant 192 : index
      %31 = vector.load %arg8[%c0_22, %c192_23] : memref<1x256xf32, #tpu.memory_space<vmem>>, vector<1x64xf32>
      %32 = arith.addf %28, %31 : vector<1x64xf32>
      %cst_24 = arith.constant 2.048000e+03 : f32
      %33 = vector.broadcast %cst_24 : f32 to vector<1x64xf32>
      %34 = arith.divf %30, %33 : vector<1x64xf32>
      %cst_25 = arith.constant 2.048000e+03 : f32
      %35 = vector.broadcast %cst_25 : f32 to vector<1x64xf32>
      %36 = arith.divf %32, %35 : vector<1x64xf32>
      %37 = arith.mulf %34, %34 : vector<1x64xf32>
      %38 = arith.subf %36, %37 : vector<1x64xf32>
      %cst_26 = arith.constant 0.000000e+00 : f32
      %39 = vector.broadcast %cst_26 : f32 to vector<1x64xf32>
      %40 = arith.maximumf %38, %39 : vector<1x64xf32>
      %cst_27 = arith.constant 9.99999974E-6 : f32
      %41 = vector.broadcast %cst_27 : f32 to vector<1x64xf32>
      %42 = arith.addf %40, %41 : vector<1x64xf32>
      %43 = math.rsqrt %42 : vector<1x64xf32>
      %c0_28 = arith.constant 0 : index
      %c0_29 = arith.constant 0 : index
      %44 = vector.load %arg4[%c0_28, %c0_29] : memref<1x64xf32, #tpu.memory_space<vmem>>, vector<1x64xf32>
      %45 = arith.mulf %43, %44 : vector<1x64xf32>
      %c0_30 = arith.constant 0 : index
      %c0_31 = arith.constant 0 : index
      %46 = vector.load %arg5[%c0_30, %c0_31] : memref<1x64xf32, #tpu.memory_space<vmem>>, vector<1x64xf32>
      %47 = arith.mulf %34, %45 : vector<1x64xf32>
      %48 = arith.subf %46, %47 : vector<1x64xf32>
      %c0_32 = arith.constant 0 : index
      %c0_33 = arith.constant 0 : index
      %49 = vector.load %arg9[%c0_32, %c0_33] : memref<1x256xf32, #tpu.memory_space<vmem>>, vector<1x64xf32>
      tpu.vector_store %arg9[%c0_32, %c0_33], %45 {strides = array<i32>} : memref<1x256xf32, #tpu.memory_space<vmem>>, vector<1x64xf32>,
      %c0_34 = arith.constant 0 : index
      %c0_35 = arith.constant 0 : index
      %50 = vector.load %arg10[%c0_34, %c0_35] : memref<1x256xf32, #tpu.memory_space<vmem>>, vector<1x64xf32>
      tpu.vector_store %arg10[%c0_34, %c0_35], %48 {strides = array<i32>} : memref<1x256xf32, #tpu.memory_space<vmem>>, vector<1x64xf32>,
      %c0_36 = arith.constant 0 : index
      %c64_37 = arith.constant 64 : index
      %51 = vector.load %arg9[%c0_36, %c64_37] : memref<1x256xf32, #tpu.memory_space<vmem>>, vector<1x64xf32>
      tpu.vector_store %arg9[%c0_36, %c64_37], %45 {strides = array<i32>} : memref<1x256xf32, #tpu.memory_space<vmem>>, vector<1x64xf32>,
      %c0_38 = arith.constant 0 : index
      %c64_39 = arith.constant 64 : index
      %52 = vector.load %arg10[%c0_38, %c64_39] : memref<1x256xf32, #tpu.memory_space<vmem>>, vector<1x64xf32>
      tpu.vector_store %arg10[%c0_38, %c64_39], %48 {strides = array<i32>} : memref<1x256xf32, #tpu.memory_space<vmem>>, vector<1x64xf32>,
      %c0_40 = arith.constant 0 : index
      %c128_41 = arith.constant 128 : index
      %53 = vector.load %arg9[%c0_40, %c128_41] : memref<1x256xf32, #tpu.memory_space<vmem>>, vector<1x64xf32>
      tpu.vector_store %arg9[%c0_40, %c128_41], %45 {strides = array<i32>} : memref<1x256xf32, #tpu.memory_space<vmem>>, vector<1x64xf32>,
      %c0_42 = arith.constant 0 : index
      %c128_43 = arith.constant 128 : index
      %54 = vector.load %arg10[%c0_42, %c128_43] : memref<1x256xf32, #tpu.memory_space<vmem>>, vector<1x64xf32>
      tpu.vector_store %arg10[%c0_42, %c128_43], %48 {strides = array<i32>} : memref<1x256xf32, #tpu.memory_space<vmem>>, vector<1x64xf32>,
      %c0_44 = arith.constant 0 : index
      %c192_45 = arith.constant 192 : index
      %55 = vector.load %arg9[%c0_44, %c192_45] : memref<1x256xf32, #tpu.memory_space<vmem>>, vector<1x64xf32>
      tpu.vector_store %arg9[%c0_44, %c192_45], %45 {strides = array<i32>} : memref<1x256xf32, #tpu.memory_space<vmem>>, vector<1x64xf32>,
      %c0_46 = arith.constant 0 : index
      %c192_47 = arith.constant 192 : index
      %56 = vector.load %arg10[%c0_46, %c192_47] : memref<1x256xf32, #tpu.memory_space<vmem>>, vector<1x64xf32>
      tpu.vector_store %arg10[%c0_46, %c192_47], %48 {strides = array<i32>} : memref<1x256xf32, #tpu.memory_space<vmem>>, vector<1x64xf32>,
    } else {
    }
    %c1_i32_9 = arith.constant 1 : i32
    %16 = arith.cmpi eq, %arg0, %c1_i32_9 : i32
    %17 = arith.extui %16 : i1 to i32
    %c0_i32_10 = arith.constant 0 : i32
    %18 = arith.cmpi ne, %17, %c0_i32_10 : i32
    scf.if %18 {
      %c0_11 = arith.constant 0 : index
      %c0_12 = arith.constant 0 : index
      %19 = vector.load %arg9[%c0_11, %c0_12] : memref<1x256xf32, #tpu.memory_space<vmem>>, vector<1x256xf32>
      %20 = vector.broadcast %19 : vector<1x256xf32> to vector<256x256xf32>
      %21 = arith.mulf %2, %20 : vector<256x256xf32>
      %c0_13 = arith.constant 0 : index
      %c0_14 = arith.constant 0 : index
      %22 = vector.load %arg10[%c0_13, %c0_14] : memref<1x256xf32, #tpu.memory_space<vmem>>, vector<1x256xf32>
      %23 = vector.broadcast %22 : vector<1x256xf32> to vector<256x256xf32>
      %24 = arith.addf %21, %23 : vector<256x256xf32>
      %cst_15 = arith.constant 0.000000e+00 : f32
      %25 = vector.broadcast %cst_15 : f32 to vector<256x256xf32>
      %26 = arith.cmpf oge, %24, %25 : vector<256x256xf32>
      %cst_16 = arith.constant 2.000000e-01 : f32
      %27 = vector.broadcast %cst_16 : f32 to vector<256x256xf32>
      %28 = arith.mulf %27, %24 : vector<256x256xf32>
      %29 = arith.select %26, %24, %28 : vector<256x256xi1>, vector<256x256xf32>
      %30 = arith.truncf %29 : vector<256x256xf32> to vector<256x256xbf16>
      %c0_17 = arith.constant 0 : index
      %c0_18 = arith.constant 0 : index
      %31 = vector.load %arg6[%c0_17, %c0_18] : memref<256x256xbf16, #tpu.memory_space<vmem>>, vector<256x256xbf16>
      tpu.vector_store %arg6[%c0_17, %c0_18], %30 {strides = array<i32>} : memref<256x256xbf16, #tpu.memory_space<vmem>>, vector<256x256xbf16>,
    } else {
    }
    return
  }
  func.func @transform_0(%arg0: i32, %arg1: i32) -> (i32, i32) {
    %c0_i32 = arith.constant 0 : i32
    %c0_i32_0 = arith.constant 0 : i32
    return %arg1, %c0_i32 : i32, i32
  }
  func.func @transform_1(%arg0: i32, %arg1: i32) -> (i32, i32) {
    %c0_i32 = arith.constant 0 : i32
    %c0_i32_0 = arith.constant 0 : i32
    %c0_i32_1 = arith.constant 0 : i32
    return %c0_i32, %c0_i32_0 : i32, i32
  }
  func.func @transform_2(%arg0: i32, %arg1: i32) -> (i32, i32) {
    %c0_i32 = arith.constant 0 : i32
    %c0_i32_0 = arith.constant 0 : i32
    %c0_i32_1 = arith.constant 0 : i32
    return %c0_i32, %c0_i32_0 : i32, i32
  }
  func.func @transform_3(%arg0: i32, %arg1: i32) -> (i32, i32) {
    %c0_i32 = arith.constant 0 : i32
    %c0_i32_0 = arith.constant 0 : i32
    %c0_i32_1 = arith.constant 0 : i32
    return %c0_i32, %c0_i32_0 : i32, i32
  }
  func.func @transform_4(%arg0: i32, %arg1: i32) -> (i32, i32) {
    %0 = arith.muli %arg0, %arg1 : i32
    %c0_i32 = arith.constant 0 : i32
    %c0_i32_0 = arith.constant 0 : i32
    return %0, %c0_i32 : i32, i32
  }
}

module attributes {stable_mosaic.version = 11 : i64} {
  func.func @_l4_fused_kernel(%arg0: memref<2048x128xbf16, #tpu.memory_space<vmem>>, %arg1: memref<2048x128xbf16, #tpu.memory_space<vmem>>, %arg2: memref<8x128xbf16, #tpu.memory_space<vmem>>, %arg3: memref<8x128xbf16, #tpu.memory_space<vmem>>, %arg4: memref<8x1xf32, #tpu.memory_space<vmem>>, %arg5: memref<8x1xf32, #tpu.memory_space<vmem>>, %arg6: memref<2x8x2048xf32, #tpu.memory_space<vmem>>) attributes {dimension_semantics = [], scalar_prefetch = 0 : i64, scratch_operands = 0 : i64, tpu.core_type = #tpu.core_type<tc>} {
    %c0 = arith.constant 0 : index
    %c0_0 = arith.constant 0 : index
    %0 = vector.load %arg2[%c0, %c0_0] : memref<8x128xbf16, #tpu.memory_space<vmem>>, vector<8x128xbf16>
    %c0_1 = arith.constant 0 : index
    %c0_2 = arith.constant 0 : index
    %1 = vector.load %arg0[%c0_1, %c0_2] : memref<2048x128xbf16, #tpu.memory_space<vmem>>, vector<2048x128xbf16>
    %cst = arith.constant dense<0.000000e+00> : vector<8x2048xf32>
    %2 = tpu.matmul %0, %1, %cst {dimension_numbers = #tpu.dot_dimension_numbers<[1], [1], [0], [0], [0, 0, 1, 0], [], []>} : vector<8x128xbf16>, vector<2048x128xbf16>, vector<8x2048xf32> -> vector<8x2048xf32>
    %c0_3 = arith.constant 0 : index
    %c0_4 = arith.constant 0 : index
    %3 = vector.load %arg3[%c0_3, %c0_4] : memref<8x128xbf16, #tpu.memory_space<vmem>>, vector<8x128xbf16>
    %c0_5 = arith.constant 0 : index
    %c0_6 = arith.constant 0 : index
    %4 = vector.load %arg1[%c0_5, %c0_6] : memref<2048x128xbf16, #tpu.memory_space<vmem>>, vector<2048x128xbf16>
    %cst_7 = arith.constant dense<0.000000e+00> : vector<8x2048xf32>
    %5 = tpu.matmul %3, %4, %cst_7 {dimension_numbers = #tpu.dot_dimension_numbers<[1], [1], [0], [0], [0, 0, 1, 0], [], []>} : vector<8x128xbf16>, vector<2048x128xbf16>, vector<8x2048xf32> -> vector<8x2048xf32>
    %cst_8 = arith.constant dense<0.000000e+00> : vector<8xf32>
    %6 = vector.multi_reduction <add>, %2, %cst_8 [1] : vector<8x2048xf32> to vector<8xf32>
    %7 = vector.shape_cast %6 : vector<8xf32> to vector<8x1xf32>
    %cst_9 = arith.constant dense<0.000000e+00> : vector<8xf32>
    %8 = vector.multi_reduction <add>, %5, %cst_9 [1] : vector<8x2048xf32> to vector<8xf32>
    %9 = vector.shape_cast %8 : vector<8xf32> to vector<8x1xf32>
    %10 = arith.addf %7, %9 : vector<8x1xf32>
    %11 = arith.mulf %2, %2 : vector<8x2048xf32>
    %cst_10 = arith.constant dense<0.000000e+00> : vector<8xf32>
    %12 = vector.multi_reduction <add>, %11, %cst_10 [1] : vector<8x2048xf32> to vector<8xf32>
    %13 = vector.shape_cast %12 : vector<8xf32> to vector<8x1xf32>
    %14 = arith.mulf %5, %5 : vector<8x2048xf32>
    %cst_11 = arith.constant dense<0.000000e+00> : vector<8xf32>
    %15 = vector.multi_reduction <add>, %14, %cst_11 [1] : vector<8x2048xf32> to vector<8xf32>
    %16 = vector.shape_cast %15 : vector<8xf32> to vector<8x1xf32>
    %17 = arith.addf %13, %16 : vector<8x1xf32>
    %cst_12 = arith.constant 4.096000e+03 : f32
    %18 = vector.broadcast %cst_12 : f32 to vector<8x1xf32>
    %19 = arith.divf %10, %18 : vector<8x1xf32>
    %cst_13 = arith.constant 4.096000e+03 : f32
    %20 = vector.broadcast %cst_13 : f32 to vector<8x1xf32>
    %21 = arith.divf %17, %20 : vector<8x1xf32>
    %22 = arith.mulf %19, %19 : vector<8x1xf32>
    %23 = arith.subf %21, %22 : vector<8x1xf32>
    %cst_14 = arith.constant 0.000000e+00 : f32
    %24 = vector.broadcast %cst_14 : f32 to vector<8x1xf32>
    %25 = arith.maximumf %23, %24 : vector<8x1xf32>
    %cst_15 = arith.constant 9.99999974E-6 : f32
    %26 = vector.broadcast %cst_15 : f32 to vector<8x1xf32>
    %27 = arith.addf %25, %26 : vector<8x1xf32>
    %28 = math.rsqrt %27 : vector<8x1xf32>
    %c0_16 = arith.constant 0 : index
    %c0_17 = arith.constant 0 : index
    %29 = vector.load %arg4[%c0_16, %c0_17] : memref<8x1xf32, #tpu.memory_space<vmem>>, vector<8x1xf32>
    %30 = arith.mulf %28, %29 : vector<8x1xf32>
    %c0_18 = arith.constant 0 : index
    %c0_19 = arith.constant 0 : index
    %31 = vector.load %arg5[%c0_18, %c0_19] : memref<8x1xf32, #tpu.memory_space<vmem>>, vector<8x1xf32>
    %32 = arith.mulf %19, %30 : vector<8x1xf32>
    %33 = arith.subf %31, %32 : vector<8x1xf32>
    %34 = vector.broadcast %30 : vector<8x1xf32> to vector<8x2048xf32>
    %35 = arith.mulf %2, %34 : vector<8x2048xf32>
    %36 = vector.broadcast %33 : vector<8x1xf32> to vector<8x2048xf32>
    %37 = arith.addf %35, %36 : vector<8x2048xf32>
    %38 = math.tanh %37 : vector<8x2048xf32>
    %c0_20 = arith.constant 0 : index
    %c0_21 = arith.constant 0 : index
    %c0_22 = arith.constant 0 : index
    %39 = vector.load %arg6[%c0_20, %c0_21, %c0_22] : memref<2x8x2048xf32, #tpu.memory_space<vmem>>, vector<1x8x2048xf32>
    %40 = vector.shape_cast %39 : vector<1x8x2048xf32> to vector<8x2048xf32>
    %41 = vector.shape_cast %38 : vector<8x2048xf32> to vector<1x8x2048xf32>
    tpu.vector_store %arg6[%c0_20, %c0_21, %c0_22], %41 {strides = array<i32>} : memref<2x8x2048xf32, #tpu.memory_space<vmem>>, vector<1x8x2048xf32>,
    %42 = vector.broadcast %30 : vector<8x1xf32> to vector<8x2048xf32>
    %43 = arith.mulf %5, %42 : vector<8x2048xf32>
    %44 = vector.broadcast %33 : vector<8x1xf32> to vector<8x2048xf32>
    %45 = arith.addf %43, %44 : vector<8x2048xf32>
    %46 = math.tanh %45 : vector<8x2048xf32>
    %c1 = arith.constant 1 : index
    %c0_23 = arith.constant 0 : index
    %c0_24 = arith.constant 0 : index
    %47 = vector.load %arg6[%c1, %c0_23, %c0_24] : memref<2x8x2048xf32, #tpu.memory_space<vmem>>, vector<1x8x2048xf32>
    %48 = vector.shape_cast %47 : vector<1x8x2048xf32> to vector<8x2048xf32>
    %49 = vector.shape_cast %46 : vector<8x2048xf32> to vector<1x8x2048xf32>
    tpu.vector_store %arg6[%c1, %c0_23, %c0_24], %49 {strides = array<i32>} : memref<2x8x2048xf32, #tpu.memory_space<vmem>>, vector<1x8x2048xf32>,
    return
  }
}

</mosaic_0001>

<bundles_post_ra>
// kernel: generator_forward.4
= control target key start
LH: loop header
LB: loop body
LE: loop exit
PB: predicated region body
PF: predicated region fallthrough
CT: control target
= control target key end

     0   :  { %9 = vsyncpa [#allocation7], 0  ;;  %s2532_s0 = inlined_call_operand.vmem [shape: bf16[32,128], index: 0, kind: input, shape index: {}]   ;;  %s2533_s1 = inlined_call_operand.hbm [shape: bf16[128,1024], index: 1, kind: input, shape index: {}]   ;;  %s2534_s2 = inlined_call_operand.hbm [shape: f32[1,256], index: 2, kind: input, shape index: {}]   ;;  %s2535_s3 = inlined_call_operand.hbm [shape: f32[1,256], index: 3, kind: input, shape index: {}]   ;;  %s2536_s4 = inlined_call_operand.vmem [shape: bf16[32,1024], index: 4, kind: output, shape index: {}]  }
   0x1   :  { %10 = vsyncpa [#allocation9], 0  ;;  %s2021_s15 = smov 0   ;;  %s2023_s16 = smov 0  }
   0x2   :  { %s2025_s17 = smov 0  }
   0x3 LB: > { %s1988_s18 = smov [#allocation8]   ;;  %s1689_s20 = sadd.s32 4294967295, %s1986_s17   ;;  %s1986_s17 = sphi %s2025_s17, %s16_s17   ;;  %s1982_s16 = sphi %s2023_s16, %s2622_s16   ;;  %s1978_s15 = sphi %s2021_s15, %s2621_s15  }
   0x4   : > { %s185_s19 = sshll.u32 %s1988_s18, 4  ;;  %p1691_p0 = scmp.ge.s32.totalorder %s1986_s17, 1  ;;  %s186_s19 = int_to_ptr.vmem [resolvable:$true] %s185_s19 }
   0x5   : > { %p150_p1 = scmp.lt.s32.totalorder %s1986_s17, 3  ;;  %p2039_p2 = scmp.eq.s32.totalorder %s1689_s20, 0 }
   0x6   : > { %s28_s23 = sadd.s32 1, %s1982_s16  ;;  %s1989_s26 = smov [#allocation6]  }
   0x7   : > { %s2563_s21 = scalar_select %p2039_p2, 1, 0 }
   0x8   : > { %p2043_p3 = pnand %p1691_p0, %p150_p1  ;;  %p2056_p6 = scmp.ge.s32.totalorder %s28_s23, 2 }
   0x9   : > { %s171_s27 = sshll.u32 %s1989_s26, 4  ;;  %s1872_s30 = scalar_lea.hbm %s2534_s2, 32  ;;  %s2060_s27 = int_to_ptr.vmem [resolvable:$true] %s171_s27 }
   0xa   : > { %s2564_s22 = scalar_select %p2043_p3, 1, 0 }
   0xb   : > { %p1820_p4 = pneg %p2043_p3  ;;  %p1873_p7 = scmp.ne.s32.totalorder %s2534_s2, %s1872_s30 }
   0xc   : > { %s2566_s25 = scalar_select %p2056_p6, 1, 0 }
   0xd   : > { %p2052_p5 = pnand %p2039_p2, %p1820_p4  ;;  %p1879_p11 = scmp.lt.u32.totalorder %s1872_s30, %s2534_s2 }
   0xf   : > { %p2070_p8 = pneg %p2052_p5 }
  0x11   : > { %p1875_p9 = pnand %p2070_p8, %p1873_p7 }
  0x13   : > { %p1876_p10 = pneg %p1875_p9 }
  0x15   : > { %p1881_p12 = pnand %p1879_p11, %p1876_p10 }
  0x17   : > { %1884 = shalt.err (!%p1881_p12)
}
  0x18   : > { %s1885_s10 = scalar_lea.vmem %s186_s19, 32  ;;  %p1893_p4 = scmp.lt.s32.totalorder %s186_s19, %s186_s19 }
  0x19   : > { %p1886_p13 = scmp.ne.s32.totalorder %s186_s19, %s1885_s10  ;;  %p1894_p2 = scmp.lt.s32.totalorder %s1885_s10, %s1885_s10 }
  0x1b   : > { %p1888_p0 = pnand %p1886_p13, %p2070_p8  ;;  %p1895_p3 = por %p1894_p2, %p1893_p4 }
  0x1d   : > { %p1889_p1 = pneg %p1888_p0 }
  0x1f   : > { %p1896_p6 = pnand %p1895_p3, %p1889_p1 }
  0x21   : > { %1899 = shalt.err (!%p1896_p6)
}
  0x22   : > { %1826 = dma.hbm_to_vmem [thread:$0]  (!%p2052_p5), %s2534_s2, 32, %s186_s19, [#allocation9]  }
  0x23   : > { %p2568_p7 = scmp.ne.s32.totalorder %s2566_s25, 0  ;;  %s1900_s18 = scalar_lea.hbm %s2533_s1, 8192 }
  0x24   : > { %p1901_p2 = scmp.ne.s32.totalorder %s2533_s1, %s1900_s18  ;;  %p1907_p9 = scmp.lt.u32.totalorder %s1900_s18, %s2533_s1 }
  0x25   : > { %s2624_s23 = smov (%p2568_p7, %s28_s23), 0 }
  0x26   : > { %p1903_p3 = pnand %p1901_p2, %p2070_p8 }
  0x28   : > { %p1904_p6 = pneg %p1903_p3 }
  0x2a   : > { %p1909_p10 = pnand %p1907_p9, %p1904_p6 }
  0x2c   : > { %1912 = shalt.err (!%p1909_p10)
}
  0x2d   : > { %s1913_s19 = scalar_lea.vmem %s2060_s27, 8192  ;;  %p1921_p0 = scmp.lt.s32.totalorder %s2060_s27, %s2060_s27 }
  0x2e   : > { %p1914_p11 = scmp.ne.s32.totalorder %s2060_s27, %s1913_s19  ;;  %p1922_p1 = scmp.lt.s32.totalorder %s1913_s19, %s1913_s19 }
  0x30   : > { %p1916_p12 = pnand %p1914_p11, %p2070_p8  ;;  %p1923_p4 = por %p1922_p1, %p1921_p0 }
  0x32   : > { %p1917_p13 = pneg %p1916_p12 }
  0x34   : > { %p1924_p7 = pnand %p1923_p4, %p1917_p13 }
  0x36   : > { %1927 = shalt.err (!%p1924_p7)
}
  0x37   : > { %s1990_s25 = smov 512   ;;  %s1991_s30 = smov 32  }
  0x38   : > { %1823 = dma.hbm_to_vmem [thread:$0]  (!%p2052_p5), %s2533_s1, 8192, %s2060_s27, [#allocation7], %s1990_s25, %s1990_s25, %s1991_s30  }
  0x39   : > { %s1992_s8 = smov [#allocation10]   ;;  %s1928_s12 = scalar_lea.hbm %s2535_s3, 32 }
  0x3a   : > { %s196_s9 = sshll.u32 %s1992_s8, 4  ;;  %p1929_p2 = scmp.ne.s32.totalorder %s2535_s3, %s1928_s12  ;;  %s197_s9 = int_to_ptr.vmem [resolvable:$true] %s196_s9 }
  0x3b   : > { %p1935_p9 = scmp.lt.u32.totalorder %s1928_s12, %s2535_s3 }
  0x3c   : > { %p1931_p3 = pnand %p1929_p2, %p2070_p8 }
  0x3e   : > { %p1932_p6 = pneg %p1931_p3 }
  0x40   : > { %p1937_p10 = pnand %p1935_p9, %p1932_p6 }
  0x42   : > { %1940 = shalt.err (!%p1937_p10)
}
  0x43   : > { %s1941_s27 = scalar_lea.vmem %s197_s9, 32  ;;  %p1949_p0 = scmp.lt.s32.totalorder %s197_s9, %s197_s9 }
  0x44   : > { %p1942_p11 = scmp.ne.s32.totalorder %s197_s9, %s1941_s27  ;;  %p1950_p1 = scmp.lt.s32.totalorder %s1941_s27, %s1941_s27 }
  0x46   : > { %p1944_p12 = pnand %p1942_p11, %p2070_p8  ;;  %p1951_p4 = por %p1950_p1, %p1949_p0 }
  0x48   : > { %p1945_p13 = pneg %p1944_p12 }
  0x4a   : > { %p1952_p7 = pnand %p1951_p4, %p1945_p13 }
  0x4c   : > { %1955 = shalt.err (!%p1952_p7)
}
  0x4d   : > { %1829 = dma.hbm_to_vmem [thread:$0]  (!%p2052_p5), %s2535_s3, 32, %s197_s9, [#allocation9]  }
  0x4e   : > { %p2569_p2 = scmp.ne.s32.totalorder %s2564_s22, 0 }
  0x50   : > { %209 = sbr.rel (%p2569_p2) target bundleno = 551 (0x227), region = 36 }
  0x57   : > { %p2570_p3 = scmp.ne.s32.totalorder %s2563_s21, 0 }
  0x59   : > { %1969 = dma.done.wait (%p2570_p3), [#allocation7], 8192  }
  0x5a   : > { %1971 = vsyncadd (%p2570_p3), [#allocation7], 4294959104 }
  0x5b   : > { %1973 = dma.done.wait (%p2570_p3), [#allocation9], 64  }
  0x5c   : > { %1975 = vsyncadd (%p2570_p3), [#allocation9], 4294967232  ;;  %v1993_v0 = vmov 0   ;;  %v265_v1 = vld [vmem:[#allocation6] sm:$0xff]  ;;  %v266_v3 = vld [vmem:[#allocation6 + $0x8] sm:$0xff]  ;;  %p873_p5 = scmp.eq.s32.totalorder %s1978_s15, 0 }
  0x5d   : > { %693 = vmatprep.mubr.bf16.mxu0 %v1993_v0  ;;  %746 = vmatprep.mubr.bf16.mxu1 %v1993_v0  ;;  %v269_v2 = vld [vmem:[#allocation6 + $0x20] sm:$0xff]  ;;  %v270_v5 = vld [vmem:[#allocation6 + $0x28] sm:$0xff]  ;;  %v267_v63 = vld [vmem:[#allocation6 + $0x10] sm:$0xff] }
  0x5e   : > { %v1703_v4 = vcombine.high %v265_v1, %v269_v2  ;;  %v1702_v6 = vcombine.low %v265_v1, %v269_v2  ;;  %v273_v7 = vld [vmem:[#allocation6 + $0x40] sm:$0xff]  ;;  %v1705_v9 = vcombine.high %v266_v3, %v270_v5  ;;  %v1704_v10 = vcombine.low %v266_v3, %v270_v5  ;;  %v274_v12 = vld [vmem:[#allocation6 + $0x48] sm:$0xff]  ;;  %v271_v1 = vld [vmem:[#allocation6 + $0x30] sm:$0xff] }
  0x5f   : > { %v277_v8 = vld [vmem:[#allocation6 + $0x60] sm:$0xff]  ;;  %v278_v13 = vld [vmem:[#allocation6 + $0x68] sm:$0xff]  ;;  %v268_v2 = vld [vmem:[#allocation6 + $0x18] sm:$0xff] }
  0x60   : > { %v1711_v11 = vcombine.high %v273_v7, %v277_v8  ;;  %v281_v14 = vld [vmem:[#allocation6 + $0x80] sm:$0xff]  ;;  %661 = vmatprep.subr.bf16.mxu0 %v1703_v4  ;;  %v1713_v15 = vcombine.high %v274_v12, %v278_v13  ;;  %v282_v17 = vld [vmem:[#allocation6 + $0x88] sm:$0xff]  ;;  %714 = vmatprep.subr.bf16.mxu1 %v1705_v9  ;;  %v1710_v19 = vcombine.low %v273_v7, %v277_v8  ;;  %v272_v3 = vld [vmem:[#allocation6 + $0x38] sm:$0xff] }
  0x61   : > { %v285_v16 = vld [vmem:[#allocation6 + $0xa0] sm:$0xff]  ;;  %v286_v18 = vld [vmem:[#allocation6 + $0xa8] sm:$0xff]  ;;  %662 = vmatpush1.bf16.msra.mxu0 %v1702_v6  ;;  %715 = vmatpush1.bf16.msra.mxu1 %v1704_v10  ;;  %v1712_v20 = vcombine.low %v274_v12, %v278_v13  ;;  %v1707_v6 = vcombine.high %v267_v63, %v271_v1  ;;  %v1709_v7 = vcombine.high %v268_v2, %v272_v3  ;;  %v275_v8 = vld [vmem:[#allocation6 + $0x50] sm:$0xff] }
  0x62   : > { %663 = vmatprep.subr.bf16.mxu0 %v1711_v11  ;;  %v1719_v21 = vcombine.high %v281_v14, %v285_v16  ;;  %716 = vmatprep.subr.bf16.mxu1 %v1713_v15  ;;  %v1721_v22 = vcombine.high %v282_v17, %v286_v18  ;;  %v289_v23 = vld [vmem:[#allocation6 + $0xc0] sm:$0xff]  ;;  %v290_v25 = vld [vmem:[#allocation6 + $0xc8] sm:$0xff]  ;;  %v1718_v27 = vcombine.low %v281_v14, %v285_v16  ;;  %v279_v9 = vld [vmem:[#allocation6 + $0x70] sm:$0xff] }
  0x63   : > { %v293_v24 = vld [vmem:[#allocation6 + $0xe0] sm:$0xff]  ;;  %v294_v26 = vld [vmem:[#allocation6 + $0xe8] sm:$0xff]  ;;  %v1720_v28 = vcombine.low %v282_v17, %v286_v18  ;;  %v276_v11 = vld [vmem:[#allocation6 + $0x58] sm:$0xff]  ;;  %v1706_v13 = vcombine.low %v267_v63, %v271_v1  ;;  %v1708_v14 = vcombine.low %v268_v2, %v272_v3  ;;  %v1715_v15 = vcombine.high %v275_v8, %v279_v9 }
  0x64   : > { %v1727_v29 = vcombine.high %v289_v23, %v293_v24  ;;  %v1729_v30 = vcombine.high %v290_v25, %v294_v26  ;;  %v297_v31 = vld [vmem:[#allocation6 + $0x100] sm:$0xff]  ;;  %v298_v33 = vld [vmem:[#allocation6 + $0x108] sm:$0xff]  ;;  %v1726_v35 = vcombine.low %v289_v23, %v293_v24  ;;  %v1728_v36 = vcombine.low %v290_v25, %v294_v26  ;;  %v280_v12 = vld [vmem:[#allocation6 + $0x78] sm:$0xff] }
  0x65   : > { %664 = vmatpush1.bf16.msra.mxu0 %v1710_v19  ;;  %717 = vmatpush1.bf16.msra.mxu1 %v1712_v20  ;;  %v301_v32 = vld [vmem:[#allocation6 + $0x120] sm:$0xff]  ;;  %v302_v34 = vld [vmem:[#allocation6 + $0x128] sm:$0xff]  ;;  %v1717_v16 = vcombine.high %v276_v11, %v280_v12  ;;  %v283_v17 = vld [vmem:[#allocation6 + $0x90] sm:$0xff] }
  0x66   : > { %665 = vmatprep.subr.bf16.mxu0 %v1719_v21  ;;  %718 = vmatprep.subr.bf16.mxu1 %v1721_v22  ;;  %v1735_v37 = vcombine.high %v297_v31, %v301_v32  ;;  %v1737_v38 = vcombine.high %v298_v33, %v302_v34  ;;  %v305_v39 = vld [vmem:[#allocation6 + $0x140] sm:$0xff]  ;;  %v306_v41 = vld [vmem:[#allocation6 + $0x148] sm:$0xff]  ;;  %v1734_v43 = vcombine.low %v297_v31, %v301_v32  ;;  %v287_v18 = vld [vmem:[#allocation6 + $0xb0] sm:$0xff] }
  0x67   : > { %v309_v40 = vld [vmem:[#allocation6 + $0x160] sm:$0xff]  ;;  %v310_v42 = vld [vmem:[#allocation6 + $0x168] sm:$0xff]  ;;  %v1736_v44 = vcombine.low %v298_v33, %v302_v34  ;;  %v284_v19 = vld [vmem:[#allocation6 + $0x98] sm:$0xff]  ;;  %v1714_v21 = vcombine.low %v275_v8, %v279_v9  ;;  %v1716_v22 = vcombine.low %v276_v11, %v280_v12  ;;  %v1723_v23 = vcombine.high %v283_v17, %v287_v18 }
  0x68   : > { %v1743_v45 = vcombine.high %v305_v39, %v309_v40  ;;  %v1745_v46 = vcombine.high %v306_v41, %v310_v42  ;;  %v313_v47 = vld [vmem:[#allocation6 + $0x180] sm:$0xff]  ;;  %v314_v49 = vld [vmem:[#allocation6 + $0x188] sm:$0xff]  ;;  %v1742_v51 = vcombine.low %v305_v39, %v309_v40  ;;  %v1744_v52 = vcombine.low %v306_v41, %v310_v42  ;;  %v288_v20 = vld [vmem:[#allocation6 + $0xb8] sm:$0xff] }
  0x69   : > { %666 = vmatpush1.bf16.msra.mxu0 %v1718_v27  ;;  %719 = vmatpush1.bf16.msra.mxu1 %v1720_v28  ;;  %v317_v48 = vld [vmem:[#allocation6 + $0x1a0] sm:$0xff]  ;;  %v318_v50 = vld [vmem:[#allocation6 + $0x1a8] sm:$0xff]  ;;  %v1725_v24 = vcombine.high %v284_v19, %v288_v20  ;;  %v291_v25 = vld [vmem:[#allocation6 + $0xd0] sm:$0xff]  ;;  %v1724_v31 = vcombine.low %v284_v19, %v288_v20 }
  0x6a   : > { %667 = vmatprep.subr.bf16.mxu0 %v1727_v29  ;;  %720 = vmatprep.subr.bf16.mxu1 %v1729_v30  ;;  %v1751_v53 = vcombine.high %v313_v47, %v317_v48  ;;  %v1753_v54 = vcombine.high %v314_v49, %v318_v50  ;;  %v321_v55 = vld [vmem:[#allocation6 + $0x1c0] sm:$0xff]  ;;  %v322_v57 = vld [vmem:[#allocation6 + $0x1c8] sm:$0xff]  ;;  %v1750_v59 = vcombine.low %v313_v47, %v317_v48  ;;  %v295_v26 = vld [vmem:[#allocation6 + $0xf0] sm:$0xff] }
  0x6b   : > { %v325_v56 = vld [vmem:[#allocation6 + $0x1e0] sm:$0xff]  ;;  %v326_v58 = vld [vmem:[#allocation6 + $0x1e8] sm:$0xff]  ;;  %v1752_v60 = vcombine.low %v314_v49, %v318_v50  ;;  %v292_v27 = vld [vmem:[#allocation6 + $0xd8] sm:$0xff]  ;;  %v1722_v30 = vcombine.low %v283_v17, %v287_v18  ;;  %v1731_v32 = vcombine.high %v291_v25, %v295_v26 }
  0x6c   : > { %v1759_v61 = vcombine.high %v321_v55, %v325_v56  ;;  %v1761_v62 = vcombine.high %v322_v57, %v326_v58  ;;  %v1758_v4 = vcombine.low %v321_v55, %v325_v56  ;;  %v1760_v5 = vcombine.low %v322_v57, %v326_v58  ;;  %v2146_v10 = vld [vmem:[%s2532_s0] sm:$0xff]   ;;  %v296_v28 = vld [vmem:[#allocation6 + $0xf8] sm:$0xff]  ;;  %v2155_v29 = vld [vmem:[%s2532_s0 + $0x8] sm:$0xff]  }
  0x6d   : > { %668 = vmatpush1.bf16.msra.mxu0 %v1726_v35  ;;  %721 = vmatpush1.bf16.msra.mxu1 %v1728_v36  ;;  %v1733_v33 = vcombine.high %v292_v27, %v296_v28  ;;  %v299_v34 = vld [vmem:[#allocation6 + $0x110] sm:$0xff]  ;;  %v300_v36 = vld [vmem:[#allocation6 + $0x118] sm:$0xff]  ;;  %v1732_v39 = vcombine.low %v292_v27, %v296_v28 }
  0x6e   : > { %669 = vmatprep.subr.bf16.mxu0 %v1735_v37  ;;  %722 = vmatprep.subr.bf16.mxu1 %v1737_v38  ;;  %v303_v35 = vld [vmem:[#allocation6 + $0x130] sm:$0xff]  ;;  %v304_v37 = vld [vmem:[#allocation6 + $0x138] sm:$0xff]  ;;  %v1730_v38 = vcombine.low %v291_v25, %v295_v26 }
  0x6f   : > { %v1739_v40 = vcombine.high %v299_v34, %v303_v35  ;;  %v1741_v41 = vcombine.high %v300_v36, %v304_v37  ;;  %v307_v42 = vld [vmem:[#allocation6 + $0x150] sm:$0xff]  ;;  %v1740_v47 = vcombine.low %v300_v36, %v304_v37  ;;  %v1994_v36 = vmov (%p873_p5), 0.0  }
  0x70   : > { %v315_v50 = vld [vmem:[#allocation6 + $0x190] sm:$0xff]  ;;  %879 = vst [vmem:[#allocation2] sm:$0xff] (%p873_p5), %v1994_v36  ;;  %880 = vst [vmem:[#allocation3] sm:$0xff] (%p873_p5), %v1994_v36 }
  0x71   : > { %670 = vmatpush1.bf16.msra.mxu0 %v1734_v43  ;;  %723 = vmatpush1.bf16.msra.mxu1 %v1736_v44  ;;  %v311_v43 = vld [vmem:[#allocation6 + $0x170] sm:$0xff]  ;;  %v308_v44 = vld [vmem:[#allocation6 + $0x158] sm:$0xff] }
  0x72   : > { %671 = vmatprep.subr.bf16.mxu0 %v1743_v45  ;;  %724 = vmatprep.subr.bf16.mxu1 %v1745_v46  ;;  %v312_v45 = vld [vmem:[#allocation6 + $0x178] sm:$0xff]  ;;  %v1738_v46 = vcombine.low %v299_v34, %v303_v35  ;;  %v1747_v48 = vcombine.high %v307_v42, %v311_v43  ;;  %v323_v58 = vld [vmem:[#allocation6 + $0x1d0] sm:$0xff] }
  0x73   : > { %v1749_v49 = vcombine.high %v308_v44, %v312_v45  ;;  %v1748_v55 = vcombine.low %v308_v44, %v312_v45 }
  0x75   : > { %672 = vmatpush1.bf16.msra.mxu0 %v1742_v51  ;;  %725 = vmatpush1.bf16.msra.mxu1 %v1744_v52  ;;  %v319_v51 = vld [vmem:[#allocation6 + $0x1b0] sm:$0xff]  ;;  %v316_v52 = vld [vmem:[#allocation6 + $0x198] sm:$0xff] }
  0x76   : > { %673 = vmatprep.subr.bf16.mxu0 %v1751_v53  ;;  %726 = vmatprep.subr.bf16.mxu1 %v1753_v54  ;;  %v320_v53 = vld [vmem:[#allocation6 + $0x1b8] sm:$0xff]  ;;  %v1746_v54 = vcombine.low %v307_v42, %v311_v43  ;;  %v1755_v56 = vcombine.high %v315_v50, %v319_v51 }
  0x77   : > { %v1757_v57 = vcombine.high %v316_v52, %v320_v53  ;;  %v1756_v63 = vcombine.low %v316_v52, %v320_v53 }
  0x79   : > { %674 = vmatpush1.bf16.msra.mxu0 %v1750_v59  ;;  %727 = vmatpush1.bf16.msra.mxu1 %v1752_v60  ;;  %v327_v59 = vld [vmem:[#allocation6 + $0x1f0] sm:$0xff]  ;;  %v324_v60 = vld [vmem:[#allocation6 + $0x1d8] sm:$0xff] }
  0x7a   : > { %675 = vmatprep.subr.bf16.mxu0 %v1759_v61  ;;  %728 = vmatprep.subr.bf16.mxu1 %v1761_v62  ;;  %v328_v61 = vld [vmem:[#allocation6 + $0x1f8] sm:$0xff]  ;;  %v1754_v62 = vcombine.low %v315_v50, %v319_v51  ;;  %v1763_v1 = vcombine.high %v323_v58, %v327_v59  ;;  %v1762_v3 = vcombine.low %v323_v58, %v327_v59 }
  0x7b   : > { %v1765_v2 = vcombine.high %v324_v60, %v328_v61 }
  0x7d   : > { %676 = vmatpush1.bf16.msra.mxu0 %v1758_v4  ;;  %729 = vmatpush1.bf16.msra.mxu1 %v1760_v5  ;;  %v1764_v4 = vcombine.low %v324_v60, %v328_v61 }
  0x7e   : > { %767 = vmatprep.subr.bf16.mxu0 %v1707_v6  ;;  %820 = vmatprep.subr.bf16.mxu1 %v1709_v7 }
  0x80   : > { %694 = vmatmul.mubr.bf16.vlgmr.msra.gmra.mrb[0].mxu0 %v2146_v10  ;;  %747 = vmatmul.mubr.bf16.vlgmr.msra.gmra.mrb[0].mxu1 %v2146_v10 }
  0x81   : > { %768 = vmatpush1.bf16.msra.mxu0 %v1706_v13  ;;  %821 = vmatpush1.bf16.msra.mxu1 %v1708_v14 }
  0x82   : > { %769 = vmatprep.subr.bf16.mxu0 %v1715_v15  ;;  %822 = vmatprep.subr.bf16.mxu1 %v1717_v16 }
  0x83   : > { %703 = vmatprep.mubr.bf16.mxu0 %v1993_v0  ;;  %756 = vmatprep.mubr.bf16.mxu1 %v1993_v0 }
  0x85   : > { %770 = vmatpush1.bf16.msra.mxu0 %v1714_v21  ;;  %823 = vmatpush1.bf16.msra.mxu1 %v1716_v22 }
  0x86   : > { %771 = vmatprep.subr.bf16.mxu0 %v1723_v23  ;;  %824 = vmatprep.subr.bf16.mxu1 %v1725_v24 }
  0x88   : > { %704 = vmatmul.mubr.bf16.gmra.mrb[4].mxu0 %v2155_v29  ;;  %757 = vmatmul.mubr.bf16.gmra.mrb[4].mxu1 %v2155_v29 }
  0x89   : > { %772 = vmatpush1.bf16.msra.mxu0 %v1722_v30  ;;  %825 = vmatpush1.bf16.msra.mxu1 %v1724_v31 }
  0x8a   : > { %773 = vmatprep.subr.bf16.mxu0 %v1731_v32  ;;  %826 = vmatprep.subr.bf16.mxu1 %v1733_v33 }
  0x8b   : > { %799 = vmatprep.mubr.bf16.mxu0 %v1993_v0  ;;  %852 = vmatprep.mubr.bf16.mxu1 %v1993_v0 }
  0x8d   : > { %774 = vmatpush1.bf16.msra.mxu0 %v1730_v38  ;;  %827 = vmatpush1.bf16.msra.mxu1 %v1732_v39 }
  0x8e   : > { %775 = vmatprep.subr.bf16.mxu0 %v1739_v40  ;;  %828 = vmatprep.subr.bf16.mxu1 %v1741_v41 }
  0x91   : > { %776 = vmatpush1.bf16.msra.mxu0 %v1738_v46  ;;  %829 = vmatpush1.bf16.msra.mxu1 %v1740_v47 }
  0x92   : > { %777 = vmatprep.subr.bf16.mxu0 %v1747_v48  ;;  %830 = vmatprep.subr.bf16.mxu1 %v1749_v49 }
  0x95   : > { %778 = vmatpush1.bf16.msra.mxu0 %v1746_v54  ;;  %831 = vmatpush1.bf16.msra.mxu1 %v1748_v55 }
  0x96   : > { %779 = vmatprep.subr.bf16.mxu0 %v1755_v56  ;;  %832 = vmatprep.subr.bf16.mxu1 %v1757_v57 }
  0x99   : > { %780 = vmatpush1.bf16.msra.mxu0 %v1754_v62  ;;  %833 = vmatpush1.bf16.msra.mxu1 %v1756_v63 }
  0x9a   : > { %781 = vmatprep.subr.bf16.mxu0 %v1763_v1  ;;  %834 = vmatprep.subr.bf16.mxu1 %v1765_v2 }
  0x9d   : > { %782 = vmatpush1.bf16.msra.mxu0 %v1762_v3  ;;  %835 = vmatpush1.bf16.msra.mxu1 %v1764_v4 }
  0xa0   : > { %800 = vmatmul.mubr.bf16.vlgmr.msra.gmra.mrb[8].mxu0 %v2146_v10  ;;  %853 = vmatmul.mubr.bf16.vlgmr.msra.gmra.mrb[8].mxu1 %v2146_v10 }
  0xa1   : > { %809 = vmatprep.mubr.bf16.mxu0 %v1993_v0  ;;  %862 = vmatprep.mubr.bf16.mxu1 %v1993_v0 }
  0xa8   : > { %810 = vmatmul.mubr.bf16.gmra.mrb[12].mxu0 %v2155_v29  ;;  %863 = vmatmul.mubr.bf16.gmra.mrb[12].mxu1 %v2155_v29 }
 0x153   : > { %v2168_v5 = vpop.f32.mrb[0].mxu0  ;;  %v2170_v6 = vpop.f32.mrb[0].mxu1 }
 0x154   : > { %v2172_v7 = vpop.f32.mrb[1].mxu0  ;;  %v2174_v8 = vpop.f32.mrb[1].mxu1 }
 0x155   : > { %v2176_v9 = vpop.f32.mrb[2].mxu0  ;;  %v2178_v10 = vpop.f32.mrb[2].mxu1 }
 0x156   : > { %2571 = vst [vmem:[#allocation13_spill] sm:$0xff] %v2178_v10  ;;  %v2180_v11 = vpop.f32.mrb[3].mxu0  ;;  %v2182_v0 = vpop.f32.mrb[3].mxu1 }
 0x157   : > { %2572 = vst [vmem:[#allocation14_spill] sm:$0xff] %v2180_v11  ;;  %2573 = vst [vmem:[#allocation15_spill] sm:$0xff] %v2182_v0 }
 0x15b   : > { %v2184_v12 = vpop.f32.mrb[4].mxu0  ;;  %v2186_v13 = vpop.f32.mrb[4].mxu1 }
 0x15c   : > { %2574 = vst [vmem:[#allocation16_spill] sm:$0xff] %v2184_v12  ;;  %2575 = vst [vmem:[#allocation17_spill] sm:$0xff] %v2186_v13  ;;  %v2188_v14 = vpop.f32.mrb[5].mxu0  ;;  %v2190_v15 = vpop.f32.mrb[5].mxu1 }
 0x15d   : > { %2576 = vst [vmem:[#allocation18_spill] sm:$0xff] %v2188_v14  ;;  %2577 = vst [vmem:[#allocation19_spill] sm:$0xff] %v2190_v15  ;;  %v2192_v16 = vpop.f32.mrb[6].mxu0  ;;  %v2194_v17 = vpop.f32.mrb[6].mxu1 }
 0x15e   : > { %2578 = vst [vmem:[#allocation20_spill] sm:$0xff] %v2192_v16  ;;  %2579 = vst [vmem:[#allocation21_spill] sm:$0xff] %v2194_v17  ;;  %v2196_v18 = vpop.f32.mrb[7].mxu0  ;;  %v2198_v19 = vpop.f32.mrb[7].mxu1 }
 0x15f   : > { %2580 = vst [vmem:[#allocation22_spill] sm:$0xff] %v2196_v18  ;;  %2581 = vst [vmem:[#allocation23_spill] sm:$0xff] %v2198_v19 }
 0x173   : > { %v2200_v20 = vpop.f32.mrb[8].mxu0  ;;  %v2202_v21 = vpop.f32.mrb[8].mxu1 }
 0x174   : > { %v2204_v22 = vpop.f32.mrb[9].mxu0  ;;  %v2206_v23 = vpop.f32.mrb[9].mxu1 }
 0x175   : > { %v2208_v24 = vpop.f32.mrb[10].mxu0  ;;  %v2210_v25 = vpop.f32.mrb[10].mxu1 }
 0x176   : > { %2582 = vst [vmem:[#allocation24_spill] sm:$0xff] %v2208_v24  ;;  %2583 = vst [vmem:[#allocation25_spill] sm:$0xff] %v2210_v25  ;;  %v2212_v26 = vpop.f32.mrb[11].mxu0  ;;  %v2214_v27 = vpop.f32.mrb[11].mxu1 }
 0x177   : > { %2584 = vst [vmem:[#allocation26_spill] sm:$0xff] %v2212_v26  ;;  %2585 = vst [vmem:[#allocation27_spill] sm:$0xff] %v2214_v27 }
 0x179   : > { %878 = sbr.rel (!%p873_p5) target bundleno = 384 (0x180), region = 52 }
 0x17b   : > { %v2216_v28 = vpop.f32.mrb[12].mxu0  ;;  %v2218_v29 = vpop.f32.mrb[12].mxu1 }
 0x17c   : > { %2586 = vst [vmem:[#allocation28_spill] sm:$0xff] %v2216_v28  ;;  %2587 = vst [vmem:[#allocation29_spill] sm:$0xff] %v2218_v29  ;;  %v2220_v30 = vpop.f32.mrb[13].mxu0  ;;  %v2222_v31 = vpop.f32.mrb[13].mxu1 }
 0x17d   : > { %2588 = vst [vmem:[#allocation30_spill] sm:$0xff] %v2220_v30  ;;  %2589 = vst [vmem:[#allocation31_spill] sm:$0xff] %v2222_v31  ;;  %v2224_v32 = vpop.f32.mrb[14].mxu0  ;;  %v2226_v33 = vpop.f32.mrb[14].mxu1 }
 0x17e   : > { %2590 = vst [vmem:[#allocation32_spill] sm:$0xff] %v2224_v32  ;;  %2591 = vst [vmem:[#allocation33_spill] sm:$0xff] %v2226_v33  ;;  %v2228_v34 = vpop.f32.mrb[15].mxu0  ;;  %v2230_v35 = vpop.f32.mrb[15].mxu1 }
 0x17f   : > { %2592 = vst [vmem:[#allocation34_spill] sm:$0xff] %v2228_v34  ;;  %2593 = vst [vmem:[#allocation35_spill] sm:$0xff] %v2230_v35 }
 0x180 PF: > { %p1767_p8 = scmp.ne.s32.totalorder %s1978_s15, 0 }
 0x181   : > { %v885_v37 = vadd.f32 (!%p1767_p8), %v2176_v9, %v2168_v5  ;;  %v894_v38 = vadd.f32 (!%p1767_p8), %v2180_v11, %v2172_v7  ;;  %v903_v39 = vadd.f32 (!%p1767_p8), %v2178_v10, %v2170_v6  ;;  %v912_v40 = vadd.f32 (!%p1767_p8), %v2182_v0, %v2174_v8 }
 0x182   : > { %883 = sbr.rel (%p1767_p8) target bundleno = 451 (0x1c3), region = 56  ;;  %v921_v41 = vadd.f32 (!%p1767_p8), %v2208_v24, %v2200_v20  ;;  %v930_v42 = vadd.f32 (!%p1767_p8), %v2212_v26, %v2204_v22  ;;  %v939_v43 = vadd.f32 (!%p1767_p8), %v2210_v25, %v2202_v21  ;;  %v948_v44 = vadd.f32 (!%p1767_p8), %v2214_v27, %v2206_v23 }
 0x183   : > { %v886_v45 = vadd.f32 (!%p1767_p8), %v885_v37, %v2184_v12  ;;  %v895_v46 = vadd.f32 (!%p1767_p8), %v894_v38, %v2188_v14  ;;  %v904_v47 = vadd.f32 (!%p1767_p8), %v903_v39, %v2186_v13  ;;  %v913_v48 = vadd.f32 (!%p1767_p8), %v912_v40, %v2190_v15 }
 0x184   : > { %v922_v49 = vadd.f32 (!%p1767_p8), %v921_v41, %v2216_v28  ;;  %v931_v50 = vadd.f32 (!%p1767_p8), %v930_v42, %v2220_v30  ;;  %v940_v51 = vadd.f32 (!%p1767_p8), %v939_v43, %v2218_v29  ;;  %v949_v52 = vadd.f32 (!%p1767_p8), %v948_v44, %v2222_v31 }
 0x185   : > { %v887_v53 = vadd.f32 (!%p1767_p8), %v886_v45, %v2192_v16  ;;  %v896_v54 = vadd.f32 (!%p1767_p8), %v895_v46, %v2196_v18  ;;  %v905_v55 = vadd.f32 (!%p1767_p8), %v904_v47, %v2194_v17  ;;  %v914_v56 = vadd.f32 (!%p1767_p8), %v913_v48, %v2198_v19 }
 0x186   : > { %v923_v57 = vadd.f32 (!%p1767_p8), %v922_v49, %v2224_v32  ;;  %v932_v58 = vadd.f32 (!%p1767_p8), %v931_v50, %v2228_v34  ;;  %v941_v59 = vadd.f32 (!%p1767_p8), %v940_v51, %v2226_v33  ;;  %v950_v60 = vadd.f32 (!%p1767_p8), %v949_v52, %v2230_v35 }
 0x187   : > { %v888_v61 = vrot.slane (!%p1767_p8), %v887_v53, 4  ;;  %v897_v62 = vrot.slane (!%p1767_p8), %v896_v54, 4  ;;  %v906_v63 = vrot.slane (!%p1767_p8), %v905_v55, 4  ;;  %v915_v1 = vrot.slane (!%p1767_p8), %v914_v56, 4 }
 0x188   : > { %v924_v2 = vrot.slane (!%p1767_p8), %v923_v57, 4  ;;  %v933_v3 = vrot.slane (!%p1767_p8), %v932_v58, 4  ;;  %v942_v4 = vrot.slane (!%p1767_p8), %v941_v59, 4  ;;  %v951_v36 = vrot.slane (!%p1767_p8), %v950_v60, 4 }
 0x189   : > { %v889_v37 = vadd.f32 %v888_v61, %v887_v53  ;;  %v898_v38 = vadd.f32 %v897_v62, %v896_v54  ;;  %v907_v39 = vadd.f32 %v906_v63, %v905_v55  ;;  %v916_v40 = vadd.f32 %v915_v1, %v914_v56 }
 0x18a   : > { %v925_v41 = vadd.f32 %v924_v2, %v923_v57  ;;  %v934_v42 = vadd.f32 %v933_v3, %v932_v58  ;;  %v943_v43 = vadd.f32 %v942_v4, %v941_v59  ;;  %v952_v44 = vadd.f32 %v951_v36, %v950_v60 }
 0x18b   : > { %v890_v45 = vrot.slane %v889_v37, 2  ;;  %v899_v46 = vrot.slane %v898_v38, 2  ;;  %v908_v47 = vrot.slane %v907_v39, 2  ;;  %v917_v48 = vrot.slane %v916_v40, 2 }
 0x18c   : > { %v926_v49 = vrot.slane %v925_v41, 2  ;;  %v935_v50 = vrot.slane %v934_v42, 2  ;;  %v944_v51 = vrot.slane %v943_v43, 2  ;;  %v953_v52 = vrot.slane %v952_v44, 2 }
 0x18d   : > { %v891_v35 = vadd.f32 %v890_v45, %v889_v37  ;;  %v900_v33 = vadd.f32 %v899_v46, %v898_v38  ;;  %v909_v34 = vadd.f32 %v908_v47, %v907_v39  ;;  %v918_v32 = vadd.f32 %v917_v48, %v916_v40 }
 0x18e   : > { %v927_v53 = vadd.f32 %v926_v49, %v925_v41  ;;  %v936_v54 = vadd.f32 %v935_v50, %v934_v42  ;;  %v945_v55 = vadd.f32 %v944_v51, %v943_v43  ;;  %v954_v56 = vadd.f32 %v953_v52, %v952_v44 }
 0x18f   : > { %v892_v57 = vrot.slane %v891_v35, 1  ;;  %v901_v58 = vrot.slane %v900_v33, 1  ;;  %v910_v59 = vrot.slane %v909_v34, 1  ;;  %v919_v60 = vrot.slane %v918_v32, 1 }
 0x190   : > { %v928_v61 = vrot.slane %v927_v53, 1  ;;  %v937_v62 = vrot.slane %v936_v54, 1  ;;  %v946_v63 = vrot.slane %v945_v55, 1  ;;  %v955_v1 = vrot.slane %v954_v56, 1 }
 0x191   : > { %v893_v2 = vadd.f32 %v892_v57, %v891_v35  ;;  %v902_v3 = vadd.f32 %v901_v58, %v900_v33  ;;  %v911_v4 = vadd.f32 %v910_v59, %v909_v34  ;;  %v920_v36 = vadd.f32 %v919_v60, %v918_v32 }
 0x192   : > { %v929_v37 = vadd.f32 %v928_v61, %v927_v53  ;;  %v938_v38 = vadd.f32 %v937_v62, %v936_v54  ;;  %v947_v39 = vadd.f32 %v946_v63, %v945_v55  ;;  %v956_v40 = vadd.f32 %v955_v1, %v954_v56 }
 0x193   : > { %v965_v41 = vcombine.low %v893_v2, %v902_v3  ;;  %v966_v42 = vcombine.low %v911_v4, %v920_v36  ;;  %v972_v43 = vlaneseq  ;;  %v1995_v46 = vmov 1966171168  }
 0x194   : > { %v967_v44 = vcombine.low %v929_v37, %v938_v38  ;;  %v968_v45 = vcombine.low %v947_v39, %v956_v40  ;;  %v970_v47 = vunpack.c.l.s4 %v1995_v46  ;;  %v1018_v48 = vmul.f32 %v2168_v5, %v2168_v5 }
 0x195   : > { %v973_v49 = vshrl.u32 %v972_v43, 7  ;;  %v1019_v33 = vmul.f32 %v2172_v7, %v2172_v7  ;;  %v1020_v32 = vmul.f32 %v2170_v6, %v2170_v6  ;;  %v1021_v34 = vmul.f32 %v2174_v8, %v2174_v8 }
 0x196   : > { %v971_v35 = vunpack.c.0.s8 %v970_v47  ;;  %v1022_v50 = vmul.f32 %v2200_v20, %v2200_v20  ;;  %v1023_v51 = vmul.f32 %v2204_v22, %v2204_v22  ;;  %v1024_v52 = vmul.f32 %v2202_v21, %v2202_v21 }
 0x197   : > { %v1025_v53 = vmul.f32 %v2206_v23, %v2206_v23  ;;  %v1026_v54 = vmul.f32 %v2176_v9, %v2176_v9  ;;  %v1027_v55 = vmul.f32 %v2180_v11, %v2180_v11  ;;  %v1028_v56 = vmul.f32 %v2178_v10, %v2178_v10 }
 0x198   : > { %v2289_v57 = vsub.s32 %v971_v35, %v973_v49  ;;  %v1029_v58 = vmul.f32 %v2182_v0, %v2182_v0  ;;  %v1030_v59 = vmul.f32 %v2208_v24, %v2208_v24  ;;  %v1031_v60 = vmul.f32 %v2212_v26, %v2212_v26 }
 0x199   : > { %v1032_v61 = vmul.f32 %v2210_v25, %v2210_v25  ;;  %v1033_v62 = vmul.f32 %v2214_v27, %v2214_v27  ;;  %v1034_v63 = vmul.f32 %v2184_v12, %v2184_v12  ;;  %v1035_v1 = vmul.f32 %v2188_v14, %v2188_v14 }
 0x19a   : > { %v975_v2 = vrot.slane %v965_v41, %v2289_v57  ;;  %v982_v3 = vrot.slane %v966_v42, %v2289_v57  ;;  %v989_v4 = vrot.slane %v967_v44, %v2289_v57  ;;  %v996_v36 = vrot.slane %v968_v45, %v2289_v57 }
 0x19b   : > { %v1036_v37 = vmul.f32 %v2186_v13, %v2186_v13  ;;  %v1037_v38 = vmul.f32 %v2190_v15, %v2190_v15  ;;  %v1038_v39 = vmul.f32 %v2216_v28, %v2216_v28  ;;  %v1039_v40 = vmul.f32 %v2220_v30, %v2220_v30  ;;  %v2597_v30 = vld [vmem:[#allocation35_spill] sm:$0xff] }
 0x19c   : > { %v997_v43 = vcombine.low %v975_v2, %v982_v3  ;;  %v998_v41 = vcombine.low %v989_v4, %v996_v36  ;;  %v1040_v42 = vmul.f32 %v2218_v29, %v2218_v29  ;;  %v1041_v44 = vmul.f32 %v2222_v31, %v2222_v31  ;;  %v2594_v3 = vld [vmem:[#allocation32_spill] sm:$0xff]  ;;  %v2595_v36 = vld [vmem:[#allocation34_spill] sm:$0xff]  ;;  %v2596_v29 = vld [vmem:[#allocation33_spill] sm:$0xff] }
 0x19d   : > { %v1042_v45 = vmul.f32 %v2192_v16, %v2192_v16  ;;  %v1043_v46 = vmul.f32 %v2196_v18, %v2196_v18  ;;  %v1044_v47 = vmul.f32 %v2194_v17, %v2194_v17  ;;  %v1045_v49 = vmul.f32 %v2198_v19, %v2198_v19  ;;  %v884_v16 = vld [vmem:[#allocation2] sm:$0xff] }
 0x19e   : > { %v1005_v35 = vrot.slane %v997_v43, %v2289_v57  ;;  %v1012_v2 = vrot.slane %v998_v41, %v2289_v57  ;;  %v1046_v4 = vmul.f32 %v2594_v3, %v2594_v3  ;;  %v1047_v31 = vmul.f32 %v2595_v36, %v2595_v36 }
 0x19f   : > { %v1048_v18 = vmul.f32 %v2596_v29, %v2596_v29  ;;  %v1049_v17 = vmul.f32 %v2597_v30, %v2597_v30  ;;  %v1050_v28 = vadd.f32 %v1026_v54, %v1018_v48  ;;  %v1059_v15 = vadd.f32 %v1027_v55, %v1019_v33 }
 0x1a0   : > { %v1013_v19 = vcombine.low %v1005_v35, %v1012_v2  ;;  %v1068_v13 = vadd.f32 %v1028_v56, %v1020_v32  ;;  %v1077_v43 = vadd.f32 %v1029_v58, %v1021_v34  ;;  %v1086_v14 = vadd.f32 %v1030_v59, %v1022_v50 }
 0x1a1   : > { %v1051_v41 = vadd.f32 %v1050_v28, %v1034_v63  ;;  %v1060_v12 = vadd.f32 %v1059_v15, %v1035_v1  ;;  %v1095_v27 = vadd.f32 %v1031_v60, %v1023_v51  ;;  %v1104_v3 = vadd.f32 %v1032_v61, %v1024_v52 }
 0x1a2   : > { %v1015_v25 = vadd.f32 %v1013_v19, %v884_v16  ;;  %v1069_v26 = vadd.f32 %v1068_v13, %v1036_v37  ;;  %v1078_v36 = vadd.f32 %v1077_v43, %v1037_v38  ;;  %v1087_v24 = vadd.f32 %v1086_v14, %v1038_v39 }
 0x1a3   : > { %v1052_v0 = vadd.f32 %v1051_v41, %v1042_v45  ;;  %v1061_v10 = vadd.f32 %v1060_v12, %v1043_v46  ;;  %v1096_v29 = vadd.f32 %v1095_v27, %v1039_v40  ;;  %v1105_v11 = vadd.f32 %v1104_v3, %v1040_v42 }
 0x1a4   : > { %1016 = vst [vmem:[#allocation2] sm:$0xff] %v1015_v25  ;;  %v1070_v30 = vadd.f32 %v1069_v26, %v1044_v47  ;;  %v1079_v48 = vadd.f32 %v1078_v36, %v1045_v49  ;;  %v1088_v33 = vadd.f32 %v1087_v24, %v1046_v4  ;;  %v1113_v54 = vadd.f32 %v1033_v62, %v1025_v53 }
 0x1a5   : > { %v1053_v32 = vrot.slane %v1052_v0, 4  ;;  %v1062_v34 = vrot.slane %v1061_v10, 4  ;;  %v1097_v50 = vadd.f32 %v1096_v29, %v1047_v31  ;;  %v1106_v28 = vadd.f32 %v1105_v11, %v1048_v18 }
 0x1a6   : > { %v1071_v15 = vrot.slane %v1070_v30, 4  ;;  %v1080_v51 = vrot.slane %v1079_v48, 4  ;;  %v1089_v52 = vrot.slane %v1088_v33, 4  ;;  %v1114_v16 = vadd.f32 %v1113_v54, %v1041_v44 }
 0x1a7   : > { %v1054_v13 = vadd.f32 %v1053_v32, %v1052_v0  ;;  %v1063_v19 = vadd.f32 %v1062_v34, %v1061_v10  ;;  %v1098_v14 = vrot.slane %v1097_v50, 4  ;;  %v1107_v55 = vrot.slane %v1106_v28, 4 }
 0x1a8   : > { %v1072_v12 = vadd.f32 %v1071_v15, %v1070_v30  ;;  %v1081_v27 = vadd.f32 %v1080_v51, %v1079_v48  ;;  %v1090_v56 = vadd.f32 %v1089_v52, %v1088_v33  ;;  %v1115_v25 = vadd.f32 %v1114_v16, %v1049_v17 }
 0x1a9   : > { %v1055_v26 = vrot.slane %v1054_v13, 2  ;;  %v1064_v58 = vrot.slane %v1063_v19, 2  ;;  %v1099_v24 = vadd.f32 %v1098_v14, %v1097_v50  ;;  %v1108_v53 = vadd.f32 %v1107_v55, %v1106_v28  ;;  %v1017_v14 = vld [vmem:[#allocation3] sm:$0xff] }
 0x1aa   : > { %v1073_v59 = vrot.slane %v1072_v12, 2  ;;  %v1082_v60 = vrot.slane %v1081_v27, 2  ;;  %v1091_v31 = vrot.slane %v1090_v56, 2  ;;  %v1116_v11 = vrot.slane %v1115_v25, 4 }
 0x1ab   : > { %v1056_v18 = vadd.f32 %v1055_v26, %v1054_v13  ;;  %v1065_v61 = vadd.f32 %v1064_v58, %v1063_v19  ;;  %v1100_v62 = vrot.slane %v1099_v24, 2  ;;  %v1109_v63 = vrot.slane %v1108_v53, 2 }
 0x1ac   : > { %v1074_v0 = vadd.f32 %v1073_v59, %v1072_v12  ;;  %v1083_v10 = vadd.f32 %v1082_v60, %v1081_v27  ;;  %v1092_v1 = vadd.f32 %v1091_v31, %v1090_v56  ;;  %v1117_v37 = vadd.f32 %v1116_v11, %v1115_v25 }
 0x1ad   : > { %v1057_v38 = vrot.slane %v1056_v18, 1  ;;  %v1066_v39 = vrot.slane %v1065_v61, 1  ;;  %v1101_v40 = vadd.f32 %v1100_v62, %v1099_v24  ;;  %v1110_v17 = vadd.f32 %v1109_v63, %v1108_v53 }
 0x1ae   : > { %v1075_v42 = vrot.slane %v1074_v0, 1  ;;  %v1084_v44 = vrot.slane %v1083_v10, 1  ;;  %v1093_v45 = vrot.slane %v1092_v1, 1  ;;  %v1118_v46 = vrot.slane %v1117_v37, 2 }
 0x1af   : > { %v1058_v47 = vadd.f32 %v1057_v38, %v1056_v18  ;;  %v1067_v49 = vadd.f32 %v1066_v39, %v1065_v61  ;;  %v1102_v35 = vrot.slane %v1101_v40, 1  ;;  %v1111_v2 = vrot.slane %v1110_v17, 1 }
 0x1b0   : > { %v1076_v4 = vadd.f32 %v1075_v42, %v1074_v0  ;;  %v1085_v43 = vadd.f32 %v1084_v44, %v1083_v10  ;;  %v1094_v41 = vadd.f32 %v1093_v45, %v1092_v1  ;;  %v1119_v3 = vadd.f32 %v1118_v46, %v1117_v37 }
 0x1b1   : > { %v1103_v36 = vadd.f32 %v1102_v35, %v1101_v40  ;;  %v1130_v29 = vcombine.low %v1058_v47, %v1067_v49  ;;  %v1112_v30 = vadd.f32 %v1111_v2, %v1110_v17 }
 0x1b2   : > { %v1120_v48 = vrot.slane %v1119_v3, 1  ;;  %v1131_v33 = vcombine.low %v1076_v4, %v1085_v43 }
 0x1b3   : > { %v1132_v54 = vcombine.low %v1094_v41, %v1103_v36  ;;  %v1140_v32 = vrot.slane %v1130_v29, %v2289_v57 }
 0x1b4   : > { %v1121_v34 = vadd.f32 %v1120_v48, %v1119_v3  ;;  %v1147_v50 = vrot.slane %v1131_v33, %v2289_v57 }
 0x1b5   : > { %v1154_v15 = vrot.slane %v1132_v54, %v2289_v57 }
 0x1b6   : > { %v1133_v28 = vcombine.low %v1112_v30, %v1121_v34  ;;  %v1162_v51 = vcombine.low %v1140_v32, %v1147_v50 }
 0x1b8   : > { %v1161_v52 = vrot.slane %v1133_v28, %v2289_v57  ;;  %v1170_v13 = vrot.slane %v1162_v51, %v2289_v57 }
 0x1ba   : > { %v1163_v16 = vcombine.low %v1154_v15, %v1161_v52 }
 0x1bc   : > { %v1177_v19 = vrot.slane %v1163_v16, %v2289_v57 }
 0x1be   : > { %v1178_v55 = vcombine.low %v1170_v13, %v1177_v19 }
 0x1c0   : > { %v1180_v12 = vadd.f32 %v1178_v55, %v1017_v14 }
 0x1c2   : > { %1181 = vst [vmem:[#allocation3] sm:$0xff] %v1180_v12 }
 0x1c3 PF: > { %p1182_p6 = scmp.eq.s32.totalorder %s1978_s15, 1 }
 0x1c4   : > { %v1187_v27 = vld [vmem:[#allocation2] sm:$0x3] (%p1182_p6)  ;;  %v1189_v25 = vld [vmem:[#allocation2 + $0x2] sm:$0x3] (%p1182_p6)  ;;  %v1193_v24 = vld [vmem:[#allocation2 + $0x4] sm:$0x3] (%p1182_p6)  ;;  %v1214_v38 = vlaneseq (%p1182_p6) }
 0x1c5   : > { %1186 = sbr.rel (!%p1182_p6) target bundleno = 491 (0x1eb), region = 60  ;;  %v1190_v26 = vadd.f32 (%p1182_p6), %v1189_v25, %v1187_v27  ;;  %v1197_v60 = vld [vmem:[#allocation2 + $0x6] sm:$0x3] (%p1182_p6)  ;;  %v1209_v39 = vld [vmem:[#allocation8] sm:$0x3] (%p1182_p6) }
 0x1c6   : > { %vm1216_vm0 = vcmp.lt.s32.totalorder (%p1182_p6), %v1214_v38, 256  ;;  %v1211_v42 = vld [vmem:[#allocation10] sm:$0x3] (%p1182_p6) }
 0x1c7   : > { %v1194_v31 = vadd.f32 (%p1182_p6), %v1193_v24, %v1190_v26 }
 0x1c9   : > { %v1188_v56 = vld [vmem:[#allocation3] sm:$0x3] (%p1182_p6)  ;;  %v1191_v58 = vld [vmem:[#allocation3 + $0x2] sm:$0x3] (%p1182_p6)  ;;  %v1195_v53 = vld [vmem:[#allocation3 + $0x4] sm:$0x3] (%p1182_p6)  ;;  %v1198_v18 = vadd.f32 (%p1182_p6), %v1197_v60, %v1194_v31 }
 0x1ca   : > { %v1192_v59 = vadd.f32 (%p1182_p6), %v1191_v58, %v1188_v56  ;;  %v1199_v11 = vld [vmem:[#allocation3 + $0x6] sm:$0x3] (%p1182_p6) }
 0x1cb   : > { %v1202_v62 = vmul.f32 (%p1182_p6), 0.0078125, %v1198_v18 }
 0x1cc   : > { %v1196_v57 = vadd.f32 %v1195_v53, %v1192_v59 }
 0x1cd   : > { %v1204_v0 = vmul.f32 %v1202_v62, %v1202_v62 }
 0x1ce   : > { %v1200_v61 = vadd.f32 %v1199_v11, %v1196_v57 }
 0x1d0   : > { %v1203_v63 = vmul.f32 0.0078125, %v1200_v61 }
 0x1d2   : > { %v1205_v10 = vsub.f32 %v1203_v63, %v1204_v0 }
 0x1d4   : > { %v1206_v1 = vmax.f32 %v1205_v10, 0.0 }
 0x1d6   : > { %v1207_v37 = vadd.f32 1e-05, %v1206_v1 }
 0x1d8   : > { %1870 = vrsqrt.f32 %v1207_v37 }
 0x1e2   : > { %v1871_v40 = vpop.eup %1870 }
 0x1e3   : > { %v1210_v17 = vmul.f32 %v1871_v40, %v1209_v39 }
 0x1e5   : > { %1218 = vst.msk [vmem:[#allocation4] sm:$0x3] %vm1216_vm0, %v1210_v17  ;;  %1220 = vst.msk [vmem:[#allocation4 + $0x2] sm:$0x3] %vm1216_vm0, %v1210_v17  ;;  %v1212_v44 = vmul.f32 %v1210_v17, %v1202_v62 }
 0x1e6   : > { %1222 = vst.msk [vmem:[#allocation4 + $0x4] sm:$0x3] %vm1216_vm0, %v1210_v17  ;;  %1224 = vst.msk [vmem:[#allocation4 + $0x6] sm:$0x3] %vm1216_vm0, %v1210_v17 }
 0x1e7   : > { %v1213_v45 = vsub.f32 %v1211_v42, %v1212_v44 }
 0x1e9   : > { %1219 = vst.msk [vmem:[#allocation5] sm:$0x3] %vm1216_vm0, %v1213_v45  ;;  %1221 = vst.msk [vmem:[#allocation5 + $0x2] sm:$0x3] %vm1216_vm0, %v1213_v45 }
 0x1ea   : > { %1223 = vst.msk [vmem:[#allocation5 + $0x4] sm:$0x3] %vm1216_vm0, %v1213_v45  ;;  %1225 = vst.msk [vmem:[#allocation5 + $0x6] sm:$0x3] %vm1216_vm0, %v1213_v45 }
 0x1eb PF: > { %p1769_p9 = scmp.ne.s32.totalorder %s1978_s15, 1 }
 0x1ec   : > { %v1231_v46 = vlaneseq (!%p1769_p9)  ;;  %v2598_v39 = vld [vmem:[#allocation14_spill] sm:$0xff] (!%p1769_p9)  ;;  %v2599_v17 = vld [vmem:[#allocation13_spill] sm:$0xff] (!%p1769_p9) }
 0x1ed   : > { %1228 = sbr.rel (%p1769_p9) target bundleno = 551 (0x227), region = 64  ;;  %v1229_v49 = vld [vmem:[#allocation4] sm:$0xff] (!%p1769_p9) }
 0x1ee   : > { %v1232_v47 = vshrl.u32 (!%p1769_p9), %v1231_v46, 7  ;;  %v2600_v46 = vld [vmem:[#allocation15_spill] sm:$0xff] (!%p1769_p9) }
 0x1f0   : > { %v1233_v2 = vsub.s32 (!%p1769_p9), 0, %v1232_v47  ;;  %v1237_v4 = vsub.s32 (!%p1769_p9), 1, %v1232_v47  ;;  %v1241_v43 = vsub.s32 (!%p1769_p9), 2, %v1232_v47  ;;  %v1245_v41 = vsub.s32 (!%p1769_p9), 3, %v1232_v47 }
 0x1f1   : > { %v1303_v35 = vld [vmem:[#allocation5] sm:$0xff] (!%p1769_p9)  ;;  %v1249_v3 = vsub.s32 (!%p1769_p9), 4, %v1232_v47  ;;  %v1253_v36 = vsub.s32 (!%p1769_p9), 5, %v1232_v47  ;;  %v1257_v29 = vsub.s32 (!%p1769_p9), 6, %v1232_v47  ;;  %v1261_v30 = vsub.s32 (!%p1769_p9), 7, %v1232_v47 }
 0x1f2   : > { %v2347_v48 = vrot.slane (!%p1769_p9), %v1229_v49, %v1233_v2  ;;  %v2349_v33 = vrot.slane (!%p1769_p9), %v1229_v49, %v1237_v4  ;;  %v2351_v54 = vrot.slane (!%p1769_p9), %v1303_v35, %v1233_v2  ;;  %v2353_v32 = vrot.slane (!%p1769_p9), %v1303_v35, %v1237_v4 }
 0x1f3   : > { %v2355_v34 = vrot.slane (!%p1769_p9), %v1229_v49, %v1241_v43  ;;  %v2357_v50 = vrot.slane (!%p1769_p9), %v1229_v49, %v1245_v41  ;;  %v2359_v28 = vrot.slane (!%p1769_p9), %v1303_v35, %v1241_v43  ;;  %v2361_v15 = vrot.slane (!%p1769_p9), %v1303_v35, %v1245_v41 }
 0x1f4   : > { %v1271_v51 = vmul.f32 %v2347_v48, %v2168_v5  ;;  %v1272_v52 = vmul.f32 %v2349_v33, %v2172_v7  ;;  %v2367_v16 = vrot.slane %v1229_v49, %v1249_v3  ;;  %v2369_v13 = vrot.slane %v1229_v49, %v1253_v36 }
 0x1f5   : > { %v1273_v19 = vmul.f32 %v2355_v34, %v2170_v6  ;;  %v1274_v14 = vmul.f32 %v2357_v50, %v2174_v8  ;;  %v2375_v55 = vrot.slane %v1303_v35, %v1249_v3  ;;  %v2377_v12 = vrot.slane %v1303_v35, %v1253_v36 }
 0x1f6   : > { %v1345_v27 = vadd.f32 %v2351_v54, %v1271_v51  ;;  %v1346_v5 = vadd.f32 %v2353_v32, %v1272_v52  ;;  %v1275_v7 = vmul.f32 %v2367_v16, %v2200_v20  ;;  %v1276_v56 = vmul.f32 %v2369_v13, %v2204_v22 }
 0x1f7   : > { %v1347_v25 = vadd.f32 %v2359_v28, %v1273_v19  ;;  %v1348_v6 = vadd.f32 %v2361_v15, %v1274_v14  ;;  %v2387_v26 = vrot.slane %v1229_v49, %v1257_v29  ;;  %v2389_v8 = vrot.slane %v1229_v49, %v1261_v30 }
 0x1f8   : > { %vm1377_vm1 = vcmp.ge.f32.partialorder %v1345_v27, 0.0  ;;  %vm1378_vm2 = vcmp.ge.f32.partialorder %v1346_v5, 0.0  ;;  %v1409_v58 = vmul.f32 0.2, %v1345_v27  ;;  %v1410_v24 = vmul.f32 0.2, %v1346_v5 }
 0x1f9   : > { %vm1379_vm3 = vcmp.ge.f32.partialorder %v1347_v25, 0.0  ;;  %vm1380_vm4 = vcmp.ge.f32.partialorder %v1348_v6, 0.0  ;;  %v1411_v53 = vmul.f32 0.2, %v1347_v25  ;;  %v1412_v59 = vmul.f32 0.2, %v1348_v6 }
 0x1fa   : > { %v1441_v20 = vsel %vm1377_vm1, %v1345_v27, %v1409_v58  ;;  %v1442_v60 = vsel %vm1378_vm2, %v1346_v5, %v1410_v24  ;;  %v1349_v22 = vadd.f32 %v2375_v55, %v1275_v7  ;;  %v1350_v31 = vadd.f32 %v2377_v12, %v1276_v56  ;;  %v2601_v7 = vld [vmem:[#allocation24_spill] sm:$0xff]  ;;  %v2603_v24 = vld [vmem:[#allocation25_spill] sm:$0xff] }
 0x1fb   : > { %v1792_v11 = vpack.c.bf16 %v1442_v60, %v1441_v20  ;;  %v1443_v57 = vsel %vm1379_vm3, %v1347_v25, %v1411_v53  ;;  %v1444_v18 = vsel %vm1380_vm4, %v1348_v6, %v1412_v59  ;;  %v1277_v61 = vmul.f32 %v2387_v26, %v2202_v21  ;;  %v2602_v6 = vld [vmem:[#allocation26_spill] sm:$0xff]  ;;  %v2604_v59 = vld [vmem:[#allocation27_spill] sm:$0xff] }
 0x1fc   : > { %v1793_v62 = vpack.c.bf16 %v1444_v18, %v1443_v57  ;;  %vm1381_vm5 = vcmp.ge.f32.partialorder %v1349_v22, 0.0  ;;  %vm1382_vm6 = vcmp.ge.f32.partialorder %v1350_v31, 0.0  ;;  %v1413_v63 = vmul.f32 0.2, %v1349_v22  ;;  %v2606_v57 = vld [vmem:[#allocation18_spill] sm:$0xff] }
 0x1fd   : > { %1569 = vst [vmem:[%s2536_s4] sm:$0xff] %v1792_v11  ;;  %v1414_v0 = vmul.f32 0.2, %v1350_v31  ;;  %v1278_v10 = vmul.f32 %v2389_v8, %v2206_v23  ;;  %v2400_v1 = vrot.slane %v1303_v35, %v1257_v29  ;;  %v2402_v37 = vrot.slane %v1303_v35, %v1261_v30 }
 0x1fe   : > { %1570 = vst [vmem:[%s2536_s4 + $0x8] sm:$0xff] %v1793_v62  ;;  %v1445_v21 = vsel %vm1381_vm5, %v1349_v22, %v1413_v63  ;;  %v1279_v38 = vmul.f32 %v2347_v48, %v2176_v9  ;;  %v1280_v40 = vmul.f32 %v2349_v33, %v2598_v39  ;;  %v1281_v42 = vmul.f32 %v2355_v34, %v2599_v17 }
 0x1ff   : > { %v1446_v44 = vsel %vm1382_vm6, %v1350_v31, %v1414_v0  ;;  %v1351_v23 = vadd.f32 %v2400_v1, %v1277_v61  ;;  %v1352_v45 = vadd.f32 %v2402_v37, %v1278_v10  ;;  %v1282_v47 = vmul.f32 %v2357_v50, %v2600_v46  ;;  %v2605_v31 = vld [vmem:[#allocation16_spill] sm:$0xff] }
 0x200   : > { %v1794_v49 = vpack.c.bf16 %v1446_v44, %v1445_v21  ;;  %v1353_v35 = vadd.f32 %v2351_v54, %v1279_v38  ;;  %v1354_v2 = vadd.f32 %v2353_v32, %v1280_v40  ;;  %v1355_v9 = vadd.f32 %v2359_v28, %v1281_v42 }
 0x201   : > { %vm1383_vm7 = vcmp.ge.f32.partialorder %v1351_v23, 0.0  ;;  %vm1384_vm8 = vcmp.ge.f32.partialorder %v1352_v45, 0.0  ;;  %v1415_v4 = vmul.f32 0.2, %v1351_v23  ;;  %v1416_v43 = vmul.f32 0.2, %v1352_v45 }
 0x202   : > { %1571 = vst [vmem:[%s2536_s4 + $0x10] sm:$0xff] %v1794_v49  ;;  %vm1385_vm9 = vcmp.ge.f32.partialorder %v1353_v35, 0.0  ;;  %vm1386_vm10 = vcmp.ge.f32.partialorder %v1354_v2, 0.0  ;;  %v1417_v41 = vmul.f32 0.2, %v1353_v35  ;;  %v1356_v30 = vadd.f32 %v2361_v15, %v1282_v47 }
 0x203   : > { %v1418_v3 = vmul.f32 0.2, %v1354_v2  ;;  %v1447_v36 = vsel %vm1383_vm7, %v1351_v23, %v1415_v4  ;;  %v1448_v29 = vsel %vm1384_vm8, %v1352_v45, %v1416_v43  ;;  %vm1387_vm11 = vcmp.ge.f32.partialorder %v1355_v9, 0.0 }
 0x204   : > { %v1795_v51 = vpack.c.bf16 %v1448_v29, %v1447_v36  ;;  %v1449_v52 = vsel %vm1385_vm9, %v1353_v35, %v1417_v41  ;;  %v1419_v14 = vmul.f32 0.2, %v1355_v9  ;;  %vm1388_vm12 = vcmp.ge.f32.partialorder %v1356_v30, 0.0  ;;  %v2607_v35 = vld [vmem:[#allocation17_spill] sm:$0xff]  ;;  %v2608_v41 = vld [vmem:[#allocation19_spill] sm:$0xff] }
 0x205   : > { %v1450_v19 = vsel %vm1386_vm10, %v1354_v2, %v1418_v3  ;;  %v1420_v5 = vmul.f32 0.2, %v1356_v30  ;;  %v1283_v56 = vmul.f32 %v2367_v16, %v2601_v7  ;;  %v1284_v58 = vmul.f32 %v2369_v13, %v2602_v6  ;;  %v2612_v7 = vld [vmem:[#allocation31_spill] sm:$0xff] }
 0x206   : > { %v1796_v27 = vpack.c.bf16 %v1450_v19, %v1449_v52  ;;  %1572 = vst [vmem:[%s2536_s4 + $0x18] sm:$0xff] %v1795_v51  ;;  %v1451_v25 = vsel %vm1387_vm11, %v1355_v9, %v1419_v14  ;;  %v1285_v53 = vmul.f32 %v2387_v26, %v2603_v24  ;;  %v1286_v20 = vmul.f32 %v2389_v8, %v2604_v59  ;;  %v2610_v52 = vld [vmem:[#allocation30_spill] sm:$0xff] }
 0x207   : > { %v1452_v60 = vsel %vm1388_vm12, %v1356_v30, %v1420_v5  ;;  %v1357_v22 = vadd.f32 %v2375_v55, %v1283_v56  ;;  %v1287_v11 = vmul.f32 %v2347_v48, %v2605_v31  ;;  %v1288_v18 = vmul.f32 %v2349_v33, %v2606_v57  ;;  %v2609_v30 = vld [vmem:[#allocation28_spill] sm:$0xff] }
 0x208   : > { %1573 = vst [vmem:[%s2536_s4 + $0x20] sm:$0xff] %v1796_v27  ;;  %v1797_v61 = vpack.c.bf16 %v1452_v60, %v1451_v25  ;;  %v1358_v62 = vadd.f32 %v2377_v12, %v1284_v58  ;;  %v1359_v63 = vadd.f32 %v2400_v1, %v1285_v53  ;;  %v1360_v0 = vadd.f32 %v2402_v37, %v1286_v20  ;;  %v2611_v27 = vld [vmem:[#allocation29_spill] sm:$0xff]  ;;  %v2613_v25 = vld [vmem:[#allocation20_spill] sm:$0xff] }
 0x209   : > { %vm1389_vm13 = vcmp.ge.f32.partialorder %v1357_v22, 0.0  ;;  %v1421_v10 = vmul.f32 0.2, %v1357_v22  ;;  %v1361_v21 = vadd.f32 %v2351_v54, %v1287_v11  ;;  %v1362_v38 = vadd.f32 %v2353_v32, %v1288_v18 }
 0x20a   : > { %1574 = vst [vmem:[%s2536_s4 + $0x28] sm:$0xff] %v1797_v61  ;;  %vm1390_vm14 = vcmp.ge.f32.partialorder %v1358_v62, 0.0  ;;  %v1422_v39 = vmul.f32 0.2, %v1358_v62  ;;  %vm1391_vm15 = vcmp.ge.f32.partialorder %v1359_v63, 0.0  ;;  %vm1392_vm0 = vcmp.ge.f32.partialorder %v1360_v0, 0.0 }
 0x20b   : > { %v1453_v40 = vsel %vm1389_vm13, %v1357_v22, %v1421_v10  ;;  %v1423_v17 = vmul.f32 0.2, %v1359_v63  ;;  %v1424_v42 = vmul.f32 0.2, %v1360_v0  ;;  %vm1393_vm1 = vcmp.ge.f32.partialorder %v1361_v21, 0.0 }
 0x20c   : > { %v1454_v44 = vsel %vm1390_vm14, %v1358_v62, %v1422_v39  ;;  %vm1394_vm2 = vcmp.ge.f32.partialorder %v1362_v38, 0.0  ;;  %v1425_v23 = vmul.f32 0.2, %v1361_v21  ;;  %v1426_v45 = vmul.f32 0.2, %v1362_v38 }
 0x20d   : > { %v1798_v46 = vpack.c.bf16 %v1454_v44, %v1453_v40  ;;  %v1455_v47 = vsel %vm1391_vm15, %v1359_v63, %v1423_v17  ;;  %v1456_v49 = vsel %vm1392_vm0, %v1360_v0, %v1424_v42  ;;  %v1289_v2 = vmul.f32 %v2355_v34, %v2607_v35  ;;  %v2614_v0 = vld [vmem:[#allocation22_spill] sm:$0xff]  ;;  %v2616_v44 = vld [vmem:[#allocation23_spill] sm:$0xff] }
 0x20e   : > { %v1799_v9 = vpack.c.bf16 %v1456_v49, %v1455_v47  ;;  %v1457_v4 = vsel %vm1393_vm1, %v1361_v21, %v1425_v23  ;;  %v1458_v43 = vsel %vm1394_vm2, %v1362_v38, %v1426_v45  ;;  %v1290_v3 = vmul.f32 %v2357_v50, %v2608_v41  ;;  %v2615_v38 = vld [vmem:[#allocation21_spill] sm:$0xff]  ;;  %v2617_v47 = vld [vmem:[#allocation32_spill] sm:$0xff]  ;;  %v2618_v35 = vld [vmem:[#allocation34_spill] sm:$0xff] }
 0x20f   : > { %1575 = vst [vmem:[%s2536_s4 + $0x30] sm:$0xff] %v1798_v46  ;;  %v1800_v36 = vpack.c.bf16 %v1458_v43, %v1457_v4  ;;  %v1363_v29 = vadd.f32 %v2359_v28, %v1289_v2  ;;  %v1291_v51 = vmul.f32 %v2367_v16, %v2609_v30  ;;  %v1292_v19 = vmul.f32 %v2369_v13, %v2610_v52 }
 0x210   : > { %1576 = vst [vmem:[%s2536_s4 + $0x38] sm:$0xff] %v1799_v9  ;;  %v1364_v14 = vadd.f32 %v2361_v15, %v1290_v3  ;;  %v1293_v5 = vmul.f32 %v2387_v26, %v2611_v27  ;;  %v1294_v56 = vmul.f32 %v2389_v8, %v2612_v7  ;;  %v1295_v6 = vmul.f32 %v2347_v48, %v2613_v25  ;;  %v2619_v9 = vld [vmem:[#allocation33_spill] sm:$0xff] }
 0x211   : > { %1577 = vst [vmem:[%s2536_s4 + $0x40] sm:$0xff] %v1800_v36  ;;  %vm1395_vm3 = vcmp.ge.f32.partialorder %v1363_v29, 0.0  ;;  %v1427_v58 = vmul.f32 0.2, %v1363_v29  ;;  %v1365_v24 = vadd.f32 %v2375_v55, %v1291_v51  ;;  %v1366_v53 = vadd.f32 %v2377_v12, %v1292_v19 }
 0x212   : > { %vm1396_vm4 = vcmp.ge.f32.partialorder %v1364_v14, 0.0  ;;  %v1428_v59 = vmul.f32 0.2, %v1364_v14  ;;  %v1367_v20 = vadd.f32 %v2400_v1, %v1293_v5  ;;  %v1368_v60 = vadd.f32 %v2402_v37, %v1294_v56 }
 0x213   : > { %v1459_v22 = vsel %vm1395_vm3, %v1363_v29, %v1427_v58  ;;  %vm1397_vm5 = vcmp.ge.f32.partialorder %v1365_v24, 0.0  ;;  %vm1398_vm6 = vcmp.ge.f32.partialorder %v1366_v53, 0.0  ;;  %v1429_v48 = vmul.f32 0.2, %v1365_v24 }
 0x214   : > { %v1460_v31 = vsel %vm1396_vm4, %v1364_v14, %v1428_v59  ;;  %v1430_v11 = vmul.f32 0.2, %v1366_v53  ;;  %vm1399_vm7 = vcmp.ge.f32.partialorder %v1367_v20, 0.0  ;;  %vm1400_vm8 = vcmp.ge.f32.partialorder %v1368_v60, 0.0 }
 0x215   : > { %v1801_v57 = vpack.c.bf16 %v1460_v31, %v1459_v22  ;;  %v1461_v18 = vsel %vm1397_vm5, %v1365_v24, %v1429_v48  ;;  %v1431_v61 = vmul.f32 0.2, %v1367_v20  ;;  %v1432_v62 = vmul.f32 0.2, %v1368_v60 }
 0x216   : > { %v1462_v63 = vsel %vm1398_vm6, %v1366_v53, %v1430_v11  ;;  %v1296_v10 = vmul.f32 %v2349_v33, %v2614_v0  ;;  %v1369_v21 = vadd.f32 %v2351_v54, %v1295_v6  ;;  %v1297_v39 = vmul.f32 %v2355_v34, %v2615_v38 }
 0x217   : > { %1578 = vst [vmem:[%s2536_s4 + $0x48] sm:$0xff] %v1801_v57  ;;  %v1802_v40 = vpack.c.bf16 %v1462_v63, %v1461_v18  ;;  %v1463_v17 = vsel %vm1399_vm7, %v1367_v20, %v1431_v61  ;;  %v1464_v42 = vsel %vm1400_vm8, %v1368_v60, %v1432_v62  ;;  %v1298_v23 = vmul.f32 %v2357_v50, %v2616_v44 }
 0x218   : > { %v1803_v45 = vpack.c.bf16 %v1464_v42, %v1463_v17  ;;  %v1370_v46 = vadd.f32 %v2353_v32, %v1296_v10  ;;  %vm1401_vm9 = vcmp.ge.f32.partialorder %v1369_v21, 0.0  ;;  %v1433_v33 = vmul.f32 0.2, %v1369_v21 }
 0x219   : > { %1579 = vst [vmem:[%s2536_s4 + $0x50] sm:$0xff] %v1802_v40  ;;  %v1371_v54 = vadd.f32 %v2359_v28, %v1297_v39  ;;  %v1372_v34 = vadd.f32 %v2361_v15, %v1298_v23  ;;  %v1299_v49 = vmul.f32 %v2367_v16, %v2617_v47  ;;  %v1300_v2 = vmul.f32 %v2369_v13, %v2618_v35  ;;  %v2620_v13 = vld [vmem:[#allocation35_spill] sm:$0xff] }
 0x21a   : > { %1580 = vst [vmem:[%s2536_s4 + $0x58] sm:$0xff] %v1803_v45  ;;  %vm1402_vm10 = vcmp.ge.f32.partialorder %v1370_v46, 0.0  ;;  %v1434_v32 = vmul.f32 0.2, %v1370_v46  ;;  %v1465_v50 = vsel %vm1401_vm9, %v1369_v21, %v1433_v33  ;;  %v1301_v4 = vmul.f32 %v2387_v26, %v2619_v9 }
 0x21b   : > { %vm1403_vm11 = vcmp.ge.f32.partialorder %v1371_v54, 0.0  ;;  %vm1404_vm12 = vcmp.ge.f32.partialorder %v1372_v34, 0.0  ;;  %v1435_v28 = vmul.f32 0.2, %v1371_v54  ;;  %v1436_v15 = vmul.f32 0.2, %v1372_v34 }
 0x21c   : > { %v1466_v43 = vsel %vm1402_vm10, %v1370_v46, %v1434_v32  ;;  %v1373_v16 = vadd.f32 %v2375_v55, %v1299_v49  ;;  %v1374_v41 = vadd.f32 %v2377_v12, %v1300_v2  ;;  %v1302_v3 = vmul.f32 %v2389_v8, %v2620_v13 }
 0x21d   : > { %v1804_v36 = vpack.c.bf16 %v1466_v43, %v1465_v50  ;;  %v1467_v29 = vsel %vm1403_vm11, %v1371_v54, %v1435_v28  ;;  %v1468_v30 = vsel %vm1404_vm12, %v1372_v34, %v1436_v15  ;;  %v1375_v51 = vadd.f32 %v2400_v1, %v1301_v4 }
 0x21e   : > { %v1805_v52 = vpack.c.bf16 %v1468_v30, %v1467_v29  ;;  %vm1405_vm13 = vcmp.ge.f32.partialorder %v1373_v16, 0.0  ;;  %vm1406_vm14 = vcmp.ge.f32.partialorder %v1374_v41, 0.0  ;;  %v1437_v26 = vmul.f32 0.2, %v1373_v16 }
 0x21f   : > { %1581 = vst [vmem:[%s2536_s4 + $0x60] sm:$0xff] %v1804_v36  ;;  %v1438_v19 = vmul.f32 0.2, %v1374_v41  ;;  %v1376_v55 = vadd.f32 %v2402_v37, %v1302_v3  ;;  %vm1407_vm15 = vcmp.ge.f32.partialorder %v1375_v51, 0.0  ;;  %v1439_v12 = vmul.f32 0.2, %v1375_v51 }
 0x220   : > { %1582 = vst [vmem:[%s2536_s4 + $0x68] sm:$0xff] %v1805_v52  ;;  %v1469_v8 = vsel %vm1405_vm13, %v1373_v16, %v1437_v26 }
 0x221   : > { %v1470_v14 = vsel %vm1406_vm14, %v1374_v41, %v1438_v19  ;;  %vm1408_vm0 = vcmp.ge.f32.partialorder %v1376_v55, 0.0  ;;  %v1440_v1 = vmul.f32 0.2, %v1376_v55  ;;  %v1471_v27 = vsel %vm1407_vm15, %v1375_v51, %v1439_v12 }
 0x222   : > { %v1806_v5 = vpack.c.bf16 %v1470_v14, %v1469_v8 }
 0x223   : > { %v1472_v7 = vsel %vm1408_vm0, %v1376_v55, %v1440_v1 }
 0x224   : > { %1583 = vst [vmem:[%s2536_s4 + $0x70] sm:$0xff] %v1806_v5  ;;  %v1807_v56 = vpack.c.bf16 %v1472_v7, %v1471_v27 }
 0x226   : > { %1584 = vst [vmem:[%s2536_s4 + $0x78] sm:$0xff] %v1807_v56 }
 0x227 PF: > { %s16_s17 = sadd.s32 1, %s1986_s17   ;;  %s2621_s15 = smov %s1982_s16 }
 0x228   : > { %p13_p10 = scmp.ge.s32.totalorder %s16_s17, 4   ;;  %s2622_s16 = smov %s2624_s23 }
 0x22a   :  { %15 = sbr.rel (!%p13_p10) target bundleno = 3 (0x3), region = 95 }
 0x231   :  { %1612 = vsyncpa [#allocation7], 1 }
 0x232   :  { %1614 = vsyncpa [#allocation7 + $0x1], 1 }
 0x233   :  { %1615 = vsyncpa [#allocation9], 1 }

// kernel: generator_forward.6
= control target key start
LH: loop header
LB: loop body
LE: loop exit
PB: predicated region body
PF: predicated region fallthrough
CT: control target
= control target key end

     0   :  { %9 = vsyncpa [#allocation7], 0  ;;  %s2881_s0 = inlined_call_operand.vmem [shape: bf16[512,128], index: 0, kind: input, shape index: {}]   ;;  %s2882_s1 = inlined_call_operand.hbm [shape: bf16[128,256], index: 1, kind: input, shape index: {}]   ;;  %s2883_s2 = inlined_call_operand.hbm [shape: f32[1,64], index: 2, kind: input, shape index: {}]   ;;  %s2884_s3 = inlined_call_operand.hbm [shape: f32[1,64], index: 3, kind: input, shape index: {}]   ;;  %s2885_s4 = inlined_call_operand.vmem [shape: bf16[512,256], index: 4, kind: output, shape index: {}]  }
   0x1   :  { %10 = vsyncpa [#allocation9], 0  ;;  %s2111_s15 = smov 0   ;;  %s2113_s16 = smov 0  }
   0x2   :  { %s2115_s17 = smov 0   ;;  %s2117_s18 = smov 0  }
   0x3   :  { %s2119_s19 = smov 0  }
   0x4 LB: > { %s2077_s20 = smov [#allocation8]   ;;  %s1693_s22 = sadd.s32 4294967295, %s2075_s19   ;;  %s2075_s19 = sphi %s2119_s19, %s16_s19   ;;  %s2071_s18 = sphi %s2117_s18, %s3030_s18   ;;  %s2067_s17 = sphi %s2115_s17, %s3029_s17   ;;  %s2063_s16 = sphi %s2113_s16, %s3028_s16   ;;  %s2059_s15 = sphi %s2111_s15, %s3027_s15  }
   0x5   : > { %s176_s21 = sshll.u32 %s2077_s20, 4  ;;  %p1695_p0 = scmp.ge.s32.totalorder %s2075_s19, 1  ;;  %s177_s21 = int_to_ptr.vmem [resolvable:$true] %s176_s21 }
   0x6   : > { %p150_p1 = scmp.lt.s32.totalorder %s2075_s19, 5  ;;  %p2139_p2 = scmp.eq.s32.totalorder %s1693_s22, 0 }
   0x7   : > { %s25_s26 = sadd.s32 1, %s2067_s17  ;;  %s1945_s30 = scalar_lea.hbm %s2883_s2, 16 }
   0x8   : > { %s2928_s23 = scalar_select %p2139_p2, 1, 0 }
   0x9   : > { %p2143_p3 = pnand %p1695_p0, %p150_p1  ;;  %p2156_p6 = scmp.ge.s32.totalorder %s25_s26, 2 }
   0xa   : > { %p1946_p7 = scmp.ne.s32.totalorder %s2883_s2, %s1945_s30  ;;  %p1952_p11 = scmp.lt.u32.totalorder %s1945_s30, %s2883_s2 }
   0xb   : > { %s2929_s24 = scalar_select %p2143_p3, 1, 0 }
   0xc   : > { %p1838_p4 = pneg %p2143_p3 }
   0xd   : > { %s2931_s27 = scalar_select %p2156_p6, 1, 0 }
   0xe   : > { %p2151_p5 = pnand %p2139_p2, %p1838_p4 }
  0x10   : > { %p2168_p8 = pneg %p2151_p5 }
  0x12   : > { %p1948_p9 = pnand %p2168_p8, %p1946_p7 }
  0x14   : > { %p1949_p10 = pneg %p1948_p9 }
  0x16   : > { %p1954_p12 = pnand %p1952_p11, %p1949_p10 }
  0x18   : > { %1957 = shalt.err (!%p1954_p12)
}
  0x19   : > { %s1958_s10 = scalar_lea.vmem %s177_s21, 16  ;;  %s1965_s11 = scalar_lea.vmem %s177_s21, 32 }
  0x1a   : > { %p1959_p13 = scmp.ne.s32.totalorder %s177_s21, %s1958_s10  ;;  %p1966_p4 = scmp.lt.s32.totalorder %s177_s21, %s177_s21 }
  0x1b   : > { %p1967_p2 = scmp.lt.s32.totalorder %s1965_s11, %s1958_s10 }
  0x1c   : > { %p1961_p0 = pnand %p1959_p13, %p2168_p8 }
  0x1d   : > { %p1968_p3 = por %p1967_p2, %p1966_p4 }
  0x1e   : > { %p1962_p1 = pneg %p1961_p0 }
  0x20   : > { %p1969_p6 = pnand %p1968_p3, %p1962_p1 }
  0x22   : > { %1972 = shalt.err (!%p1969_p6)
}
  0x23   : > { %1844 = dma.hbm_to_vmem [thread:$0]  (!%p2151_p5), %s2883_s2, 16, %s177_s21, [#allocation9]  }
  0x24   : > { %p2933_p7 = scmp.ne.s32.totalorder %s2931_s27, 0  ;;  %s28_s14 = sadd.s32 1, %s2071_s18 }
  0x25   : > { %s2078_s20 = smov [#allocation6]   ;;  %s1973_s30 = scalar_lea.hbm %s2882_s1, 2048 }
  0x26   : > { %s3032_s26 = smov (%p2933_p7, %s25_s26), 0  ;;  %s3034_s14 = smov (!%p2933_p7, %s28_s14), %s2071_s18 }
  0x27   : > { %s162_s22 = sshll.u32 %s2078_s20, 4  ;;  %p30_p2 = scmp.ge.s32.totalorder %s3034_s14, 2  ;;  %s163_s22 = int_to_ptr.vmem [resolvable:$true] %s162_s22 }
  0x28   : > { %p1974_p3 = scmp.ne.s32.totalorder %s2882_s1, %s1973_s30  ;;  %p1980_p10 = scmp.lt.u32.totalorder %s1973_s30, %s2882_s1 }
  0x29   : > { %s3036_s14 = smov (%p30_p2, %s3034_s14), 0 }
  0x2a   : > { %p1976_p6 = pnand %p1974_p3, %p2168_p8 }
  0x2c   : > { %p1977_p9 = pneg %p1976_p6 }
  0x2e   : > { %p1982_p11 = pnand %p1980_p10, %p1977_p9 }
  0x30   : > { %1985 = shalt.err (!%p1982_p11)
}
  0x31   : > { %s1986_s8 = scalar_lea.vmem %s163_s22, 2048  ;;  %p1994_p1 = scmp.lt.s32.totalorder %s163_s22, %s163_s22 }
  0x32   : > { %p1987_p12 = scmp.ne.s32.totalorder %s163_s22, %s1986_s8  ;;  %p1995_p4 = scmp.lt.s32.totalorder %s1986_s8, %s1986_s8 }
  0x34   : > { %p1989_p13 = pnand %p1987_p12, %p2168_p8  ;;  %p1996_p7 = por %p1995_p4, %p1994_p1 }
  0x36   : > { %p1990_p0 = pneg %p1989_p13 }
  0x38   : > { %p1997_p2 = pnand %p1996_p7, %p1990_p0 }
  0x3a   : > { %2000 = shalt.err (!%p1997_p2)
}
  0x3b   : > { %s2079_s9 = smov 128   ;;  %s2080_s10 = smov 8  }
  0x3c   : > { %1841 = dma.hbm_to_vmem [thread:$0]  (!%p2151_p5), %s2882_s1, 2048, %s163_s22, [#allocation7], %s2079_s9, %s2079_s9, %s2080_s10  }
  0x3d   : > { %s2081_s13 = smov [#allocation10]   ;;  %s2001_s30 = scalar_lea.hbm %s2884_s3, 16 }
  0x3e   : > { %s187_s20 = sshll.u32 %s2081_s13, 4  ;;  %p2002_p3 = scmp.ne.s32.totalorder %s2884_s3, %s2001_s30  ;;  %s188_s20 = int_to_ptr.vmem [resolvable:$true] %s187_s20 }
  0x3f   : > { %p2008_p10 = scmp.lt.u32.totalorder %s2001_s30, %s2884_s3 }
  0x40   : > { %p2004_p6 = pnand %p2002_p3, %p2168_p8 }
  0x42   : > { %p2005_p9 = pneg %p2004_p6 }
  0x44   : > { %p2010_p11 = pnand %p2008_p10, %p2005_p9 }
  0x46   : > { %2013 = shalt.err (!%p2010_p11)
}
  0x47   : > { %s2014_s22 = scalar_lea.vmem %s188_s20, 16  ;;  %s2021_s8 = scalar_lea.vmem %s188_s20, 32 }
  0x48   : > { %p2015_p12 = scmp.ne.s32.totalorder %s188_s20, %s2014_s22  ;;  %p2022_p1 = scmp.lt.s32.totalorder %s188_s20, %s188_s20 }
  0x49   : > { %p2023_p4 = scmp.lt.s32.totalorder %s2021_s8, %s2014_s22 }
  0x4a   : > { %p2017_p13 = pnand %p2015_p12, %p2168_p8 }
  0x4b   : > { %p2024_p7 = por %p2023_p4, %p2022_p1 }
  0x4c   : > { %p2018_p0 = pneg %p2017_p13 }
  0x4e   : > { %p2025_p2 = pnand %p2024_p7, %p2018_p0 }
  0x50   : > { %2028 = shalt.err (!%p2025_p2)
}
  0x51   : > { %1847 = dma.hbm_to_vmem [thread:$0]  (!%p2151_p5), %s2884_s3, 16, %s188_s20, [#allocation9]  }
  0x52   : > { %p2934_p3 = scmp.ne.s32.totalorder %s2929_s24, 0 }
  0x54   : > { %209 = sbr.rel (%p2934_p3) target bundleno = 879 (0x36f), region = 36 }
  0x5b   : > { %p2935_p6 = scmp.ne.s32.totalorder %s2928_s23, 0 }
  0x5d   : > { %2050 = dma.done.wait (%p2935_p6), [#allocation7], 2048  }
  0x5e   : > { %2052 = vsyncadd (%p2935_p6), [#allocation7], 4294965248 }
  0x5f   : > { %2054 = dma.done.wait (%p2935_p6), [#allocation9], 32  }
  0x60   : > { %2056 = vsyncadd (%p2935_p6), [#allocation9], 4294967264  ;;  %s251_s25 = smul.u32 %s2059_s15, %s2063_s16  ;;  %v2082_v0 = vmov 0   ;;  %s1704_s24 = sshll.u32 %s2059_s15, 5  ;;  %v1903_v1 = vld [vmem:[#allocation6 + $0x4] ss:$8 sps:$4 sm:$0xff]  }
  0x61   : > { %517 = vmatprep.mubr.bf16.mxu0 %v2082_v0  ;;  %597 = vmatprep.mubr.bf16.mxu1 %v2082_v0  ;;  %p246_p8 = scmp.lt.s32.totalorder %s1704_s24, 63  ;;  %v1905_v2 = vld [vmem:[#allocation6] ss:$8 sps:$4 sm:$0xff]   ;;  %v1906_v3 = vld [vmem:[#allocation6 + $0x14] ss:$8 sps:$4 sm:$0xff]   ;;  %p678_p9 = scmp.eq.s32.totalorder %s2063_s16, 0 }
  0x62   : > { %s1706_s7 = sshll.u32 %s251_s25, 5  ;;  %485 = vmatprep.subr.bf16.mxu0 %v1903_v1  ;;  %1810 = vmatprep.subr.bf16.mxu1 %v1903_v1  ;;  %v1908_v4 = vld [vmem:[#allocation6 + $0x10] ss:$8 sps:$4 sm:$0xff]   ;;  %v1909_v5 = vld [vmem:[#allocation6 + $0x24] ss:$8 sps:$4 sm:$0xff]   ;;  %p679_p10 = scmp.eq.s32.totalorder %s2059_s15, 0 }
  0x63   : > { %p253_p5 = scmp.lt.s32.totalorder %s1706_s7, 63  ;;  %s3040_s24 = smov (!%p246_p8, %s1704_s24), 63  ;;  %486 = vmatpush1.bf16.msra.mxu0 %v1905_v2  ;;  %1818 = vmatpush1.bf16.msra.mxu1 %v1905_v2  ;;  %v1911_v6 = vld [vmem:[#allocation6 + $0x20] ss:$8 sps:$4 sm:$0xff]   ;;  %v1912_v7 = vld [vmem:[#allocation6 + $0x34] ss:$8 sps:$4 sm:$0xff]  }
  0x64   : > { %487 = vmatprep.subr.bf16.mxu0 %v1906_v3  ;;  %1811 = vmatprep.subr.bf16.mxu1 %v1906_v3  ;;  %s1705_s20 = sshll.u32 %s3040_s24, 2  ;;  %v1914_v8 = vld [vmem:[#allocation6 + $0x30] ss:$8 sps:$4 sm:$0xff]   ;;  %v1915_v9 = vld [vmem:[#allocation6 + $0x44] ss:$8 sps:$4 sm:$0xff]   ;;  %p2289_p11 = pnand %p679_p10, %p678_p9 }
  0x65   : > { %s3038_s7 = smov (!%p253_p5, %s1706_s7), 63  ;;  %s2253_s30 = scalar_lea.vmem %s2881_s0, %s1705_s20  ;;  %v1917_v10 = vld [vmem:[#allocation6 + $0x40] ss:$8 sps:$4 sm:$0xff]   ;;  %v1918_v11 = vld [vmem:[#allocation6 + $0x54] ss:$8 sps:$4 sm:$0xff]  }
  0x66   : > { %s1777_s11 = sshll.u32 %s3038_s7, 3  ;;  %v1920_v12 = vld [vmem:[#allocation6 + $0x50] ss:$8 sps:$4 sm:$0xff]   ;;  %v1921_v13 = vld [vmem:[#allocation6 + $0x64] ss:$8 sps:$4 sm:$0xff]  }
  0x67   : > { %s2248_s23 = scalar_lea.vmem %s2885_s4, %s1777_s11  ;;  %488 = vmatpush1.bf16.msra.mxu0 %v1908_v4  ;;  %1819 = vmatpush1.bf16.msra.mxu1 %v1908_v4  ;;  %v1923_v14 = vld [vmem:[#allocation6 + $0x60] ss:$8 sps:$4 sm:$0xff]   ;;  %v1924_v15 = vld [vmem:[#allocation6 + $0x74] ss:$8 sps:$4 sm:$0xff]   ;;  %v1926_v16 = vld [vmem:[#allocation6 + $0x70] ss:$8 sps:$4 sm:$0xff]  }
  0x68   : > { %489 = vmatprep.subr.bf16.mxu0 %v1909_v5  ;;  %1812 = vmatprep.subr.bf16.mxu1 %v1909_v5  ;;  %v1927_v17 = vld [vmem:[%s2253_s30] sm:$0xff]   ;;  %v1929_v19 = vld [vmem:[%s2253_s30 + $0x8] sm:$0xff]   ;;  %v1931_v21 = vld [vmem:[%s2253_s30 + $0x10] sm:$0xff]  }
  0x69   : > { %v1928_v18 = vld [vmem:[%s2253_s30 + $0x40] sm:$0xff]   ;;  %v1930_v20 = vld [vmem:[%s2253_s30 + $0x48] sm:$0xff]   ;;  %v1932_v22 = vld [vmem:[%s2253_s30 + $0x50] sm:$0xff]  }
  0x6a   : > { %v1933_v23 = vld [vmem:[%s2253_s30 + $0x18] sm:$0xff]   ;;  %v1935_v25 = vld [vmem:[%s2253_s30 + $0x20] sm:$0xff]   ;;  %v1937_v27 = vld [vmem:[%s2253_s30 + $0x28] sm:$0xff]  }
  0x6b   : > { %490 = vmatpush1.bf16.msra.mxu0 %v1911_v6  ;;  %1820 = vmatpush1.bf16.msra.mxu1 %v1911_v6  ;;  %v1934_v24 = vld [vmem:[%s2253_s30 + $0x58] sm:$0xff]   ;;  %v1936_v26 = vld [vmem:[%s2253_s30 + $0x60] sm:$0xff]   ;;  %v1938_v28 = vld [vmem:[%s2253_s30 + $0x68] sm:$0xff]  }
  0x6c   : > { %491 = vmatprep.subr.bf16.mxu0 %v1912_v7  ;;  %1813 = vmatprep.subr.bf16.mxu1 %v1912_v7  ;;  %v1939_v29 = vld [vmem:[%s2253_s30 + $0x30] sm:$0xff]   ;;  %v1941_v31 = vld [vmem:[%s2253_s30 + $0x38] sm:$0xff]  }
  0x6d   : > { %v1940_v30 = vld [vmem:[%s2253_s30 + $0x70] sm:$0xff]   ;;  %v1942_v32 = vld [vmem:[%s2253_s30 + $0x78] sm:$0xff]  }
  0x6f   : > { %492 = vmatpush1.bf16.msra.mxu0 %v1914_v8  ;;  %1821 = vmatpush1.bf16.msra.mxu1 %v1914_v8 }
  0x70   : > { %493 = vmatprep.subr.bf16.mxu0 %v1915_v9  ;;  %1814 = vmatprep.subr.bf16.mxu1 %v1915_v9 }
  0x73   : > { %494 = vmatpush1.bf16.msra.mxu0 %v1917_v10  ;;  %1822 = vmatpush1.bf16.msra.mxu1 %v1917_v10 }
  0x74   : > { %495 = vmatprep.subr.bf16.mxu0 %v1918_v11  ;;  %1815 = vmatprep.subr.bf16.mxu1 %v1918_v11 }
  0x77   : > { %496 = vmatpush1.bf16.msra.mxu0 %v1920_v12  ;;  %1823 = vmatpush1.bf16.msra.mxu1 %v1920_v12 }
  0x78   : > { %497 = vmatprep.subr.bf16.mxu0 %v1921_v13  ;;  %1816 = vmatprep.subr.bf16.mxu1 %v1921_v13 }
  0x7b   : > { %498 = vmatpush1.bf16.msra.mxu0 %v1923_v14  ;;  %1824 = vmatpush1.bf16.msra.mxu1 %v1923_v14 }
  0x7c   : > { %499 = vmatprep.subr.bf16.mxu0 %v1924_v15  ;;  %1817 = vmatprep.subr.bf16.mxu1 %v1924_v15 }
  0x7f   : > { %500 = vmatpush1.bf16.msra.mxu0 %v1926_v16  ;;  %1825 = vmatpush1.bf16.msra.mxu1 %v1926_v16 }
  0x82   : > { %518 = vmatmul.mubr.bf16.vlgmr.msra.gmra.mrb[0].mxu0 %v1927_v17  ;;  %598 = vmatmul.mubr.bf16.vlgmr.msra.gmra.mrb[0].mxu1 %v1928_v18 }
  0x83   : > { %527 = vmatprep.mubr.bf16.mxu0 %v2082_v0  ;;  %607 = vmatprep.mubr.bf16.mxu1 %v2082_v0 }
  0x8a   : > { %528 = vmatmul.mubr.bf16.gmra.mrb[4].mxu0 %v1929_v19  ;;  %608 = vmatmul.mubr.bf16.gmra.mrb[4].mxu1 %v1930_v20 }
  0x8b   : > { %537 = vmatprep.mubr.bf16.mxu0 %v2082_v0  ;;  %617 = vmatprep.mubr.bf16.mxu1 %v2082_v0 }
  0x92   : > { %538 = vmatmul.mubr.bf16.gmra.mrb[8].mxu0 %v1931_v21  ;;  %618 = vmatmul.mubr.bf16.gmra.mrb[8].mxu1 %v1932_v22 }
  0x93   : > { %547 = vmatprep.mubr.bf16.mxu0 %v2082_v0  ;;  %627 = vmatprep.mubr.bf16.mxu1 %v2082_v0 }
  0x9a   : > { %548 = vmatmul.mubr.bf16.gmra.mrb[12].mxu0 %v1933_v23  ;;  %628 = vmatmul.mubr.bf16.gmra.mrb[12].mxu1 %v1934_v24 }
  0x9b   : > { %557 = vmatprep.mubr.bf16.mxu0 %v2082_v0  ;;  %637 = vmatprep.mubr.bf16.mxu1 %v2082_v0 }
  0xa2   : > { %558 = vmatmul.mubr.bf16.gmra.mrb[16].mxu0 %v1935_v25  ;;  %638 = vmatmul.mubr.bf16.gmra.mrb[16].mxu1 %v1936_v26 }
  0xa3   : > { %567 = vmatprep.mubr.bf16.mxu0 %v2082_v0  ;;  %647 = vmatprep.mubr.bf16.mxu1 %v2082_v0 }
  0xaa   : > { %568 = vmatmul.mubr.bf16.gmra.mrb[20].mxu0 %v1937_v27  ;;  %648 = vmatmul.mubr.bf16.gmra.mrb[20].mxu1 %v1938_v28 }
  0xab   : > { %577 = vmatprep.mubr.bf16.mxu0 %v2082_v0  ;;  %657 = vmatprep.mubr.bf16.mxu1 %v2082_v0 }
  0xb2   : > { %578 = vmatmul.mubr.bf16.gmra.mrb[24].mxu0 %v1939_v29  ;;  %658 = vmatmul.mubr.bf16.gmra.mrb[24].mxu1 %v1940_v30 }
  0xb3   : > { %587 = vmatprep.mubr.bf16.mxu0 %v2082_v0  ;;  %667 = vmatprep.mubr.bf16.mxu1 %v2082_v0 }
  0xba   : > { %588 = vmatmul.mubr.bf16.gmra.mrb[28].mxu0 %v1941_v31  ;;  %668 = vmatmul.mubr.bf16.gmra.mrb[28].mxu1 %v1942_v32 }
 0x155   : > { %v2293_v33 = vpop.f32.mrb[0].mxu0  ;;  %v2295_v34 = vpop.f32.mrb[0].mxu1 }
 0x156   : > { %2937 = vst [vmem:[#allocation13_spill] sm:$0xff] %v2293_v33  ;;  %2938 = vst [vmem:[#allocation14_spill] sm:$0xff] %v2295_v34  ;;  %v2297_v35 = vpop.f32.mrb[1].mxu0  ;;  %v2299_v36 = vpop.f32.mrb[1].mxu1 }
 0x157   : > { %2939 = vst [vmem:[#allocation15_spill] sm:$0xff] %v2297_v35  ;;  %2940 = vst [vmem:[#allocation16_spill] sm:$0xff] %v2299_v36  ;;  %v2301_v37 = vpop.f32.mrb[2].mxu0  ;;  %v2303_v38 = vpop.f32.mrb[2].mxu1 }
 0x158   : > { %2941 = vst [vmem:[#allocation17_spill] sm:$0xff] %v2301_v37  ;;  %2942 = vst [vmem:[#allocation18_spill] sm:$0xff] %v2303_v38  ;;  %v2305_v39 = vpop.f32.mrb[3].mxu0  ;;  %v2307_v40 = vpop.f32.mrb[3].mxu1 }
 0x159   : > { %2943 = vst [vmem:[#allocation19_spill] sm:$0xff] %v2305_v39  ;;  %2944 = vst [vmem:[#allocation20_spill] sm:$0xff] %v2307_v40 }
 0x15d   : > { %v2309_v41 = vpop.f32.mrb[4].mxu0  ;;  %v2311_v42 = vpop.f32.mrb[4].mxu1 }
 0x15e   : > { %2945 = vst [vmem:[#allocation21_spill] sm:$0xff] %v2309_v41  ;;  %2946 = vst [vmem:[#allocation22_spill] sm:$0xff] %v2311_v42  ;;  %v2313_v43 = vpop.f32.mrb[5].mxu0  ;;  %v2315_v44 = vpop.f32.mrb[5].mxu1 }
 0x15f   : > { %2947 = vst [vmem:[#allocation23_spill] sm:$0xff] %v2313_v43  ;;  %2948 = vst [vmem:[#allocation24_spill] sm:$0xff] %v2315_v44  ;;  %v2317_v45 = vpop.f32.mrb[6].mxu0  ;;  %v2319_v46 = vpop.f32.mrb[6].mxu1 }
 0x160   : > { %2949 = vst [vmem:[#allocation25_spill] sm:$0xff] %v2317_v45  ;;  %2950 = vst [vmem:[#allocation26_spill] sm:$0xff] %v2319_v46  ;;  %v2321_v47 = vpop.f32.mrb[7].mxu0  ;;  %v2323_v48 = vpop.f32.mrb[7].mxu1 }
 0x161   : > { %2951 = vst [vmem:[#allocation27_spill] sm:$0xff] %v2323_v48 }
 0x165   : > { %v2325_v49 = vpop.f32.mrb[8].mxu0  ;;  %v2327_v50 = vpop.f32.mrb[8].mxu1 }
 0x166   : > { %2952 = vst [vmem:[#allocation28_spill] sm:$0xff] %v2327_v50  ;;  %v2329_v51 = vpop.f32.mrb[9].mxu0  ;;  %v2331_v52 = vpop.f32.mrb[9].mxu1 }
 0x167   : > { %2953 = vst [vmem:[#allocation29_spill] sm:$0xff] %v2331_v52  ;;  %v2333_v53 = vpop.f32.mrb[10].mxu0  ;;  %v2335_v54 = vpop.f32.mrb[10].mxu1 }
 0x168   : > { %2954 = vst [vmem:[#allocation30_spill] sm:$0xff] %v2335_v54  ;;  %v2337_v55 = vpop.f32.mrb[11].mxu0  ;;  %v2339_v56 = vpop.f32.mrb[11].mxu1 }
 0x169   : > { %2955 = vst [vmem:[#allocation31_spill] sm:$0xff] %v2339_v56 }
 0x16d   : > { %v2341_v57 = vpop.f32.mrb[12].mxu0  ;;  %v2343_v58 = vpop.f32.mrb[12].mxu1 }
 0x16e   : > { %2956 = vst [vmem:[#allocation32_spill] sm:$0xff] %v2343_v58  ;;  %v2345_v59 = vpop.f32.mrb[13].mxu0  ;;  %v2347_v60 = vpop.f32.mrb[13].mxu1 }
 0x16f   : > { %2957 = vst [vmem:[#allocation33_spill] sm:$0xff] %v2347_v60  ;;  %v2349_v61 = vpop.f32.mrb[14].mxu0  ;;  %v2351_v62 = vpop.f32.mrb[14].mxu1 }
 0x170   : > { %v2353_v63 = vpop.f32.mrb[15].mxu0  ;;  %v2355_v0 = vpop.f32.mrb[15].mxu1 }
 0x175   : > { %v2357_v1 = vpop.f32.mrb[16].mxu0  ;;  %v2359_v2 = vpop.f32.mrb[16].mxu1 }
 0x176   : > { %v2361_v3 = vpop.f32.mrb[17].mxu0  ;;  %v2363_v4 = vpop.f32.mrb[17].mxu1 }
 0x177   : > { %v2365_v5 = vpop.f32.mrb[18].mxu0  ;;  %v2367_v6 = vpop.f32.mrb[18].mxu1 }
 0x178   : > { %v2369_v7 = vpop.f32.mrb[19].mxu0  ;;  %v2371_v8 = vpop.f32.mrb[19].mxu1 }
 0x17d   : > { %v2373_v9 = vpop.f32.mrb[20].mxu0  ;;  %v2375_v10 = vpop.f32.mrb[20].mxu1 }
 0x17e   : > { %2958 = vst [vmem:[#allocation34_spill] sm:$0xff] %v2375_v10  ;;  %v2377_v11 = vpop.f32.mrb[21].mxu0  ;;  %v2379_v12 = vpop.f32.mrb[21].mxu1 }
 0x17f   : > { %2959 = vst [vmem:[#allocation35_spill] sm:$0xff] %v2379_v12  ;;  %v2381_v13 = vpop.f32.mrb[22].mxu0  ;;  %v2383_v14 = vpop.f32.mrb[22].mxu1 }
 0x180   : > { %2960 = vst [vmem:[#allocation36_spill] sm:$0xff] %v2383_v14  ;;  %v2385_v15 = vpop.f32.mrb[23].mxu0  ;;  %v2387_v16 = vpop.f32.mrb[23].mxu1 }
 0x181   : > { %2961 = vst [vmem:[#allocation37_spill] sm:$0xff] %v2387_v16 }
 0x185   : > { %v2389_v17 = vpop.f32.mrb[24].mxu0  ;;  %v2391_v18 = vpop.f32.mrb[24].mxu1 }
 0x186   : > { %2962 = vst [vmem:[#allocation38_spill] sm:$0xff] %v2391_v18  ;;  %v2393_v19 = vpop.f32.mrb[25].mxu0  ;;  %v2395_v20 = vpop.f32.mrb[25].mxu1 }
 0x187   : > { %2963 = vst [vmem:[#allocation39_spill] sm:$0xff] %v2395_v20  ;;  %v2397_v21 = vpop.f32.mrb[26].mxu0  ;;  %v2399_v22 = vpop.f32.mrb[26].mxu1 }
 0x188   : > { %2964 = vst [vmem:[#allocation40_spill] sm:$0xff] %v2399_v22  ;;  %v2401_v23 = vpop.f32.mrb[27].mxu0  ;;  %v2403_v24 = vpop.f32.mrb[27].mxu1  ;;  %v2083_v22 = vmov (!%p2289_p11), 0.0  }
 0x189   : > { %2965 = vst [vmem:[#allocation41_spill] sm:$0xff] %v2401_v23  ;;  %2966 = vst [vmem:[#allocation42_spill] sm:$0xff] %v2403_v24  ;;  %v684_v24 = vlaneseq (!%p2289_p11) }
 0x18b   : > { %683 = sbr.rel (%p2289_p11) target bundleno = 402 (0x192), region = 52  ;;  %vm686_vm0 = vcmp.lt.s32.totalorder (!%p2289_p11), %v684_v24, 256 }
 0x18c   : > { %688 = vst.msk [vmem:[#allocation2] sm:$0x3] (!%p2289_p11), %vm686_vm0, %v2083_v22  ;;  %689 = vst.msk [vmem:[#allocation3] sm:$0x3] (!%p2289_p11), %vm686_vm0, %v2083_v22 }
 0x18d   : > { %v2405_v25 = vpop.f32.mrb[28].mxu0  ;;  %v2407_v26 = vpop.f32.mrb[28].mxu1 }
 0x18e   : > { %2967 = vst [vmem:[#allocation43_spill] sm:$0xff] %v2405_v25  ;;  %2968 = vst [vmem:[#allocation44_spill] sm:$0xff] %v2407_v26  ;;  %v2409_v27 = vpop.f32.mrb[29].mxu0  ;;  %v2411_v28 = vpop.f32.mrb[29].mxu1 }
 0x18f   : > { %2969 = vst [vmem:[#allocation45_spill] sm:$0xff] %v2409_v27  ;;  %2970 = vst [vmem:[#allocation46_spill] sm:$0xff] %v2411_v28  ;;  %v2413_v29 = vpop.f32.mrb[30].mxu0  ;;  %v2415_v30 = vpop.f32.mrb[30].mxu1 }
 0x190   : > { %2971 = vst [vmem:[#allocation47_spill] sm:$0xff] %v2413_v29  ;;  %2972 = vst [vmem:[#allocation48_spill] sm:$0xff] %v2415_v30  ;;  %v2417_v31 = vpop.f32.mrb[31].mxu0  ;;  %v2419_v32 = vpop.f32.mrb[31].mxu1 }
 0x191   : > { %2973 = vst [vmem:[#allocation49_spill] sm:$0xff] %v2417_v31  ;;  %2974 = vst [vmem:[#allocation50_spill] sm:$0xff] %v2419_v32 }
 0x192 PF: > { %p1741_p12 = scmp.ne.s32.totalorder %s2063_s16, 0 }
 0x193   : > { %v694_v28 = vadd.f32 (!%p1741_p12), %v2301_v37, %v2293_v33  ;;  %v731_v30 = vadd.f32 (!%p1741_p12), %v2305_v39, %v2297_v35 }
 0x194   : > { %692 = sbr.rel (%p1741_p12) target bundleno = 506 (0x1fa), region = 56 }
 0x195   : > { %v695_v32 = vadd.f32 (!%p1741_p12), %v694_v28, %v2309_v41  ;;  %v732_v26 = vadd.f32 (!%p1741_p12), %v731_v30, %v2313_v43 }
 0x197   : > { %v696_v20 = vadd.f32 (!%p1741_p12), %v695_v32, %v2317_v45  ;;  %v733_v24 = vadd.f32 (!%p1741_p12), %v732_v26, %v2321_v47 }
 0x199   : > { %v697_v22 = vadd.f32 (!%p1741_p12), %v696_v20, %v2325_v49  ;;  %v734_v18 = vadd.f32 (!%p1741_p12), %v733_v24, %v2329_v51 }
 0x19b   : > { %v698_v16 = vadd.f32 %v697_v22, %v2333_v53  ;;  %v735_v14 = vadd.f32 %v734_v18, %v2337_v55 }
 0x19d   : > { %v699_v12 = vadd.f32 %v698_v16, %v2341_v57  ;;  %v736_v10 = vadd.f32 %v735_v14, %v2345_v59  ;;  %v793_v16 = vmul.f32 %v2293_v33, %v2293_v33 }
 0x19f   : > { %v700_v28 = vadd.f32 %v699_v12, %v2349_v61  ;;  %v737_v30 = vadd.f32 %v736_v10, %v2353_v63  ;;  %v795_v12 = vmul.f32 %v2301_v37, %v2301_v37 }
 0x1a1   : > { %v701_v32 = vadd.f32 %v700_v28, %v2357_v1  ;;  %v738_v26 = vadd.f32 %v737_v30, %v2361_v3  ;;  %v794_v28 = vmul.f32 %v2297_v35, %v2297_v35  ;;  %v796_v30 = vmul.f32 %v2305_v39, %v2305_v39 }
 0x1a2   : > { %v800_v39 = vmul.f32 %v2321_v47, %v2321_v47 }
 0x1a3   : > { %v702_v20 = vadd.f32 %v701_v32, %v2365_v5  ;;  %v739_v24 = vadd.f32 %v738_v26, %v2369_v7  ;;  %v797_v32 = vmul.f32 %v2309_v41, %v2309_v41  ;;  %v894_v33 = vadd.f32 %v796_v30, %v794_v28 }
 0x1a4   : > { %v804_v30 = vmul.f32 %v2337_v55, %v2337_v55 }
 0x1a5   : > { %v703_v22 = vadd.f32 %v702_v20, %v2373_v9  ;;  %v740_v18 = vadd.f32 %v739_v24, %v2377_v11  ;;  %v798_v24 = vmul.f32 %v2313_v43, %v2313_v43 }
 0x1a7   : > { %v704_v10 = vadd.f32 %v703_v22, %v2381_v13  ;;  %v741_v14 = vadd.f32 %v740_v18, %v2385_v15  ;;  %v799_v22 = vmul.f32 %v2317_v45, %v2317_v45  ;;  %v857_v18 = vadd.f32 %v795_v12, %v793_v16 }
 0x1a8   : > { %v802_v45 = vmul.f32 %v2329_v51, %v2329_v51  ;;  %v895_v16 = vadd.f32 %v894_v33, %v798_v24  ;;  %v803_v12 = vmul.f32 %v2333_v53, %v2333_v53  ;;  %v806_v24 = vmul.f32 %v2345_v59, %v2345_v59 }
 0x1a9   : > { %v705_v26 = vadd.f32 %v704_v10, %v2389_v17  ;;  %v742_v20 = vadd.f32 %v741_v14, %v2393_v19  ;;  %v801_v10 = vmul.f32 %v2325_v49, %v2325_v49  ;;  %v858_v41 = vadd.f32 %v857_v18, %v797_v32 }
 0x1aa   : > { %v896_v32 = vadd.f32 %v895_v16, %v800_v39  ;;  %v808_v16 = vmul.f32 %v2353_v63, %v2353_v63 }
 0x1ab   : > { %v706_v37 = vadd.f32 %v705_v26, %v2397_v21  ;;  %v743_v35 = vadd.f32 %v742_v20, %v2401_v23  ;;  %v859_v26 = vadd.f32 %v858_v41, %v799_v22  ;;  %v807_v22 = vmul.f32 %v2349_v61, %v2349_v61 }
 0x1ac   : > { %v897_v41 = vadd.f32 %v896_v32, %v802_v45  ;;  %v810_v32 = vmul.f32 %v2361_v3, %v2361_v3 }
 0x1ad   : > { %v707_v14 = vadd.f32 %v706_v37, %v2405_v25  ;;  %v744_v43 = vadd.f32 %v743_v35, %v2409_v27  ;;  %v805_v37 = vmul.f32 %v2341_v57, %v2341_v57  ;;  %v860_v35 = vadd.f32 %v859_v26, %v801_v10 }
 0x1ae   : > { %v898_v10 = vadd.f32 %v897_v41, %v804_v30  ;;  %v809_v26 = vmul.f32 %v2357_v1, %v2357_v1  ;;  %v812_v41 = vmul.f32 %v2369_v7, %v2369_v7 }
 0x1af   : > { %v708_v20 = vadd.f32 %v707_v14, %v2413_v29  ;;  %v745_v28 = vadd.f32 %v744_v43, %v2417_v31  ;;  %v861_v43 = vadd.f32 %v860_v35, %v803_v12  ;;  %v811_v35 = vmul.f32 %v2365_v5, %v2365_v5 }
 0x1b0   : > { %v899_v12 = vadd.f32 %v898_v10, %v806_v24  ;;  %v814_v10 = vmul.f32 %v2377_v11, %v2377_v11 }
 0x1b1   : > { %v709_v18 = vadd.f32 %v708_v20, %v2295_v34  ;;  %v746_v33 = vadd.f32 %v745_v28, %v2299_v36  ;;  %v862_v20 = vadd.f32 %v861_v43, %v805_v37  ;;  %v813_v43 = vmul.f32 %v2373_v9, %v2373_v9 }
 0x1b2   : > { %v900_v37 = vadd.f32 %v899_v12, %v808_v16  ;;  %v816_v12 = vmul.f32 %v2385_v15, %v2385_v15 }
 0x1b3   : > { %v710_v14 = vadd.f32 %v709_v18, %v2303_v38  ;;  %v747_v39 = vadd.f32 %v746_v33, %v2307_v40  ;;  %v863_v18 = vadd.f32 %v862_v20, %v807_v22  ;;  %v815_v20 = vmul.f32 %v2381_v13, %v2381_v13 }
 0x1b4   : > { %v901_v22 = vadd.f32 %v900_v37, %v810_v32  ;;  %v818_v37 = vmul.f32 %v2393_v19, %v2393_v19 }
 0x1b5   : > { %v711_v28 = vadd.f32 %v710_v14, %v2311_v42  ;;  %v748_v45 = vadd.f32 %v747_v39, %v2315_v44  ;;  %v864_v14 = vadd.f32 %v863_v18, %v809_v26  ;;  %v817_v18 = vmul.f32 %v2389_v17, %v2389_v17 }
 0x1b6   : > { %v902_v26 = vadd.f32 %v901_v22, %v812_v41  ;;  %v820_v22 = vmul.f32 %v2401_v23, %v2401_v23 }
 0x1b7   : > { %v712_v33 = vadd.f32 %v711_v28, %v2319_v46  ;;  %v749_v30 = vadd.f32 %v748_v45, %v2323_v48  ;;  %v865_v28 = vadd.f32 %v864_v14, %v811_v35  ;;  %v819_v14 = vmul.f32 %v2397_v21, %v2397_v21 }
 0x1b8   : > { %v903_v35 = vadd.f32 %v902_v26, %v814_v10  ;;  %v822_v26 = vmul.f32 %v2409_v27, %v2409_v27  ;;  %v2976_v27 = vld [vmem:[#allocation35_spill] sm:$0xff] }
 0x1b9   : > { %v713_v39 = vadd.f32 %v712_v33, %v2327_v50  ;;  %v750_v24 = vadd.f32 %v749_v30, %v2331_v52  ;;  %v866_v33 = vadd.f32 %v865_v28, %v813_v43  ;;  %v821_v28 = vmul.f32 %v2405_v25, %v2405_v25 }
 0x1ba   : > { %v904_v43 = vadd.f32 %v903_v35, %v816_v12  ;;  %v824_v35 = vmul.f32 %v2417_v31, %v2417_v31  ;;  %v2978_v31 = vld [vmem:[#allocation37_spill] sm:$0xff] }
 0x1bb   : > { %v714_v45 = vadd.f32 %v713_v39, %v2335_v54  ;;  %v751_v16 = vadd.f32 %v750_v24, %v2339_v56  ;;  %v867_v39 = vadd.f32 %v866_v33, %v815_v20  ;;  %v823_v33 = vmul.f32 %v2413_v29, %v2413_v29 }
 0x1bc   : > { %v905_v20 = vadd.f32 %v904_v43, %v818_v37  ;;  %v826_v43 = vmul.f32 %v2299_v36, %v2299_v36  ;;  %v2980_v36 = vld [vmem:[#allocation39_spill] sm:$0xff] }
 0x1bd   : > { %v715_v30 = vadd.f32 %v714_v45, %v2343_v58  ;;  %v752_v32 = vadd.f32 %v751_v16, %v2347_v60  ;;  %v868_v45 = vadd.f32 %v867_v39, %v817_v18  ;;  %v825_v39 = vmul.f32 %v2295_v34, %v2295_v34 }
 0x1be   : > { %v906_v18 = vadd.f32 %v905_v20, %v820_v22  ;;  %v828_v20 = vmul.f32 %v2307_v40, %v2307_v40  ;;  %v2982_v40 = vld [vmem:[#allocation42_spill] sm:$0xff] }
 0x1bf   : > { %v716_v24 = vadd.f32 %v715_v30, %v2351_v62  ;;  %v753_v41 = vadd.f32 %v752_v32, %v2355_v0  ;;  %v869_v30 = vadd.f32 %v868_v45, %v819_v14  ;;  %v827_v45 = vmul.f32 %v2303_v38, %v2303_v38 }
 0x1c0   : > { %v907_v14 = vadd.f32 %v906_v18, %v822_v26  ;;  %v830_v18 = vmul.f32 %v2315_v44, %v2315_v44  ;;  %v2984_v44 = vld [vmem:[#allocation46_spill] sm:$0xff] }
 0x1c1   : > { %v717_v16 = vadd.f32 %v716_v24, %v2359_v2  ;;  %v754_v10 = vadd.f32 %v753_v41, %v2363_v4  ;;  %v870_v24 = vadd.f32 %v869_v30, %v821_v28  ;;  %v2975_v41 = vld [vmem:[#allocation34_spill] sm:$0xff]  ;;  %v829_v30 = vmul.f32 %v2311_v42, %v2311_v42 }
 0x1c2   : > { %v908_v28 = vadd.f32 %v907_v14, %v824_v35  ;;  %v832_v14 = vmul.f32 %v2323_v48, %v2323_v48  ;;  %v2986_v48 = vld [vmem:[#allocation50_spill] sm:$0xff] }
 0x1c3   : > { %v718_v32 = vadd.f32 %v717_v16, %v2367_v6  ;;  %v755_v12 = vadd.f32 %v754_v10, %v2371_v8  ;;  %v871_v16 = vadd.f32 %v870_v24, %v823_v33  ;;  %v2977_v10 = vld [vmem:[#allocation36_spill] sm:$0xff] }
 0x1c4   : > { %v909_v33 = vadd.f32 %v908_v28, %v826_v43  ;;  %v834_v28 = vmul.f32 %v2331_v52, %v2331_v52 }
 0x1c5   : > { %v719_v25 = vadd.f32 %v718_v32, %v2975_v41  ;;  %v756_v37 = vadd.f32 %v755_v12, %v2976_v27  ;;  %v872_v32 = vadd.f32 %v871_v16, %v825_v39  ;;  %v2979_v12 = vld [vmem:[#allocation38_spill] sm:$0xff] }
 0x1c6   : > { %v910_v39 = vadd.f32 %v909_v33, %v828_v20  ;;  %v836_v33 = vmul.f32 %v2339_v56, %v2339_v56 }
 0x1c7   : > { %v720_v29 = vadd.f32 %v719_v25, %v2977_v10  ;;  %v757_v22 = vadd.f32 %v756_v37, %v2978_v31  ;;  %v831_v25 = vmul.f32 %v2319_v46, %v2319_v46  ;;  %v873_v24 = vadd.f32 %v872_v32, %v827_v45  ;;  %v2981_v37 = vld [vmem:[#allocation40_spill] sm:$0xff] }
 0x1c8   : > { %v911_v45 = vadd.f32 %v910_v39, %v830_v18  ;;  %v838_v18 = vmul.f32 %v2347_v60, %v2347_v60 }
 0x1c9   : > { %v721_v34 = vadd.f32 %v720_v29, %v2979_v12  ;;  %v758_v26 = vadd.f32 %v757_v22, %v2980_v36  ;;  %v833_v29 = vmul.f32 %v2327_v50, %v2327_v50  ;;  %v874_v16 = vadd.f32 %v873_v24, %v829_v30  ;;  %v2983_v22 = vld [vmem:[#allocation44_spill] sm:$0xff] }
 0x1ca   : > { %v912_v30 = vadd.f32 %v911_v45, %v832_v14  ;;  %v840_v14 = vmul.f32 %v2355_v0, %v2355_v0 }
 0x1cb   : > { %v722_v38 = vadd.f32 %v721_v34, %v2981_v37  ;;  %v759_v35 = vadd.f32 %v758_v26, %v2982_v40  ;;  %v835_v34 = vmul.f32 %v2335_v54, %v2335_v54  ;;  %v875_v32 = vadd.f32 %v874_v16, %v831_v25  ;;  %v2985_v26 = vld [vmem:[#allocation48_spill] sm:$0xff] }
 0x1cc   : > { %v913_v39 = vadd.f32 %v912_v30, %v834_v28  ;;  %v2084_v54 = vmov 1966171168   ;;  %v774_v16 = vlaneseq }
 0x1cd   : > { %v723_v42 = vadd.f32 %v722_v38, %v2983_v22  ;;  %v760_v43 = vadd.f32 %v759_v35, %v2984_v44  ;;  %v837_v38 = vmul.f32 %v2343_v58, %v2343_v58  ;;  %v876_v24 = vadd.f32 %v875_v32, %v833_v29 }
 0x1ce   : > { %v772_v25 = vunpack.c.l.s4 %v2084_v54  ;;  %v914_v45 = vadd.f32 %v913_v39, %v836_v33  ;;  %v841_v29 = vmul.f32 %v2359_v2, %v2359_v2  ;;  %v842_v54 = vmul.f32 %v2363_v4, %v2363_v4 }
 0x1cf   : > { %v724_v46 = vadd.f32 %v723_v42, %v2985_v26  ;;  %v761_v20 = vadd.f32 %v760_v43, %v2986_v48  ;;  %v839_v42 = vmul.f32 %v2351_v62, %v2351_v62  ;;  %v877_v43 = vadd.f32 %v876_v24, %v835_v34 }
 0x1d0   : > { %v915_v28 = vadd.f32 %v914_v45, %v838_v18  ;;  %v773_v30 = vunpack.c.0.s8 %v772_v25  ;;  %v775_v23 = vshrl.u32 %v774_v16, 7  ;;  %v844_v33 = vmul.f32 %v2371_v8, %v2371_v8 }
 0x1d1   : > { %v725_v35 = vrot.slane %v724_v46, 4  ;;  %v762_v50 = vrot.slane %v761_v20, 4  ;;  %v878_v32 = vadd.f32 %v877_v43, %v837_v38  ;;  %v845_v38 = vmul.f32 %v2975_v41, %v2975_v41 }
 0x1d2   : > { %v916_v24 = vadd.f32 %v915_v28, %v840_v14  ;;  %v846_v18 = vmul.f32 %v2976_v27, %v2976_v27  ;;  %v776_v45 = vsub.s32 %v773_v30, %v775_v23  ;;  %v849_v41 = vmul.f32 %v2979_v12, %v2979_v12 }
 0x1d3   : > { %v726_v52 = vadd.f32 %v725_v35, %v724_v46  ;;  %v763_v56 = vadd.f32 %v762_v50, %v761_v20  ;;  %v843_v46 = vmul.f32 %v2367_v6, %v2367_v6  ;;  %v879_v50 = vadd.f32 %v878_v32, %v839_v42 }
 0x1d4   : > { %v917_v25 = vadd.f32 %v916_v24, %v842_v54  ;;  %v847_v42 = vmul.f32 %v2977_v10, %v2977_v10  ;;  %v850_v27 = vmul.f32 %v2980_v36, %v2980_v36  ;;  %v851_v23 = vmul.f32 %v2981_v37, %v2981_v37 }
 0x1d5   : > { %v727_v58 = vrot.slane %v726_v52, 2  ;;  %v764_v60 = vrot.slane %v763_v56, 2  ;;  %v880_v35 = vadd.f32 %v879_v50, %v841_v29  ;;  %v852_v30 = vmul.f32 %v2982_v40, %v2982_v40 }
 0x1d6   : > { %v918_v14 = vadd.f32 %v917_v25, %v844_v33  ;;  %v853_v50 = vmul.f32 %v2983_v22, %v2983_v22  ;;  %vm2612_vm1 = vcmp.lt.s32.totalorder %v774_v16, 256  ;;  %v855_v37 = vmul.f32 %v2985_v26, %v2985_v26 }
 0x1d7   : > { %v728_v34 = vadd.f32 %v727_v58, %v726_v52  ;;  %v765_v20 = vadd.f32 %v764_v60, %v763_v56  ;;  %v881_v52 = vadd.f32 %v880_v35, %v843_v46  ;;  %v848_v60 = vmul.f32 %v2978_v31, %v2978_v31  ;;  %v693_v31 = vld [vmem:[#allocation2] sm:$0x3] }
 0x1d8   : > { %v919_v54 = vadd.f32 %v918_v14, %v846_v18 }
 0x1d9   : > { %v729_v39 = vrot.slane %v728_v34, 1  ;;  %v766_v43 = vrot.slane %v765_v20, 1  ;;  %v882_v29 = vadd.f32 %v881_v52, %v845_v38  ;;  %v856_v38 = vmul.f32 %v2986_v48, %v2986_v48 }
 0x1da   : > { %v920_v46 = vadd.f32 %v919_v54, %v848_v60 }
 0x1db   : > { %v730_v56 = vadd.f32 %v729_v39, %v728_v34  ;;  %v767_v58 = vadd.f32 %v766_v43, %v765_v20  ;;  %v883_v10 = vadd.f32 %v882_v29, %v847_v42  ;;  %v854_v20 = vmul.f32 %v2984_v44, %v2984_v44 }
 0x1dc   : > { %v921_v36 = vadd.f32 %v920_v46, %v850_v27  ;;  %v792_v27 = vld [vmem:[#allocation3] sm:$0x3] }
 0x1dd   : > { %v770_v32 = vcombine.low %v730_v56, %v767_v58  ;;  %v884_v12 = vadd.f32 %v883_v10, %v849_v41 }
 0x1de   : > { %v922_v35 = vadd.f32 %v921_v36, %v852_v30 }
 0x1df   : > { %v777_v28 = vrot.slane %v770_v32, %v776_v45  ;;  %v885_v24 = vadd.f32 %v884_v12, %v851_v23 }
 0x1e0   : > { %v923_v39 = vadd.f32 %v922_v35, %v854_v20 }
 0x1e1   : > { %v784_v34 = vrot.slane %v777_v28, %v776_v45  ;;  %v886_v22 = vadd.f32 %v885_v24, %v853_v50 }
 0x1e2   : > { %v924_v43 = vadd.f32 %v923_v39, %v856_v38 }
 0x1e3   : > { %v786_v40 = vadd.f32 %v784_v34, %v693_v31  ;;  %v887_v44 = vadd.f32 %v886_v22, %v855_v37 }
 0x1e4   : > { %v925_v18 = vrot.slane %v924_v43, 4 }
 0x1e5   : > { %791 = vst.msk [vmem:[#allocation2] sm:$0x3] %vm2612_vm1, %v786_v40  ;;  %v888_v16 = vrot.slane %v887_v44, 4 }
 0x1e6   : > { %v926_v42 = vadd.f32 %v925_v18, %v924_v43 }
 0x1e7   : > { %v889_v25 = vadd.f32 %v888_v16, %v887_v44 }
 0x1e8   : > { %v927_v56 = vrot.slane %v926_v42, 2 }
 0x1e9   : > { %v890_v52 = vrot.slane %v889_v25, 2 }
 0x1ea   : > { %v928_v58 = vadd.f32 %v927_v56, %v926_v42 }
 0x1eb   : > { %v891_v26 = vadd.f32 %v890_v52, %v889_v25 }
 0x1ec   : > { %v929_v14 = vrot.slane %v928_v58, 1 }
 0x1ed   : > { %v892_v60 = vrot.slane %v891_v26, 1 }
 0x1ee   : > { %v930_v48 = vadd.f32 %v929_v14, %v928_v58 }
 0x1ef   : > { %v893_v41 = vadd.f32 %v892_v60, %v891_v26 }
 0x1f1   : > { %v933_v29 = vcombine.low %v893_v41, %v930_v48 }
 0x1f3   : > { %v940_v32 = vrot.slane %v933_v29, %v776_v45 }
 0x1f5   : > { %v947_v54 = vrot.slane %v940_v32, %v776_v45 }
 0x1f7   : > { %v949_v23 = vadd.f32 %v947_v54, %v792_v27 }
 0x1f9   : > { %950 = vst.msk [vmem:[#allocation3] sm:$0x3] %vm2612_vm1, %v949_v23 }
 0x1fa PF: > { %p951_p13 = scmp.eq.s32.totalorder %s2063_s16, 1 }
 0x1fc   : > { %p952_p0 = pnand %p951_p13, %p679_p10 }
 0x1fd   : > { %v956_v10 = vld [vmem:[#allocation2] sm:$0x1] (!%p952_p0)  ;;  %v968_v28 = vld [vmem:[#allocation2 + $0x1] sm:$0x1] (!%p952_p0)  ;;  %s2085_s6 = smov (!%p952_p0), 64   ;;  %v995_v43 = vlaneseq (!%p952_p0) }
 0x1fe   : > { %955 = sbr.rel (%p952_p0) target bundleno = 776 (0x308), region = 60  ;;  %959 = vrot.lane.b32.xlu0 (!%p952_p0), %v956_v10, %s2085_s6  ;;  %973 = vrot.lane.b32.xlu1 (!%p952_p0), %v968_v28, %s2085_s6  ;;  %v990_v16 = vld [vmem:[#allocation8] sm:$0x1] (!%p952_p0)  ;;  %v992_v42 = vld [vmem:[#allocation10] sm:$0x1] (!%p952_p0) }
 0x1ff   : > { %vm997_vm2 = vcmp.lt.s32.totalorder (!%p952_p0), %v995_v43, 64  ;;  %vm1005_vm3 = vcmp.ge.s32.totalorder (!%p952_p0), %v995_v43, 64  ;;  %vm1006_vm4 = vcmp.lt.s32.totalorder (!%p952_p0), %v995_v43, 128 }
 0x200   : > { %v957_v30 = vld [vmem:[#allocation3] sm:$0x1] (!%p952_p0)  ;;  %v970_v45 = vld [vmem:[#allocation3 + $0x1] sm:$0x1] (!%p952_p0)  ;;  %vm1007_vm5 = vmand (!%p952_p0), %vm1005_vm3, %vm1006_vm4 }
 0x202   : > { %964 = vrot.lane.b32.xlu0 (!%p952_p0), %v957_v30, %s2085_s6  ;;  %978 = vrot.lane.b32.xlu1 (!%p952_p0), %v970_v45, %s2085_s6 }
 0x270   : > { %v960_v46 = vpop.permute.xlu0 %959  ;;  %v974_v31 = vpop.permute.xlu1 %973 }
 0x271   : > { %v962_v50 = vadd.f32 %v960_v46, %v956_v10 }
 0x273   : > { %v969_v12 = vadd.f32 %v968_v28, %v962_v50 }
 0x274   : > { %v965_v34 = vpop.permute.xlu0 %964  ;;  %v979_v33 = vpop.permute.xlu1 %978 }
 0x275   : > { %v976_v20 = vadd.f32 %v974_v31, %v969_v12  ;;  %v967_v36 = vadd.f32 %v965_v34, %v957_v30 }
 0x277   : > { %v983_v37 = vmul.f32 0.00048828125, %v976_v20  ;;  %v971_v24 = vadd.f32 %v970_v45, %v967_v36 }
 0x279   : > { %v981_v40 = vadd.f32 %v979_v33, %v971_v24  ;;  %v985_v38 = vmul.f32 %v983_v37, %v983_v37 }
 0x27b   : > { %v984_v35 = vmul.f32 0.00048828125, %v981_v40 }
 0x27d   : > { %v986_v22 = vsub.f32 %v984_v35, %v985_v38 }
 0x27f   : > { %v987_v39 = vmax.f32 %v986_v22, 0.0 }
 0x281   : > { %v988_v44 = vadd.f32 1e-05, %v987_v39 }
 0x283   : > { %1943 = vrsqrt.f32 %v988_v44 }
 0x28d   : > { %v1944_v18 = vpop.eup %1943 }
 0x28e   : > { %v991_v25 = vmul.f32 %v1944_v18, %v990_v16 }
 0x290   : > { %1002 = vrot.lane.b32.xlu0 %v991_v25, %s2085_s6  ;;  %v993_v52 = vmul.f32 %v991_v25, %v983_v37  ;;  %999 = vst.msk [vmem:[#allocation4] sm:$0x1] %vm997_vm2, %v991_v25  ;;  %1014 = vst.msk [vmem:[#allocation4 + $0x1] sm:$0x1] %vm997_vm2, %v991_v25 }
 0x292   : > { %v994_v56 = vsub.f32 %v992_v42, %v993_v52 }
 0x294   : > { %1010 = vrot.lane.b32.xlu1 %v994_v56, %s2085_s6  ;;  %1000 = vst.msk [vmem:[#allocation5] sm:$0x1] %vm997_vm2, %v994_v56  ;;  %1015 = vst.msk [vmem:[#allocation5 + $0x1] sm:$0x1] %vm997_vm2, %v994_v56 }
 0x302   : > { %v1003_v26 = vpop.permute.xlu0 %1002 }
 0x303   : > { %1008 = vst.msk [vmem:[#allocation4] sm:$0x1] %vm1007_vm5, %v1003_v26  ;;  %1016 = vst.msk [vmem:[#allocation4 + $0x1] sm:$0x1] %vm1007_vm5, %v1003_v26 }
 0x306   : > { %v1011_v58 = vpop.permute.xlu1 %1010 }
 0x307   : > { %1013 = vst.msk [vmem:[#allocation5] sm:$0x1] %vm1007_vm5, %v1011_v58  ;;  %1017 = vst.msk [vmem:[#allocation5 + $0x1] sm:$0x1] %vm1007_vm5, %v1011_v58 }
 0x308 PF: > { %p1742_p1 = scmp.ne.s32.totalorder %s2063_s16, 1 }
 0x309   : > { %v1023_v60 = vlaneseq (!%p1742_p1)  ;;  %v2989_v28 = vld [vmem:[#allocation13_spill] sm:$0xff] (!%p1742_p1)  ;;  %v2990_v45 = vld [vmem:[#allocation15_spill] sm:$0xff] (!%p1742_p1) }
 0x30a   : > { %1020 = sbr.rel (%p1742_p1) target bundleno = 879 (0x36f), region = 64  ;;  %v1021_v41 = vld [vmem:[#allocation4] sm:$0x3] (!%p1742_p1)  ;;  %v2991_v31 = vld [vmem:[#allocation17_spill] sm:$0xff] (!%p1742_p1)  ;;  %v2992_v12 = vld [vmem:[#allocation19_spill] sm:$0xff] (!%p1742_p1) }
 0x30b   : > { %v1024_v14 = vshrl.u32 (!%p1742_p1), %v1023_v60, 7  ;;  %v2993_v20 = vld [vmem:[#allocation21_spill] sm:$0xff] (!%p1742_p1)  ;;  %v2994_v33 = vld [vmem:[#allocation23_spill] sm:$0xff] (!%p1742_p1) }
 0x30c   : > { %v2995_v24 = vld [vmem:[#allocation25_spill] sm:$0xff] (!%p1742_p1) }
 0x30d   : > { %v1025_v29 = vsub.s32 (!%p1742_p1), 0, %v1024_v14  ;;  %v1029_v32 = vsub.s32 (!%p1742_p1), 1, %v1024_v14 }
 0x30e   : > { %v1097_v48 = vld [vmem:[#allocation5] sm:$0x3] (!%p1742_p1) }
 0x30f   : > { %v2634_v27 = vrot.slane (!%p1742_p1), %v1021_v41, %v1025_v29  ;;  %v2636_v54 = vrot.slane (!%p1742_p1), %v1021_v41, %v1029_v32  ;;  %v2638_v23 = vrot.slane (!%p1742_p1), %v1097_v48, %v1025_v29  ;;  %v2640_v10 = vrot.slane (!%p1742_p1), %v1097_v48, %v1029_v32 }
 0x311   : > { %v1033_v30 = vmul.f32 %v2634_v27, %v2989_v28  ;;  %v1034_v46 = vmul.f32 %v2636_v54, %v2990_v45  ;;  %v1035_v50 = vmul.f32 %v2634_v27, %v2991_v31  ;;  %v1036_v34 = vmul.f32 %v2636_v54, %v2992_v12 }
 0x312   : > { %v1037_v36 = vmul.f32 %v2634_v27, %v2993_v20  ;;  %v1038_v37 = vmul.f32 %v2636_v54, %v2994_v33  ;;  %v1039_v40 = vmul.f32 %v2634_v27, %v2995_v24  ;;  %v1040_v38 = vmul.f32 %v2636_v54, %v2321_v47 }
 0x313   : > { %v1109_v35 = vadd.f32 %v2638_v23, %v1033_v30  ;;  %v1110_v22 = vadd.f32 %v2640_v10, %v1034_v46  ;;  %v1111_v39 = vadd.f32 %v2638_v23, %v1035_v50  ;;  %v1112_v44 = vadd.f32 %v2640_v10, %v1036_v34 }
 0x314   : > { %v1113_v43 = vadd.f32 %v2638_v23, %v1037_v36  ;;  %v1114_v16 = vadd.f32 %v2640_v10, %v1038_v37  ;;  %v1115_v18 = vadd.f32 %v2638_v23, %v1039_v40  ;;  %v1116_v25 = vadd.f32 %v2640_v10, %v1040_v38 }
 0x315   : > { %vm1173_vm6 = vcmp.ge.f32.partialorder %v1109_v35, 0.0  ;;  %vm1174_vm7 = vcmp.ge.f32.partialorder %v1110_v22, 0.0  ;;  %v1237_v42 = vmul.f32 0.2, %v1109_v35  ;;  %v1238_v47 = vmul.f32 0.2, %v1110_v22 }
 0x316   : > { %vm1175_vm8 = vcmp.ge.f32.partialorder %v1111_v39, 0.0  ;;  %vm1176_vm9 = vcmp.ge.f32.partialorder %v1112_v44, 0.0  ;;  %v1239_v52 = vmul.f32 0.2, %v1111_v39  ;;  %v1240_v56 = vmul.f32 0.2, %v1112_v44 }
 0x317   : > { %v1301_v26 = vsel %vm1173_vm6, %v1109_v35, %v1237_v42  ;;  %v1302_v58 = vsel %vm1174_vm7, %v1110_v22, %v1238_v47  ;;  %vm1177_vm10 = vcmp.ge.f32.partialorder %v1113_v43, 0.0  ;;  %vm1178_vm11 = vcmp.ge.f32.partialorder %v1114_v16, 0.0 }
 0x318   : > { %v1778_v60 = vpack.c.bf16 %v1302_v58, %v1301_v26  ;;  %v1303_v14 = vsel %vm1175_vm8, %v1111_v39, %v1239_v52  ;;  %v1304_v41 = vsel %vm1176_vm9, %v1112_v44, %v1240_v56  ;;  %v1241_v48 = vmul.f32 0.2, %v1113_v43 }
 0x319   : > { %v1779_v29 = vpack.c.bf16 %v1304_v41, %v1303_v14  ;;  %v1242_v32 = vmul.f32 0.2, %v1114_v16  ;;  %vm1179_vm12 = vcmp.ge.f32.partialorder %v1115_v18, 0.0  ;;  %vm1180_vm13 = vcmp.ge.f32.partialorder %v1116_v25, 0.0 }
 0x31a   : > { %1557 = vst [vmem:[%s2248_s23] sm:$0xff] %v1778_v60  ;;  %v1305_v28 = vsel %vm1177_vm10, %v1113_v43, %v1241_v48  ;;  %v1243_v30 = vmul.f32 0.2, %v1115_v18  ;;  %v1244_v45 = vmul.f32 0.2, %v1116_v25  ;;  %v1041_v46 = vmul.f32 %v2634_v27, %v2325_v49 }
 0x31b   : > { %1558 = vst [vmem:[%s2248_s23 + $0x8] sm:$0xff] %v1779_v29  ;;  %v1306_v31 = vsel %vm1178_vm11, %v1114_v16, %v1242_v32  ;;  %v1042_v50 = vmul.f32 %v2636_v54, %v2329_v51  ;;  %v1043_v12 = vmul.f32 %v2634_v27, %v2333_v53  ;;  %v1044_v34 = vmul.f32 %v2636_v54, %v2337_v55 }
 0x31c   : > { %v1780_v20 = vpack.c.bf16 %v1306_v31, %v1305_v28  ;;  %v1307_v36 = vsel %vm1179_vm12, %v1115_v18, %v1243_v30  ;;  %v1308_v33 = vsel %vm1180_vm13, %v1116_v25, %v1244_v45  ;;  %v1117_v37 = vadd.f32 %v2638_v23, %v1041_v46 }
 0x31d   : > { %v1781_v24 = vpack.c.bf16 %v1308_v33, %v1307_v36  ;;  %v1118_v49 = vadd.f32 %v2640_v10, %v1042_v50  ;;  %v1119_v40 = vadd.f32 %v2638_v23, %v1043_v12  ;;  %v1120_v38 = vadd.f32 %v2640_v10, %v1044_v34 }
 0x31e   : > { %1559 = vst [vmem:[%s2248_s23 + $0x10] sm:$0xff] %v1780_v20  ;;  %vm1181_vm14 = vcmp.ge.f32.partialorder %v1117_v37, 0.0  ;;  %v1245_v51 = vmul.f32 0.2, %v1117_v37  ;;  %v1045_v53 = vmul.f32 %v2634_v27, %v2341_v57  ;;  %v1046_v55 = vmul.f32 %v2636_v54, %v2345_v59 }
 0x31f   : > { %1560 = vst [vmem:[%s2248_s23 + $0x18] sm:$0xff] %v1781_v24  ;;  %vm1182_vm15 = vcmp.ge.f32.partialorder %v1118_v49, 0.0  ;;  %v1246_v35 = vmul.f32 0.2, %v1118_v49  ;;  %vm1183_vm0 = vcmp.ge.f32.partialorder %v1119_v40, 0.0  ;;  %vm1184_vm1 = vcmp.ge.f32.partialorder %v1120_v38, 0.0 }
 0x320   : > { %v1309_v22 = vsel %vm1181_vm14, %v1117_v37, %v1245_v51  ;;  %v1247_v39 = vmul.f32 0.2, %v1119_v40  ;;  %v1248_v44 = vmul.f32 0.2, %v1120_v38  ;;  %v1121_v43 = vadd.f32 %v2638_v23, %v1045_v53 }
 0x321   : > { %v1310_v16 = vsel %vm1182_vm15, %v1118_v49, %v1246_v35  ;;  %v1122_v18 = vadd.f32 %v2640_v10, %v1046_v55  ;;  %v1047_v57 = vmul.f32 %v2634_v27, %v2349_v61  ;;  %v1048_v59 = vmul.f32 %v2636_v54, %v2353_v63 }
 0x322   : > { %v1782_v25 = vpack.c.bf16 %v1310_v16, %v1309_v22  ;;  %v1311_v42 = vsel %vm1183_vm0, %v1119_v40, %v1247_v39  ;;  %v1312_v47 = vsel %vm1184_vm1, %v1120_v38, %v1248_v44  ;;  %vm1185_vm2 = vcmp.ge.f32.partialorder %v1121_v43, 0.0 }
 0x323   : > { %v1783_v52 = vpack.c.bf16 %v1312_v47, %v1311_v42  ;;  %vm1186_vm3 = vcmp.ge.f32.partialorder %v1122_v18, 0.0  ;;  %v1249_v56 = vmul.f32 0.2, %v1121_v43  ;;  %v1250_v26 = vmul.f32 0.2, %v1122_v18 }
 0x324   : > { %1561 = vst [vmem:[%s2248_s23 + $0x20] sm:$0xff] %v1782_v25  ;;  %v1123_v58 = vadd.f32 %v2638_v23, %v1047_v57  ;;  %v1124_v60 = vadd.f32 %v2640_v10, %v1048_v59  ;;  %v1049_v61 = vmul.f32 %v2634_v27, %v2357_v1  ;;  %v1050_v63 = vmul.f32 %v2636_v54, %v2361_v3  ;;  %v2996_v57 = vld [vmem:[#allocation41_spill] sm:$0xff] }
 0x325   : > { %1562 = vst [vmem:[%s2248_s23 + $0x28] sm:$0xff] %v1783_v52  ;;  %v1313_v14 = vsel %vm1185_vm2, %v1121_v43, %v1249_v56  ;;  %v1314_v41 = vsel %vm1186_vm3, %v1122_v18, %v1250_v26  ;;  %v1051_v48 = vmul.f32 %v2634_v27, %v2365_v5  ;;  %v1052_v29 = vmul.f32 %v2636_v54, %v2369_v7 }
 0x326   : > { %v1784_v32 = vpack.c.bf16 %v1314_v41, %v1313_v14  ;;  %vm1187_vm4 = vcmp.ge.f32.partialorder %v1123_v58, 0.0  ;;  %vm1188_vm5 = vcmp.ge.f32.partialorder %v1124_v60, 0.0  ;;  %v1251_v28 = vmul.f32 0.2, %v1123_v58 }
 0x327   : > { %v1252_v30 = vmul.f32 0.2, %v1124_v60  ;;  %v1125_v45 = vadd.f32 %v2638_v23, %v1049_v61  ;;  %v1126_v1 = vadd.f32 %v2640_v10, %v1050_v63  ;;  %v1127_v3 = vadd.f32 %v2638_v23, %v1051_v48 }
 0x328   : > { %1563 = vst [vmem:[%s2248_s23 + $0x30] sm:$0xff] %v1784_v32  ;;  %v1315_v46 = vsel %vm1187_vm4, %v1123_v58, %v1251_v28  ;;  %v1128_v31 = vadd.f32 %v2640_v10, %v1052_v29  ;;  %v1053_v5 = vmul.f32 %v2634_v27, %v2373_v9  ;;  %v1054_v7 = vmul.f32 %v2636_v54, %v2377_v11 }
 0x329   : > { %v1316_v50 = vsel %vm1188_vm5, %v1124_v60, %v1252_v30  ;;  %vm1189_vm6 = vcmp.ge.f32.partialorder %v1125_v45, 0.0  ;;  %vm1190_vm7 = vcmp.ge.f32.partialorder %v1126_v1, 0.0  ;;  %v1253_v12 = vmul.f32 0.2, %v1125_v45  ;;  %v2998_v60 = vld [vmem:[#allocation45_spill] sm:$0xff] }
 0x32a   : > { %v1785_v34 = vpack.c.bf16 %v1316_v50, %v1315_v46  ;;  %v1254_v20 = vmul.f32 0.2, %v1126_v1  ;;  %vm1191_vm8 = vcmp.ge.f32.partialorder %v1127_v3, 0.0  ;;  %vm1192_vm9 = vcmp.ge.f32.partialorder %v1128_v31, 0.0 }
 0x32b   : > { %v1317_v36 = vsel %vm1189_vm6, %v1125_v45, %v1253_v12  ;;  %v1255_v33 = vmul.f32 0.2, %v1127_v3  ;;  %v1256_v37 = vmul.f32 0.2, %v1128_v31  ;;  %v1129_v24 = vadd.f32 %v2638_v23, %v1053_v5 }
 0x32c   : > { %1564 = vst [vmem:[%s2248_s23 + $0x38] sm:$0xff] %v1785_v34  ;;  %v1318_v49 = vsel %vm1190_vm7, %v1126_v1, %v1254_v20  ;;  %v1130_v9 = vadd.f32 %v2640_v10, %v1054_v7  ;;  %v1055_v11 = vmul.f32 %v2634_v27, %v2381_v13  ;;  %v1056_v40 = vmul.f32 %v2636_v54, %v2385_v15 }
 0x32d   : > { %v1786_v38 = vpack.c.bf16 %v1318_v49, %v1317_v36  ;;  %v1319_v51 = vsel %vm1191_vm8, %v1127_v3, %v1255_v33  ;;  %v1320_v53 = vsel %vm1192_vm9, %v1128_v31, %v1256_v37  ;;  %vm1193_vm10 = vcmp.ge.f32.partialorder %v1129_v24, 0.0  ;;  %v2999_v3 = vld [vmem:[#allocation47_spill] sm:$0xff]  ;;  %v3000_v31 = vld [vmem:[#allocation49_spill] sm:$0xff] }
 0x32e   : > { %v1787_v55 = vpack.c.bf16 %v1320_v53, %v1319_v51  ;;  %vm1194_vm11 = vcmp.ge.f32.partialorder %v1130_v9, 0.0  ;;  %v1257_v35 = vmul.f32 0.2, %v1129_v24  ;;  %v1258_v22 = vmul.f32 0.2, %v1130_v9  ;;  %v3003_v51 = vld [vmem:[#allocation18_spill] sm:$0xff] }
 0x32f   : > { %1565 = vst [vmem:[%s2248_s23 + $0x40] sm:$0xff] %v1786_v38  ;;  %v1131_v39 = vadd.f32 %v2638_v23, %v1055_v11  ;;  %v1132_v44 = vadd.f32 %v2640_v10, %v1056_v40  ;;  %v1057_v13 = vmul.f32 %v2634_v27, %v2389_v17  ;;  %v1058_v15 = vmul.f32 %v2636_v54, %v2393_v19 }
 0x330   : > { %1566 = vst [vmem:[%s2248_s23 + $0x48] sm:$0xff] %v1787_v55  ;;  %v1321_v43 = vsel %vm1193_vm10, %v1129_v24, %v1257_v35  ;;  %v1322_v16 = vsel %vm1194_vm11, %v1130_v9, %v1258_v22  ;;  %v1059_v18 = vmul.f32 %v2634_v27, %v2397_v21  ;;  %v1060_v59 = vmul.f32 %v2636_v54, %v2996_v57  ;;  %v2997_v21 = vld [vmem:[#allocation43_spill] sm:$0xff]  ;;  %v3001_v24 = vld [vmem:[#allocation14_spill] sm:$0xff]  ;;  %v3002_v9 = vld [vmem:[#allocation16_spill] sm:$0xff] }
 0x331   : > { %v1788_v25 = vpack.c.bf16 %v1322_v16, %v1321_v43  ;;  %vm1195_vm12 = vcmp.ge.f32.partialorder %v1131_v39, 0.0  ;;  %vm1196_vm13 = vcmp.ge.f32.partialorder %v1132_v44, 0.0  ;;  %v1259_v42 = vmul.f32 0.2, %v1131_v39  ;;  %v3004_v55 = vld [vmem:[#allocation20_spill] sm:$0xff]  ;;  %v3005_v57 = vld [vmem:[#allocation22_spill] sm:$0xff] }
 0x332   : > { %v1260_v47 = vmul.f32 0.2, %v1132_v44  ;;  %v1133_v52 = vadd.f32 %v2638_v23, %v1057_v13  ;;  %v1134_v17 = vadd.f32 %v2640_v10, %v1058_v15  ;;  %v1135_v19 = vadd.f32 %v2638_v23, %v1059_v18 }
 0x333   : > { %1567 = vst [vmem:[%s2248_s23 + $0x50] sm:$0xff] %v1788_v25  ;;  %v1323_v56 = vsel %vm1195_vm12, %v1131_v39, %v1259_v42  ;;  %v1136_v26 = vadd.f32 %v2640_v10, %v1060_v59  ;;  %v1061_v58 = vmul.f32 %v2634_v27, %v2997_v21  ;;  %v1062_v61 = vmul.f32 %v2636_v54, %v2998_v60  ;;  %v3006_v25 = vld [vmem:[#allocation24_spill] sm:$0xff] }
 0x334   : > { %v1324_v63 = vsel %vm1196_vm13, %v1132_v44, %v1260_v47  ;;  %vm1197_vm14 = vcmp.ge.f32.partialorder %v1133_v52, 0.0  ;;  %vm1198_vm15 = vcmp.ge.f32.partialorder %v1134_v17, 0.0  ;;  %v1261_v14 = vmul.f32 0.2, %v1133_v52 }
 0x335   : > { %v1789_v41 = vpack.c.bf16 %v1324_v63, %v1323_v56  ;;  %v1262_v48 = vmul.f32 0.2, %v1134_v17  ;;  %vm1199_vm0 = vcmp.ge.f32.partialorder %v1135_v19, 0.0  ;;  %vm1200_vm1 = vcmp.ge.f32.partialorder %v1136_v26, 0.0  ;;  %v3007_v63 = vld [vmem:[#allocation26_spill] sm:$0xff] }
 0x336   : > { %v1325_v29 = vsel %vm1197_vm14, %v1133_v52, %v1261_v14  ;;  %v1263_v32 = vmul.f32 0.2, %v1135_v19  ;;  %v1264_v28 = vmul.f32 0.2, %v1136_v26  ;;  %v1137_v30 = vadd.f32 %v2638_v23, %v1061_v58 }
 0x337   : > { %1568 = vst [vmem:[%s2248_s23 + $0x58] sm:$0xff] %v1789_v41  ;;  %v1326_v45 = vsel %vm1198_vm15, %v1134_v17, %v1262_v48  ;;  %v1138_v1 = vadd.f32 %v2640_v10, %v1062_v61  ;;  %v1063_v46 = vmul.f32 %v2634_v27, %v2999_v3  ;;  %v1064_v5 = vmul.f32 %v2636_v54, %v3000_v31  ;;  %v3008_v41 = vld [vmem:[#allocation27_spill] sm:$0xff]  ;;  %v3009_v31 = vld [vmem:[#allocation28_spill] sm:$0xff] }
 0x338   : > { %v1790_v7 = vpack.c.bf16 %v1326_v45, %v1325_v29  ;;  %v1327_v50 = vsel %vm1199_vm0, %v1135_v19, %v1263_v32  ;;  %v1328_v12 = vsel %vm1200_vm1, %v1136_v26, %v1264_v28  ;;  %vm1201_vm2 = vcmp.ge.f32.partialorder %v1137_v30, 0.0 }
 0x339   : > { %v1791_v34 = vpack.c.bf16 %v1328_v12, %v1327_v50  ;;  %vm1202_vm3 = vcmp.ge.f32.partialorder %v1138_v1, 0.0  ;;  %v1265_v20 = vmul.f32 0.2, %v1137_v30  ;;  %v1266_v36 = vmul.f32 0.2, %v1138_v1 }
 0x33a   : > { %1569 = vst [vmem:[%s2248_s23 + $0x60] sm:$0xff] %v1790_v7  ;;  %v1139_v33 = vadd.f32 %v2638_v23, %v1063_v46  ;;  %v1140_v37 = vadd.f32 %v2640_v10, %v1064_v5  ;;  %v1065_v49 = vmul.f32 %v2634_v27, %v3001_v24  ;;  %v1066_v11 = vmul.f32 %v2636_v54, %v3002_v9  ;;  %v3010_v7 = vld [vmem:[#allocation29_spill] sm:$0xff] }
 0x33b   : > { %1570 = vst [vmem:[%s2248_s23 + $0x68] sm:$0xff] %v1791_v34  ;;  %v1329_v40 = vsel %vm1201_vm2, %v1137_v30, %v1265_v20  ;;  %v1330_v38 = vsel %vm1202_vm3, %v1138_v1, %v1266_v36  ;;  %v1067_v53 = vmul.f32 %v2634_v27, %v3003_v51  ;;  %v1068_v35 = vmul.f32 %v2636_v54, %v3004_v55  ;;  %v3011_v20 = vld [vmem:[#allocation30_spill] sm:$0xff]  ;;  %v3013_v55 = vld [vmem:[#allocation32_spill] sm:$0xff] }
 0x33c   : > { %v1792_v22 = vpack.c.bf16 %v1330_v38, %v1329_v40  ;;  %vm1203_vm4 = vcmp.ge.f32.partialorder %v1139_v33, 0.0  ;;  %vm1204_vm5 = vcmp.ge.f32.partialorder %v1140_v37, 0.0  ;;  %v1267_v39 = vmul.f32 0.2, %v1139_v33 }
 0x33d   : > { %v1268_v44 = vmul.f32 0.2, %v1140_v37  ;;  %v1141_v13 = vadd.f32 %v2638_v23, %v1065_v49  ;;  %v1142_v15 = vadd.f32 %v2640_v10, %v1066_v11  ;;  %v1143_v43 = vadd.f32 %v2638_v23, %v1067_v53 }
 0x33e   : > { %1571 = vst [vmem:[%s2248_s23 + $0x70] sm:$0xff] %v1792_v22  ;;  %v1331_v16 = vsel %vm1203_vm4, %v1139_v33, %v1267_v39  ;;  %v1144_v18 = vadd.f32 %v2640_v10, %v1068_v35  ;;  %v1069_v59 = vmul.f32 %v2634_v27, %v3005_v57  ;;  %v1070_v42 = vmul.f32 %v2636_v54, %v3006_v25  ;;  %v3012_v33 = vld [vmem:[#allocation31_spill] sm:$0xff]  ;;  %v3014_v22 = vld [vmem:[#allocation33_spill] sm:$0xff] }
 0x33f   : > { %v1332_v47 = vsel %vm1204_vm5, %v1140_v37, %v1268_v44  ;;  %vm1205_vm6 = vcmp.ge.f32.partialorder %v1141_v13, 0.0  ;;  %vm1206_vm7 = vcmp.ge.f32.partialorder %v1142_v15, 0.0  ;;  %v1269_v52 = vmul.f32 0.2, %v1141_v13 }
 0x340   : > { %v1793_v17 = vpack.c.bf16 %v1332_v47, %v1331_v16  ;;  %v1270_v19 = vmul.f32 0.2, %v1142_v15  ;;  %vm1207_vm8 = vcmp.ge.f32.partialorder %v1143_v43, 0.0  ;;  %vm1208_vm9 = vcmp.ge.f32.partialorder %v1144_v18, 0.0 }
 0x341   : > { %v1333_v56 = vsel %vm1205_vm6, %v1141_v13, %v1269_v52  ;;  %v1271_v26 = vmul.f32 0.2, %v1143_v43  ;;  %v1272_v21 = vmul.f32 0.2, %v1144_v18  ;;  %v1145_v58 = vadd.f32 %v2638_v23, %v1069_v59 }
 0x342   : > { %1572 = vst [vmem:[%s2248_s23 + $0x78] sm:$0xff] %v1793_v17  ;;  %v1334_v60 = vsel %vm1206_vm7, %v1142_v15, %v1270_v19  ;;  %v1146_v61 = vadd.f32 %v2640_v10, %v1070_v42  ;;  %v1071_v14 = vmul.f32 %v2634_v27, %v3007_v63  ;;  %v1072_v48 = vmul.f32 %v2636_v54, %v3008_v41 }
 0x343   : > { %v1794_v29 = vpack.c.bf16 %v1334_v60, %v1333_v56  ;;  %v1335_v32 = vsel %vm1207_vm8, %v1143_v43, %v1271_v26  ;;  %v1336_v28 = vsel %vm1208_vm9, %v1144_v18, %v1272_v21  ;;  %vm1209_vm10 = vcmp.ge.f32.partialorder %v1145_v58, 0.0 }
 0x344   : > { %v1795_v30 = vpack.c.bf16 %v1336_v28, %v1335_v32  ;;  %vm1210_vm11 = vcmp.ge.f32.partialorder %v1146_v61, 0.0  ;;  %v1273_v45 = vmul.f32 0.2, %v1145_v58  ;;  %v1274_v1 = vmul.f32 0.2, %v1146_v61 }
 0x345   : > { %1573 = vst [vmem:[%s2248_s23 + $0x80] sm:$0xff] %v1794_v29  ;;  %v1147_v3 = vadd.f32 %v2638_v23, %v1071_v14  ;;  %v1148_v46 = vadd.f32 %v2640_v10, %v1072_v48  ;;  %v1073_v5 = vmul.f32 %v2634_v27, %v3009_v31  ;;  %v1074_v50 = vmul.f32 %v2636_v54, %v3010_v7 }
 0x346   : > { %1574 = vst [vmem:[%s2248_s23 + $0x88] sm:$0xff] %v1795_v30  ;;  %v1337_v12 = vsel %vm1209_vm10, %v1145_v58, %v1273_v45  ;;  %v1338_v34 = vsel %vm1210_vm11, %v1146_v61, %v1274_v1  ;;  %v1075_v36 = vmul.f32 %v2634_v27, %v3011_v20  ;;  %v1076_v37 = vmul.f32 %v2636_v54, %v3012_v33 }
 0x347   : > { %v1796_v24 = vpack.c.bf16 %v1338_v34, %v1337_v12  ;;  %vm1211_vm12 = vcmp.ge.f32.partialorder %v1147_v3, 0.0  ;;  %vm1212_vm13 = vcmp.ge.f32.partialorder %v1148_v46, 0.0  ;;  %v1275_v49 = vmul.f32 0.2, %v1147_v3 }
 0x348   : > { %v1276_v9 = vmul.f32 0.2, %v1148_v46  ;;  %v1149_v11 = vadd.f32 %v2638_v23, %v1073_v5  ;;  %v1150_v40 = vadd.f32 %v2640_v10, %v1074_v50  ;;  %v1151_v38 = vadd.f32 %v2638_v23, %v1075_v36 }
 0x349   : > { %1575 = vst [vmem:[%s2248_s23 + $0x90] sm:$0xff] %v1796_v24  ;;  %v1339_v51 = vsel %vm1211_vm12, %v1147_v3, %v1275_v49  ;;  %v1152_v53 = vadd.f32 %v2640_v10, %v1076_v37  ;;  %v1077_v35 = vmul.f32 %v2634_v27, %v3013_v55  ;;  %v1078_v39 = vmul.f32 %v2636_v54, %v3014_v22  ;;  %v3017_v24 = vld [vmem:[#allocation36_spill] sm:$0xff] }
 0x34a   : > { %v1340_v44 = vsel %vm1212_vm13, %v1148_v46, %v1276_v9  ;;  %vm1213_vm14 = vcmp.ge.f32.partialorder %v1149_v11, 0.0  ;;  %vm1214_vm15 = vcmp.ge.f32.partialorder %v1150_v40, 0.0  ;;  %v1277_v13 = vmul.f32 0.2, %v1149_v11  ;;  %v3018_v9 = vld [vmem:[#allocation37_spill] sm:$0xff] }
 0x34b   : > { %v1797_v15 = vpack.c.bf16 %v1340_v44, %v1339_v51  ;;  %v1278_v43 = vmul.f32 0.2, %v1150_v40  ;;  %vm1215_vm0 = vcmp.ge.f32.partialorder %v1151_v38, 0.0  ;;  %vm1216_vm1 = vcmp.ge.f32.partialorder %v1152_v53, 0.0  ;;  %v3019_v44 = vld [vmem:[#allocation38_spill] sm:$0xff] }
 0x34c   : > { %v1341_v16 = vsel %vm1213_vm14, %v1149_v11, %v1277_v13  ;;  %v1279_v18 = vmul.f32 0.2, %v1151_v38  ;;  %v1280_v57 = vmul.f32 0.2, %v1152_v53  ;;  %v1153_v59 = vadd.f32 %v2638_v23, %v1077_v35 }
 0x34d   : > { %1576 = vst [vmem:[%s2248_s23 + $0x98] sm:$0xff] %v1797_v15  ;;  %v1342_v25 = vsel %vm1214_vm15, %v1150_v40, %v1278_v43  ;;  %v1154_v42 = vadd.f32 %v2640_v10, %v1078_v39  ;;  %v1079_v47 = vmul.f32 %v2634_v27, %v2351_v62  ;;  %v1080_v52 = vmul.f32 %v2636_v54, %v2355_v0  ;;  %v3020_v15 = vld [vmem:[#allocation39_spill] sm:$0xff] }
 0x34e   : > { %v1798_v17 = vpack.c.bf16 %v1342_v25, %v1341_v16  ;;  %v1343_v19 = vsel %vm1215_vm0, %v1151_v38, %v1279_v18  ;;  %v1344_v56 = vsel %vm1216_vm1, %v1152_v53, %v1280_v57  ;;  %vm1217_vm2 = vcmp.ge.f32.partialorder %v1153_v59, 0.0  ;;  %v3021_v57 = vld [vmem:[#allocation40_spill] sm:$0xff]  ;;  %v3022_v25 = vld [vmem:[#allocation42_spill] sm:$0xff] }
 0x34f   : > { %v1799_v26 = vpack.c.bf16 %v1344_v56, %v1343_v19  ;;  %vm1218_vm3 = vcmp.ge.f32.partialorder %v1154_v42, 0.0  ;;  %v1281_v21 = vmul.f32 0.2, %v1153_v59  ;;  %v1282_v58 = vmul.f32 0.2, %v1154_v42 }
 0x350   : > { %1577 = vst [vmem:[%s2248_s23 + $0xa0] sm:$0xff] %v1798_v17  ;;  %v1155_v60 = vadd.f32 %v2638_v23, %v1079_v47  ;;  %v1156_v61 = vadd.f32 %v2640_v10, %v1080_v52  ;;  %v1081_v62 = vmul.f32 %v2634_v27, %v2359_v2  ;;  %v1082_v0 = vmul.f32 %v2636_v54, %v2363_v4 }
 0x351   : > { %1578 = vst [vmem:[%s2248_s23 + $0xa8] sm:$0xff] %v1799_v26  ;;  %v1345_v63 = vsel %vm1217_vm2, %v1153_v59, %v1281_v21  ;;  %v1346_v14 = vsel %vm1218_vm3, %v1154_v42, %v1282_v58  ;;  %v1083_v41 = vmul.f32 %v2634_v27, %v2367_v6  ;;  %v1084_v48 = vmul.f32 %v2636_v54, %v2371_v8  ;;  %v3015_v6 = vld [vmem:[#allocation34_spill] sm:$0xff]  ;;  %v3016_v8 = vld [vmem:[#allocation35_spill] sm:$0xff] }
 0x352   : > { %v1800_v29 = vpack.c.bf16 %v1346_v14, %v1345_v63  ;;  %vm1219_vm4 = vcmp.ge.f32.partialorder %v1155_v60, 0.0  ;;  %vm1220_vm5 = vcmp.ge.f32.partialorder %v1156_v61, 0.0  ;;  %v1283_v32 = vmul.f32 0.2, %v1155_v60 }
 0x353   : > { %v1284_v28 = vmul.f32 0.2, %v1156_v61  ;;  %v1157_v30 = vadd.f32 %v2638_v23, %v1081_v62  ;;  %v1158_v2 = vadd.f32 %v2640_v10, %v1082_v0  ;;  %v1159_v4 = vadd.f32 %v2638_v23, %v1083_v41  ;;  %v3024_v62 = vld [vmem:[#allocation46_spill] sm:$0xff] }
 0x354   : > { %1579 = vst [vmem:[%s2248_s23 + $0xb0] sm:$0xff] %v1800_v29  ;;  %v1347_v45 = vsel %vm1219_vm4, %v1155_v60, %v1283_v32  ;;  %v1160_v1 = vadd.f32 %v2640_v10, %v1084_v48  ;;  %v1085_v3 = vmul.f32 %v2634_v27, %v3015_v6  ;;  %v1086_v46 = vmul.f32 %v2636_v54, %v3016_v8  ;;  %v3023_v60 = vld [vmem:[#allocation44_spill] sm:$0xff]  ;;  %v3026_v6 = vld [vmem:[#allocation50_spill] sm:$0xff] }
 0x355   : > { %v1348_v31 = vsel %vm1220_vm5, %v1156_v61, %v1284_v28  ;;  %vm1221_vm6 = vcmp.ge.f32.partialorder %v1157_v30, 0.0  ;;  %vm1222_vm7 = vcmp.ge.f32.partialorder %v1158_v2, 0.0  ;;  %v1285_v5 = vmul.f32 0.2, %v1157_v30 }
 0x356   : > { %v1801_v7 = vpack.c.bf16 %v1348_v31, %v1347_v45  ;;  %v1286_v50 = vmul.f32 0.2, %v1158_v2  ;;  %vm1223_vm8 = vcmp.ge.f32.partialorder %v1159_v4, 0.0  ;;  %vm1224_vm9 = vcmp.ge.f32.partialorder %v1160_v1, 0.0  ;;  %v3025_v45 = vld [vmem:[#allocation48_spill] sm:$0xff] }
 0x357   : > { %v1349_v12 = vsel %vm1221_vm6, %v1157_v30, %v1285_v5  ;;  %v1287_v34 = vmul.f32 0.2, %v1159_v4  ;;  %v1288_v20 = vmul.f32 0.2, %v1160_v1  ;;  %v1161_v36 = vadd.f32 %v2638_v23, %v1085_v3 }
 0x358   : > { %1580 = vst [vmem:[%s2248_s23 + $0xb8] sm:$0xff] %v1801_v7  ;;  %v1350_v33 = vsel %vm1222_vm7, %v1158_v2, %v1286_v50  ;;  %v1162_v37 = vadd.f32 %v2640_v10, %v1086_v46  ;;  %v1087_v49 = vmul.f32 %v2634_v27, %v3017_v24  ;;  %v1088_v11 = vmul.f32 %v2636_v54, %v3018_v9 }
 0x359   : > { %v1802_v40 = vpack.c.bf16 %v1350_v33, %v1349_v12  ;;  %v1351_v38 = vsel %vm1223_vm8, %v1159_v4, %v1287_v34  ;;  %v1352_v51 = vsel %vm1224_vm9, %v1160_v1, %v1288_v20  ;;  %vm1225_vm10 = vcmp.ge.f32.partialorder %v1161_v36, 0.0 }
 0x35a   : > { %v1803_v53 = vpack.c.bf16 %v1352_v51, %v1351_v38  ;;  %vm1226_vm11 = vcmp.ge.f32.partialorder %v1162_v37, 0.0  ;;  %v1289_v55 = vmul.f32 0.2, %v1161_v36  ;;  %v1290_v35 = vmul.f32 0.2, %v1162_v37 }
 0x35b   : > { %1581 = vst [vmem:[%s2248_s23 + $0xc0] sm:$0xff] %v1802_v40  ;;  %v1163_v22 = vadd.f32 %v2638_v23, %v1087_v49  ;;  %v1164_v39 = vadd.f32 %v2640_v10, %v1088_v11  ;;  %v1089_v13 = vmul.f32 %v2634_v27, %v3019_v44  ;;  %v1090_v43 = vmul.f32 %v2636_v54, %v3020_v15 }
 0x35c   : > { %1582 = vst [vmem:[%s2248_s23 + $0xc8] sm:$0xff] %v1803_v53  ;;  %v1353_v16 = vsel %vm1225_vm10, %v1161_v36, %v1289_v55  ;;  %v1354_v18 = vsel %vm1226_vm11, %v1162_v37, %v1290_v35  ;;  %v1091_v59 = vmul.f32 %v2634_v27, %v3021_v57  ;;  %v1092_v42 = vmul.f32 %v2636_v54, %v3022_v25 }
 0x35d   : > { %v1804_v47 = vpack.c.bf16 %v1354_v18, %v1353_v16  ;;  %vm1227_vm12 = vcmp.ge.f32.partialorder %v1163_v22, 0.0  ;;  %vm1228_vm13 = vcmp.ge.f32.partialorder %v1164_v39, 0.0  ;;  %v1291_v52 = vmul.f32 0.2, %v1163_v22 }
 0x35e   : > { %v1292_v17 = vmul.f32 0.2, %v1164_v39  ;;  %v1165_v19 = vadd.f32 %v2638_v23, %v1089_v13  ;;  %v1166_v56 = vadd.f32 %v2640_v10, %v1090_v43  ;;  %v1167_v26 = vadd.f32 %v2638_v23, %v1091_v59 }
 0x35f   : > { %1583 = vst [vmem:[%s2248_s23 + $0xd0] sm:$0xff] %v1804_v47  ;;  %v1355_v21 = vsel %vm1227_vm12, %v1163_v22, %v1291_v52  ;;  %v1168_v58 = vadd.f32 %v2640_v10, %v1092_v42  ;;  %v1093_v61 = vmul.f32 %v2634_v27, %v3023_v60  ;;  %v1094_v0 = vmul.f32 %v2636_v54, %v3024_v62 }
 0x360   : > { %v1356_v63 = vsel %vm1228_vm13, %v1164_v39, %v1292_v17  ;;  %vm1229_vm14 = vcmp.ge.f32.partialorder %v1165_v19, 0.0  ;;  %vm1230_vm15 = vcmp.ge.f32.partialorder %v1166_v56, 0.0  ;;  %v1293_v14 = vmul.f32 0.2, %v1165_v19 }
 0x361   : > { %v1805_v41 = vpack.c.bf16 %v1356_v63, %v1355_v21  ;;  %v1294_v48 = vmul.f32 0.2, %v1166_v56  ;;  %vm1231_vm0 = vcmp.ge.f32.partialorder %v1167_v26, 0.0  ;;  %vm1232_vm1 = vcmp.ge.f32.partialorder %v1168_v58, 0.0 }
 0x362   : > { %v1357_v29 = vsel %vm1229_vm14, %v1165_v19, %v1293_v14  ;;  %v1295_v32 = vmul.f32 0.2, %v1167_v26  ;;  %v1296_v28 = vmul.f32 0.2, %v1168_v58  ;;  %v1169_v30 = vadd.f32 %v2638_v23, %v1093_v61 }
 0x363   : > { %1584 = vst [vmem:[%s2248_s23 + $0xd8] sm:$0xff] %v1805_v41  ;;  %v1358_v2 = vsel %vm1230_vm15, %v1166_v56, %v1294_v48  ;;  %v1170_v4 = vadd.f32 %v2640_v10, %v1094_v0  ;;  %v1095_v1 = vmul.f32 %v2634_v27, %v3025_v45  ;;  %v1096_v3 = vmul.f32 %v2636_v54, %v3026_v6 }
 0x364   : > { %v1806_v8 = vpack.c.bf16 %v1358_v2, %v1357_v29  ;;  %v1359_v46 = vsel %vm1231_vm0, %v1167_v26, %v1295_v32  ;;  %v1360_v31 = vsel %vm1232_vm1, %v1168_v58, %v1296_v28  ;;  %vm1233_vm2 = vcmp.ge.f32.partialorder %v1169_v30, 0.0 }
 0x365   : > { %v1807_v5 = vpack.c.bf16 %v1360_v31, %v1359_v46  ;;  %vm1234_vm3 = vcmp.ge.f32.partialorder %v1170_v4, 0.0  ;;  %v1297_v7 = vmul.f32 0.2, %v1169_v30  ;;  %v1298_v50 = vmul.f32 0.2, %v1170_v4 }
 0x366   : > { %1585 = vst [vmem:[%s2248_s23 + $0xe0] sm:$0xff] %v1806_v8  ;;  %v1171_v12 = vadd.f32 %v2638_v23, %v1095_v1  ;;  %v1172_v34 = vadd.f32 %v2640_v10, %v1096_v3 }
 0x367   : > { %1586 = vst [vmem:[%s2248_s23 + $0xe8] sm:$0xff] %v1807_v5  ;;  %v1361_v27 = vsel %vm1233_vm2, %v1169_v30, %v1297_v7  ;;  %v1362_v20 = vsel %vm1234_vm3, %v1170_v4, %v1298_v50 }
 0x368   : > { %v1808_v36 = vpack.c.bf16 %v1362_v20, %v1361_v27  ;;  %vm1235_vm4 = vcmp.ge.f32.partialorder %v1171_v12, 0.0  ;;  %vm1236_vm5 = vcmp.ge.f32.partialorder %v1172_v34, 0.0  ;;  %v1299_v54 = vmul.f32 0.2, %v1171_v12 }
 0x369   : > { %v1300_v33 = vmul.f32 0.2, %v1172_v34 }
 0x36a   : > { %1587 = vst [vmem:[%s2248_s23 + $0xf0] sm:$0xff] %v1808_v36  ;;  %v1363_v37 = vsel %vm1235_vm4, %v1171_v12, %v1299_v54 }
 0x36b   : > { %v1364_v24 = vsel %vm1236_vm5, %v1172_v34, %v1300_v33 }
 0x36c   : > { %v1809_v49 = vpack.c.bf16 %v1364_v24, %v1363_v37 }
 0x36e   : > { %1588 = vst [vmem:[%s2248_s23 + $0xf8] sm:$0xff] %v1809_v49 }
 0x36f PF: > { %s16_s19 = sadd.s32 1, %s2075_s19   ;;  %s3027_s15 = smov %s2067_s17 }
 0x370   : > { %p13_p4 = scmp.ge.s32.totalorder %s16_s19, 6   ;;  %s3028_s16 = smov %s2071_s18 }
 0x371   : > { %s3029_s17 = smov %s3032_s26  ;;  %s3030_s18 = smov %s3036_s14 }
 0x372   :  { %15 = sbr.rel (!%p13_p4) target bundleno = 4 (0x4), region = 95 }
 0x379   :  { %1616 = vsyncpa [#allocation7], 1 }
 0x37a   :  { %1618 = vsyncpa [#allocation7 + $0x1], 1 }
 0x37b   :  { %1619 = vsyncpa [#allocation9], 1 }

// kernel: generator_forward.5
= control target key start
LH: loop header
LB: loop body
LE: loop exit
PB: predicated region body
PF: predicated region fallthrough
CT: control target
= control target key end

     0   :  { %9 = vsyncpa [#allocation7], 0  ;;  %s3354_s0 = inlined_call_operand.vmem [shape: bf16[128,256], index: 0, kind: input, shape index: {}]   ;;  %s3355_s1 = inlined_call_operand.hbm [shape: bf16[256,512], index: 1, kind: input, shape index: {}]   ;;  %s3356_s2 = inlined_call_operand.hbm [shape: f32[1,128], index: 2, kind: input, shape index: {}]   ;;  %s3357_s3 = inlined_call_operand.hbm [shape: f32[1,128], index: 3, kind: input, shape index: {}]   ;;  %s3358_s4 = inlined_call_operand.vmem [shape: bf16[128,512], index: 4, kind: output, shape index: {}]  }
   0x1   :  { %10 = vsyncpa [#allocation9], 0  ;;  %s2517_s15 = smov 0   ;;  %s2519_s16 = smov 0  }
   0x2   :  { %s2521_s17 = smov 0  }
   0x3 LB: > { %s2485_s18 = smov [#allocation8]   ;;  %s2023_s20 = sadd.s32 4294967295, %s2483_s17   ;;  %s2483_s17 = sphi %s2521_s17, %s16_s17   ;;  %s2479_s16 = sphi %s2519_s16, %s3591_s16   ;;  %s2475_s15 = sphi %s2517_s15, %s3590_s15  }
   0x4   : > { %s186_s19 = sshll.u32 %s2485_s18, 4  ;;  %p2025_p0 = scmp.ge.s32.totalorder %s2483_s17, 1  ;;  %s187_s19 = int_to_ptr.vmem [resolvable:$true] %s186_s19 }
   0x5   : > { %p150_p1 = scmp.lt.s32.totalorder %s2483_s17, 3  ;;  %p2535_p2 = scmp.eq.s32.totalorder %s2023_s20, 0 }
   0x6   : > { %s28_s23 = sadd.s32 1, %s2479_s16  ;;  %s2486_s26 = smov [#allocation6]  }
   0x7   : > { %s3421_s21 = scalar_select %p2535_p2, 1, 0 }
   0x8   : > { %p2539_p3 = pnand %p2025_p0, %p150_p1  ;;  %p2552_p6 = scmp.ge.s32.totalorder %s28_s23, 2 }
   0x9   : > { %s172_s27 = sshll.u32 %s2486_s26, 4  ;;  %s2369_s30 = scalar_lea.hbm %s3356_s2, 16  ;;  %s2556_s27 = int_to_ptr.vmem [resolvable:$true] %s172_s27 }
   0xa   : > { %s3422_s22 = scalar_select %p2539_p3, 1, 0 }
   0xb   : > { %p2200_p4 = pneg %p2539_p3  ;;  %p2370_p7 = scmp.ne.s32.totalorder %s3356_s2, %s2369_s30 }
   0xc   : > { %s3424_s25 = scalar_select %p2552_p6, 1, 0 }
   0xd   : > { %p2548_p5 = pnand %p2535_p2, %p2200_p4  ;;  %p2376_p11 = scmp.lt.u32.totalorder %s2369_s30, %s3356_s2 }
   0xf   : > { %p2566_p8 = pneg %p2548_p5 }
  0x11   : > { %p2372_p9 = pnand %p2566_p8, %p2370_p7 }
  0x13   : > { %p2373_p10 = pneg %p2372_p9 }
  0x15   : > { %p2378_p12 = pnand %p2376_p11, %p2373_p10 }
  0x17   : > { %2381 = shalt.err (!%p2378_p12)
}
  0x18   : > { %s2382_s10 = scalar_lea.vmem %s187_s19, 16  ;;  %s2389_s11 = scalar_lea.vmem %s187_s19, 32 }
  0x19   : > { %p2383_p13 = scmp.ne.s32.totalorder %s187_s19, %s2382_s10  ;;  %p2390_p4 = scmp.lt.s32.totalorder %s187_s19, %s187_s19 }
  0x1a   : > { %p2391_p2 = scmp.lt.s32.totalorder %s2389_s11, %s2382_s10 }
  0x1b   : > { %p2385_p0 = pnand %p2383_p13, %p2566_p8 }
  0x1c   : > { %p2392_p3 = por %p2391_p2, %p2390_p4 }
  0x1d   : > { %p2386_p1 = pneg %p2385_p0 }
  0x1f   : > { %p2393_p6 = pnand %p2392_p3, %p2386_p1 }
  0x21   : > { %2396 = shalt.err (!%p2393_p6)
}
  0x22   : > { %2206 = dma.hbm_to_vmem [thread:$0]  (!%p2548_p5), %s3356_s2, 16, %s187_s19, [#allocation9]  }
  0x23   : > { %p3426_p7 = scmp.ne.s32.totalorder %s3424_s25, 0  ;;  %s2397_s20 = scalar_lea.hbm %s3355_s1, 8192 }
  0x24   : > { %p2398_p2 = scmp.ne.s32.totalorder %s3355_s1, %s2397_s20  ;;  %p2404_p9 = scmp.lt.u32.totalorder %s2397_s20, %s3355_s1 }
  0x25   : > { %s3593_s23 = smov (%p3426_p7, %s28_s23), 0 }
  0x26   : > { %p2400_p3 = pnand %p2398_p2, %p2566_p8 }
  0x28   : > { %p2401_p6 = pneg %p2400_p3 }
  0x2a   : > { %p2406_p10 = pnand %p2404_p9, %p2401_p6 }
  0x2c   : > { %2409 = shalt.err (!%p2406_p10)
}
  0x2d   : > { %s2410_s19 = scalar_lea.vmem %s2556_s27, 8192  ;;  %p2418_p0 = scmp.lt.s32.totalorder %s2556_s27, %s2556_s27 }
  0x2e   : > { %p2411_p11 = scmp.ne.s32.totalorder %s2556_s27, %s2410_s19  ;;  %p2419_p1 = scmp.lt.s32.totalorder %s2410_s19, %s2410_s19 }
  0x30   : > { %p2413_p12 = pnand %p2411_p11, %p2566_p8  ;;  %p2420_p4 = por %p2419_p1, %p2418_p0 }
  0x32   : > { %p2414_p13 = pneg %p2413_p12 }
  0x34   : > { %p2421_p7 = pnand %p2420_p4, %p2414_p13 }
  0x36   : > { %2424 = shalt.err (!%p2421_p7)
}
  0x37   : > { %s2487_s25 = smov 256   ;;  %s2488_s5 = smov 16  }
  0x38   : > { %2203 = dma.hbm_to_vmem [thread:$0]  (!%p2548_p5), %s3355_s1, 8192, %s2556_s27, [#allocation7], %s2487_s25, %s2487_s25, %s2488_s5  }
  0x39   : > { %s2489_s9 = smov [#allocation10]   ;;  %s2425_s13 = scalar_lea.hbm %s3357_s3, 16 }
  0x3a   : > { %s197_s10 = sshll.u32 %s2489_s9, 4  ;;  %p2426_p2 = scmp.ne.s32.totalorder %s3357_s3, %s2425_s13  ;;  %s198_s10 = int_to_ptr.vmem [resolvable:$true] %s197_s10 }
  0x3b   : > { %p2432_p9 = scmp.lt.u32.totalorder %s2425_s13, %s3357_s3 }
  0x3c   : > { %p2428_p3 = pnand %p2426_p2, %p2566_p8 }
  0x3e   : > { %p2429_p6 = pneg %p2428_p3 }
  0x40   : > { %p2434_p10 = pnand %p2432_p9, %p2429_p6 }
  0x42   : > { %2437 = shalt.err (!%p2434_p10)
}
  0x43   : > { %s2438_s27 = scalar_lea.vmem %s198_s10, 16  ;;  %s2445_s28 = scalar_lea.vmem %s198_s10, 32 }
  0x44   : > { %p2439_p11 = scmp.ne.s32.totalorder %s198_s10, %s2438_s27  ;;  %p2446_p0 = scmp.lt.s32.totalorder %s198_s10, %s198_s10 }
  0x45   : > { %p2447_p1 = scmp.lt.s32.totalorder %s2445_s28, %s2438_s27 }
  0x46   : > { %p2441_p12 = pnand %p2439_p11, %p2566_p8 }
  0x47   : > { %p2448_p4 = por %p2447_p1, %p2446_p0 }
  0x48   : > { %p2442_p13 = pneg %p2441_p12 }
  0x4a   : > { %p2449_p7 = pnand %p2448_p4, %p2442_p13 }
  0x4c   : > { %2452 = shalt.err (!%p2449_p7)
}
  0x4d   : > { %2209 = dma.hbm_to_vmem [thread:$0]  (!%p2548_p5), %s3357_s3, 16, %s198_s10, [#allocation9]  }
  0x4e   : > { %p3427_p2 = scmp.ne.s32.totalorder %s3422_s22, 0 }
  0x50   : > { %210 = sbr.rel (%p3427_p2) target bundleno = 663 (0x297), region = 36 }
  0x57   : > { %p3428_p3 = scmp.ne.s32.totalorder %s3421_s21, 0 }
  0x59   : > { %2466 = dma.done.wait (%p3428_p3), [#allocation7], 8192  }
  0x5a   : > { %2468 = vsyncadd (%p3428_p3), [#allocation7], 4294959104 }
  0x5b   : > { %2470 = dma.done.wait (%p3428_p3), [#allocation9], 32  }
  0x5c   : > { %2472 = vsyncadd (%p3428_p3), [#allocation9], 4294967264  ;;  %v2247_v0 = vld [vmem:[#allocation6 + $0x4] ss:$16 sps:$4 sm:$0xff]   ;;  %v2249_v1 = vld [vmem:[#allocation6 + $0xc] ss:$16 sps:$4 sm:$0xff]  }
  0x5d   : > { %743 = vmatprep.subr.bf16.mxu0 %v2247_v0  ;;  %v2251_v2 = vld [vmem:[#allocation6] ss:$16 sps:$4 sm:$0xff]   ;;  %v2252_v3 = vld [vmem:[#allocation6 + $0x8] ss:$16 sps:$4 sm:$0xff]   ;;  %856 = vmatprep.subr.bf16.mxu1 %v2249_v1  ;;  %v2253_v4 = vld [vmem:[#allocation6 + $0x24] ss:$16 sps:$4 sm:$0xff]  }
  0x5e   : > { %744 = vmatpush1.bf16.msra.mxu0 %v2251_v2  ;;  %857 = vmatpush1.bf16.msra.mxu1 %v2252_v3  ;;  %v2255_v5 = vld [vmem:[#allocation6 + $0x2c] ss:$16 sps:$4 sm:$0xff]   ;;  %v2257_v6 = vld [vmem:[#allocation6 + $0x20] ss:$16 sps:$4 sm:$0xff]   ;;  %v2258_v7 = vld [vmem:[#allocation6 + $0x28] ss:$16 sps:$4 sm:$0xff]  }
  0x5f   : > { %745 = vmatprep.subr.bf16.mxu0 %v2253_v4  ;;  %858 = vmatprep.subr.bf16.mxu1 %v2255_v5  ;;  %v2259_v8 = vld [vmem:[#allocation6 + $0x44] ss:$16 sps:$4 sm:$0xff]   ;;  %v2261_v9 = vld [vmem:[#allocation6 + $0x4c] ss:$16 sps:$4 sm:$0xff]   ;;  %v2263_v10 = vld [vmem:[#allocation6 + $0x40] ss:$16 sps:$4 sm:$0xff]  }
  0x60   : > { %v2264_v11 = vld [vmem:[#allocation6 + $0x48] ss:$16 sps:$4 sm:$0xff]   ;;  %v2265_v12 = vld [vmem:[#allocation6 + $0x64] ss:$16 sps:$4 sm:$0xff]   ;;  %v2267_v13 = vld [vmem:[#allocation6 + $0x6c] ss:$16 sps:$4 sm:$0xff]  }
  0x61   : > { %v2269_v14 = vld [vmem:[#allocation6 + $0x60] ss:$16 sps:$4 sm:$0xff]   ;;  %v2270_v15 = vld [vmem:[#allocation6 + $0x68] ss:$16 sps:$4 sm:$0xff]   ;;  %v2271_v16 = vld [vmem:[#allocation6 + $0x84] ss:$16 sps:$4 sm:$0xff]  }
  0x62   : > { %746 = vmatpush1.bf16.msra.mxu0 %v2257_v6  ;;  %859 = vmatpush1.bf16.msra.mxu1 %v2258_v7  ;;  %v2273_v17 = vld [vmem:[#allocation6 + $0x8c] ss:$16 sps:$4 sm:$0xff]   ;;  %v2275_v18 = vld [vmem:[#allocation6 + $0x80] ss:$16 sps:$4 sm:$0xff]   ;;  %v2276_v19 = vld [vmem:[#allocation6 + $0x88] ss:$16 sps:$4 sm:$0xff]  }
  0x63   : > { %747 = vmatprep.subr.bf16.mxu0 %v2259_v8  ;;  %860 = vmatprep.subr.bf16.mxu1 %v2261_v9  ;;  %v2277_v20 = vld [vmem:[#allocation6 + $0xa4] ss:$16 sps:$4 sm:$0xff]   ;;  %v2279_v21 = vld [vmem:[#allocation6 + $0xac] ss:$16 sps:$4 sm:$0xff]   ;;  %v2281_v22 = vld [vmem:[#allocation6 + $0xa0] ss:$16 sps:$4 sm:$0xff]  }
  0x64   : > { %v2282_v23 = vld [vmem:[#allocation6 + $0xa8] ss:$16 sps:$4 sm:$0xff]   ;;  %v2283_v24 = vld [vmem:[#allocation6 + $0xc4] ss:$16 sps:$4 sm:$0xff]   ;;  %v2285_v25 = vld [vmem:[#allocation6 + $0xcc] ss:$16 sps:$4 sm:$0xff]  }
  0x65   : > { %v2287_v26 = vld [vmem:[#allocation6 + $0xc0] ss:$16 sps:$4 sm:$0xff]   ;;  %v2288_v27 = vld [vmem:[#allocation6 + $0xc8] ss:$16 sps:$4 sm:$0xff]   ;;  %v2289_v28 = vld [vmem:[#allocation6 + $0xe4] ss:$16 sps:$4 sm:$0xff]  }
  0x66   : > { %748 = vmatpush1.bf16.msra.mxu0 %v2263_v10  ;;  %861 = vmatpush1.bf16.msra.mxu1 %v2264_v11  ;;  %v2291_v29 = vld [vmem:[#allocation6 + $0xec] ss:$16 sps:$4 sm:$0xff]   ;;  %v2293_v30 = vld [vmem:[#allocation6 + $0xe0] ss:$16 sps:$4 sm:$0xff]   ;;  %v2294_v31 = vld [vmem:[#allocation6 + $0xe8] ss:$16 sps:$4 sm:$0xff]  }
  0x67   : > { %749 = vmatprep.subr.bf16.mxu0 %v2265_v12  ;;  %862 = vmatprep.subr.bf16.mxu1 %v2267_v13  ;;  %v2295_v32 = vld [vmem:[#allocation6 + $0x104] ss:$16 sps:$4 sm:$0xff]   ;;  %v2297_v33 = vld [vmem:[#allocation6 + $0x10c] ss:$16 sps:$4 sm:$0xff]   ;;  %v2299_v34 = vld [vmem:[#allocation6 + $0x100] ss:$16 sps:$4 sm:$0xff]  }
  0x68   : > { %v2300_v35 = vld [vmem:[#allocation6 + $0x108] ss:$16 sps:$4 sm:$0xff]   ;;  %v2301_v36 = vld [vmem:[#allocation6 + $0x124] ss:$16 sps:$4 sm:$0xff]   ;;  %v2303_v37 = vld [vmem:[#allocation6 + $0x12c] ss:$16 sps:$4 sm:$0xff]  }
  0x69   : > { %v2305_v38 = vld [vmem:[#allocation6 + $0x120] ss:$16 sps:$4 sm:$0xff]   ;;  %v2306_v39 = vld [vmem:[#allocation6 + $0x128] ss:$16 sps:$4 sm:$0xff]   ;;  %v2307_v40 = vld [vmem:[#allocation6 + $0x144] ss:$16 sps:$4 sm:$0xff]  }
  0x6a   : > { %750 = vmatpush1.bf16.msra.mxu0 %v2269_v14  ;;  %863 = vmatpush1.bf16.msra.mxu1 %v2270_v15  ;;  %v2309_v41 = vld [vmem:[#allocation6 + $0x14c] ss:$16 sps:$4 sm:$0xff]   ;;  %v2311_v42 = vld [vmem:[#allocation6 + $0x140] ss:$16 sps:$4 sm:$0xff]   ;;  %v2312_v43 = vld [vmem:[#allocation6 + $0x148] ss:$16 sps:$4 sm:$0xff]  }
  0x6b   : > { %751 = vmatprep.subr.bf16.mxu0 %v2271_v16  ;;  %864 = vmatprep.subr.bf16.mxu1 %v2273_v17  ;;  %v2313_v44 = vld [vmem:[#allocation6 + $0x164] ss:$16 sps:$4 sm:$0xff]   ;;  %v2315_v45 = vld [vmem:[#allocation6 + $0x16c] ss:$16 sps:$4 sm:$0xff]   ;;  %v2317_v46 = vld [vmem:[#allocation6 + $0x160] ss:$16 sps:$4 sm:$0xff]  }
  0x6c   : > { %v2318_v47 = vld [vmem:[#allocation6 + $0x168] ss:$16 sps:$4 sm:$0xff]   ;;  %v2345_v48 = vld [vmem:[%s3354_s0 + $0x4] ss:$8 sps:$4 sm:$0xff]   ;;  %v2323_v51 = vld [vmem:[#allocation6 + $0x180] ss:$16 sps:$4 sm:$0xff]  }
  0x6d   : > { %v2319_v49 = vld [vmem:[#allocation6 + $0x184] ss:$16 sps:$4 sm:$0xff]   ;;  %v2321_v50 = vld [vmem:[#allocation6 + $0x18c] ss:$16 sps:$4 sm:$0xff]   ;;  %775 = vmatprep.mubr.bf16.mxu0 %v2345_v48  ;;  %888 = vmatprep.mubr.bf16.mxu1 %v2345_v48  ;;  %v2324_v52 = vld [vmem:[#allocation6 + $0x188] ss:$16 sps:$4 sm:$0xff]  }
  0x6e   : > { %752 = vmatpush1.bf16.msra.mxu0 %v2275_v18  ;;  %865 = vmatpush1.bf16.msra.mxu1 %v2276_v19  ;;  %v2325_v53 = vld [vmem:[#allocation6 + $0x1a4] ss:$16 sps:$4 sm:$0xff]   ;;  %v2327_v54 = vld [vmem:[#allocation6 + $0x1ac] ss:$16 sps:$4 sm:$0xff]   ;;  %v2329_v55 = vld [vmem:[#allocation6 + $0x1a0] ss:$16 sps:$4 sm:$0xff]  }
  0x6f   : > { %753 = vmatprep.subr.bf16.mxu0 %v2277_v20  ;;  %866 = vmatprep.subr.bf16.mxu1 %v2279_v21  ;;  %v2330_v56 = vld [vmem:[#allocation6 + $0x1a8] ss:$16 sps:$4 sm:$0xff]   ;;  %v2331_v57 = vld [vmem:[#allocation6 + $0x1c4] ss:$16 sps:$4 sm:$0xff]   ;;  %v2333_v58 = vld [vmem:[#allocation6 + $0x1cc] ss:$16 sps:$4 sm:$0xff]  }
  0x70   : > { %v2335_v59 = vld [vmem:[#allocation6 + $0x1c0] ss:$16 sps:$4 sm:$0xff]   ;;  %v2336_v60 = vld [vmem:[#allocation6 + $0x1c8] ss:$16 sps:$4 sm:$0xff]   ;;  %v2337_v61 = vld [vmem:[#allocation6 + $0x1e4] ss:$16 sps:$4 sm:$0xff]  }
  0x71   : > { %v2339_v62 = vld [vmem:[#allocation6 + $0x1ec] ss:$16 sps:$4 sm:$0xff]   ;;  %v2341_v63 = vld [vmem:[#allocation6 + $0x1e0] ss:$16 sps:$4 sm:$0xff]   ;;  %v2342_v0 = vld [vmem:[#allocation6 + $0x1e8] ss:$16 sps:$4 sm:$0xff]  }
  0x72   : > { %754 = vmatpush1.bf16.msra.mxu0 %v2281_v22  ;;  %867 = vmatpush1.bf16.msra.mxu1 %v2282_v23  ;;  %v2343_v1 = vld [vmem:[%s3354_s0] ss:$8 sps:$4 sm:$0xff]   ;;  %v2346_v2 = vld [vmem:[%s3354_s0 + $0x14] ss:$8 sps:$4 sm:$0xff]   ;;  %v2348_v3 = vld [vmem:[%s3354_s0 + $0x10] ss:$8 sps:$4 sm:$0xff]  }
  0x73   : > { %755 = vmatprep.subr.bf16.mxu0 %v2283_v24  ;;  %868 = vmatprep.subr.bf16.mxu1 %v2285_v25  ;;  %v2349_v4 = vld [vmem:[%s3354_s0 + $0x24] ss:$8 sps:$4 sm:$0xff]   ;;  %v2351_v5 = vld [vmem:[%s3354_s0 + $0x20] ss:$8 sps:$4 sm:$0xff]   ;;  %v2352_v6 = vld [vmem:[%s3354_s0 + $0x34] ss:$8 sps:$4 sm:$0xff]  }
  0x74   : > { %v2354_v7 = vld [vmem:[%s3354_s0 + $0x30] ss:$8 sps:$4 sm:$0xff]   ;;  %v2355_v8 = vld [vmem:[%s3354_s0 + $0x44] ss:$8 sps:$4 sm:$0xff]   ;;  %v2357_v9 = vld [vmem:[%s3354_s0 + $0x40] ss:$8 sps:$4 sm:$0xff]  }
  0x75   : > { %v2358_v10 = vld [vmem:[%s3354_s0 + $0x54] ss:$8 sps:$4 sm:$0xff]   ;;  %v2360_v11 = vld [vmem:[%s3354_s0 + $0x50] ss:$8 sps:$4 sm:$0xff]   ;;  %v2361_v12 = vld [vmem:[%s3354_s0 + $0x64] ss:$8 sps:$4 sm:$0xff]  }
  0x76   : > { %756 = vmatpush1.bf16.msra.mxu0 %v2287_v26  ;;  %869 = vmatpush1.bf16.msra.mxu1 %v2288_v27  ;;  %v2363_v13 = vld [vmem:[%s3354_s0 + $0x60] ss:$8 sps:$4 sm:$0xff]   ;;  %v2364_v14 = vld [vmem:[%s3354_s0 + $0x74] ss:$8 sps:$4 sm:$0xff]   ;;  %v2366_v15 = vld [vmem:[%s3354_s0 + $0x70] ss:$8 sps:$4 sm:$0xff]  }
  0x77   : > { %757 = vmatprep.subr.bf16.mxu0 %v2289_v28  ;;  %870 = vmatprep.subr.bf16.mxu1 %v2291_v29  ;;  %p969_p5 = scmp.eq.s32.totalorder %s2475_s15, 0 }
  0x7a   : > { %758 = vmatpush1.bf16.msra.mxu0 %v2293_v30  ;;  %871 = vmatpush1.bf16.msra.mxu1 %v2294_v31 }
  0x7b   : > { %759 = vmatprep.subr.bf16.mxu0 %v2295_v32  ;;  %872 = vmatprep.subr.bf16.mxu1 %v2297_v33 }
  0x7e   : > { %760 = vmatpush1.bf16.msra.mxu0 %v2299_v34  ;;  %873 = vmatpush1.bf16.msra.mxu1 %v2300_v35 }
  0x7f   : > { %761 = vmatprep.subr.bf16.mxu0 %v2301_v36  ;;  %874 = vmatprep.subr.bf16.mxu1 %v2303_v37 }
  0x82   : > { %762 = vmatpush1.bf16.msra.mxu0 %v2305_v38  ;;  %875 = vmatpush1.bf16.msra.mxu1 %v2306_v39 }
  0x83   : > { %763 = vmatprep.subr.bf16.mxu0 %v2307_v40  ;;  %876 = vmatprep.subr.bf16.mxu1 %v2309_v41 }
  0x86   : > { %764 = vmatpush1.bf16.msra.mxu0 %v2311_v42  ;;  %877 = vmatpush1.bf16.msra.mxu1 %v2312_v43 }
  0x87   : > { %765 = vmatprep.subr.bf16.mxu0 %v2313_v44  ;;  %878 = vmatprep.subr.bf16.mxu1 %v2315_v45 }
  0x8a   : > { %766 = vmatpush1.bf16.msra.mxu0 %v2317_v46  ;;  %879 = vmatpush1.bf16.msra.mxu1 %v2318_v47 }
  0x8b   : > { %767 = vmatprep.subr.bf16.mxu0 %v2319_v49  ;;  %880 = vmatprep.subr.bf16.mxu1 %v2321_v50 }
  0x8e   : > { %768 = vmatpush1.bf16.msra.mxu0 %v2323_v51  ;;  %881 = vmatpush1.bf16.msra.mxu1 %v2324_v52 }
  0x8f   : > { %769 = vmatprep.subr.bf16.mxu0 %v2325_v53  ;;  %882 = vmatprep.subr.bf16.mxu1 %v2327_v54 }
  0x92   : > { %770 = vmatpush1.bf16.msra.mxu0 %v2329_v55  ;;  %883 = vmatpush1.bf16.msra.mxu1 %v2330_v56 }
  0x93   : > { %771 = vmatprep.subr.bf16.mxu0 %v2331_v57  ;;  %884 = vmatprep.subr.bf16.mxu1 %v2333_v58 }
  0x96   : > { %772 = vmatpush1.bf16.msra.mxu0 %v2335_v59  ;;  %885 = vmatpush1.bf16.msra.mxu1 %v2336_v60 }
  0x97   : > { %773 = vmatprep.subr.bf16.mxu0 %v2337_v61  ;;  %886 = vmatprep.subr.bf16.mxu1 %v2339_v62 }
  0x9a   : > { %774 = vmatpush1.bf16.msra.mxu0 %v2341_v63  ;;  %887 = vmatpush1.bf16.msra.mxu1 %v2342_v0 }
  0x9d   : > { %776 = vmatmul.mubr.bf16.vlgmr.msra.gmra.mrb[0].mxu0 %v2343_v1  ;;  %889 = vmatmul.mubr.bf16.vlgmr.msra.gmra.mrb[0].mxu1 %v2343_v1 }
  0x9e   : > { %785 = vmatprep.mubr.bf16.mxu0 %v2346_v2  ;;  %898 = vmatprep.mubr.bf16.mxu1 %v2346_v2 }
  0xa5   : > { %786 = vmatmul.mubr.bf16.gmra.mrb[4].mxu0 %v2348_v3  ;;  %899 = vmatmul.mubr.bf16.gmra.mrb[4].mxu1 %v2348_v3 }
  0xa6   : > { %795 = vmatprep.mubr.bf16.mxu0 %v2349_v4  ;;  %908 = vmatprep.mubr.bf16.mxu1 %v2349_v4 }
  0xad   : > { %796 = vmatmul.mubr.bf16.gmra.mrb[8].mxu0 %v2351_v5  ;;  %909 = vmatmul.mubr.bf16.gmra.mrb[8].mxu1 %v2351_v5 }
  0xae   : > { %805 = vmatprep.mubr.bf16.mxu0 %v2352_v6  ;;  %918 = vmatprep.mubr.bf16.mxu1 %v2352_v6 }
  0xb5   : > { %806 = vmatmul.mubr.bf16.gmra.mrb[12].mxu0 %v2354_v7  ;;  %919 = vmatmul.mubr.bf16.gmra.mrb[12].mxu1 %v2354_v7 }
  0xb6   : > { %815 = vmatprep.mubr.bf16.mxu0 %v2355_v8  ;;  %928 = vmatprep.mubr.bf16.mxu1 %v2355_v8 }
  0xbd   : > { %816 = vmatmul.mubr.bf16.gmra.mrb[16].mxu0 %v2357_v9  ;;  %929 = vmatmul.mubr.bf16.gmra.mrb[16].mxu1 %v2357_v9 }
  0xbe   : > { %825 = vmatprep.mubr.bf16.mxu0 %v2358_v10  ;;  %938 = vmatprep.mubr.bf16.mxu1 %v2358_v10 }
  0xc5   : > { %826 = vmatmul.mubr.bf16.gmra.mrb[20].mxu0 %v2360_v11  ;;  %939 = vmatmul.mubr.bf16.gmra.mrb[20].mxu1 %v2360_v11 }
  0xc6   : > { %835 = vmatprep.mubr.bf16.mxu0 %v2361_v12  ;;  %948 = vmatprep.mubr.bf16.mxu1 %v2361_v12 }
  0xcd   : > { %836 = vmatmul.mubr.bf16.gmra.mrb[24].mxu0 %v2363_v13  ;;  %949 = vmatmul.mubr.bf16.gmra.mrb[24].mxu1 %v2363_v13 }
  0xce   : > { %845 = vmatprep.mubr.bf16.mxu0 %v2364_v14  ;;  %958 = vmatprep.mubr.bf16.mxu1 %v2364_v14 }
  0xd5   : > { %846 = vmatmul.mubr.bf16.gmra.mrb[28].mxu0 %v2366_v15  ;;  %959 = vmatmul.mubr.bf16.gmra.mrb[28].mxu1 %v2366_v15 }
 0x170   : > { %v2686_v16 = vpop.f32.mrb[0].mxu0  ;;  %v2688_v17 = vpop.f32.mrb[0].mxu1 }
 0x171   : > { %3429 = vst [vmem:[#allocation13_spill] sm:$0xff] %v2686_v16  ;;  %3430 = vst [vmem:[#allocation14_spill] sm:$0xff] %v2688_v17  ;;  %v2690_v18 = vpop.f32.mrb[1].mxu0  ;;  %v2692_v19 = vpop.f32.mrb[1].mxu1 }
 0x172   : > { %3431 = vst [vmem:[#allocation15_spill] sm:$0xff] %v2690_v18  ;;  %3432 = vst [vmem:[#allocation16_spill] sm:$0xff] %v2692_v19  ;;  %v2694_v20 = vpop.f32.mrb[2].mxu0  ;;  %v2696_v21 = vpop.f32.mrb[2].mxu1 }
 0x173   : > { %3433 = vst [vmem:[#allocation17_spill] sm:$0xff] %v2694_v20  ;;  %3434 = vst [vmem:[#allocation18_spill] sm:$0xff] %v2696_v21  ;;  %v2698_v22 = vpop.f32.mrb[3].mxu0  ;;  %v2700_v23 = vpop.f32.mrb[3].mxu1 }
 0x174   : > { %3435 = vst [vmem:[#allocation19_spill] sm:$0xff] %v2698_v22  ;;  %3436 = vst [vmem:[#allocation20_spill] sm:$0xff] %v2700_v23 }
 0x178   : > { %v2702_v24 = vpop.f32.mrb[4].mxu0  ;;  %v2704_v25 = vpop.f32.mrb[4].mxu1 }
 0x179   : > { %3437 = vst [vmem:[#allocation21_spill] sm:$0xff] %v2702_v24  ;;  %3438 = vst [vmem:[#allocation22_spill] sm:$0xff] %v2704_v25  ;;  %v2706_v26 = vpop.f32.mrb[5].mxu0  ;;  %v2708_v27 = vpop.f32.mrb[5].mxu1 }
 0x17a   : > { %3439 = vst [vmem:[#allocation23_spill] sm:$0xff] %v2706_v26  ;;  %3440 = vst [vmem:[#allocation24_spill] sm:$0xff] %v2708_v27  ;;  %v2710_v28 = vpop.f32.mrb[6].mxu0  ;;  %v2712_v29 = vpop.f32.mrb[6].mxu1 }
 0x17b   : > { %3441 = vst [vmem:[#allocation25_spill] sm:$0xff] %v2710_v28  ;;  %3442 = vst [vmem:[#allocation26_spill] sm:$0xff] %v2712_v29  ;;  %v2714_v30 = vpop.f32.mrb[7].mxu0  ;;  %v2716_v31 = vpop.f32.mrb[7].mxu1 }
 0x17c   : > { %3443 = vst [vmem:[#allocation27_spill] sm:$0xff] %v2714_v30  ;;  %3444 = vst [vmem:[#allocation28_spill] sm:$0xff] %v2716_v31 }
 0x180   : > { %v2718_v32 = vpop.f32.mrb[8].mxu0  ;;  %v2720_v33 = vpop.f32.mrb[8].mxu1 }
 0x181   : > { %3445 = vst [vmem:[#allocation29_spill] sm:$0xff] %v2718_v32  ;;  %3446 = vst [vmem:[#allocation30_spill] sm:$0xff] %v2720_v33  ;;  %v2722_v34 = vpop.f32.mrb[9].mxu0  ;;  %v2724_v35 = vpop.f32.mrb[9].mxu1 }
 0x182   : > { %3447 = vst [vmem:[#allocation31_spill] sm:$0xff] %v2722_v34  ;;  %3448 = vst [vmem:[#allocation32_spill] sm:$0xff] %v2724_v35  ;;  %v2726_v36 = vpop.f32.mrb[10].mxu0  ;;  %v2728_v37 = vpop.f32.mrb[10].mxu1 }
 0x183   : > { %3449 = vst [vmem:[#allocation33_spill] sm:$0xff] %v2726_v36  ;;  %3450 = vst [vmem:[#allocation34_spill] sm:$0xff] %v2728_v37  ;;  %v2730_v38 = vpop.f32.mrb[11].mxu0  ;;  %v2732_v39 = vpop.f32.mrb[11].mxu1 }
 0x184   : > { %3451 = vst [vmem:[#allocation35_spill] sm:$0xff] %v2730_v38  ;;  %3452 = vst [vmem:[#allocation36_spill] sm:$0xff] %v2732_v39 }
 0x188   : > { %v2734_v40 = vpop.f32.mrb[12].mxu0  ;;  %v2736_v41 = vpop.f32.mrb[12].mxu1 }
 0x189   : > { %3453 = vst [vmem:[#allocation37_spill] sm:$0xff] %v2734_v40  ;;  %3454 = vst [vmem:[#allocation38_spill] sm:$0xff] %v2736_v41  ;;  %v2738_v42 = vpop.f32.mrb[13].mxu0  ;;  %v2740_v43 = vpop.f32.mrb[13].mxu1 }
 0x18a   : > { %3455 = vst [vmem:[#allocation39_spill] sm:$0xff] %v2738_v42  ;;  %3456 = vst [vmem:[#allocation40_spill] sm:$0xff] %v2740_v43  ;;  %v2742_v44 = vpop.f32.mrb[14].mxu0  ;;  %v2744_v45 = vpop.f32.mrb[14].mxu1 }
 0x18b   : > { %3457 = vst [vmem:[#allocation41_spill] sm:$0xff] %v2742_v44  ;;  %3458 = vst [vmem:[#allocation42_spill] sm:$0xff] %v2744_v45  ;;  %v2746_v46 = vpop.f32.mrb[15].mxu0  ;;  %v2748_v47 = vpop.f32.mrb[15].mxu1 }
 0x18c   : > { %3459 = vst [vmem:[#allocation43_spill] sm:$0xff] %v2746_v46  ;;  %3460 = vst [vmem:[#allocation44_spill] sm:$0xff] %v2748_v47 }
 0x190   : > { %v2750_v48 = vpop.f32.mrb[16].mxu0  ;;  %v2752_v49 = vpop.f32.mrb[16].mxu1 }
 0x191   : > { %v2754_v50 = vpop.f32.mrb[17].mxu0  ;;  %v2756_v51 = vpop.f32.mrb[17].mxu1 }
 0x192   : > { %v2758_v52 = vpop.f32.mrb[18].mxu0  ;;  %v2760_v53 = vpop.f32.mrb[18].mxu1 }
 0x193   : > { %3461 = vst [vmem:[#allocation45_spill] sm:$0xff] %v2760_v53  ;;  %v2762_v54 = vpop.f32.mrb[19].mxu0  ;;  %v2764_v55 = vpop.f32.mrb[19].mxu1 }
 0x194   : > { %3462 = vst [vmem:[#allocation46_spill] sm:$0xff] %v2764_v55 }
 0x198   : > { %v2766_v56 = vpop.f32.mrb[20].mxu0  ;;  %v2768_v57 = vpop.f32.mrb[20].mxu1 }
 0x199   : > { %3463 = vst [vmem:[#allocation47_spill] sm:$0xff] %v2766_v56  ;;  %3464 = vst [vmem:[#allocation48_spill] sm:$0xff] %v2768_v57  ;;  %v2770_v58 = vpop.f32.mrb[21].mxu0  ;;  %v2772_v59 = vpop.f32.mrb[21].mxu1 }
 0x19a   : > { %3465 = vst [vmem:[#allocation49_spill] sm:$0xff] %v2770_v58  ;;  %3466 = vst [vmem:[#allocation50_spill] sm:$0xff] %v2772_v59  ;;  %v2774_v60 = vpop.f32.mrb[22].mxu0  ;;  %v2776_v61 = vpop.f32.mrb[22].mxu1 }
 0x19b   : > { %3467 = vst [vmem:[#allocation51_spill] sm:$0xff] %v2774_v60  ;;  %3468 = vst [vmem:[#allocation52_spill] sm:$0xff] %v2776_v61  ;;  %v2778_v62 = vpop.f32.mrb[23].mxu0  ;;  %v2780_v63 = vpop.f32.mrb[23].mxu1 }
 0x19c   : > { %3469 = vst [vmem:[#allocation53_spill] sm:$0xff] %v2778_v62  ;;  %3470 = vst [vmem:[#allocation54_spill] sm:$0xff] %v2780_v63 }
 0x1a0   : > { %v2782_v0 = vpop.f32.mrb[24].mxu0  ;;  %v2784_v1 = vpop.f32.mrb[24].mxu1 }
 0x1a1   : > { %3471 = vst [vmem:[#allocation55_spill] sm:$0xff] %v2782_v0  ;;  %3472 = vst [vmem:[#allocation56_spill] sm:$0xff] %v2784_v1  ;;  %v2786_v2 = vpop.f32.mrb[25].mxu0  ;;  %v2788_v3 = vpop.f32.mrb[25].mxu1 }
 0x1a2   : > { %3473 = vst [vmem:[#allocation57_spill] sm:$0xff] %v2786_v2  ;;  %3474 = vst [vmem:[#allocation58_spill] sm:$0xff] %v2788_v3  ;;  %v2790_v4 = vpop.f32.mrb[26].mxu0  ;;  %v2792_v5 = vpop.f32.mrb[26].mxu1 }
 0x1a3   : > { %3475 = vst [vmem:[#allocation59_spill] sm:$0xff] %v2790_v4  ;;  %3476 = vst [vmem:[#allocation60_spill] sm:$0xff] %v2792_v5  ;;  %v2794_v6 = vpop.f32.mrb[27].mxu0  ;;  %v2796_v7 = vpop.f32.mrb[27].mxu1 }
 0x1a4   : > { %3477 = vst [vmem:[#allocation61_spill] sm:$0xff] %v2794_v6  ;;  %3478 = vst [vmem:[#allocation62_spill] sm:$0xff] %v2796_v7  ;;  %v975_v7 = vlaneseq (%p969_p5) }
 0x1a6   : > { %974 = sbr.rel (!%p969_p5) target bundleno = 430 (0x1ae), region = 52  ;;  %vm977_vm0 = vcmp.lt.s32.totalorder (%p969_p5), %v975_v7, 512 }
 0x1a8   : > { %v2798_v8 = vpop.f32.mrb[28].mxu0  ;;  %v2800_v9 = vpop.f32.mrb[28].mxu1 }
 0x1a9   : > { %3479 = vst [vmem:[#allocation63_spill] sm:$0xff] %v2798_v8  ;;  %3480 = vst [vmem:[#allocation64_spill] sm:$0xff] %v2800_v9  ;;  %v2802_v10 = vpop.f32.mrb[29].mxu0  ;;  %v2804_v11 = vpop.f32.mrb[29].mxu1  ;;  %v2490_v8 = vmov (%p969_p5), 0.0  }
 0x1aa   : > { %3481 = vst [vmem:[#allocation65_spill] sm:$0xff] %v2802_v10  ;;  %3482 = vst [vmem:[#allocation66_spill] sm:$0xff] %v2804_v11  ;;  %v2806_v12 = vpop.f32.mrb[30].mxu0  ;;  %v2808_v13 = vpop.f32.mrb[30].mxu1 }
 0x1ab   : > { %3483 = vst [vmem:[#allocation67_spill] sm:$0xff] %v2806_v12  ;;  %3484 = vst [vmem:[#allocation68_spill] sm:$0xff] %v2808_v13  ;;  %v2810_v14 = vpop.f32.mrb[31].mxu0  ;;  %v2812_v15 = vpop.f32.mrb[31].mxu1 }
 0x1ac   : > { %3485 = vst [vmem:[#allocation69_spill] sm:$0xff] %v2810_v14  ;;  %3486 = vst [vmem:[#allocation70_spill] sm:$0xff] %v2812_v15 }
 0x1ad   : > { %979 = vst.msk [vmem:[#allocation2] sm:$0xf] %vm977_vm0, %v2490_v8  ;;  %980 = vst.msk [vmem:[#allocation3] sm:$0xf] %vm977_vm0, %v2490_v8 }
 0x1ae PF: > { %p2115_p8 = scmp.ne.s32.totalorder %s2475_s15, 0 }
 0x1af   : > { %v985_v12 = vadd.f32 (!%p2115_p8), %v2694_v20, %v2686_v16  ;;  %v1006_v13 = vadd.f32 (!%p2115_p8), %v2698_v22, %v2690_v18  ;;  %v1027_v15 = vadd.f32 (!%p2115_p8), %v2696_v21, %v2688_v17  ;;  %v1048_v14 = vadd.f32 (!%p2115_p8), %v2700_v23, %v2692_v19 }
 0x1b0   : > { %983 = sbr.rel (%p2115_p8) target bundleno = 520 (0x208), region = 56 }
 0x1b1   : > { %v986_v7 = vadd.f32 (!%p2115_p8), %v985_v12, %v2702_v24  ;;  %v1007_v8 = vadd.f32 (!%p2115_p8), %v1006_v13, %v2706_v26  ;;  %v1028_v11 = vadd.f32 (!%p2115_p8), %v1027_v15, %v2704_v25  ;;  %v1049_v9 = vadd.f32 (!%p2115_p8), %v1048_v14, %v2708_v27 }
 0x1b3   : > { %v987_v10 = vadd.f32 (!%p2115_p8), %v986_v7, %v2710_v28  ;;  %v1008_v5 = vadd.f32 (!%p2115_p8), %v1007_v8, %v2714_v30  ;;  %v1029_v6 = vadd.f32 (!%p2115_p8), %v1028_v11, %v2712_v29  ;;  %v1050_v4 = vadd.f32 (!%p2115_p8), %v1049_v9, %v2716_v31 }
 0x1b5   : > { %v988_v21 = vadd.f32 (!%p2115_p8), %v987_v10, %v2718_v32  ;;  %v1009_v23 = vadd.f32 (!%p2115_p8), %v1008_v5, %v2722_v34  ;;  %v1030_v12 = vadd.f32 (!%p2115_p8), %v1029_v6, %v2720_v33  ;;  %v1051_v13 = vadd.f32 (!%p2115_p8), %v1050_v4, %v2724_v35 }
 0x1b7   : > { %v989_v15 = vadd.f32 %v988_v21, %v2726_v36  ;;  %v1010_v14 = vadd.f32 %v1009_v23, %v2730_v38  ;;  %v1031_v7 = vadd.f32 %v1030_v12, %v2728_v37  ;;  %v1052_v8 = vadd.f32 %v1051_v13, %v2732_v39 }
 0x1b9   : > { %v990_v11 = vadd.f32 %v989_v15, %v2734_v40  ;;  %v1011_v9 = vadd.f32 %v1010_v14, %v2738_v42  ;;  %v1032_v10 = vadd.f32 %v1031_v7, %v2736_v41  ;;  %v1053_v5 = vadd.f32 %v1052_v8, %v2740_v43 }
 0x1ba   : > { %v2491_v42 = vmov 1966171168   ;;  %v3378_v41 = vlaneseq }
 0x1bb   : > { %v991_v6 = vadd.f32 %v990_v11, %v2742_v44  ;;  %v1012_v4 = vadd.f32 %v1011_v9, %v2746_v46  ;;  %v1033_v21 = vadd.f32 %v1032_v10, %v2744_v45  ;;  %v1054_v23 = vadd.f32 %v1053_v5, %v2748_v47 }
 0x1bc   : > { %v1076_v7 = vunpack.c.l.s4 %v2491_v42  ;;  %v1079_v42 = vshrl.u32 %v3378_v41, 7 }
 0x1bd   : > { %v992_v12 = vadd.f32 %v991_v6, %v2750_v48  ;;  %v1013_v13 = vadd.f32 %v1012_v4, %v2754_v50  ;;  %v1034_v15 = vadd.f32 %v1033_v21, %v2752_v49  ;;  %v1055_v14 = vadd.f32 %v1054_v23, %v2756_v51 }
 0x1be   : > { %v1077_v23 = vunpack.c.0.s8 %v1076_v7  ;;  %v2876_v7 = vmul.f32 %v2688_v17, %v2688_v17 }
 0x1bf   : > { %v993_v8 = vadd.f32 %v992_v12, %v2758_v52  ;;  %v1014_v11 = vadd.f32 %v1013_v13, %v2762_v54  ;;  %v1035_v9 = vadd.f32 %v1034_v15, %v2760_v53  ;;  %v1056_v10 = vadd.f32 %v1055_v14, %v2764_v55 }
 0x1c0   : > { %v2864_v12 = vmul.f32 %v2686_v16, %v2686_v16  ;;  %v2868_v13 = vmul.f32 %v2690_v18, %v2690_v18  ;;  %v2890_v17 = vsub.s32 %v1077_v23, %v1079_v42  ;;  %v3487_v18 = vld [vmem:[#allocation18_spill] sm:$0xff]  ;;  %v3488_v16 = vld [vmem:[#allocation20_spill] sm:$0xff]  ;;  %v1114_v23 = vmul.f32 %v2706_v26, %v2706_v26 }
 0x1c1   : > { %v994_v5 = vadd.f32 %v993_v8, %v2766_v56  ;;  %v1015_v6 = vadd.f32 %v1014_v11, %v2770_v58  ;;  %v1036_v4 = vadd.f32 %v1035_v9, %v2768_v57  ;;  %v1057_v21 = vadd.f32 %v1056_v10, %v2772_v59 }
 0x1c2   : > { %v2880_v9 = vmul.f32 %v2692_v19, %v2692_v19  ;;  %v1109_v10 = vmul.f32 %v2694_v20, %v2694_v20  ;;  %v1111_v19 = vmul.f32 %v3487_v18, %v3487_v18  ;;  %v1113_v20 = vmul.f32 %v2702_v24, %v2702_v24  ;;  %v3494_v24 = vld [vmem:[#allocation65_spill] sm:$0xff] }
 0x1c3   : > { %v995_v15 = vadd.f32 %v994_v5, %v2774_v60  ;;  %v1016_v14 = vadd.f32 %v1015_v6, %v2778_v62  ;;  %v1037_v8 = vadd.f32 %v1036_v4, %v2776_v61  ;;  %v1058_v11 = vadd.f32 %v1057_v21, %v2780_v63 }
 0x1c4   : > { %v1110_v5 = vmul.f32 %v2698_v22, %v2698_v22  ;;  %v1112_v63 = vmul.f32 %v3488_v16, %v3488_v16  ;;  %v3489_v22 = vld [vmem:[#allocation59_spill] sm:$0xff]  ;;  %v1115_v18 = vmul.f32 %v2704_v25, %v2704_v25  ;;  %v1116_v16 = vmul.f32 %v2708_v27, %v2708_v27 }
 0x1c5   : > { %v996_v6 = vadd.f32 %v995_v15, %v2782_v0  ;;  %v1017_v4 = vadd.f32 %v1016_v14, %v2786_v2  ;;  %v1038_v21 = vadd.f32 %v1037_v8, %v2784_v1  ;;  %v1059_v41 = vadd.f32 %v1058_v11, %v2788_v3  ;;  %v3490_v15 = vld [vmem:[#allocation61_spill] sm:$0xff]  ;;  %v3491_v14 = vld [vmem:[#allocation60_spill] sm:$0xff]  ;;  %v3492_v8 = vld [vmem:[#allocation62_spill] sm:$0xff] }
 0x1c6   : > { %v1117_v42 = vmul.f32 %v2710_v28, %v2710_v28  ;;  %v3493_v11 = vld [vmem:[#allocation63_spill] sm:$0xff]  ;;  %v1118_v26 = vmul.f32 %v2714_v30, %v2714_v30  ;;  %v1119_v25 = vmul.f32 %v2712_v29, %v2712_v29  ;;  %v1120_v27 = vmul.f32 %v2716_v31, %v2716_v31  ;;  %v3502_v3 = vld [vmem:[#allocation38_spill] sm:$0xff] }
 0x1c7   : > { %v997_v61 = vadd.f32 %v996_v6, %v3489_v22  ;;  %v1018_v0 = vadd.f32 %v1017_v4, %v3490_v15  ;;  %v1039_v2 = vadd.f32 %v1038_v21, %v3491_v14  ;;  %v1060_v1 = vadd.f32 %v1059_v41, %v3492_v8  ;;  %v3495_v15 = vld [vmem:[#allocation64_spill] sm:$0xff]  ;;  %v3496_v14 = vld [vmem:[#allocation66_spill] sm:$0xff]  ;;  %v3497_v8 = vld [vmem:[#allocation67_spill] sm:$0xff] }
 0x1c8   : > { %v1121_v28 = vmul.f32 %v2718_v32, %v2718_v32  ;;  %v1122_v30 = vmul.f32 %v2722_v34, %v2722_v34  ;;  %v1123_v29 = vmul.f32 %v2720_v33, %v2720_v33  ;;  %v1124_v31 = vmul.f32 %v2724_v35, %v2724_v35 }
 0x1c9   : > { %v998_v6 = vadd.f32 %v997_v61, %v3493_v11  ;;  %v1019_v4 = vadd.f32 %v1018_v0, %v3494_v24  ;;  %v1040_v21 = vadd.f32 %v1039_v2, %v3495_v15  ;;  %v1061_v41 = vadd.f32 %v1060_v1, %v3496_v14  ;;  %v3498_v11 = vld [vmem:[#allocation69_spill] sm:$0xff]  ;;  %v3499_v24 = vld [vmem:[#allocation68_spill] sm:$0xff]  ;;  %v3500_v15 = vld [vmem:[#allocation70_spill] sm:$0xff] }
 0x1ca   : > { %v1125_v32 = vmul.f32 %v2726_v36, %v2726_v36  ;;  %v1128_v34 = vmul.f32 %v2732_v39, %v2732_v39  ;;  %v1129_v33 = vmul.f32 %v2734_v40, %v2734_v40  ;;  %v1131_v62 = vmul.f32 %v3502_v3, %v3502_v3 }
 0x1cb   : > { %v999_v61 = vadd.f32 %v998_v6, %v3497_v8  ;;  %v1020_v0 = vadd.f32 %v1019_v4, %v3498_v11  ;;  %v1041_v2 = vadd.f32 %v1040_v21, %v3499_v24  ;;  %v1062_v1 = vadd.f32 %v1061_v41, %v3500_v15  ;;  %v3501_v11 = vld [vmem:[#allocation39_spill] sm:$0xff] }
 0x1cc   : > { %v1126_v21 = vmul.f32 %v2730_v38, %v2730_v38  ;;  %v1127_v41 = vmul.f32 %v2728_v37, %v2728_v37  ;;  %v1130_v22 = vmul.f32 %v3501_v11, %v3501_v11  ;;  %v1132_v38 = vmul.f32 %v2740_v43, %v2740_v43 }
 0x1cd   : > { %v1000_v14 = vrot.slane %v999_v61, 4  ;;  %v1021_v6 = vrot.slane %v1020_v0, 4  ;;  %v1042_v8 = vrot.slane %v1041_v2, 4  ;;  %v1063_v4 = vrot.slane %v1062_v1, 4 }
 0x1ce   : > { %v1133_v37 = vmul.f32 %v2742_v44, %v2742_v44  ;;  %v1136_v11 = vmul.f32 %v2748_v47, %v2748_v47  ;;  %v1169_v3 = vadd.f32 %v1109_v10, %v2864_v12  ;;  %v1211_v44 = vadd.f32 %v1111_v19, %v2876_v7 }
 0x1cf   : > { %v1001_v35 = vadd.f32 %v1000_v14, %v999_v61  ;;  %v1022_v15 = vadd.f32 %v1021_v6, %v1020_v0  ;;  %v1043_v24 = vadd.f32 %v1042_v8, %v1041_v2  ;;  %v1064_v36 = vadd.f32 %v1063_v4, %v1062_v1 }
 0x1d0   : > { %v1134_v14 = vmul.f32 %v2746_v46, %v2746_v46  ;;  %v1135_v8 = vmul.f32 %v2744_v45, %v2744_v45  ;;  %v1170_v6 = vadd.f32 %v1169_v3, %v1113_v20  ;;  %v1190_v4 = vadd.f32 %v1110_v5, %v2868_v13 }
 0x1d1   : > { %v1002_v39 = vrot.slane %v1001_v35, 2  ;;  %v1023_v60 = vrot.slane %v1022_v15, 2  ;;  %v1044_v59 = vrot.slane %v1043_v24, 2  ;;  %v1065_v40 = vrot.slane %v1064_v36, 2 }
 0x1d2   : > { %v1232_v43 = vadd.f32 %v1112_v63, %v2880_v9  ;;  %v1171_v56 = vadd.f32 %v1170_v6, %v1117_v42  ;;  %v1191_v55 = vadd.f32 %v1190_v4, %v1114_v23  ;;  %v1212_v47 = vadd.f32 %v1211_v44, %v1115_v18  ;;  %v3507_v18 = vld [vmem:[#allocation46_spill] sm:$0xff]  ;;  %v3512_v6 = vld [vmem:[#allocation51_spill] sm:$0xff] }
 0x1d3   : > { %v1003_v61 = vadd.f32 %v1002_v39, %v1001_v35  ;;  %v1024_v0 = vadd.f32 %v1023_v60, %v1022_v15  ;;  %v1045_v2 = vadd.f32 %v1044_v59, %v1043_v24  ;;  %v1066_v1 = vadd.f32 %v1065_v40, %v1064_v36 }
 0x1d4   : > { %v1233_v53 = vadd.f32 %v1232_v43, %v1116_v16  ;;  %v3503_v36 = vlaneseq  ;;  %v1172_v19 = vadd.f32 %v1171_v56, %v1121_v28  ;;  %v1192_v40 = vadd.f32 %v1191_v55, %v1118_v26  ;;  %v984_v56 = vld [vmem:[#allocation2] sm:$0xf]  ;;  %v3508_v16 = vld [vmem:[#allocation47_spill] sm:$0xff] }
 0x1d5   : > { %v1004_v46 = vrot.slane %v1003_v61, 1  ;;  %v1025_v57 = vrot.slane %v1024_v0, 1  ;;  %v1046_v58 = vrot.slane %v1045_v2, 1  ;;  %v1067_v45 = vrot.slane %v1066_v1, 1 }
 0x1d6   : > { %vm2961_vm1 = vcmp.lt.s32.totalorder %v3503_v36, 512  ;;  %v1213_v59 = vadd.f32 %v1212_v47, %v1119_v25  ;;  %v1234_v60 = vadd.f32 %v1233_v53, %v1120_v27  ;;  %v1137_v7 = vmul.f32 %v2750_v48, %v2750_v48 }
 0x1d7   : > { %v1005_v12 = vadd.f32 %v1004_v46, %v1003_v61  ;;  %v1026_v35 = vadd.f32 %v1025_v57, %v1024_v0  ;;  %v1047_v39 = vadd.f32 %v1046_v58, %v1045_v2  ;;  %v1068_v24 = vadd.f32 %v1067_v45, %v1066_v1 }
 0x1d8   : > { %v1138_v43 = vmul.f32 %v2754_v50, %v2754_v50  ;;  %v1173_v44 = vadd.f32 %v1172_v19, %v1125_v32  ;;  %v1193_v46 = vadd.f32 %v1192_v40, %v1122_v30  ;;  %v1214_v45 = vadd.f32 %v1213_v59, %v1123_v29  ;;  %v3515_v19 = vld [vmem:[#allocation54_spill] sm:$0xff]  ;;  %v3516_v59 = vld [vmem:[#allocation55_spill] sm:$0xff] }
 0x1d9   : > { %v1073_v63 = vcombine.low %v1005_v12, %v1026_v35  ;;  %v1074_v13 = vcombine.low %v1047_v39, %v1068_v24  ;;  %v1235_v57 = vadd.f32 %v1234_v60, %v1124_v31  ;;  %v1139_v25 = vmul.f32 %v2752_v49, %v2752_v49  ;;  %v3506_v31 = vld [vmem:[#allocation45_spill] sm:$0xff] }
 0x1da   : > { %v1140_v26 = vmul.f32 %v2756_v51, %v2756_v51  ;;  %v1174_v27 = vadd.f32 %v1173_v44, %v1129_v33  ;;  %v1194_v28 = vadd.f32 %v1193_v46, %v1126_v21  ;;  %v1215_v47 = vadd.f32 %v1214_v45, %v1127_v41  ;;  %v3509_v21 = vld [vmem:[#allocation49_spill] sm:$0xff]  ;;  %v3518_v45 = vld [vmem:[#allocation56_spill] sm:$0xff] }
 0x1db   : > { %v1081_v58 = vrot.slane %v1073_v63, %v2890_v17  ;;  %v1088_v9 = vrot.slane %v1074_v13, %v2890_v17  ;;  %v1236_v53 = vadd.f32 %v1235_v57, %v1128_v34  ;;  %v1141_v30 = vmul.f32 %v2758_v52, %v2758_v52  ;;  %v3517_v44 = vld [vmem:[#allocation57_spill] sm:$0xff] }
 0x1dc   : > { %v1142_v29 = vmul.f32 %v2762_v54, %v2762_v54  ;;  %v1143_v32 = vmul.f32 %v3506_v31, %v3506_v31  ;;  %v1175_v10 = vadd.f32 %v1174_v27, %v1133_v37  ;;  %v1195_v5 = vadd.f32 %v1194_v28, %v1130_v22  ;;  %v3510_v37 = vld [vmem:[#allocation48_spill] sm:$0xff] }
 0x1dd   : > { %v1089_v55 = vcombine.low %v1081_v58, %v1088_v9  ;;  %v1216_v15 = vadd.f32 %v1215_v47, %v1131_v62  ;;  %v1237_v23 = vadd.f32 %v1236_v53, %v1132_v38  ;;  %v1144_v34 = vmul.f32 %v3507_v18, %v3507_v18  ;;  %v3511_v38 = vld [vmem:[#allocation50_spill] sm:$0xff] }
 0x1de   : > { %v1145_v42 = vmul.f32 %v3508_v16, %v3508_v16  ;;  %v1146_v41 = vmul.f32 %v3509_v21, %v3509_v21  ;;  %v1176_v3 = vadd.f32 %v1175_v10, %v1137_v7  ;;  %v1196_v61 = vadd.f32 %v1195_v5, %v1134_v14  ;;  %v3513_v14 = vld [vmem:[#allocation53_spill] sm:$0xff]  ;;  %v3519_v58 = vld [vmem:[#allocation58_spill] sm:$0xff]  ;;  %v3524_v10 = vld [vmem:[#allocation63_spill] sm:$0xff] }
 0x1df   : > { %v1096_v33 = vrot.slane %v1089_v55, %v2890_v17  ;;  %v1217_v0 = vadd.f32 %v1216_v15, %v1135_v8  ;;  %v1238_v2 = vadd.f32 %v1237_v23, %v1136_v11  ;;  %v1147_v22 = vmul.f32 %v3510_v37, %v3510_v37  ;;  %v3514_v11 = vld [vmem:[#allocation52_spill] sm:$0xff]  ;;  %v3521_v55 = vld [vmem:[#allocation61_spill] sm:$0xff] }
 0x1e0   : > { %v1148_v62 = vmul.f32 %v3511_v38, %v3511_v38  ;;  %v1149_v4 = vmul.f32 %v3512_v6, %v3512_v6  ;;  %v1177_v12 = vadd.f32 %v1176_v3, %v1141_v30  ;;  %v1197_v35 = vadd.f32 %v1196_v61, %v1138_v43  ;;  %v3528_v61 = vld [vmem:[#allocation67_spill] sm:$0xff]  ;;  %v3529_v38 = vld [vmem:[#allocation69_spill] sm:$0xff]  ;;  %v3530_v6 = vld [vmem:[#allocation68_spill] sm:$0xff] }
 0x1e1   : > { %v1098_v1 = vadd.f32 %v1096_v33, %v984_v56  ;;  %v1218_v39 = vadd.f32 %v1217_v0, %v1139_v25  ;;  %v1239_v24 = vadd.f32 %v1238_v2, %v1140_v26  ;;  %v1150_v8 = vmul.f32 %v3513_v14, %v3513_v14  ;;  %v3520_v25 = vld [vmem:[#allocation59_spill] sm:$0xff] }
 0x1e2   : > { %v1151_v36 = vmul.f32 %v3514_v11, %v3514_v11  ;;  %v1152_v40 = vmul.f32 %v3515_v19, %v3515_v19  ;;  %v1153_v60 = vmul.f32 %v3516_v59, %v3516_v59  ;;  %v1178_v63 = vadd.f32 %v1177_v12, %v1145_v42  ;;  %v3526_v42 = vld [vmem:[#allocation64_spill] sm:$0xff]  ;;  %v3531_v12 = vld [vmem:[#allocation70_spill] sm:$0xff] }
 0x1e3   : > { %1103 = vst.msk [vmem:[#allocation2] sm:$0xf] %vm2961_vm1, %v1098_v1  ;;  %v1198_v13 = vadd.f32 %v1197_v35, %v1142_v29  ;;  %v1219_v7 = vadd.f32 %v1218_v39, %v1143_v32  ;;  %v1240_v43 = vadd.f32 %v1239_v24, %v1144_v34  ;;  %v1154_v46 = vmul.f32 %v3517_v44, %v3517_v44  ;;  %v3522_v29 = vld [vmem:[#allocation60_spill] sm:$0xff]  ;;  %v3523_v32 = vld [vmem:[#allocation62_spill] sm:$0xff]  ;;  %v3525_v34 = vld [vmem:[#allocation65_spill] sm:$0xff] }
 0x1e4   : > { %v1155_v57 = vmul.f32 %v3518_v45, %v3518_v45  ;;  %v1156_v9 = vmul.f32 %v3519_v58, %v3519_v58  ;;  %v1157_v26 = vmul.f32 %v3520_v25, %v3520_v25  ;;  %v1179_v27 = vadd.f32 %v1178_v63, %v1149_v4 }
 0x1e5   : > { %v1199_v28 = vadd.f32 %v1198_v13, %v1146_v41  ;;  %v1220_v47 = vadd.f32 %v1219_v7, %v1147_v22  ;;  %v1241_v53 = vadd.f32 %v1240_v43, %v1148_v62  ;;  %v1158_v30 = vmul.f32 %v3521_v55, %v3521_v55  ;;  %v3527_v41 = vld [vmem:[#allocation66_spill] sm:$0xff] }
 0x1e6   : > { %v1159_v31 = vmul.f32 %v3522_v29, %v3522_v29  ;;  %v1160_v56 = vmul.f32 %v3523_v32, %v3523_v32  ;;  %v1161_v5 = vmul.f32 %v3524_v10, %v3524_v10  ;;  %v1180_v15 = vadd.f32 %v1179_v27, %v1153_v60 }
 0x1e7   : > { %v1200_v23 = vadd.f32 %v1199_v28, %v1150_v8  ;;  %v1221_v33 = vadd.f32 %v1220_v47, %v1151_v36  ;;  %v1242_v18 = vadd.f32 %v1241_v53, %v1152_v40  ;;  %v1162_v16 = vmul.f32 %v3525_v34, %v3525_v34 }
 0x1e8   : > { %v1163_v21 = vmul.f32 %v3526_v42, %v3526_v42  ;;  %v1164_v3 = vmul.f32 %v3527_v41, %v3527_v41  ;;  %v1165_v0 = vmul.f32 %v3528_v61, %v3528_v61  ;;  %v1181_v2 = vadd.f32 %v1180_v15, %v1157_v26  ;;  %v1104_v42 = vld [vmem:[#allocation3] sm:$0xf] }
 0x1e9   : > { %v1201_v1 = vadd.f32 %v1200_v23, %v1154_v46  ;;  %v1222_v37 = vadd.f32 %v1221_v33, %v1155_v57  ;;  %v1243_v22 = vadd.f32 %v1242_v18, %v1156_v9  ;;  %v1166_v62 = vmul.f32 %v3529_v38, %v3529_v38 }
 0x1ea   : > { %v1167_v4 = vmul.f32 %v3530_v6, %v3530_v6  ;;  %v1168_v35 = vmul.f32 %v3531_v12, %v3531_v12  ;;  %v1182_v39 = vadd.f32 %v1181_v2, %v1161_v5 }
 0x1eb   : > { %v1202_v24 = vadd.f32 %v1201_v1, %v1158_v30  ;;  %v1223_v14 = vadd.f32 %v1222_v37, %v1159_v31  ;;  %v1244_v8 = vadd.f32 %v1243_v22, %v1160_v56 }
 0x1ec   : > { %v1183_v11 = vadd.f32 %v1182_v39, %v1165_v0 }
 0x1ed   : > { %v1203_v36 = vadd.f32 %v1202_v24, %v1162_v16  ;;  %v1224_v19 = vadd.f32 %v1223_v14, %v1163_v21  ;;  %v1245_v40 = vadd.f32 %v1244_v8, %v1164_v3 }
 0x1ee   : > { %v1184_v59 = vrot.slane %v1183_v11, 4 }
 0x1ef   : > { %v1204_v60 = vadd.f32 %v1203_v36, %v1166_v62  ;;  %v1225_v63 = vadd.f32 %v1224_v19, %v1167_v4  ;;  %v1246_v13 = vadd.f32 %v1245_v40, %v1168_v35 }
 0x1f0   : > { %v1185_v7 = vadd.f32 %v1184_v59, %v1183_v11 }
 0x1f1   : > { %v1205_v43 = vrot.slane %v1204_v60, 4  ;;  %v1226_v44 = vrot.slane %v1225_v63, 4  ;;  %v1247_v46 = vrot.slane %v1246_v13, 4 }
 0x1f2   : > { %v1186_v45 = vrot.slane %v1185_v7, 2 }
 0x1f3   : > { %v1206_v57 = vadd.f32 %v1205_v43, %v1204_v60  ;;  %v1227_v58 = vadd.f32 %v1226_v44, %v1225_v63  ;;  %v1248_v9 = vadd.f32 %v1247_v46, %v1246_v13 }
 0x1f4   : > { %v1187_v25 = vadd.f32 %v1186_v45, %v1185_v7 }
 0x1f5   : > { %v1207_v26 = vrot.slane %v1206_v57, 2  ;;  %v1228_v27 = vrot.slane %v1227_v58, 2  ;;  %v1249_v28 = vrot.slane %v1248_v9, 2 }
 0x1f6   : > { %v1188_v47 = vrot.slane %v1187_v25, 1 }
 0x1f7   : > { %v1208_v53 = vadd.f32 %v1207_v26, %v1206_v57  ;;  %v1229_v55 = vadd.f32 %v1228_v27, %v1227_v58  ;;  %v1250_v30 = vadd.f32 %v1249_v28, %v1248_v9 }
 0x1f8   : > { %v1189_v29 = vadd.f32 %v1188_v47, %v1187_v25 }
 0x1f9   : > { %v1209_v31 = vrot.slane %v1208_v53, 1  ;;  %v1230_v32 = vrot.slane %v1229_v55, 1  ;;  %v1251_v56 = vrot.slane %v1250_v30, 1 }
 0x1fb   : > { %v1210_v10 = vadd.f32 %v1209_v31, %v1208_v53  ;;  %v1231_v5 = vadd.f32 %v1230_v32, %v1229_v55  ;;  %v1252_v15 = vadd.f32 %v1251_v56, %v1250_v30 }
 0x1fd   : > { %v1257_v23 = vcombine.low %v1189_v29, %v1210_v10  ;;  %v1258_v33 = vcombine.low %v1231_v5, %v1252_v15 }
 0x1ff   : > { %v1265_v18 = vrot.slane %v1257_v23, %v2890_v17  ;;  %v1272_v34 = vrot.slane %v1258_v33, %v2890_v17 }
 0x201   : > { %v1273_v16 = vcombine.low %v1265_v18, %v1272_v34 }
 0x203   : > { %v1280_v21 = vrot.slane %v1273_v16, %v2890_v17 }
 0x205   : > { %v1282_v41 = vadd.f32 %v1280_v21, %v1104_v42 }
 0x207   : > { %1283 = vst.msk [vmem:[#allocation3] sm:$0xf] %vm2961_vm1, %v1282_v41 }
 0x208 PF: > { %p1284_p6 = scmp.eq.s32.totalorder %s2475_s15, 1 }
 0x209   : > { %v1289_v3 = vld [vmem:[#allocation2] sm:$0x1] (%p1284_p6)  ;;  %v1291_v0 = vld [vmem:[#allocation2 + $0x1] sm:$0x1] (%p1284_p6)  ;;  %v1295_v37 = vld [vmem:[#allocation2 + $0x2] sm:$0x1] (%p1284_p6)  ;;  %v1316_v36 = vlaneseq (%p1284_p6) }
 0x20a   : > { %1288 = sbr.rel (!%p1284_p6) target bundleno = 560 (0x230), region = 60  ;;  %v1292_v2 = vadd.f32 (%p1284_p6), %v1291_v0, %v1289_v3  ;;  %v1299_v62 = vld [vmem:[#allocation2 + $0x3] sm:$0x1] (%p1284_p6)  ;;  %v1311_v19 = vld [vmem:[#allocation8] sm:$0x1] (%p1284_p6) }
 0x20b   : > { %vm1318_vm2 = vcmp.lt.s32.totalorder (%p1284_p6), %v1316_v36, 128  ;;  %v1313_v60 = vld [vmem:[#allocation10] sm:$0x1] (%p1284_p6) }
 0x20c   : > { %v1296_v6 = vadd.f32 (%p1284_p6), %v1295_v37, %v1292_v2 }
 0x20e   : > { %v1290_v61 = vld [vmem:[#allocation3] sm:$0x1] (%p1284_p6)  ;;  %v1293_v1 = vld [vmem:[#allocation3 + $0x1] sm:$0x1] (%p1284_p6)  ;;  %v1297_v22 = vld [vmem:[#allocation3 + $0x2] sm:$0x1] (%p1284_p6)  ;;  %v1300_v12 = vadd.f32 (%p1284_p6), %v1299_v62, %v1296_v6 }
 0x20f   : > { %v1294_v38 = vadd.f32 (%p1284_p6), %v1293_v1, %v1290_v61  ;;  %v1301_v4 = vld [vmem:[#allocation3 + $0x3] sm:$0x1] (%p1284_p6) }
 0x210   : > { %v1304_v20 = vmul.f32 (%p1284_p6), 0.001953125, %v1300_v12 }
 0x211   : > { %v1298_v17 = vadd.f32 %v1297_v22, %v1294_v38 }
 0x212   : > { %v1306_v24 = vmul.f32 %v1304_v20, %v1304_v20 }
 0x213   : > { %v1302_v35 = vadd.f32 %v1301_v4, %v1298_v17 }
 0x215   : > { %v1305_v39 = vmul.f32 0.001953125, %v1302_v35 }
 0x217   : > { %v1307_v14 = vsub.f32 %v1305_v39, %v1306_v24 }
 0x219   : > { %v1308_v8 = vmax.f32 %v1307_v14, 0.0 }
 0x21b   : > { %v1309_v11 = vadd.f32 1e-05, %v1308_v8 }
 0x21d   : > { %2367 = vrsqrt.f32 %v1309_v11 }
 0x227   : > { %v2368_v40 = vpop.eup %2367 }
 0x228   : > { %v1312_v59 = vmul.f32 %v2368_v40, %v1311_v19 }
 0x22a   : > { %1320 = vst.msk [vmem:[#allocation4] sm:$0x1] %vm1318_vm2, %v1312_v59  ;;  %1322 = vst.msk [vmem:[#allocation4 + $0x1] sm:$0x1] %vm1318_vm2, %v1312_v59  ;;  %v1314_v63 = vmul.f32 %v1312_v59, %v1304_v20 }
 0x22b   : > { %1324 = vst.msk [vmem:[#allocation4 + $0x2] sm:$0x1] %vm1318_vm2, %v1312_v59  ;;  %1326 = vst.msk [vmem:[#allocation4 + $0x3] sm:$0x1] %vm1318_vm2, %v1312_v59 }
 0x22c   : > { %v1315_v13 = vsub.f32 %v1313_v60, %v1314_v63 }
 0x22e   : > { %1321 = vst.msk [vmem:[#allocation5] sm:$0x1] %vm1318_vm2, %v1315_v13  ;;  %1323 = vst.msk [vmem:[#allocation5 + $0x1] sm:$0x1] %vm1318_vm2, %v1315_v13 }
 0x22f   : > { %1325 = vst.msk [vmem:[#allocation5 + $0x2] sm:$0x1] %vm1318_vm2, %v1315_v13  ;;  %1327 = vst.msk [vmem:[#allocation5 + $0x3] sm:$0x1] %vm1318_vm2, %v1315_v13 }
 0x230 PF: > { %p2117_p9 = scmp.ne.s32.totalorder %s2475_s15, 1 }
 0x231   : > { %v1333_v7 = vlaneseq (!%p2117_p9)  ;;  %v3532_v29 = vld [vmem:[#allocation13_spill] sm:$0xff] (!%p2117_p9)  ;;  %v3533_v32 = vld [vmem:[#allocation15_spill] sm:$0xff] (!%p2117_p9)  ;;  %v3536_v33 = vld [vmem:[#allocation14_spill] sm:$0xff] (!%p2117_p9) }
 0x232   : > { %1330 = sbr.rel (%p2117_p9) target bundleno = 663 (0x297), region = 64  ;;  %v1331_v44 = vld [vmem:[#allocation4] sm:$0xf] (!%p2117_p9)  ;;  %v3534_v10 = vld [vmem:[#allocation17_spill] sm:$0xff] (!%p2117_p9)  ;;  %v3537_v34 = vld [vmem:[#allocation16_spill] sm:$0xff] (!%p2117_p9) }
 0x233   : > { %v1334_v43 = vshrl.u32 (!%p2117_p9), %v1333_v7, 7  ;;  %v3535_v15 = vld [vmem:[#allocation19_spill] sm:$0xff] (!%p2117_p9)  ;;  %v3538_v42 = vld [vmem:[#allocation18_spill] sm:$0xff] (!%p2117_p9)  ;;  %v3539_v41 = vld [vmem:[#allocation20_spill] sm:$0xff] (!%p2117_p9) }
 0x234   : > { %v3540_v60 = vld [vmem:[#allocation21_spill] sm:$0xff] (!%p2117_p9)  ;;  %v3541_v7 = vld [vmem:[#allocation23_spill] sm:$0xff] (!%p2117_p9) }
 0x235   : > { %v1335_v45 = vsub.s32 (!%p2117_p9), 0, %v1334_v43  ;;  %v1339_v57 = vsub.s32 (!%p2117_p9), 1, %v1334_v43  ;;  %v1343_v58 = vsub.s32 (!%p2117_p9), 2, %v1334_v43  ;;  %v1347_v9 = vsub.s32 (!%p2117_p9), 3, %v1334_v43 }
 0x236   : > { %v1417_v46 = vld [vmem:[#allocation5] sm:$0xf] (!%p2117_p9) }
 0x237   : > { %v3041_v25 = vrot.slane (!%p2117_p9), %v1331_v44, %v1335_v45  ;;  %v3043_v26 = vrot.slane (!%p2117_p9), %v1331_v44, %v1339_v57  ;;  %v3045_v27 = vrot.slane (!%p2117_p9), %v1417_v46, %v1335_v45  ;;  %v3047_v28 = vrot.slane (!%p2117_p9), %v1417_v46, %v1339_v57  ;;  %v3543_v45 = vld [vmem:[#allocation24_spill] sm:$0xff] (!%p2117_p9) }
 0x238   : > { %v3049_v47 = vrot.slane (!%p2117_p9), %v1331_v44, %v1343_v58  ;;  %v3051_v53 = vrot.slane (!%p2117_p9), %v1331_v44, %v1347_v9  ;;  %v3053_v55 = vrot.slane (!%p2117_p9), %v1417_v46, %v1343_v58  ;;  %v3055_v30 = vrot.slane (!%p2117_p9), %v1417_v46, %v1347_v9  ;;  %v3542_v44 = vld [vmem:[#allocation22_spill] sm:$0xff] (!%p2117_p9) }
 0x239   : > { %v1353_v31 = vmul.f32 %v3041_v25, %v3532_v29  ;;  %v1354_v56 = vmul.f32 %v3043_v26, %v3533_v32  ;;  %v1357_v5 = vmul.f32 %v3041_v25, %v3534_v10  ;;  %v1358_v23 = vmul.f32 %v3043_v26, %v3535_v15 }
 0x23a   : > { %v1355_v18 = vmul.f32 %v3049_v47, %v3536_v33  ;;  %v1356_v16 = vmul.f32 %v3051_v53, %v3537_v34  ;;  %v1359_v21 = vmul.f32 %v3049_v47, %v3538_v42  ;;  %v1360_v3 = vmul.f32 %v3051_v53, %v3539_v41 }
 0x23b   : > { %v1439_v61 = vadd.f32 %v3045_v27, %v1353_v31  ;;  %v1440_v0 = vadd.f32 %v3047_v28, %v1354_v56  ;;  %v1443_v2 = vadd.f32 %v3045_v27, %v1357_v5  ;;  %v1444_v1 = vadd.f32 %v3047_v28, %v1358_v23  ;;  %v3544_v23 = vld [vmem:[#allocation25_spill] sm:$0xff] }
 0x23c   : > { %v1441_v37 = vadd.f32 %v3053_v55, %v1355_v18  ;;  %v1442_v22 = vadd.f32 %v3055_v30, %v1356_v16  ;;  %v1445_v38 = vadd.f32 %v3053_v55, %v1359_v21  ;;  %v1446_v62 = vadd.f32 %v3055_v30, %v1360_v3  ;;  %v3545_v18 = vld [vmem:[#allocation27_spill] sm:$0xff] }
 0x23d   : > { %vm1503_vm3 = vcmp.ge.f32.partialorder %v1439_v61, 0.0  ;;  %vm1504_vm4 = vcmp.ge.f32.partialorder %v1440_v0, 0.0  ;;  %v1567_v6 = vmul.f32 0.2, %v1439_v61  ;;  %v1568_v4 = vmul.f32 0.2, %v1440_v0 }
 0x23e   : > { %vm1505_vm5 = vcmp.ge.f32.partialorder %v1441_v37, 0.0  ;;  %vm1506_vm6 = vcmp.ge.f32.partialorder %v1442_v22, 0.0  ;;  %v1569_v17 = vmul.f32 0.2, %v1441_v37  ;;  %v1570_v12 = vmul.f32 0.2, %v1442_v22 }
 0x23f   : > { %v1631_v35 = vsel %vm1503_vm3, %v1439_v61, %v1567_v6  ;;  %v1632_v20 = vsel %vm1504_vm4, %v1440_v0, %v1568_v4  ;;  %vm1507_vm7 = vcmp.ge.f32.partialorder %v1443_v2, 0.0  ;;  %vm1508_vm8 = vcmp.ge.f32.partialorder %v1444_v1, 0.0 }
 0x240   : > { %v2156_v39 = vpack.c.bf16 %v1632_v20, %v1631_v35  ;;  %v1633_v24 = vsel %vm1505_vm5, %v1441_v37, %v1569_v17  ;;  %v1634_v14 = vsel %vm1506_vm6, %v1442_v22, %v1570_v12  ;;  %v1571_v8 = vmul.f32 0.2, %v1443_v2  ;;  %v3547_v37 = vld [vmem:[#allocation28_spill] sm:$0xff] }
 0x241   : > { %v2157_v11 = vpack.c.bf16 %v1634_v14, %v1633_v24  ;;  %v1572_v36 = vmul.f32 0.2, %v1444_v1  ;;  %vm1509_vm9 = vcmp.ge.f32.partialorder %v1445_v38, 0.0  ;;  %vm1510_vm10 = vcmp.ge.f32.partialorder %v1446_v62, 0.0  ;;  %v3549_v14 = vld [vmem:[#allocation31_spill] sm:$0xff] }
 0x242   : > { %1887 = vst [vmem:[%s3358_s4] sm:$0xff] %v2156_v39  ;;  %v1635_v19 = vsel %vm1507_vm7, %v1443_v2, %v1571_v8  ;;  %v1573_v40 = vmul.f32 0.2, %v1445_v38  ;;  %v1574_v59 = vmul.f32 0.2, %v1446_v62  ;;  %v1361_v63 = vmul.f32 %v3041_v25, %v3540_v60  ;;  %v3546_v2 = vld [vmem:[#allocation26_spill] sm:$0xff]  ;;  %v3548_v39 = vld [vmem:[#allocation29_spill] sm:$0xff] }
 0x243   : > { %1888 = vst [vmem:[%s3358_s4 + $0x8] sm:$0xff] %v2157_v11  ;;  %v1636_v13 = vsel %vm1508_vm8, %v1444_v1, %v1572_v36  ;;  %v1362_v43 = vmul.f32 %v3043_v26, %v3541_v7  ;;  %v1363_v46 = vmul.f32 %v3049_v47, %v3542_v44  ;;  %v1364_v57 = vmul.f32 %v3051_v53, %v3543_v45 }
 0x244   : > { %v2158_v58 = vpack.c.bf16 %v1636_v13, %v1635_v19  ;;  %v1637_v9 = vsel %vm1509_vm9, %v1445_v38, %v1573_v40  ;;  %v1638_v29 = vsel %vm1510_vm10, %v1446_v62, %v1574_v59  ;;  %v1447_v31 = vadd.f32 %v3045_v27, %v1361_v63  ;;  %v3550_v19 = vld [vmem:[#allocation30_spill] sm:$0xff]  ;;  %v3551_v59 = vld [vmem:[#allocation32_spill] sm:$0xff] }
 0x245   : > { %v2159_v32 = vpack.c.bf16 %v1638_v29, %v1637_v9  ;;  %v1448_v56 = vadd.f32 %v3047_v28, %v1362_v43  ;;  %v1449_v10 = vadd.f32 %v3053_v55, %v1363_v46  ;;  %v1450_v5 = vadd.f32 %v3055_v30, %v1364_v57  ;;  %v3553_v29 = vld [vmem:[#allocation35_spill] sm:$0xff] }
 0x246   : > { %1889 = vst [vmem:[%s3358_s4 + $0x10] sm:$0xff] %v2158_v58  ;;  %vm1511_vm11 = vcmp.ge.f32.partialorder %v1447_v31, 0.0  ;;  %v1575_v15 = vmul.f32 0.2, %v1447_v31  ;;  %v1365_v33 = vmul.f32 %v3041_v25, %v3544_v23  ;;  %v1366_v34 = vmul.f32 %v3043_v26, %v3545_v18  ;;  %v3552_v58 = vld [vmem:[#allocation33_spill] sm:$0xff] }
 0x247   : > { %1890 = vst [vmem:[%s3358_s4 + $0x18] sm:$0xff] %v2159_v32  ;;  %vm1512_vm12 = vcmp.ge.f32.partialorder %v1448_v56, 0.0  ;;  %v1576_v16 = vmul.f32 0.2, %v1448_v56  ;;  %vm1513_vm13 = vcmp.ge.f32.partialorder %v1449_v10, 0.0  ;;  %vm1514_vm14 = vcmp.ge.f32.partialorder %v1450_v5, 0.0 }
 0x248   : > { %v1639_v42 = vsel %vm1511_vm11, %v1447_v31, %v1575_v15  ;;  %v1577_v21 = vmul.f32 0.2, %v1449_v10  ;;  %v1578_v41 = vmul.f32 0.2, %v1450_v5  ;;  %v1451_v3 = vadd.f32 %v3045_v27, %v1365_v33 }
 0x249   : > { %v1640_v61 = vsel %vm1512_vm12, %v1448_v56, %v1576_v16  ;;  %v1452_v0 = vadd.f32 %v3047_v28, %v1366_v34  ;;  %v1367_v1 = vmul.f32 %v3049_v47, %v3546_v2  ;;  %v1368_v22 = vmul.f32 %v3051_v53, %v3547_v37 }
 0x24a   : > { %v2160_v38 = vpack.c.bf16 %v1640_v61, %v1639_v42  ;;  %v1641_v62 = vsel %vm1513_vm13, %v1449_v10, %v1577_v21  ;;  %v1642_v6 = vsel %vm1514_vm14, %v1450_v5, %v1578_v41  ;;  %vm1515_vm15 = vcmp.ge.f32.partialorder %v1451_v3, 0.0  ;;  %v3554_v42 = vld [vmem:[#allocation34_spill] sm:$0xff]  ;;  %v3555_v41 = vld [vmem:[#allocation36_spill] sm:$0xff] }
 0x24b   : > { %v2161_v4 = vpack.c.bf16 %v1642_v6, %v1641_v62  ;;  %vm1516_vm0 = vcmp.ge.f32.partialorder %v1452_v0, 0.0  ;;  %v1579_v17 = vmul.f32 0.2, %v1451_v3  ;;  %v1580_v12 = vmul.f32 0.2, %v1452_v0  ;;  %v3556_v6 = vld [vmem:[#allocation37_spill] sm:$0xff] }
 0x24c   : > { %1891 = vst [vmem:[%s3358_s4 + $0x20] sm:$0xff] %v2160_v38  ;;  %v1453_v35 = vadd.f32 %v3053_v55, %v1367_v1  ;;  %v1454_v20 = vadd.f32 %v3055_v30, %v1368_v22  ;;  %v1369_v24 = vmul.f32 %v3041_v25, %v3548_v39  ;;  %v1370_v8 = vmul.f32 %v3043_v26, %v3549_v14  ;;  %v3558_v39 = vld [vmem:[#allocation38_spill] sm:$0xff]  ;;  %v3559_v14 = vld [vmem:[#allocation40_spill] sm:$0xff] }
 0x24d   : > { %1892 = vst [vmem:[%s3358_s4 + $0x28] sm:$0xff] %v2161_v4  ;;  %v1643_v11 = vsel %vm1515_vm15, %v1451_v3, %v1579_v17  ;;  %v1644_v36 = vsel %vm1516_vm0, %v1452_v0, %v1580_v12  ;;  %v1371_v40 = vmul.f32 %v3049_v47, %v3550_v19  ;;  %v1372_v60 = vmul.f32 %v3051_v53, %v3551_v59  ;;  %v3557_v17 = vld [vmem:[#allocation39_spill] sm:$0xff] }
 0x24e   : > { %v2162_v63 = vpack.c.bf16 %v1644_v36, %v1643_v11  ;;  %vm1517_vm1 = vcmp.ge.f32.partialorder %v1453_v35, 0.0  ;;  %vm1518_vm2 = vcmp.ge.f32.partialorder %v1454_v20, 0.0  ;;  %v1581_v13 = vmul.f32 0.2, %v1453_v35 }
 0x24f   : > { %v1582_v7 = vmul.f32 0.2, %v1454_v20  ;;  %v1455_v43 = vadd.f32 %v3045_v27, %v1369_v24  ;;  %v1456_v44 = vadd.f32 %v3047_v28, %v1370_v8  ;;  %v1457_v46 = vadd.f32 %v3053_v55, %v1371_v40 }
 0x250   : > { %1893 = vst [vmem:[%s3358_s4 + $0x30] sm:$0xff] %v2162_v63  ;;  %v1645_v45 = vsel %vm1517_vm1, %v1453_v35, %v1581_v13  ;;  %v1458_v57 = vadd.f32 %v3055_v30, %v1372_v60  ;;  %v1373_v9 = vmul.f32 %v3041_v25, %v3552_v58  ;;  %v1374_v31 = vmul.f32 %v3043_v26, %v3553_v29 }
 0x251   : > { %v1646_v32 = vsel %vm1518_vm2, %v1454_v20, %v1582_v7  ;;  %vm1519_vm3 = vcmp.ge.f32.partialorder %v1455_v43, 0.0  ;;  %vm1520_vm4 = vcmp.ge.f32.partialorder %v1456_v44, 0.0  ;;  %v1583_v56 = vmul.f32 0.2, %v1455_v43  ;;  %v3560_v7 = vld [vmem:[#allocation41_spill] sm:$0xff] }
 0x252   : > { %v2163_v10 = vpack.c.bf16 %v1646_v32, %v1645_v45  ;;  %v1584_v5 = vmul.f32 0.2, %v1456_v44  ;;  %vm1521_vm5 = vcmp.ge.f32.partialorder %v1457_v46, 0.0  ;;  %vm1522_vm6 = vcmp.ge.f32.partialorder %v1458_v57, 0.0 }
 0x253   : > { %v1647_v15 = vsel %vm1519_vm3, %v1455_v43, %v1583_v56  ;;  %v1585_v23 = vmul.f32 0.2, %v1457_v46  ;;  %v1586_v33 = vmul.f32 0.2, %v1458_v57  ;;  %v1459_v18 = vadd.f32 %v3045_v27, %v1373_v9 }
 0x254   : > { %1894 = vst [vmem:[%s3358_s4 + $0x38] sm:$0xff] %v2163_v10  ;;  %v1648_v34 = vsel %vm1520_vm4, %v1456_v44, %v1584_v5  ;;  %v1460_v16 = vadd.f32 %v3047_v28, %v1374_v31  ;;  %v1375_v21 = vmul.f32 %v3049_v47, %v3554_v42  ;;  %v1376_v3 = vmul.f32 %v3051_v53, %v3555_v41  ;;  %v3561_v44 = vld [vmem:[#allocation43_spill] sm:$0xff] }
 0x255   : > { %v2164_v61 = vpack.c.bf16 %v1648_v34, %v1647_v15  ;;  %v1649_v0 = vsel %vm1521_vm5, %v1457_v46, %v1585_v23  ;;  %v1650_v2 = vsel %vm1522_vm6, %v1458_v57, %v1586_v33  ;;  %vm1523_vm7 = vcmp.ge.f32.partialorder %v1459_v18, 0.0  ;;  %v3562_v15 = vld [vmem:[#allocation42_spill] sm:$0xff]  ;;  %v3563_v33 = vld [vmem:[#allocation44_spill] sm:$0xff] }
 0x256   : > { %v2165_v1 = vpack.c.bf16 %v1650_v2, %v1649_v0  ;;  %vm1524_vm8 = vcmp.ge.f32.partialorder %v1460_v16, 0.0  ;;  %v1587_v37 = vmul.f32 0.2, %v1459_v18  ;;  %v1588_v22 = vmul.f32 0.2, %v1460_v16 }
 0x257   : > { %1895 = vst [vmem:[%s3358_s4 + $0x40] sm:$0xff] %v2164_v61  ;;  %v1461_v38 = vadd.f32 %v3053_v55, %v1375_v21  ;;  %v1462_v62 = vadd.f32 %v3055_v30, %v1376_v3  ;;  %v1377_v4 = vmul.f32 %v3041_v25, %v3556_v6  ;;  %v1378_v12 = vmul.f32 %v3043_v26, %v3557_v17 }
 0x258   : > { %1896 = vst [vmem:[%s3358_s4 + $0x48] sm:$0xff] %v2165_v1  ;;  %v1651_v35 = vsel %vm1523_vm7, %v1459_v18, %v1587_v37  ;;  %v1652_v20 = vsel %vm1524_vm8, %v1460_v16, %v1588_v22  ;;  %v1379_v24 = vmul.f32 %v3049_v47, %v3558_v39  ;;  %v1380_v8 = vmul.f32 %v3051_v53, %v3559_v14 }
 0x259   : > { %v2166_v11 = vpack.c.bf16 %v1652_v20, %v1651_v35  ;;  %vm1525_vm9 = vcmp.ge.f32.partialorder %v1461_v38, 0.0  ;;  %vm1526_vm10 = vcmp.ge.f32.partialorder %v1462_v62, 0.0  ;;  %v1589_v36 = vmul.f32 0.2, %v1461_v38 }
 0x25a   : > { %v1590_v19 = vmul.f32 0.2, %v1462_v62  ;;  %v1463_v40 = vadd.f32 %v3045_v27, %v1377_v4  ;;  %v1464_v59 = vadd.f32 %v3047_v28, %v1378_v12  ;;  %v1465_v60 = vadd.f32 %v3053_v55, %v1379_v24 }
 0x25b   : > { %1897 = vst [vmem:[%s3358_s4 + $0x50] sm:$0xff] %v2166_v11  ;;  %v1653_v63 = vsel %vm1525_vm9, %v1461_v38, %v1589_v36  ;;  %v1466_v13 = vadd.f32 %v3055_v30, %v1380_v8  ;;  %v1381_v43 = vmul.f32 %v3041_v25, %v3560_v7  ;;  %v1382_v46 = vmul.f32 %v3043_v26, %v3561_v44 }
 0x25c   : > { %v1654_v45 = vsel %vm1526_vm10, %v1462_v62, %v1590_v19  ;;  %vm1527_vm11 = vcmp.ge.f32.partialorder %v1463_v40, 0.0  ;;  %vm1528_vm12 = vcmp.ge.f32.partialorder %v1464_v59, 0.0  ;;  %v1591_v57 = vmul.f32 0.2, %v1463_v40 }
 0x25d   : > { %v2167_v58 = vpack.c.bf16 %v1654_v45, %v1653_v63  ;;  %v1592_v9 = vmul.f32 0.2, %v1464_v59  ;;  %vm1529_vm13 = vcmp.ge.f32.partialorder %v1465_v60, 0.0  ;;  %vm1530_vm14 = vcmp.ge.f32.partialorder %v1466_v13, 0.0  ;;  %v3565_v63 = vld [vmem:[#allocation46_spill] sm:$0xff] }
 0x25e   : > { %v1655_v29 = vsel %vm1527_vm11, %v1463_v40, %v1591_v57  ;;  %v1593_v31 = vmul.f32 0.2, %v1465_v60  ;;  %v1594_v32 = vmul.f32 0.2, %v1466_v13  ;;  %v1467_v56 = vadd.f32 %v3045_v27, %v1381_v43 }
 0x25f   : > { %1898 = vst [vmem:[%s3358_s4 + $0x58] sm:$0xff] %v2167_v58  ;;  %v1656_v10 = vsel %vm1528_vm12, %v1464_v59, %v1592_v9  ;;  %v1468_v5 = vadd.f32 %v3047_v28, %v1382_v46  ;;  %v1383_v23 = vmul.f32 %v3049_v47, %v3562_v15  ;;  %v1384_v18 = vmul.f32 %v3051_v53, %v3563_v33  ;;  %v3564_v59 = vld [vmem:[#allocation45_spill] sm:$0xff]  ;;  %v3568_v15 = vld [vmem:[#allocation48_spill] sm:$0xff]  ;;  %v3569_v33 = vld [vmem:[#allocation50_spill] sm:$0xff] }
 0x260   : > { %v2168_v34 = vpack.c.bf16 %v1656_v10, %v1655_v29  ;;  %v1657_v16 = vsel %vm1529_vm13, %v1465_v60, %v1593_v31  ;;  %v1658_v42 = vsel %vm1530_vm14, %v1466_v13, %v1594_v32  ;;  %vm1531_vm15 = vcmp.ge.f32.partialorder %v1467_v56, 0.0  ;;  %v3566_v29 = vld [vmem:[#allocation47_spill] sm:$0xff]  ;;  %v3567_v32 = vld [vmem:[#allocation49_spill] sm:$0xff] }
 0x261   : > { %v2169_v21 = vpack.c.bf16 %v1658_v42, %v1657_v16  ;;  %vm1532_vm0 = vcmp.ge.f32.partialorder %v1468_v5, 0.0  ;;  %v1595_v41 = vmul.f32 0.2, %v1467_v56  ;;  %v1596_v3 = vmul.f32 0.2, %v1468_v5 }
 0x262   : > { %1899 = vst [vmem:[%s3358_s4 + $0x60] sm:$0xff] %v2168_v34  ;;  %v1469_v61 = vadd.f32 %v3053_v55, %v1383_v23  ;;  %v1470_v0 = vadd.f32 %v3055_v30, %v1384_v18  ;;  %v1385_v2 = vmul.f32 %v3041_v25, %v2750_v48  ;;  %v1386_v1 = vmul.f32 %v3043_v26, %v2754_v50 }
 0x263   : > { %1900 = vst [vmem:[%s3358_s4 + $0x68] sm:$0xff] %v2169_v21  ;;  %v1659_v37 = vsel %vm1531_vm15, %v1467_v56, %v1595_v41  ;;  %v1660_v22 = vsel %vm1532_vm0, %v1468_v5, %v1596_v3  ;;  %v1387_v38 = vmul.f32 %v3049_v47, %v2752_v49  ;;  %v1388_v62 = vmul.f32 %v3051_v53, %v2756_v51 }
 0x264   : > { %v2170_v6 = vpack.c.bf16 %v1660_v22, %v1659_v37  ;;  %vm1533_vm1 = vcmp.ge.f32.partialorder %v1469_v61, 0.0  ;;  %vm1534_vm2 = vcmp.ge.f32.partialorder %v1470_v0, 0.0  ;;  %v1597_v4 = vmul.f32 0.2, %v1469_v61  ;;  %v3571_v37 = vld [vmem:[#allocation53_spill] sm:$0xff] }
 0x265   : > { %v1598_v48 = vmul.f32 0.2, %v1470_v0  ;;  %v1471_v17 = vadd.f32 %v3045_v27, %v1385_v2  ;;  %v1472_v50 = vadd.f32 %v3047_v28, %v1386_v1  ;;  %v1473_v12 = vadd.f32 %v3053_v55, %v1387_v38  ;;  %v3570_v2 = vld [vmem:[#allocation51_spill] sm:$0xff] }
 0x266   : > { %1901 = vst [vmem:[%s3358_s4 + $0x70] sm:$0xff] %v2170_v6  ;;  %v1661_v35 = vsel %vm1533_vm1, %v1469_v61, %v1597_v4  ;;  %v1474_v49 = vadd.f32 %v3055_v30, %v1388_v62  ;;  %v1389_v51 = vmul.f32 %v3041_v25, %v2758_v52  ;;  %v1390_v20 = vmul.f32 %v3043_v26, %v2762_v54 }
 0x267   : > { %v1662_v39 = vsel %vm1534_vm2, %v1470_v0, %v1598_v48  ;;  %vm1535_vm3 = vcmp.ge.f32.partialorder %v1471_v17, 0.0  ;;  %vm1536_vm4 = vcmp.ge.f32.partialorder %v1472_v50, 0.0  ;;  %v1599_v24 = vmul.f32 0.2, %v1471_v17 }
 0x268   : > { %v2171_v14 = vpack.c.bf16 %v1662_v39, %v1661_v35  ;;  %v1600_v8 = vmul.f32 0.2, %v1472_v50  ;;  %vm1537_vm5 = vcmp.ge.f32.partialorder %v1473_v12, 0.0  ;;  %vm1538_vm6 = vcmp.ge.f32.partialorder %v1474_v49, 0.0  ;;  %v3573_v39 = vld [vmem:[#allocation54_spill] sm:$0xff] }
 0x269   : > { %v1663_v11 = vsel %vm1535_vm3, %v1471_v17, %v1599_v24  ;;  %v1601_v36 = vmul.f32 0.2, %v1473_v12  ;;  %v1602_v19 = vmul.f32 0.2, %v1474_v49  ;;  %v1475_v40 = vadd.f32 %v3045_v27, %v1389_v51  ;;  %v3572_v51 = vld [vmem:[#allocation52_spill] sm:$0xff] }
 0x26a   : > { %1902 = vst [vmem:[%s3358_s4 + $0x78] sm:$0xff] %v2171_v14  ;;  %v1664_v52 = vsel %vm1536_vm4, %v1472_v50, %v1600_v8  ;;  %v1476_v54 = vadd.f32 %v3047_v28, %v1390_v20  ;;  %v1391_v60 = vmul.f32 %v3049_v47, %v3564_v59  ;;  %v1392_v13 = vmul.f32 %v3051_v53, %v3565_v63  ;;  %v3574_v59 = vld [vmem:[#allocation55_spill] sm:$0xff]  ;;  %v3575_v63 = vld [vmem:[#allocation57_spill] sm:$0xff] }
 0x26b   : > { %v2172_v7 = vpack.c.bf16 %v1664_v52, %v1663_v11  ;;  %v1665_v43 = vsel %vm1537_vm5, %v1473_v12, %v1601_v36  ;;  %v1666_v44 = vsel %vm1538_vm6, %v1474_v49, %v1602_v19  ;;  %vm1539_vm7 = vcmp.ge.f32.partialorder %v1475_v40, 0.0 }
 0x26c   : > { %v2173_v46 = vpack.c.bf16 %v1666_v44, %v1665_v43  ;;  %vm1540_vm8 = vcmp.ge.f32.partialorder %v1476_v54, 0.0  ;;  %v1603_v45 = vmul.f32 0.2, %v1475_v40  ;;  %v1604_v57 = vmul.f32 0.2, %v1476_v54  ;;  %v3576_v44 = vld [vmem:[#allocation56_spill] sm:$0xff] }
 0x26d   : > { %1903 = vst [vmem:[%s3358_s4 + $0x80] sm:$0xff] %v2172_v7  ;;  %v1477_v58 = vadd.f32 %v3053_v55, %v1391_v60  ;;  %v1478_v9 = vadd.f32 %v3055_v30, %v1392_v13  ;;  %v1393_v31 = vmul.f32 %v3041_v25, %v3566_v29  ;;  %v1394_v56 = vmul.f32 %v3043_v26, %v3567_v32 }
 0x26e   : > { %1904 = vst [vmem:[%s3358_s4 + $0x88] sm:$0xff] %v2173_v46  ;;  %v1667_v10 = vsel %vm1539_vm7, %v1475_v40, %v1603_v45  ;;  %v1668_v5 = vsel %vm1540_vm8, %v1476_v54, %v1604_v57  ;;  %v1395_v23 = vmul.f32 %v3049_v47, %v3568_v15  ;;  %v1396_v18 = vmul.f32 %v3051_v53, %v3569_v33  ;;  %v3577_v45 = vld [vmem:[#allocation58_spill] sm:$0xff]  ;;  %v3578_v15 = vld [vmem:[#allocation59_spill] sm:$0xff]  ;;  %v3579_v33 = vld [vmem:[#allocation61_spill] sm:$0xff] }
 0x26f   : > { %v2174_v34 = vpack.c.bf16 %v1668_v5, %v1667_v10  ;;  %vm1541_vm9 = vcmp.ge.f32.partialorder %v1477_v58, 0.0  ;;  %vm1542_vm10 = vcmp.ge.f32.partialorder %v1478_v9, 0.0  ;;  %v1605_v16 = vmul.f32 0.2, %v1477_v58 }
 0x270   : > { %v1606_v42 = vmul.f32 0.2, %v1478_v9  ;;  %v1479_v21 = vadd.f32 %v3045_v27, %v1393_v31  ;;  %v1480_v41 = vadd.f32 %v3047_v28, %v1394_v56  ;;  %v1481_v3 = vadd.f32 %v3053_v55, %v1395_v23 }
 0x271   : > { %1905 = vst [vmem:[%s3358_s4 + $0x90] sm:$0xff] %v2174_v34  ;;  %v1669_v61 = vsel %vm1541_vm9, %v1477_v58, %v1605_v16  ;;  %v1482_v0 = vadd.f32 %v3055_v30, %v1396_v18  ;;  %v1397_v1 = vmul.f32 %v3041_v25, %v3570_v2  ;;  %v1398_v22 = vmul.f32 %v3043_v26, %v3571_v37  ;;  %v3580_v37 = vld [vmem:[#allocation60_spill] sm:$0xff] }
 0x272   : > { %v1670_v38 = vsel %vm1542_vm10, %v1478_v9, %v1606_v42  ;;  %vm1543_vm11 = vcmp.ge.f32.partialorder %v1479_v21, 0.0  ;;  %vm1544_vm12 = vcmp.ge.f32.partialorder %v1480_v41, 0.0  ;;  %v1607_v62 = vmul.f32 0.2, %v1479_v21 }
 0x273   : > { %v2175_v6 = vpack.c.bf16 %v1670_v38, %v1669_v61  ;;  %v1608_v4 = vmul.f32 0.2, %v1480_v41  ;;  %vm1545_vm13 = vcmp.ge.f32.partialorder %v1481_v3, 0.0  ;;  %vm1546_vm14 = vcmp.ge.f32.partialorder %v1482_v0, 0.0  ;;  %v3581_v38 = vld [vmem:[#allocation62_spill] sm:$0xff] }
 0x274   : > { %v1671_v48 = vsel %vm1543_vm11, %v1479_v21, %v1607_v62  ;;  %v1609_v17 = vmul.f32 0.2, %v1481_v3  ;;  %v1610_v50 = vmul.f32 0.2, %v1482_v0  ;;  %v1483_v12 = vadd.f32 %v3045_v27, %v1397_v1 }
 0x275   : > { %1906 = vst [vmem:[%s3358_s4 + $0x98] sm:$0xff] %v2175_v6  ;;  %v1672_v35 = vsel %vm1544_vm12, %v1480_v41, %v1608_v4  ;;  %v1484_v49 = vadd.f32 %v3047_v28, %v1398_v22  ;;  %v1399_v20 = vmul.f32 %v3049_v47, %v3572_v51  ;;  %v1400_v24 = vmul.f32 %v3051_v53, %v3573_v39  ;;  %v3582_v51 = vld [vmem:[#allocation63_spill] sm:$0xff]  ;;  %v3583_v39 = vld [vmem:[#allocation65_spill] sm:$0xff] }
 0x276   : > { %v2176_v14 = vpack.c.bf16 %v1672_v35, %v1671_v48  ;;  %v1673_v8 = vsel %vm1545_vm13, %v1481_v3, %v1609_v17  ;;  %v1674_v11 = vsel %vm1546_vm14, %v1482_v0, %v1610_v50  ;;  %vm1547_vm15 = vcmp.ge.f32.partialorder %v1483_v12, 0.0 }
 0x277   : > { %v2177_v36 = vpack.c.bf16 %v1674_v11, %v1673_v8  ;;  %vm1548_vm0 = vcmp.ge.f32.partialorder %v1484_v49, 0.0  ;;  %v1611_v19 = vmul.f32 0.2, %v1483_v12  ;;  %v1612_v40 = vmul.f32 0.2, %v1484_v49  ;;  %v3584_v11 = vld [vmem:[#allocation64_spill] sm:$0xff] }
 0x278   : > { %1907 = vst [vmem:[%s3358_s4 + $0xa0] sm:$0xff] %v2176_v14  ;;  %v1485_v52 = vadd.f32 %v3053_v55, %v1399_v20  ;;  %v1486_v54 = vadd.f32 %v3055_v30, %v1400_v24  ;;  %v1401_v60 = vmul.f32 %v3041_v25, %v3574_v59  ;;  %v1402_v13 = vmul.f32 %v3043_v26, %v3575_v63 }
 0x279   : > { %1908 = vst [vmem:[%s3358_s4 + $0xa8] sm:$0xff] %v2177_v36  ;;  %v1675_v7 = vsel %vm1547_vm15, %v1483_v12, %v1611_v19  ;;  %v1676_v43 = vsel %vm1548_vm0, %v1484_v49, %v1612_v40  ;;  %v1403_v46 = vmul.f32 %v3049_v47, %v3576_v44  ;;  %v1404_v57 = vmul.f32 %v3051_v53, %v3577_v45  ;;  %v3585_v19 = vld [vmem:[#allocation66_spill] sm:$0xff]  ;;  %v3586_v44 = vld [vmem:[#allocation67_spill] sm:$0xff]  ;;  %v3587_v45 = vld [vmem:[#allocation69_spill] sm:$0xff] }
 0x27a   : > { %v2178_v58 = vpack.c.bf16 %v1676_v43, %v1675_v7  ;;  %vm1549_vm1 = vcmp.ge.f32.partialorder %v1485_v52, 0.0  ;;  %vm1550_vm2 = vcmp.ge.f32.partialorder %v1486_v54, 0.0  ;;  %v1613_v9 = vmul.f32 0.2, %v1485_v52 }
 0x27b   : > { %v1614_v29 = vmul.f32 0.2, %v1486_v54  ;;  %v1487_v31 = vadd.f32 %v3045_v27, %v1401_v60  ;;  %v1488_v32 = vadd.f32 %v3047_v28, %v1402_v13  ;;  %v1489_v56 = vadd.f32 %v3053_v55, %v1403_v46 }
 0x27c   : > { %1909 = vst [vmem:[%s3358_s4 + $0xb0] sm:$0xff] %v2178_v58  ;;  %v1677_v10 = vsel %vm1549_vm1, %v1485_v52, %v1613_v9  ;;  %v1490_v5 = vadd.f32 %v3055_v30, %v1404_v57  ;;  %v1405_v23 = vmul.f32 %v3041_v25, %v3578_v15  ;;  %v1406_v18 = vmul.f32 %v3043_v26, %v3579_v33  ;;  %v3588_v15 = vld [vmem:[#allocation68_spill] sm:$0xff]  ;;  %v3589_v33 = vld [vmem:[#allocation70_spill] sm:$0xff] }
 0x27d   : > { %v1678_v34 = vsel %vm1550_vm2, %v1486_v54, %v1614_v29  ;;  %vm1551_vm3 = vcmp.ge.f32.partialorder %v1487_v31, 0.0  ;;  %vm1552_vm4 = vcmp.ge.f32.partialorder %v1488_v32, 0.0  ;;  %v1615_v16 = vmul.f32 0.2, %v1487_v31 }
 0x27e   : > { %v2179_v42 = vpack.c.bf16 %v1678_v34, %v1677_v10  ;;  %v1616_v21 = vmul.f32 0.2, %v1488_v32  ;;  %vm1553_vm5 = vcmp.ge.f32.partialorder %v1489_v56, 0.0  ;;  %vm1554_vm6 = vcmp.ge.f32.partialorder %v1490_v5, 0.0 }
 0x27f   : > { %v1679_v41 = vsel %vm1551_vm3, %v1487_v31, %v1615_v16  ;;  %v1617_v3 = vmul.f32 0.2, %v1489_v56  ;;  %v1618_v61 = vmul.f32 0.2, %v1490_v5  ;;  %v1491_v0 = vadd.f32 %v3045_v27, %v1405_v23 }
 0x280   : > { %1910 = vst [vmem:[%s3358_s4 + $0xb8] sm:$0xff] %v2179_v42  ;;  %v1680_v2 = vsel %vm1552_vm4, %v1488_v32, %v1616_v21  ;;  %v1492_v1 = vadd.f32 %v3047_v28, %v1406_v18  ;;  %v1407_v22 = vmul.f32 %v3049_v47, %v3580_v37  ;;  %v1408_v62 = vmul.f32 %v3051_v53, %v3581_v38 }
 0x281   : > { %v2180_v6 = vpack.c.bf16 %v1680_v2, %v1679_v41  ;;  %v1681_v4 = vsel %vm1553_vm5, %v1489_v56, %v1617_v3  ;;  %v1682_v48 = vsel %vm1554_vm6, %v1490_v5, %v1618_v61  ;;  %vm1555_vm7 = vcmp.ge.f32.partialorder %v1491_v0, 0.0 }
 0x282   : > { %v2181_v17 = vpack.c.bf16 %v1682_v48, %v1681_v4  ;;  %vm1556_vm8 = vcmp.ge.f32.partialorder %v1492_v1, 0.0  ;;  %v1619_v50 = vmul.f32 0.2, %v1491_v0  ;;  %v1620_v12 = vmul.f32 0.2, %v1492_v1 }
 0x283   : > { %1911 = vst [vmem:[%s3358_s4 + $0xc0] sm:$0xff] %v2180_v6  ;;  %v1493_v35 = vadd.f32 %v3053_v55, %v1407_v22  ;;  %v1494_v49 = vadd.f32 %v3055_v30, %v1408_v62  ;;  %v1409_v20 = vmul.f32 %v3041_v25, %v3582_v51  ;;  %v1410_v24 = vmul.f32 %v3043_v26, %v3583_v39 }
 0x284   : > { %1912 = vst [vmem:[%s3358_s4 + $0xc8] sm:$0xff] %v2181_v17  ;;  %v1683_v14 = vsel %vm1555_vm7, %v1491_v0, %v1619_v50  ;;  %v1684_v8 = vsel %vm1556_vm8, %v1492_v1, %v1620_v12  ;;  %v1411_v36 = vmul.f32 %v3049_v47, %v3584_v11  ;;  %v1412_v40 = vmul.f32 %v3051_v53, %v3585_v19 }
 0x285   : > { %v2182_v52 = vpack.c.bf16 %v1684_v8, %v1683_v14  ;;  %vm1557_vm9 = vcmp.ge.f32.partialorder %v1493_v35, 0.0  ;;  %vm1558_vm10 = vcmp.ge.f32.partialorder %v1494_v49, 0.0  ;;  %v1621_v54 = vmul.f32 0.2, %v1493_v35 }
 0x286   : > { %v1622_v59 = vmul.f32 0.2, %v1494_v49  ;;  %v1495_v60 = vadd.f32 %v3045_v27, %v1409_v20  ;;  %v1496_v63 = vadd.f32 %v3047_v28, %v1410_v24  ;;  %v1497_v13 = vadd.f32 %v3053_v55, %v1411_v36 }
 0x287   : > { %1913 = vst [vmem:[%s3358_s4 + $0xd0] sm:$0xff] %v2182_v52  ;;  %v1685_v7 = vsel %vm1557_vm9, %v1493_v35, %v1621_v54  ;;  %v1498_v43 = vadd.f32 %v3055_v30, %v1412_v40  ;;  %v1413_v46 = vmul.f32 %v3041_v25, %v3586_v44  ;;  %v1414_v57 = vmul.f32 %v3043_v26, %v3587_v45 }
 0x288   : > { %v1686_v58 = vsel %vm1558_vm10, %v1494_v49, %v1622_v59  ;;  %vm1559_vm11 = vcmp.ge.f32.partialorder %v1495_v60, 0.0  ;;  %vm1560_vm12 = vcmp.ge.f32.partialorder %v1496_v63, 0.0  ;;  %v1623_v9 = vmul.f32 0.2, %v1495_v60 }
 0x289   : > { %v2183_v29 = vpack.c.bf16 %v1686_v58, %v1685_v7  ;;  %v1624_v31 = vmul.f32 0.2, %v1496_v63  ;;  %vm1561_vm13 = vcmp.ge.f32.partialorder %v1497_v13, 0.0  ;;  %vm1562_vm14 = vcmp.ge.f32.partialorder %v1498_v43, 0.0 }
 0x28a   : > { %v1687_v32 = vsel %vm1559_vm11, %v1495_v60, %v1623_v9  ;;  %v1625_v56 = vmul.f32 0.2, %v1497_v13  ;;  %v1626_v10 = vmul.f32 0.2, %v1498_v43  ;;  %v1499_v5 = vadd.f32 %v3045_v27, %v1413_v46 }
 0x28b   : > { %1914 = vst [vmem:[%s3358_s4 + $0xd8] sm:$0xff] %v2183_v29  ;;  %v1688_v25 = vsel %vm1560_vm12, %v1496_v63, %v1624_v31  ;;  %v1500_v26 = vadd.f32 %v3047_v28, %v1414_v57  ;;  %v1415_v23 = vmul.f32 %v3049_v47, %v3588_v15  ;;  %v1416_v18 = vmul.f32 %v3051_v53, %v3589_v33 }
 0x28c   : > { %v2184_v34 = vpack.c.bf16 %v1688_v25, %v1687_v32  ;;  %v1689_v16 = vsel %vm1561_vm13, %v1497_v13, %v1625_v56  ;;  %v1690_v42 = vsel %vm1562_vm14, %v1498_v43, %v1626_v10  ;;  %vm1563_vm15 = vcmp.ge.f32.partialorder %v1499_v5, 0.0 }
 0x28d   : > { %v2185_v21 = vpack.c.bf16 %v1690_v42, %v1689_v16  ;;  %vm1564_vm0 = vcmp.ge.f32.partialorder %v1500_v26, 0.0  ;;  %v1627_v27 = vmul.f32 0.2, %v1499_v5  ;;  %v1628_v41 = vmul.f32 0.2, %v1500_v26 }
 0x28e   : > { %1915 = vst [vmem:[%s3358_s4 + $0xe0] sm:$0xff] %v2184_v34  ;;  %v1501_v28 = vadd.f32 %v3053_v55, %v1415_v23  ;;  %v1502_v3 = vadd.f32 %v3055_v30, %v1416_v18 }
 0x28f   : > { %1916 = vst [vmem:[%s3358_s4 + $0xe8] sm:$0xff] %v2185_v21  ;;  %v1691_v47 = vsel %vm1563_vm15, %v1499_v5, %v1627_v27  ;;  %v1692_v53 = vsel %vm1564_vm0, %v1500_v26, %v1628_v41 }
 0x290   : > { %v2186_v61 = vpack.c.bf16 %v1692_v53, %v1691_v47  ;;  %vm1565_vm1 = vcmp.ge.f32.partialorder %v1501_v28, 0.0  ;;  %vm1566_vm2 = vcmp.ge.f32.partialorder %v1502_v3, 0.0  ;;  %v1629_v0 = vmul.f32 0.2, %v1501_v28 }
 0x291   : > { %v1630_v2 = vmul.f32 0.2, %v1502_v3 }
 0x292   : > { %1917 = vst [vmem:[%s3358_s4 + $0xf0] sm:$0xff] %v2186_v61  ;;  %v1693_v1 = vsel %vm1565_vm1, %v1501_v28, %v1629_v0 }
 0x293   : > { %v1694_v37 = vsel %vm1566_vm2, %v1502_v3, %v1630_v2 }
 0x294   : > { %v2187_v55 = vpack.c.bf16 %v1694_v37, %v1693_v1 }
 0x296   : > { %1918 = vst [vmem:[%s3358_s4 + $0xf8] sm:$0xff] %v2187_v55 }
 0x297 PF: > { %s16_s17 = sadd.s32 1, %s2483_s17   ;;  %s3590_s15 = smov %s2479_s16 }
 0x298   : > { %p13_p10 = scmp.ge.s32.totalorder %s16_s17, 4   ;;  %s3591_s16 = smov %s3593_s23 }
 0x29a   :  { %15 = sbr.rel (!%p13_p10) target bundleno = 3 (0x3), region = 95 }
 0x2a1   :  { %1946 = vsyncpa [#allocation7], 1 }
 0x2a2   :  { %1948 = vsyncpa [#allocation7 + $0x1], 1 }
 0x2a3   :  { %1949 = vsyncpa [#allocation9], 1 }

// kernel: generator_forward.7
= control target key start
LH: loop header
LB: loop body
LE: loop exit
PB: predicated region body
PF: predicated region fallthrough
CT: control target
= control target key end

     0   :  { %s5105_s0 = inlined_call_operand.vmem [shape: bf16[2048,128], index: 0, kind: input, shape index: {}]   ;;  %s5106_s2 = inlined_call_operand.vmem [shape: bf16[8,128], index: 2, kind: input, shape index: {}]   ;;  %s5107_s1 = inlined_call_operand.vmem [shape: bf16[2048,128], index: 1, kind: input, shape index: {}]   ;;  %s5108_s3 = inlined_call_operand.vmem [shape: bf16[8,128], index: 3, kind: input, shape index: {}]   ;;  %s5109_s4 = inlined_call_operand.vmem [shape: f32[8,1], index: 4, kind: input, shape index: {}]   ;;  %s5110_s5 = inlined_call_operand.vmem [shape: f32[8,1], index: 5, kind: input, shape index: {}]   ;;  %s5111_s6 = inlined_call_operand.vmem [shape: f32[2,8,2048], index: 6, kind: output, shape index: {}]  }
   0x1   :  { %v3551_v0 = vld [vmem:[%s5105_s0 + $0x40] sm:$0xff]   ;;  %v3555_v4 = vld [vmem:[%s5105_s0 + $0x48] sm:$0xff]   ;;  %v3559_v7 = vld [vmem:[%s5105_s0 + $0x50] sm:$0xff]  }
   0x2   :  { %v3552_v1 = vld [vmem:[%s5105_s0] sm:$0xff]   ;;  %3260 = vmatprep.subr.bf16.mxu0 %v3551_v0  ;;  %v3557_v5 = vld [vmem:[%s5105_s0 + $0xc8] sm:$0xff]   ;;  %v3561_v9 = vld [vmem:[%s5105_s0 + $0xd0] sm:$0xff]  }
   0x3   :  { %v3553_v2 = vld [vmem:[%s5105_s0 + $0xc0] sm:$0xff]   ;;  %3261 = vmatpush3.bf16.xpose.msra.mxu0 %v3552_v1  ;;  %v3556_v6 = vld [vmem:[%s5105_s0 + $0x8] sm:$0xff]   ;;  %v3560_v10 = vld [vmem:[%s5105_s0 + $0x10] sm:$0xff]  }
   0x4   :  { %v3554_v3 = vld [vmem:[%s5105_s0 + $0x80] sm:$0xff]   ;;  %3278 = vmatprep.subr.bf16.mxu1 %v3553_v2  ;;  %3262 = vmatprep.subr.bf16.mxu0 %v3555_v4  ;;  %v3558_v8 = vld [vmem:[%s5105_s0 + $0x88] sm:$0xff]   ;;  %v3563_v11 = vld [vmem:[%s5105_s0 + $0x58] sm:$0xff]  }
   0x5   :  { %3279 = vmatpush3.bf16.xpose.msra.mxu1 %v3554_v3  ;;  %v3562_v12 = vld [vmem:[%s5105_s0 + $0x90] sm:$0xff]   ;;  %v3565_v13 = vld [vmem:[%s5105_s0 + $0xd8] sm:$0xff]   ;;  %v3567_v15 = vld [vmem:[%s5105_s0 + $0x60] sm:$0xff]  }
   0x6   :  { %3280 = vmatprep.subr.bf16.mxu1 %v3557_v5  ;;  %v3564_v14 = vld [vmem:[%s5105_s0 + $0x18] sm:$0xff]   ;;  %v3569_v17 = vld [vmem:[%s5105_s0 + $0xe0] sm:$0xff]   ;;  %v3571_v19 = vld [vmem:[%s5105_s0 + $0x68] sm:$0xff]  }
   0x7   :  { %v3566_v16 = vld [vmem:[%s5105_s0 + $0x98] sm:$0xff]   ;;  %v3568_v18 = vld [vmem:[%s5105_s0 + $0x20] sm:$0xff]   ;;  %v3573_v22 = vld [vmem:[%s5105_s0 + $0xe8] sm:$0xff]  }
   0x8   :  { %v3973_v20 = vld [vmem:[%s5106_s2] sm:$0xf]  ;;  %v3572_v23 = vld [vmem:[%s5105_s0 + $0x28] sm:$0xff]   ;;  %v3575_v24 = vld [vmem:[%s5105_s0 + $0x70] sm:$0xff]  }
   0x9   :  { %v3570_v21 = vld [vmem:[%s5105_s0 + $0xa0] sm:$0xff]   ;;  %3276 = vmatprep.mubr.bf16.mxu0 %v3973_v20  ;;  %3294 = vmatprep.mubr.bf16.mxu1 %v3973_v20  ;;  %v3574_v25 = vld [vmem:[%s5105_s0 + $0xa8] sm:$0xff]   ;;  %v3577_v26 = vld [vmem:[%s5105_s0 + $0xf0] sm:$0xff]  }
   0xa   :  { %v3576_v27 = vld [vmem:[%s5105_s0 + $0x30] sm:$0xff]   ;;  %v3579_v28 = vld [vmem:[%s5105_s0 + $0x78] sm:$0xff]   ;;  %v3583_v32 = vld [vmem:[%s5105_s0 + $0x140] sm:$0xff]  }
   0xb   :  { %3263 = vmatpush3.bf16.xpose.msra.mxu0 %v3556_v6  ;;  %v3578_v29 = vld [vmem:[%s5105_s0 + $0xb0] sm:$0xff]   ;;  %v3581_v30 = vld [vmem:[%s5105_s0 + $0xf8] sm:$0xff]   ;;  %v3585_v34 = vld [vmem:[%s5105_s0 + $0x1c0] sm:$0xff]  }
   0xc   :  { %3264 = vmatprep.subr.bf16.mxu0 %v3559_v7  ;;  %v3580_v31 = vld [vmem:[%s5105_s0 + $0x38] sm:$0xff]   ;;  %v3584_v35 = vld [vmem:[%s5105_s0 + $0x100] sm:$0xff]   ;;  %v3587_v36 = vld [vmem:[%s5105_s0 + $0x148] sm:$0xff]  }
   0xd   :  { %3281 = vmatpush3.bf16.xpose.msra.mxu1 %v3558_v8  ;;  %v3582_v33 = vld [vmem:[%s5105_s0 + $0xb8] sm:$0xff]   ;;  %v3586_v37 = vld [vmem:[%s5105_s0 + $0x180] sm:$0xff]   ;;  %v3589_v38 = vld [vmem:[%s5105_s0 + $0x1c8] sm:$0xff]  }
   0xe   :  { %3282 = vmatprep.subr.bf16.mxu1 %v3561_v9  ;;  %v3588_v39 = vld [vmem:[%s5105_s0 + $0x108] sm:$0xff]   ;;  %v3591_v40 = vld [vmem:[%s5105_s0 + $0x150] sm:$0xff]   ;;  %v3595_v44 = vld [vmem:[%s5105_s0 + $0x158] sm:$0xff]  }
   0xf   :  { %v3590_v41 = vld [vmem:[%s5105_s0 + $0x188] sm:$0xff]   ;;  %v3593_v42 = vld [vmem:[%s5105_s0 + $0x1d0] sm:$0xff]   ;;  %v3597_v46 = vld [vmem:[%s5105_s0 + $0x1d8] sm:$0xff]  }
  0x10   :  { %v3592_v43 = vld [vmem:[%s5105_s0 + $0x110] sm:$0xff]   ;;  %v3596_v47 = vld [vmem:[%s5105_s0 + $0x118] sm:$0xff]   ;;  %v3599_v48 = vld [vmem:[%s5105_s0 + $0x160] sm:$0xff]  }
  0x11   :  { %v3594_v45 = vld [vmem:[%s5105_s0 + $0x190] sm:$0xff]   ;;  %v3598_v49 = vld [vmem:[%s5105_s0 + $0x198] sm:$0xff]   ;;  %v3601_v50 = vld [vmem:[%s5105_s0 + $0x1e0] sm:$0xff]  }
  0x12   :  { %v3600_v51 = vld [vmem:[%s5105_s0 + $0x120] sm:$0xff]   ;;  %v3603_v52 = vld [vmem:[%s5105_s0 + $0x168] sm:$0xff]   ;;  %v3607_v56 = vld [vmem:[%s5105_s0 + $0x170] sm:$0xff]  }
  0x13   :  { %3265 = vmatpush3.bf16.xpose.msra.mxu0 %v3560_v10  ;;  %v3602_v53 = vld [vmem:[%s5105_s0 + $0x1a0] sm:$0xff]   ;;  %v3605_v54 = vld [vmem:[%s5105_s0 + $0x1e8] sm:$0xff]   ;;  %v3609_v58 = vld [vmem:[%s5105_s0 + $0x1f0] sm:$0xff]  }
  0x14   :  { %3266 = vmatprep.subr.bf16.mxu0 %v3563_v11  ;;  %v3604_v55 = vld [vmem:[%s5105_s0 + $0x128] sm:$0xff]   ;;  %v3608_v59 = vld [vmem:[%s5105_s0 + $0x130] sm:$0xff]   ;;  %v3611_v60 = vld [vmem:[%s5105_s0 + $0x178] sm:$0xff]  }
  0x15   :  { %3283 = vmatpush3.bf16.xpose.msra.mxu1 %v3562_v12  ;;  %v3606_v57 = vld [vmem:[%s5105_s0 + $0x1a8] sm:$0xff]   ;;  %v3610_v61 = vld [vmem:[%s5105_s0 + $0x1b0] sm:$0xff]   ;;  %v3613_v62 = vld [vmem:[%s5105_s0 + $0x1f8] sm:$0xff]  }
  0x16   :  { %3284 = vmatprep.subr.bf16.mxu1 %v3565_v13  ;;  %v3612_v63 = vld [vmem:[%s5105_s0 + $0x138] sm:$0xff]   ;;  %v3615_v0 = vld [vmem:[%s5105_s0 + $0x240] sm:$0xff]   ;;  %v3619_v4 = vld [vmem:[%s5105_s0 + $0x248] sm:$0xff]  }
  0x17   :  { %v3614_v1 = vld [vmem:[%s5105_s0 + $0x1b8] sm:$0xff]   ;;  %v3617_v2 = vld [vmem:[%s5105_s0 + $0x2c0] sm:$0xff]   ;;  %v3621_v6 = vld [vmem:[%s5105_s0 + $0x2c8] sm:$0xff]  }
  0x18   :  { %v3616_v3 = vld [vmem:[%s5105_s0 + $0x200] sm:$0xff]   ;;  %v3620_v7 = vld [vmem:[%s5105_s0 + $0x208] sm:$0xff]   ;;  %v3623_v8 = vld [vmem:[%s5105_s0 + $0x250] sm:$0xff]  }
  0x19   :  { %v3618_v5 = vld [vmem:[%s5105_s0 + $0x280] sm:$0xff]   ;;  %v3622_v9 = vld [vmem:[%s5105_s0 + $0x288] sm:$0xff]   ;;  %v3625_v10 = vld [vmem:[%s5105_s0 + $0x2d0] sm:$0xff]  }
  0x1a   :  { %v3624_v11 = vld [vmem:[%s5105_s0 + $0x210] sm:$0xff]   ;;  %v3627_v12 = vld [vmem:[%s5105_s0 + $0x258] sm:$0xff]  }
  0x1b   :  { %3267 = vmatpush3.bf16.xpose.msra.mxu0 %v3564_v14  ;;  %v3626_v13 = vld [vmem:[%s5105_s0 + $0x290] sm:$0xff]   ;;  %v3629_v14 = vld [vmem:[%s5105_s0 + $0x2d8] sm:$0xff]  }
  0x1c   :  { %3268 = vmatprep.subr.bf16.mxu0 %v3567_v15  ;;  %v3628_v15 = vld [vmem:[%s5105_s0 + $0x218] sm:$0xff]  }
  0x1d   :  { %3285 = vmatpush3.bf16.xpose.msra.mxu1 %v3566_v16  ;;  %v3631_v16 = vld [vmem:[%s5105_s0 + $0x260] sm:$0xff]  }
  0x1e   :  { %3286 = vmatprep.subr.bf16.mxu1 %v3569_v17  ;;  %v3630_v17 = vld [vmem:[%s5105_s0 + $0x298] sm:$0xff]  }
  0x23   :  { %3269 = vmatpush3.bf16.xpose.msra.mxu0 %v3568_v18  ;;  %v3633_v18 = vld [vmem:[%s5105_s0 + $0x2e0] sm:$0xff]  }
  0x24   :  { %3270 = vmatprep.subr.bf16.mxu0 %v3571_v19  ;;  %v3632_v19 = vld [vmem:[%s5105_s0 + $0x220] sm:$0xff]  }
  0x25   :  { %3287 = vmatpush3.bf16.xpose.msra.mxu1 %v3570_v21  ;;  %v3634_v21 = vld [vmem:[%s5105_s0 + $0x2a0] sm:$0xff]  }
  0x26   :  { %3288 = vmatprep.subr.bf16.mxu1 %v3573_v22  ;;  %v3637_v22 = vld [vmem:[%s5105_s0 + $0x2e8] sm:$0xff]  }
  0x2b   :  { %3271 = vmatpush3.bf16.xpose.msra.mxu0 %v3572_v23  ;;  %v3636_v23 = vld [vmem:[%s5105_s0 + $0x228] sm:$0xff]  }
  0x2c   :  { %3272 = vmatprep.subr.bf16.mxu0 %v3575_v24  ;;  %v3639_v24 = vld [vmem:[%s5105_s0 + $0x270] sm:$0xff]  }
  0x2d   :  { %3289 = vmatpush3.bf16.xpose.msra.mxu1 %v3574_v25  ;;  %v3638_v25 = vld [vmem:[%s5105_s0 + $0x2a8] sm:$0xff]  }
  0x2e   :  { %3290 = vmatprep.subr.bf16.mxu1 %v3577_v26  ;;  %v3641_v26 = vld [vmem:[%s5105_s0 + $0x2f0] sm:$0xff]  }
  0x33   :  { %3273 = vmatpush3.bf16.xpose.msra.mxu0 %v3576_v27  ;;  %v3640_v27 = vld [vmem:[%s5105_s0 + $0x230] sm:$0xff]  }
  0x34   :  { %3274 = vmatprep.subr.bf16.mxu0 %v3579_v28  ;;  %v3643_v28 = vld [vmem:[%s5105_s0 + $0x278] sm:$0xff]  }
  0x35   :  { %3291 = vmatpush3.bf16.xpose.msra.mxu1 %v3578_v29  ;;  %v3642_v29 = vld [vmem:[%s5105_s0 + $0x2b0] sm:$0xff]  }
  0x36   :  { %3292 = vmatprep.subr.bf16.mxu1 %v3581_v30  ;;  %v3645_v30 = vld [vmem:[%s5105_s0 + $0x2f8] sm:$0xff]  }
  0x3b   :  { %3275 = vmatpush3.bf16.xpose.msra.mxu0 %v3580_v31  ;;  %v3644_v31 = vld [vmem:[%s5105_s0 + $0x238] sm:$0xff]  }
  0x3c   :  { %3296 = vmatprep.subr.bf16.mxu0 %v3583_v32  ;;  %v3647_v32 = vld [vmem:[%s5105_s0 + $0x340] sm:$0xff]  }
  0x3d   :  { %3293 = vmatpush3.bf16.xpose.msra.mxu1 %v3582_v33  ;;  %v3646_v33 = vld [vmem:[%s5105_s0 + $0x2b8] sm:$0xff]  }
  0x3e   :  { %3314 = vmatprep.subr.bf16.mxu1 %v3585_v34  ;;  %v3649_v34 = vld [vmem:[%s5105_s0 + $0x3c0] sm:$0xff]  }
  0x42   :  { %3277 = vmatmul.mubr.bf16.vlgmr.msra.gmra.mrb[0].mxu0 %v3973_v20 }
  0x43   :  { %3297 = vmatpush3.bf16.xpose.msra.mxu0 %v3584_v35  ;;  %3312 = vmatprep.mubr.bf16.mxu0 %v3973_v20  ;;  %v3648_v35 = vld [vmem:[%s5105_s0 + $0x300] sm:$0xff]  }
  0x44   :  { %3295 = vmatmul.mubr.bf16.vlgmr.msra.gmra.mrb[0].mxu1 %v3973_v20  ;;  %3298 = vmatprep.subr.bf16.mxu0 %v3587_v36  ;;  %v3651_v36 = vld [vmem:[%s5105_s0 + $0x348] sm:$0xff]  }
  0x45   :  { %3315 = vmatpush3.bf16.xpose.msra.mxu1 %v3586_v37  ;;  %3330 = vmatprep.mubr.bf16.mxu1 %v3973_v20  ;;  %v3650_v37 = vld [vmem:[%s5105_s0 + $0x380] sm:$0xff]  }
  0x46   :  { %3316 = vmatprep.subr.bf16.mxu1 %v3589_v38  ;;  %v4231_v38 = vld [vmem:[%s5106_s2] sm:$0xf] }
  0x4b   :  { %3299 = vmatpush3.bf16.xpose.msra.mxu0 %v3588_v39  ;;  %v3653_v39 = vld [vmem:[%s5105_s0 + $0x3c8] sm:$0xff]  }
  0x4c   :  { %3300 = vmatprep.subr.bf16.mxu0 %v3591_v40  ;;  %v3652_v40 = vld [vmem:[%s5105_s0 + $0x308] sm:$0xff]  }
  0x4d   :  { %3317 = vmatpush3.bf16.xpose.msra.mxu1 %v3590_v41  ;;  %v3655_v41 = vld [vmem:[%s5105_s0 + $0x350] sm:$0xff]  }
  0x4e   :  { %3318 = vmatprep.subr.bf16.mxu1 %v3593_v42  ;;  %v3654_v42 = vld [vmem:[%s5105_s0 + $0x388] sm:$0xff]  }
  0x53   :  { %3301 = vmatpush3.bf16.xpose.msra.mxu0 %v3592_v43  ;;  %v3657_v43 = vld [vmem:[%s5105_s0 + $0x3d0] sm:$0xff]  }
  0x54   :  { %3302 = vmatprep.subr.bf16.mxu0 %v3595_v44  ;;  %v3656_v44 = vld [vmem:[%s5105_s0 + $0x310] sm:$0xff]  }
  0x55   :  { %3319 = vmatpush3.bf16.xpose.msra.mxu1 %v3594_v45  ;;  %v3659_v45 = vld [vmem:[%s5105_s0 + $0x358] sm:$0xff]  }
  0x56   :  { %3320 = vmatprep.subr.bf16.mxu1 %v3597_v46  ;;  %v3658_v46 = vld [vmem:[%s5105_s0 + $0x390] sm:$0xff]  }
  0x5b   :  { %3303 = vmatpush3.bf16.xpose.msra.mxu0 %v3596_v47  ;;  %v3661_v47 = vld [vmem:[%s5105_s0 + $0x3d8] sm:$0xff]  }
  0x5c   :  { %3304 = vmatprep.subr.bf16.mxu0 %v3599_v48  ;;  %v3660_v48 = vld [vmem:[%s5105_s0 + $0x318] sm:$0xff]  }
  0x5d   :  { %3321 = vmatpush3.bf16.xpose.msra.mxu1 %v3598_v49  ;;  %v3663_v49 = vld [vmem:[%s5105_s0 + $0x360] sm:$0xff]  }
  0x5e   :  { %3322 = vmatprep.subr.bf16.mxu1 %v3601_v50  ;;  %v3662_v50 = vld [vmem:[%s5105_s0 + $0x398] sm:$0xff]  }
  0x63   :  { %3305 = vmatpush3.bf16.xpose.msra.mxu0 %v3600_v51  ;;  %v3665_v51 = vld [vmem:[%s5105_s0 + $0x3e0] sm:$0xff]  }
  0x64   :  { %3306 = vmatprep.subr.bf16.mxu0 %v3603_v52  ;;  %v3664_v52 = vld [vmem:[%s5105_s0 + $0x320] sm:$0xff]  }
  0x65   :  { %3323 = vmatpush3.bf16.xpose.msra.mxu1 %v3602_v53  ;;  %v3667_v53 = vld [vmem:[%s5105_s0 + $0x368] sm:$0xff]  }
  0x66   :  { %3324 = vmatprep.subr.bf16.mxu1 %v3605_v54  ;;  %v3666_v54 = vld [vmem:[%s5105_s0 + $0x3a0] sm:$0xff]  }
  0x6b   :  { %3307 = vmatpush3.bf16.xpose.msra.mxu0 %v3604_v55  ;;  %v3669_v55 = vld [vmem:[%s5105_s0 + $0x3e8] sm:$0xff]  }
  0x6c   :  { %3308 = vmatprep.subr.bf16.mxu0 %v3607_v56  ;;  %v3668_v56 = vld [vmem:[%s5105_s0 + $0x328] sm:$0xff]  }
  0x6d   :  { %3325 = vmatpush3.bf16.xpose.msra.mxu1 %v3606_v57  ;;  %v3671_v57 = vld [vmem:[%s5105_s0 + $0x370] sm:$0xff]  }
  0x6e   :  { %3326 = vmatprep.subr.bf16.mxu1 %v3609_v58  ;;  %v3670_v58 = vld [vmem:[%s5105_s0 + $0x3a8] sm:$0xff]  }
  0x73   :  { %3309 = vmatpush3.bf16.xpose.msra.mxu0 %v3608_v59  ;;  %v3673_v59 = vld [vmem:[%s5105_s0 + $0x3f0] sm:$0xff]  }
  0x74   :  { %3310 = vmatprep.subr.bf16.mxu0 %v3611_v60  ;;  %v3672_v60 = vld [vmem:[%s5105_s0 + $0x330] sm:$0xff]  }
  0x75   :  { %3327 = vmatpush3.bf16.xpose.msra.mxu1 %v3610_v61  ;;  %v3675_v61 = vld [vmem:[%s5105_s0 + $0x378] sm:$0xff]  }
  0x76   :  { %3328 = vmatprep.subr.bf16.mxu1 %v3613_v62  ;;  %v3674_v62 = vld [vmem:[%s5105_s0 + $0x3b0] sm:$0xff]  }
  0x7b   :  { %3311 = vmatpush3.bf16.xpose.msra.mxu0 %v3612_v63  ;;  %v3677_v63 = vld [vmem:[%s5105_s0 + $0x3f8] sm:$0xff]  }
  0x7c   :  { %3332 = vmatprep.subr.bf16.mxu0 %v3615_v0  ;;  %v3676_v0 = vld [vmem:[%s5105_s0 + $0x338] sm:$0xff]  }
  0x7d   :  { %3329 = vmatpush3.bf16.xpose.msra.mxu1 %v3614_v1  ;;  %v3679_v1 = vld [vmem:[%s5107_s1 + $0x40] sm:$0xff]  }
  0x7e   :  { %3350 = vmatprep.subr.bf16.mxu1 %v3617_v2  ;;  %v3678_v2 = vld [vmem:[%s5105_s0 + $0x3b8] sm:$0xff]  }
  0x82   :  { %3313 = vmatmul.mubr.bf16.vlgmr.msra.gmra.mrb[4].mxu0 %v3973_v20 }
  0x83   :  { %3333 = vmatpush3.bf16.xpose.msra.mxu0 %v3616_v3  ;;  %3348 = vmatprep.mubr.bf16.mxu0 %v3973_v20  ;;  %v3681_v3 = vld [vmem:[%s5107_s1 + $0xc0] sm:$0xff]  }
  0x84   :  { %3331 = vmatmul.mubr.bf16.vlgmr.msra.gmra.mrb[4].mxu1 %v3973_v20  ;;  %3334 = vmatprep.subr.bf16.mxu0 %v3619_v4  ;;  %v3680_v4 = vld [vmem:[%s5107_s1] sm:$0xff]  }
  0x85   :  { %3351 = vmatpush3.bf16.xpose.msra.mxu1 %v3618_v5  ;;  %3366 = vmatprep.mubr.bf16.mxu1 %v3973_v20  ;;  %v3635_v20 = vld [vmem:[%s5105_s0 + $0x268] sm:$0xff]  }
  0x86   :  { %3352 = vmatprep.subr.bf16.mxu1 %v3621_v6  ;;  %v3683_v5 = vld [vmem:[%s5107_s1 + $0x48] sm:$0xff]   ;;  %v4333_v6 = vld [vmem:[%s5108_s3] sm:$0xf] }
  0x8b   :  { %3335 = vmatpush3.bf16.xpose.msra.mxu0 %v3620_v7  ;;  %v3682_v7 = vld [vmem:[%s5107_s1 + $0x80] sm:$0xff]  }
  0x8c   :  { %3336 = vmatprep.subr.bf16.mxu0 %v3623_v8  ;;  %v3685_v8 = vld [vmem:[%s5107_s1 + $0xc8] sm:$0xff]  }
  0x8d   :  { %3353 = vmatpush3.bf16.xpose.msra.mxu1 %v3622_v9  ;;  %v3684_v9 = vld [vmem:[%s5107_s1 + $0x8] sm:$0xff]  }
  0x8e   :  { %3354 = vmatprep.subr.bf16.mxu1 %v3625_v10  ;;  %v3687_v10 = vld [vmem:[%s5107_s1 + $0x50] sm:$0xff]  }
  0x93   :  { %3337 = vmatpush3.bf16.xpose.msra.mxu0 %v3624_v11  ;;  %v3686_v11 = vld [vmem:[%s5107_s1 + $0x88] sm:$0xff]  }
  0x94   :  { %3338 = vmatprep.subr.bf16.mxu0 %v3627_v12  ;;  %v3689_v12 = vld [vmem:[%s5107_s1 + $0xd0] sm:$0xff]  }
  0x95   :  { %3355 = vmatpush3.bf16.xpose.msra.mxu1 %v3626_v13  ;;  %v3688_v13 = vld [vmem:[%s5107_s1 + $0x10] sm:$0xff]  }
  0x96   :  { %3356 = vmatprep.subr.bf16.mxu1 %v3629_v14  ;;  %v3691_v14 = vld [vmem:[%s5107_s1 + $0x58] sm:$0xff]  }
  0x9b   :  { %3339 = vmatpush3.bf16.xpose.msra.mxu0 %v3628_v15  ;;  %v3690_v15 = vld [vmem:[%s5107_s1 + $0x90] sm:$0xff]  }
  0x9c   :  { %3340 = vmatprep.subr.bf16.mxu0 %v3631_v16  ;;  %v3693_v16 = vld [vmem:[%s5107_s1 + $0xd8] sm:$0xff]  }
  0x9d   :  { %3357 = vmatpush3.bf16.xpose.msra.mxu1 %v3630_v17 }
  0x9e   :  { %3358 = vmatprep.subr.bf16.mxu1 %v3633_v18 }
  0xa3   :  { %3341 = vmatpush3.bf16.xpose.msra.mxu0 %v3632_v19 }
  0xa4   :  { %3342 = vmatprep.subr.bf16.mxu0 %v3635_v20 }
  0xa5   :  { %3359 = vmatpush3.bf16.xpose.msra.mxu1 %v3634_v21 }
  0xa6   :  { %3360 = vmatprep.subr.bf16.mxu1 %v3637_v22 }
  0xab   :  { %3343 = vmatpush3.bf16.xpose.msra.mxu0 %v3636_v23 }
  0xac   :  { %3344 = vmatprep.subr.bf16.mxu0 %v3639_v24  ;;  %v3692_v24 = vld [vmem:[%s5107_s1 + $0x18] sm:$0xff]  }
  0xad   :  { %3361 = vmatpush3.bf16.xpose.msra.mxu1 %v3638_v25 }
  0xae   :  { %3362 = vmatprep.subr.bf16.mxu1 %v3641_v26 }
  0xb3   :  { %3345 = vmatpush3.bf16.xpose.msra.mxu0 %v3640_v27 }
  0xb4   :  { %3346 = vmatprep.subr.bf16.mxu0 %v3643_v28  ;;  %v3695_v28 = vld [vmem:[%s5107_s1 + $0x60] sm:$0xff]  }
  0xb5   :  { %3363 = vmatpush3.bf16.xpose.msra.mxu1 %v3642_v29 }
  0xb6   :  { %3364 = vmatprep.subr.bf16.mxu1 %v3645_v30 }
  0xbb   :  { %3347 = vmatpush3.bf16.xpose.msra.mxu0 %v3644_v31 }
  0xbc   :  { %3368 = vmatprep.subr.bf16.mxu0 %v3647_v32 }
  0xbd   :  { %3365 = vmatpush3.bf16.xpose.msra.mxu1 %v3646_v33  ;;  %v3694_v33 = vld [vmem:[%s5107_s1 + $0x98] sm:$0xff]  }
  0xbe   :  { %3386 = vmatprep.subr.bf16.mxu1 %v3649_v34 }
  0xc2   :  { %3349 = vmatmul.mubr.bf16.vlgmr.msra.gmra.mrb[8].mxu0 %v4231_v38 }
  0xc3   :  { %3369 = vmatpush3.bf16.xpose.msra.mxu0 %v3648_v35  ;;  %3384 = vmatprep.mubr.bf16.mxu0 %v4231_v38  ;;  %v3697_v35 = vld [vmem:[%s5107_s1 + $0xe0] sm:$0xff]  }
  0xc4   :  { %3367 = vmatmul.mubr.bf16.vlgmr.msra.gmra.mrb[8].mxu1 %v4231_v38  ;;  %3370 = vmatprep.subr.bf16.mxu0 %v3651_v36 }
  0xc5   :  { %3387 = vmatpush3.bf16.xpose.msra.mxu1 %v3650_v37  ;;  %3402 = vmatprep.mubr.bf16.mxu1 %v4231_v38 }
  0xc6   :  { %3388 = vmatprep.subr.bf16.mxu1 %v3653_v39  ;;  %v3696_v39 = vld [vmem:[%s5107_s1 + $0x20] sm:$0xff]  }
  0xcb   :  { %3371 = vmatpush3.bf16.xpose.msra.mxu0 %v3652_v40  ;;  %v3699_v40 = vld [vmem:[%s5107_s1 + $0x68] sm:$0xff]  }
  0xcc   :  { %3372 = vmatprep.subr.bf16.mxu0 %v3655_v41  ;;  %v3698_v41 = vld [vmem:[%s5107_s1 + $0xa0] sm:$0xff]  }
  0xcd   :  { %3389 = vmatpush3.bf16.xpose.msra.mxu1 %v3654_v42  ;;  %v3701_v42 = vld [vmem:[%s5107_s1 + $0xe8] sm:$0xff]  }
  0xce   :  { %3390 = vmatprep.subr.bf16.mxu1 %v3657_v43  ;;  %v3700_v43 = vld [vmem:[%s5107_s1 + $0x28] sm:$0xff]  }
  0xd3   :  { %3373 = vmatpush3.bf16.xpose.msra.mxu0 %v3656_v44  ;;  %v3703_v44 = vld [vmem:[%s5107_s1 + $0x70] sm:$0xff]  }
  0xd4   :  { %3374 = vmatprep.subr.bf16.mxu0 %v3659_v45  ;;  %v3702_v45 = vld [vmem:[%s5107_s1 + $0xa8] sm:$0xff]  }
  0xd5   :  { %3391 = vmatpush3.bf16.xpose.msra.mxu1 %v3658_v46  ;;  %v3705_v46 = vld [vmem:[%s5107_s1 + $0xf0] sm:$0xff]  }
  0xd6   :  { %3392 = vmatprep.subr.bf16.mxu1 %v3661_v47  ;;  %v3704_v47 = vld [vmem:[%s5107_s1 + $0x30] sm:$0xff]  }
  0xdb   :  { %3375 = vmatpush3.bf16.xpose.msra.mxu0 %v3660_v48  ;;  %v3707_v48 = vld [vmem:[%s5107_s1 + $0x78] sm:$0xff]  }
  0xdc   :  { %3376 = vmatprep.subr.bf16.mxu0 %v3663_v49  ;;  %v3706_v49 = vld [vmem:[%s5107_s1 + $0xb0] sm:$0xff]  }
  0xdd   :  { %3393 = vmatpush3.bf16.xpose.msra.mxu1 %v3662_v50  ;;  %v3709_v50 = vld [vmem:[%s5107_s1 + $0xf8] sm:$0xff]  }
  0xde   :  { %3394 = vmatprep.subr.bf16.mxu1 %v3665_v51  ;;  %v3708_v51 = vld [vmem:[%s5107_s1 + $0x38] sm:$0xff]  }
  0xe3   :  { %3377 = vmatpush3.bf16.xpose.msra.mxu0 %v3664_v52  ;;  %v3711_v52 = vld [vmem:[%s5107_s1 + $0x140] sm:$0xff]  }
  0xe4   :  { %3378 = vmatprep.subr.bf16.mxu0 %v3667_v53  ;;  %v3710_v53 = vld [vmem:[%s5107_s1 + $0xb8] sm:$0xff]  }
  0xe5   :  { %3395 = vmatpush3.bf16.xpose.msra.mxu1 %v3666_v54  ;;  %v3713_v54 = vld [vmem:[%s5107_s1 + $0x1c0] sm:$0xff]  }
  0xe6   :  { %3396 = vmatprep.subr.bf16.mxu1 %v3669_v55  ;;  %v3712_v55 = vld [vmem:[%s5107_s1 + $0x100] sm:$0xff]  }
  0xeb   :  { %3379 = vmatpush3.bf16.xpose.msra.mxu0 %v3668_v56  ;;  %v3715_v56 = vld [vmem:[%s5107_s1 + $0x148] sm:$0xff]  }
  0xec   :  { %3380 = vmatprep.subr.bf16.mxu0 %v3671_v57  ;;  %v3714_v57 = vld [vmem:[%s5107_s1 + $0x180] sm:$0xff]  }
  0xed   :  { %3397 = vmatpush3.bf16.xpose.msra.mxu1 %v3670_v58  ;;  %v3717_v58 = vld [vmem:[%s5107_s1 + $0x1c8] sm:$0xff]  }
  0xee   :  { %3398 = vmatprep.subr.bf16.mxu1 %v3673_v59  ;;  %v3716_v59 = vld [vmem:[%s5107_s1 + $0x108] sm:$0xff]  }
  0xf3   :  { %3381 = vmatpush3.bf16.xpose.msra.mxu0 %v3672_v60  ;;  %v3719_v60 = vld [vmem:[%s5107_s1 + $0x150] sm:$0xff]  }
  0xf4   :  { %3382 = vmatprep.subr.bf16.mxu0 %v3675_v61  ;;  %v3718_v61 = vld [vmem:[%s5107_s1 + $0x188] sm:$0xff]  }
  0xf5   :  { %3399 = vmatpush3.bf16.xpose.msra.mxu1 %v3674_v62  ;;  %v3721_v62 = vld [vmem:[%s5107_s1 + $0x1d0] sm:$0xff]  }
  0xf6   :  { %3400 = vmatprep.subr.bf16.mxu1 %v3677_v63  ;;  %v3720_v63 = vld [vmem:[%s5107_s1 + $0x110] sm:$0xff]  }
  0xfb   :  { %3383 = vmatpush3.bf16.xpose.msra.mxu0 %v3676_v0  ;;  %v3723_v0 = vld [vmem:[%s5107_s1 + $0x158] sm:$0xff]  }
  0xfc   :  { %3404 = vmatprep.subr.bf16.mxu0 %v3679_v1  ;;  %v3722_v1 = vld [vmem:[%s5107_s1 + $0x190] sm:$0xff]  }
  0xfd   :  { %3401 = vmatpush3.bf16.xpose.msra.mxu1 %v3678_v2  ;;  %v3725_v2 = vld [vmem:[%s5107_s1 + $0x1d8] sm:$0xff]  }
  0xfe   :  { %3422 = vmatprep.subr.bf16.mxu1 %v3681_v3 }
 0x102   :  { %3385 = vmatmul.mubr.bf16.vlgmr.msra.gmra.mrb[12].mxu0 %v4231_v38 }
 0x103   :  { %3405 = vmatpush3.bf16.xpose.msra.mxu0 %v3680_v4  ;;  %3420 = vmatprep.mubr.bf16.mxu0 %v4333_v6 }
 0x104   :  { %3403 = vmatmul.mubr.bf16.vlgmr.msra.gmra.mrb[12].mxu1 %v4231_v38  ;;  %3406 = vmatprep.subr.bf16.mxu0 %v3683_v5 }
 0x105   :  { %3423 = vmatpush3.bf16.xpose.msra.mxu1 %v3682_v7  ;;  %3438 = vmatprep.mubr.bf16.mxu1 %v4333_v6 }
 0x106   :  { %3424 = vmatprep.subr.bf16.mxu1 %v3685_v8 }
 0x10b   :  { %3407 = vmatpush3.bf16.xpose.msra.mxu0 %v3684_v9 }
 0x10c   :  { %3408 = vmatprep.subr.bf16.mxu0 %v3687_v10 }
 0x10d   :  { %3425 = vmatpush3.bf16.xpose.msra.mxu1 %v3686_v11  ;;  %v3724_v11 = vld [vmem:[%s5107_s1 + $0x118] sm:$0xff]  }
 0x10e   :  { %3426 = vmatprep.subr.bf16.mxu1 %v3689_v12 }
 0x113   :  { %3409 = vmatpush3.bf16.xpose.msra.mxu0 %v3688_v13 }
 0x114   :  { %3410 = vmatprep.subr.bf16.mxu0 %v3691_v14 }
 0x115   :  { %3427 = vmatpush3.bf16.xpose.msra.mxu1 %v3690_v15  ;;  %v4369_v17 = vpop.f32.mrb[0].mxu0 }
 0x116   :  { %v2765_v18 = vmul.f32 %v4369_v17, %v4369_v17  ;;  %v4373_v19 = vpop.f32.mrb[1].mxu0  ;;  %3428 = vmatprep.subr.bf16.mxu1 %v3693_v16 }
 0x117   :  { %v2730_v20 = vadd.f32 %v4373_v19, %v4369_v17  ;;  %v2766_v21 = vmul.f32 %v4373_v19, %v4373_v19  ;;  %v1087_v22 = vpop.f32.mrb[2].mxu0  ;;  %v4379_v23 = vpop.f32.mrb[0].mxu1 }
 0x118   :  { %v2767_v25 = vmul.f32 %v4379_v23, %v4379_v23  ;;  %v1088_v26 = vpop.f32.mrb[3].mxu0  ;;  %v4386_v27 = vpop.f32.mrb[1].mxu1 }
 0x119   :  { %v2781_v29 = vadd.f32 %v2766_v21, %v2765_v18  ;;  %v2731_v30 = vadd.f32 %v2730_v20, %v4379_v23  ;;  %v2768_v31 = vmul.f32 %v4386_v27, %v4386_v27  ;;  %v1128_v32 = vpop.f32.mrb[2].mxu1  ;;  %v3727_v18 = vld [vmem:[%s5107_s1 + $0x160] sm:$0xff]   ;;  %v3726_v21 = vld [vmem:[%s5107_s1 + $0x198] sm:$0xff]  }
 0x11a   :  { %v1129_v34 = vpop.f32.mrb[3].mxu1  ;;  %v3728_v32 = vld [vmem:[%s5107_s1 + $0x120] sm:$0xff]  }
 0x11b   :  { %v2782_v36 = vadd.f32 %v2781_v29, %v2767_v25  ;;  %v4401_v37 = vadd.f32 %v2731_v30, %v4386_v27  ;;  %3411 = vmatpush3.bf16.xpose.msra.mxu0 %v3692_v24  ;;  %v3730_v34 = vld [vmem:[%s5107_s1 + $0x1a0] sm:$0xff]  }
 0x11c   :  { %3412 = vmatprep.subr.bf16.mxu0 %v3695_v28  ;;  %v3729_v28 = vld [vmem:[%s5107_s1 + $0x1e0] sm:$0xff]  }
 0x11d   :  { %v4403_v38 = vadd.f32 %v2782_v36, %v2768_v31  ;;  %3429 = vmatpush3.bf16.xpose.msra.mxu1 %v3694_v33  ;;  %v3731_v33 = vld [vmem:[%s5107_s1 + $0x168] sm:$0xff]  }
 0x11e   :  { %3430 = vmatprep.subr.bf16.mxu1 %v3697_v35  ;;  %v3733_v35 = vld [vmem:[%s5107_s1 + $0x1e8] sm:$0xff]  }
 0x11f   :  { %v3732_v36 = vld [vmem:[%s5107_s1 + $0x128] sm:$0xff]  }
 0x123   :  { %3413 = vmatpush3.bf16.xpose.msra.mxu0 %v3696_v39  ;;  %v3737_v39 = vld [vmem:[%s5107_s1 + $0x1f0] sm:$0xff]  }
 0x124   :  { %3414 = vmatprep.subr.bf16.mxu0 %v3699_v40  ;;  %v3736_v40 = vld [vmem:[%s5107_s1 + $0x130] sm:$0xff]  }
 0x125   :  { %3431 = vmatpush3.bf16.xpose.msra.mxu1 %v3698_v41  ;;  %v3739_v41 = vld [vmem:[%s5107_s1 + $0x178] sm:$0xff]  }
 0x126   :  { %3432 = vmatprep.subr.bf16.mxu1 %v3701_v42  ;;  %v3738_v42 = vld [vmem:[%s5107_s1 + $0x1b0] sm:$0xff]  }
 0x12b   :  { %3415 = vmatpush3.bf16.xpose.msra.mxu0 %v3700_v43  ;;  %v3741_v43 = vld [vmem:[%s5107_s1 + $0x1f8] sm:$0xff]  }
 0x12c   :  { %3416 = vmatprep.subr.bf16.mxu0 %v3703_v44  ;;  %v3740_v44 = vld [vmem:[%s5107_s1 + $0x138] sm:$0xff]  }
 0x12d   :  { %3433 = vmatpush3.bf16.xpose.msra.mxu1 %v3702_v45  ;;  %v3743_v45 = vld [vmem:[%s5107_s1 + $0x240] sm:$0xff]  }
 0x12e   :  { %3434 = vmatprep.subr.bf16.mxu1 %v3705_v46  ;;  %v3742_v46 = vld [vmem:[%s5107_s1 + $0x1b8] sm:$0xff]  }
 0x133   :  { %3417 = vmatpush3.bf16.xpose.msra.mxu0 %v3704_v47  ;;  %v3745_v47 = vld [vmem:[%s5107_s1 + $0x2c0] sm:$0xff]  }
 0x134   :  { %3418 = vmatprep.subr.bf16.mxu0 %v3707_v48  ;;  %v3744_v48 = vld [vmem:[%s5107_s1 + $0x200] sm:$0xff]  }
 0x135   :  { %3435 = vmatpush3.bf16.xpose.msra.mxu1 %v3706_v49  ;;  %v3747_v49 = vld [vmem:[%s5107_s1 + $0x248] sm:$0xff]  }
 0x136   :  { %3436 = vmatprep.subr.bf16.mxu1 %v3709_v50  ;;  %v3746_v50 = vld [vmem:[%s5107_s1 + $0x280] sm:$0xff]  }
 0x13b   :  { %3419 = vmatpush3.bf16.xpose.msra.mxu0 %v3708_v51  ;;  %v3749_v51 = vld [vmem:[%s5107_s1 + $0x2c8] sm:$0xff]  }
 0x13c   :  { %3440 = vmatprep.subr.bf16.mxu0 %v3711_v52  ;;  %v3748_v52 = vld [vmem:[%s5107_s1 + $0x208] sm:$0xff]  }
 0x13d   :  { %3437 = vmatpush3.bf16.xpose.msra.mxu1 %v3710_v53  ;;  %v3751_v53 = vld [vmem:[%s5107_s1 + $0x250] sm:$0xff]  }
 0x13e   :  { %3458 = vmatprep.subr.bf16.mxu1 %v3713_v54  ;;  %v3750_v54 = vld [vmem:[%s5107_s1 + $0x288] sm:$0xff]  }
 0x142   :  { %3421 = vmatmul.mubr.bf16.vlgmr.msra.gmra.mrb[16].mxu0 %v4333_v6 }
 0x143   :  { %3441 = vmatpush3.bf16.xpose.msra.mxu0 %v3712_v55  ;;  %3456 = vmatprep.mubr.bf16.mxu0 %v4333_v6  ;;  %v3753_v55 = vld [vmem:[%s5107_s1 + $0x2d0] sm:$0xff]  }
 0x144   :  { %3439 = vmatmul.mubr.bf16.vlgmr.msra.gmra.mrb[16].mxu1 %v4333_v6  ;;  %3442 = vmatprep.subr.bf16.mxu0 %v3715_v56  ;;  %v3752_v56 = vld [vmem:[%s5107_s1 + $0x210] sm:$0xff]  }
 0x145   :  { %3459 = vmatpush3.bf16.xpose.msra.mxu1 %v3714_v57  ;;  %3474 = vmatprep.mubr.bf16.mxu1 %v4333_v6  ;;  %v3755_v57 = vld [vmem:[%s5107_s1 + $0x258] sm:$0xff]  }
 0x146   :  { %3460 = vmatprep.subr.bf16.mxu1 %v3717_v58  ;;  %v3754_v58 = vld [vmem:[%s5107_s1 + $0x290] sm:$0xff]  }
 0x14b   :  { %3443 = vmatpush3.bf16.xpose.msra.mxu0 %v3716_v59  ;;  %v3757_v59 = vld [vmem:[%s5107_s1 + $0x2d8] sm:$0xff]  }
 0x14c   :  { %3444 = vmatprep.subr.bf16.mxu0 %v3719_v60 }
 0x14d   :  { %3461 = vmatpush3.bf16.xpose.msra.mxu1 %v3718_v61 }
 0x14e   :  { %3462 = vmatprep.subr.bf16.mxu1 %v3721_v62 }
 0x153   :  { %3445 = vmatpush3.bf16.xpose.msra.mxu0 %v3720_v63 }
 0x154   :  { %3446 = vmatprep.subr.bf16.mxu0 %v3723_v0 }
 0x155   :  { %3463 = vmatpush3.bf16.xpose.msra.mxu1 %v3722_v1  ;;  %v4493_v3 = vpop.f32.mrb[4].mxu0 }
 0x156   :  { %v2733_v4 = vadd.f32 %v4401_v37, %v4493_v3  ;;  %v2769_v5 = vmul.f32 %v4493_v3, %v4493_v3  ;;  %v4499_v7 = vpop.f32.mrb[5].mxu0  ;;  %3464 = vmatprep.subr.bf16.mxu1 %v3725_v2  ;;  %v3735_v37 = vld [vmem:[%s5107_s1 + $0x170] sm:$0xff]  }
 0x157   :  { %v2770_v8 = vmul.f32 %v4499_v7, %v4499_v7  ;;  %v1169_v9 = vpop.f32.mrb[6].mxu0  ;;  %v4503_v10 = vpop.f32.mrb[4].mxu1 }
 0x158   :  { %v2784_v12 = vadd.f32 %v4403_v38, %v2769_v5  ;;  %v2734_v13 = vadd.f32 %v2733_v4, %v4499_v7  ;;  %v2771_v14 = vmul.f32 %v4503_v10, %v4503_v10  ;;  %v1170_v15 = vpop.f32.mrb[7].mxu0  ;;  %v4512_v16 = vpop.f32.mrb[5].mxu1  ;;  %v3734_v38 = vld [vmem:[%s5107_s1 + $0x1a8] sm:$0xff]   ;;  %v3756_v4 = vld [vmem:[%s5107_s1 + $0x218] sm:$0xff]  }
 0x159   :  { %v1210_v20 = vpop.f32.mrb[6].mxu1  ;;  %v2772_v25 = vmul.f32 %v4512_v16, %v4512_v16  ;;  %v3758_v15 = vld [vmem:[%s5107_s1 + $0x298] sm:$0xff]  }
 0x15a   :  { %v2785_v22 = vadd.f32 %v2784_v12, %v2770_v8  ;;  %v2735_v24 = vadd.f32 %v2734_v13, %v4503_v10  ;;  %v1211_v26 = vpop.f32.mrb[7].mxu1  ;;  %v3759_v13 = vld [vmem:[%s5107_s1 + $0x260] sm:$0xff]  }
 0x15b   :  { %3447 = vmatpush3.bf16.xpose.msra.mxu0 %v3724_v11 }
 0x15c   :  { %v2786_v29 = vadd.f32 %v2785_v22, %v2771_v14  ;;  %v4527_v30 = vadd.f32 %v2735_v24, %v4512_v16  ;;  %3448 = vmatprep.subr.bf16.mxu0 %v3727_v18  ;;  %v3761_v24 = vld [vmem:[%s5107_s1 + $0x2e0] sm:$0xff]  }
 0x15d   :  { %3465 = vmatpush3.bf16.xpose.msra.mxu1 %v3726_v21 }
 0x15e   :  { %v4529_v31 = vadd.f32 %v2786_v29, %v2772_v25  ;;  %3466 = vmatprep.subr.bf16.mxu1 %v3729_v28  ;;  %v3760_v29 = vld [vmem:[%s5107_s1 + $0x220] sm:$0xff]  }
 0x163   :  { %3449 = vmatpush3.bf16.xpose.msra.mxu0 %v3728_v32  ;;  %v3765_v32 = vld [vmem:[%s5107_s1 + $0x2e8] sm:$0xff]  }
 0x164   :  { %3450 = vmatprep.subr.bf16.mxu0 %v3731_v33  ;;  %v3764_v33 = vld [vmem:[%s5107_s1 + $0x228] sm:$0xff]  }
 0x165   :  { %3467 = vmatpush3.bf16.xpose.msra.mxu1 %v3730_v34  ;;  %v3767_v34 = vld [vmem:[%s5107_s1 + $0x270] sm:$0xff]  }
 0x166   :  { %3468 = vmatprep.subr.bf16.mxu1 %v3733_v35  ;;  %v3766_v35 = vld [vmem:[%s5107_s1 + $0x2a8] sm:$0xff]  }
 0x16b   :  { %3451 = vmatpush3.bf16.xpose.msra.mxu0 %v3732_v36  ;;  %v3769_v36 = vld [vmem:[%s5107_s1 + $0x2f0] sm:$0xff]  }
 0x16c   :  { %3452 = vmatprep.subr.bf16.mxu0 %v3735_v37  ;;  %v3768_v37 = vld [vmem:[%s5107_s1 + $0x230] sm:$0xff]  }
 0x16d   :  { %3469 = vmatpush3.bf16.xpose.msra.mxu1 %v3734_v38  ;;  %v3771_v38 = vld [vmem:[%s5107_s1 + $0x278] sm:$0xff]  }
 0x16e   :  { %3470 = vmatprep.subr.bf16.mxu1 %v3737_v39  ;;  %v3770_v39 = vld [vmem:[%s5107_s1 + $0x2b0] sm:$0xff]  }
 0x173   :  { %3453 = vmatpush3.bf16.xpose.msra.mxu0 %v3736_v40  ;;  %v3773_v40 = vld [vmem:[%s5107_s1 + $0x2f8] sm:$0xff]  }
 0x174   :  { %3454 = vmatprep.subr.bf16.mxu0 %v3739_v41  ;;  %v3772_v41 = vld [vmem:[%s5107_s1 + $0x238] sm:$0xff]  }
 0x175   :  { %3471 = vmatpush3.bf16.xpose.msra.mxu1 %v3738_v42  ;;  %v3775_v42 = vld [vmem:[%s5107_s1 + $0x340] sm:$0xff]  }
 0x176   :  { %3472 = vmatprep.subr.bf16.mxu1 %v3741_v43  ;;  %v3774_v43 = vld [vmem:[%s5107_s1 + $0x2b8] sm:$0xff]  }
 0x17b   :  { %3455 = vmatpush3.bf16.xpose.msra.mxu0 %v3740_v44  ;;  %v3777_v44 = vld [vmem:[%s5107_s1 + $0x3c0] sm:$0xff]  }
 0x17c   :  { %3476 = vmatprep.subr.bf16.mxu0 %v3743_v45  ;;  %v3776_v45 = vld [vmem:[%s5107_s1 + $0x300] sm:$0xff]  }
 0x17d   :  { %3473 = vmatpush3.bf16.xpose.msra.mxu1 %v3742_v46  ;;  %v3779_v46 = vld [vmem:[%s5107_s1 + $0x348] sm:$0xff]  }
 0x17e   :  { %3494 = vmatprep.subr.bf16.mxu1 %v3745_v47  ;;  %v3778_v47 = vld [vmem:[%s5107_s1 + $0x380] sm:$0xff]  }
 0x182   :  { %3457 = vmatmul.mubr.bf16.vlgmr.msra.gmra.mrb[20].mxu0 %v4333_v6 }
 0x183   :  { %3477 = vmatpush3.bf16.xpose.msra.mxu0 %v3744_v48  ;;  %3492 = vmatprep.mubr.bf16.mxu0 %v4333_v6  ;;  %v3781_v48 = vld [vmem:[%s5107_s1 + $0x3c8] sm:$0xff]  }
 0x184   :  { %3475 = vmatmul.mubr.bf16.vlgmr.msra.gmra.mrb[20].mxu1 %v4333_v6  ;;  %3478 = vmatprep.subr.bf16.mxu0 %v3747_v49  ;;  %v3780_v49 = vld [vmem:[%s5107_s1 + $0x308] sm:$0xff]  }
 0x185   :  { %3495 = vmatpush3.bf16.xpose.msra.mxu1 %v3746_v50  ;;  %3510 = vmatprep.mubr.bf16.mxu1 %v4333_v6  ;;  %v3783_v50 = vld [vmem:[%s5107_s1 + $0x350] sm:$0xff]  }
 0x186   :  { %3496 = vmatprep.subr.bf16.mxu1 %v3749_v51  ;;  %v3782_v51 = vld [vmem:[%s5107_s1 + $0x388] sm:$0xff]  }
 0x18b   :  { %3479 = vmatpush3.bf16.xpose.msra.mxu0 %v3748_v52  ;;  %v3785_v52 = vld [vmem:[%s5107_s1 + $0x3d0] sm:$0xff]  }
 0x18c   :  { %3480 = vmatprep.subr.bf16.mxu0 %v3751_v53  ;;  %v3784_v53 = vld [vmem:[%s5107_s1 + $0x310] sm:$0xff]  }
 0x18d   :  { %3497 = vmatpush3.bf16.xpose.msra.mxu1 %v3750_v54  ;;  %v3787_v54 = vld [vmem:[%s5107_s1 + $0x358] sm:$0xff]  }
 0x18e   :  { %3498 = vmatprep.subr.bf16.mxu1 %v3753_v55  ;;  %v3786_v55 = vld [vmem:[%s5107_s1 + $0x390] sm:$0xff]  }
 0x193   :  { %3481 = vmatpush3.bf16.xpose.msra.mxu0 %v3752_v56  ;;  %v3789_v56 = vld [vmem:[%s5107_s1 + $0x3d8] sm:$0xff]  }
 0x194   :  { %3482 = vmatprep.subr.bf16.mxu0 %v3755_v57 }
 0x195   :  { %3499 = vmatpush3.bf16.xpose.msra.mxu1 %v3754_v58  ;;  %v4619_v60 = vpop.f32.mrb[8].mxu0 }
 0x196   :  { %v2737_v61 = vadd.f32 %v4527_v30, %v4619_v60  ;;  %v2773_v62 = vmul.f32 %v4619_v60, %v4619_v60  ;;  %v4625_v63 = vpop.f32.mrb[9].mxu0  ;;  %3500 = vmatprep.subr.bf16.mxu1 %v3757_v59  ;;  %v3763_v30 = vld [vmem:[%s5107_s1 + $0x268] sm:$0xff]  }
 0x197   :  { %v2774_v0 = vmul.f32 %v4625_v63, %v4625_v63  ;;  %v1251_v1 = vpop.f32.mrb[10].mxu0  ;;  %v4629_v2 = vpop.f32.mrb[8].mxu1 }
 0x198   :  { %v2788_v5 = vadd.f32 %v4529_v31, %v2773_v62  ;;  %v2738_v8 = vadd.f32 %v2737_v61, %v4625_v63  ;;  %v2775_v9 = vmul.f32 %v4629_v2, %v4629_v2  ;;  %v1252_v11 = vpop.f32.mrb[11].mxu0  ;;  %v4638_v12 = vpop.f32.mrb[9].mxu1  ;;  %v3762_v31 = vld [vmem:[%s5107_s1 + $0x2a0] sm:$0xff]  }
 0x199   :  { %v1292_v14 = vpop.f32.mrb[10].mxu1  ;;  %v2776_v21 = vmul.f32 %v4638_v12, %v4638_v12 }
 0x19a   :  { %v2789_v18 = vadd.f32 %v2788_v5, %v2774_v0  ;;  %v2739_v20 = vadd.f32 %v2738_v8, %v4629_v2  ;;  %v1293_v22 = vpop.f32.mrb[11].mxu1  ;;  %v3791_v14 = vld [vmem:[%s5107_s1 + $0x360] sm:$0xff]  }
 0x19b   :  { %3483 = vmatpush3.bf16.xpose.msra.mxu0 %v3756_v4  ;;  %v3788_v4 = vld [vmem:[%s5107_s1 + $0x318] sm:$0xff]  }
 0x19c   :  { %v2790_v25 = vadd.f32 %v2789_v18, %v2775_v9  ;;  %v4653_v26 = vadd.f32 %v2739_v20, %v4638_v12  ;;  %3484 = vmatprep.subr.bf16.mxu0 %v3759_v13  ;;  %v3790_v18 = vld [vmem:[%s5107_s1 + $0x398] sm:$0xff]  }
 0x19d   :  { %3501 = vmatpush3.bf16.xpose.msra.mxu1 %v3758_v15 }
 0x19e   :  { %v4655_v28 = vadd.f32 %v2790_v25, %v2776_v21  ;;  %3502 = vmatprep.subr.bf16.mxu1 %v3761_v24  ;;  %v3793_v25 = vld [vmem:[%s5107_s1 + $0x3e0] sm:$0xff]  }
 0x1a3   :  { %3485 = vmatpush3.bf16.xpose.msra.mxu0 %v3760_v29 }
 0x1a4   :  { %3486 = vmatprep.subr.bf16.mxu0 %v3763_v30  ;;  %v3792_v30 = vld [vmem:[%s5107_s1 + $0x320] sm:$0xff]  }
 0x1a5   :  { %3503 = vmatpush3.bf16.xpose.msra.mxu1 %v3762_v31  ;;  %v3795_v31 = vld [vmem:[%s5107_s1 + $0x368] sm:$0xff]  }
 0x1a6   :  { %3504 = vmatprep.subr.bf16.mxu1 %v3765_v32  ;;  %v3794_v32 = vld [vmem:[%s5107_s1 + $0x3a0] sm:$0xff]  }
 0x1ab   :  { %3487 = vmatpush3.bf16.xpose.msra.mxu0 %v3764_v33  ;;  %v3797_v33 = vld [vmem:[%s5107_s1 + $0x3e8] sm:$0xff]  }
 0x1ac   :  { %3488 = vmatprep.subr.bf16.mxu0 %v3767_v34  ;;  %v3796_v34 = vld [vmem:[%s5107_s1 + $0x328] sm:$0xff]  }
 0x1ad   :  { %3505 = vmatpush3.bf16.xpose.msra.mxu1 %v3766_v35  ;;  %v3799_v35 = vld [vmem:[%s5107_s1 + $0x370] sm:$0xff]  }
 0x1ae   :  { %3506 = vmatprep.subr.bf16.mxu1 %v3769_v36  ;;  %v3798_v36 = vld [vmem:[%s5107_s1 + $0x3a8] sm:$0xff]  }
 0x1b3   :  { %3489 = vmatpush3.bf16.xpose.msra.mxu0 %v3768_v37  ;;  %v3801_v37 = vld [vmem:[%s5107_s1 + $0x3f0] sm:$0xff]  }
 0x1b4   :  { %3490 = vmatprep.subr.bf16.mxu0 %v3771_v38  ;;  %v3800_v38 = vld [vmem:[%s5107_s1 + $0x330] sm:$0xff]  }
 0x1b5   :  { %3507 = vmatpush3.bf16.xpose.msra.mxu1 %v3770_v39  ;;  %v3803_v39 = vld [vmem:[%s5107_s1 + $0x378] sm:$0xff]  }
 0x1b6   :  { %3508 = vmatprep.subr.bf16.mxu1 %v3773_v40  ;;  %v3802_v40 = vld [vmem:[%s5107_s1 + $0x3b0] sm:$0xff]  }
 0x1bb   :  { %3491 = vmatpush3.bf16.xpose.msra.mxu0 %v3772_v41  ;;  %v3805_v41 = vld [vmem:[%s5107_s1 + $0x3f8] sm:$0xff]  }
 0x1bc   :  { %3512 = vmatprep.subr.bf16.mxu0 %v3775_v42  ;;  %v3804_v42 = vld [vmem:[%s5107_s1 + $0x338] sm:$0xff]  }
 0x1bd   :  { %3509 = vmatpush3.bf16.xpose.msra.mxu1 %v3774_v43  ;;  %v3806_v43 = vld [vmem:[%s5107_s1 + $0x3b8] sm:$0xff]  }
 0x1be   :  { %3530 = vmatprep.subr.bf16.mxu1 %v3777_v44 }
 0x1c2   :  { %3493 = vmatmul.mubr.bf16.vlgmr.msra.gmra.mrb[24].mxu0 %v4333_v6 }
 0x1c3   :  { %3513 = vmatpush3.bf16.xpose.msra.mxu0 %v3776_v45  ;;  %3528 = vmatprep.mubr.bf16.mxu0 %v4333_v6 }
 0x1c4   :  { %3511 = vmatmul.mubr.bf16.vlgmr.msra.gmra.mrb[24].mxu1 %v4333_v6  ;;  %3514 = vmatprep.subr.bf16.mxu0 %v3779_v46 }
 0x1c5   :  { %3531 = vmatpush3.bf16.xpose.msra.mxu1 %v3778_v47  ;;  %3546 = vmatprep.mubr.bf16.mxu1 %v4333_v6 }
 0x1c6   :  { %3532 = vmatprep.subr.bf16.mxu1 %v3781_v48 }
 0x1cb   :  { %3515 = vmatpush3.bf16.xpose.msra.mxu0 %v3780_v49 }
 0x1cc   :  { %3516 = vmatprep.subr.bf16.mxu0 %v3783_v50 }
 0x1cd   :  { %3533 = vmatpush3.bf16.xpose.msra.mxu1 %v3782_v51 }
 0x1ce   :  { %3534 = vmatprep.subr.bf16.mxu1 %v3785_v52 }
 0x1d3   :  { %3517 = vmatpush3.bf16.xpose.msra.mxu0 %v3784_v53 }
 0x1d4   :  { %3518 = vmatprep.subr.bf16.mxu0 %v3787_v54 }
 0x1d5   :  { %3535 = vmatpush3.bf16.xpose.msra.mxu1 %v3786_v55  ;;  %v4745_v57 = vpop.f32.mrb[12].mxu0 }
 0x1d6   :  { %v2741_v58 = vadd.f32 %v4653_v26, %v4745_v57  ;;  %v2777_v59 = vmul.f32 %v4745_v57, %v4745_v57  ;;  %v4751_v61 = vpop.f32.mrb[13].mxu0  ;;  %3536 = vmatprep.subr.bf16.mxu1 %v3789_v56 }
 0x1d7   :  { %v2778_v62 = vmul.f32 %v4751_v61, %v4751_v61  ;;  %v1333_v0 = vpop.f32.mrb[14].mxu0  ;;  %v4755_v1 = vpop.f32.mrb[12].mxu1 }
 0x1d8   :  { %v2792_v5 = vadd.f32 %v4655_v28, %v2777_v59  ;;  %v2742_v8 = vadd.f32 %v2741_v58, %v4751_v61  ;;  %v2779_v9 = vmul.f32 %v4755_v1, %v4755_v1  ;;  %v1334_v11 = vpop.f32.mrb[15].mxu0  ;;  %v4764_v13 = vpop.f32.mrb[13].mxu1 }
 0x1d9   :  { %v1374_v15 = vpop.f32.mrb[14].mxu1  ;;  %v2780_v22 = vmul.f32 %v4764_v13, %v4764_v13 }
 0x1da   :  { %v1375_v20 = vpop.f32.mrb[15].mxu1  ;;  %v2743_v21 = vadd.f32 %v2742_v8, %v4755_v1  ;;  %v2793_v24 = vadd.f32 %v2792_v5, %v2778_v62 }
 0x1db   :  { %3519 = vmatpush3.bf16.xpose.msra.mxu0 %v3788_v4 }
 0x1dc   :  { %v2744_v26 = vadd.f32 %v2743_v21, %v4764_v13  ;;  %v2794_v28 = vadd.f32 %v2793_v24, %v2779_v9  ;;  %3520 = vmatprep.subr.bf16.mxu0 %v3791_v14 }
 0x1dd   :  { %3537 = vmatpush3.bf16.xpose.msra.mxu1 %v3790_v18 }
 0x1de   :  { %2745 = vadd.xlane.f32.xlu0 %v2744_v26  ;;  %v2795_v29 = vadd.f32 %v2794_v28, %v2780_v22  ;;  %3538 = vmatprep.subr.bf16.mxu1 %v3793_v25 }
 0x1e0   :  { %2796 = vadd.xlane.f32.xlu1 %v2795_v29 }
 0x1e3   :  { %3521 = vmatpush3.bf16.xpose.msra.mxu0 %v3792_v30 }
 0x1e4   :  { %3522 = vmatprep.subr.bf16.mxu0 %v3795_v31 }
 0x1e5   :  { %3539 = vmatpush3.bf16.xpose.msra.mxu1 %v3794_v32 }
 0x1e6   :  { %3540 = vmatprep.subr.bf16.mxu1 %v3797_v33 }
 0x1eb   :  { %3523 = vmatpush3.bf16.xpose.msra.mxu0 %v3796_v34 }
 0x1ec   :  { %3524 = vmatprep.subr.bf16.mxu0 %v3799_v35 }
 0x1ed   :  { %3541 = vmatpush3.bf16.xpose.msra.mxu1 %v3798_v36 }
 0x1ee   :  { %3542 = vmatprep.subr.bf16.mxu1 %v3801_v37 }
 0x1f3   :  { %3525 = vmatpush3.bf16.xpose.msra.mxu0 %v3800_v38 }
 0x1f4   :  { %3526 = vmatprep.subr.bf16.mxu0 %v3803_v39 }
 0x1f5   :  { %3543 = vmatpush3.bf16.xpose.msra.mxu1 %v3802_v40 }
 0x1f6   :  { %3544 = vmatprep.subr.bf16.mxu1 %v3805_v41 }
 0x1fb   :  { %3527 = vmatpush3.bf16.xpose.msra.mxu0 %v3804_v42 }
 0x1fd   :  { %3545 = vmatpush3.bf16.xpose.msra.mxu1 %v3806_v43 }
 0x202   :  { %3529 = vmatmul.mubr.bf16.vlgmr.msra.gmra.mrb[28].mxu0 %v4333_v6 }
 0x204   :  { %3547 = vmatmul.mubr.bf16.vlgmr.msra.gmra.mrb[28].mxu1 %v4333_v6 }
 0x215   :  { %v4823_v44 = vpop.f32.mrb[16].mxu0 }
 0x216   :  { %v2798_v45 = vmul.f32 %v4823_v44, %v4823_v44  ;;  %v4827_v46 = vpop.f32.mrb[17].mxu0 }
 0x217   :  { %v2747_v47 = vadd.f32 %v4827_v46, %v4823_v44  ;;  %v2799_v48 = vmul.f32 %v4827_v46, %v4827_v46  ;;  %v2440_v49 = vpop.f32.mrb[18].mxu0  ;;  %v4833_v50 = vpop.f32.mrb[16].mxu1 }
 0x218   :  { %v2800_v51 = vmul.f32 %v4833_v50, %v4833_v50  ;;  %v2441_v6 = vpop.f32.mrb[19].mxu0  ;;  %v4837_v52 = vpop.f32.mrb[17].mxu1 }
 0x219   :  { %v2814_v53 = vadd.f32 %v2799_v48, %v2798_v45  ;;  %v2748_v54 = vadd.f32 %v2747_v47, %v4833_v50  ;;  %v2801_v55 = vmul.f32 %v4837_v52, %v4837_v52  ;;  %v2481_v56 = vpop.f32.mrb[18].mxu1 }
 0x21a   :  { %v2482_v58 = vpop.f32.mrb[19].mxu1 }
 0x21b   :  { %v2815_v59 = vadd.f32 %v2814_v53, %v2800_v51  ;;  %v2749_v62 = vadd.f32 %v2748_v54, %v4837_v52 }
 0x21d   :  { %v2816_v0 = vadd.f32 %v2815_v59, %v2801_v55 }
 0x255   :  { %v4843_v4 = vpop.f32.mrb[20].mxu0 }
 0x256   :  { %v2750_v5 = vadd.f32 %v2749_v62, %v4843_v4  ;;  %v2802_v8 = vmul.f32 %v4843_v4, %v4843_v4  ;;  %v4848_v9 = vpop.f32.mrb[21].mxu0 }
 0x257   :  { %v2803_v11 = vmul.f32 %v4848_v9, %v4848_v9  ;;  %v2522_v14 = vpop.f32.mrb[22].mxu0  ;;  %v4852_v15 = vpop.f32.mrb[20].mxu1 }
 0x258   :  { %v2817_v18 = vadd.f32 %v2816_v0, %v2802_v8  ;;  %v2751_v20 = vadd.f32 %v2750_v5, %v4848_v9  ;;  %v2804_v21 = vmul.f32 %v4852_v15, %v4852_v15  ;;  %v2523_v22 = vpop.f32.mrb[23].mxu0  ;;  %v4857_v24 = vpop.f32.mrb[21].mxu1 }
 0x259   :  { %v2563_v25 = vpop.f32.mrb[22].mxu1  ;;  %v2805_v29 = vmul.f32 %v4857_v24, %v4857_v24 }
 0x25a   :  { %v2818_v26 = vadd.f32 %v2817_v18, %v2803_v11  ;;  %v2752_v28 = vadd.f32 %v2751_v20, %v4852_v15  ;;  %v2564_v30 = vpop.f32.mrb[23].mxu1 }
 0x25c   :  { %v2819_v31 = vadd.f32 %v2818_v26, %v2804_v21  ;;  %v2753_v32 = vadd.f32 %v2752_v28, %v4857_v24 }
 0x25e   :  { %v2820_v33 = vadd.f32 %v2819_v31, %v2805_v29 }
 0x295   :  { %v4863_v34 = vpop.f32.mrb[24].mxu0 }
 0x296   :  { %v2754_v35 = vadd.f32 %v2753_v32, %v4863_v34  ;;  %v2806_v36 = vmul.f32 %v4863_v34, %v4863_v34  ;;  %v4868_v37 = vpop.f32.mrb[25].mxu0 }
 0x297   :  { %v2807_v38 = vmul.f32 %v4868_v37, %v4868_v37  ;;  %v2604_v39 = vpop.f32.mrb[26].mxu0  ;;  %v4872_v40 = vpop.f32.mrb[24].mxu1 }
 0x298   :  { %v2821_v41 = vadd.f32 %v2820_v33, %v2806_v36  ;;  %v2755_v42 = vadd.f32 %v2754_v35, %v4868_v37  ;;  %v2808_v43 = vmul.f32 %v4872_v40, %v4872_v40  ;;  %v2605_v45 = vpop.f32.mrb[27].mxu0  ;;  %v4877_v47 = vpop.f32.mrb[25].mxu1  ;;  %v3874_v35 = vmov 0  }
 0x299   :  { %v2645_v48 = vpop.f32.mrb[26].mxu1  ;;  %v2809_v6 = vmul.f32 %v4877_v47, %v4877_v47  ;;  %3549 = vset.pattern.permute.xlu0 %v3874_v35  ;;  %3550 = vset.pattern.permute.xlu1 %v3874_v35  ;;  %v2746_v36 = vpop.xlane.xlu0 %2745 }
 0x29a   :  { %v2822_v49 = vadd.f32 %v2821_v41, %v2807_v38  ;;  %v2756_v51 = vadd.f32 %v2755_v42, %v4872_v40  ;;  %v2646_v53 = vpop.f32.mrb[27].mxu1  ;;  %v2797_v38 = vpop.xlane.xlu1 %2796 }
 0x29c   :  { %v2823_v54 = vadd.f32 %v2822_v49, %v2808_v43  ;;  %v2757_v55 = vadd.f32 %v2756_v51, %v4877_v47 }
 0x29e   :  { %v2824_v56 = vadd.f32 %v2823_v54, %v2809_v6  ;;  %v2840_v54 = vld [vmem:[%s5109_s4] sm:$0xff] }
 0x2d5   :  { %v4883_v58 = vpop.f32.mrb[28].mxu0 }
 0x2d6   :  { %v2758_v59 = vadd.f32 %v2757_v55, %v4883_v58  ;;  %v2810_v62 = vmul.f32 %v4883_v58, %v4883_v58  ;;  %v4888_v0 = vpop.f32.mrb[29].mxu0 }
 0x2d7   :  { %v2811_v5 = vmul.f32 %v4888_v0, %v4888_v0  ;;  %v4892_v8 = vpop.f32.mrb[28].mxu1  ;;  %v2686_v11 = vpop.f32.mrb[30].mxu0 }
 0x2d8   :  { %v2825_v14 = vadd.f32 %v2824_v56, %v2810_v62  ;;  %v2759_v18 = vadd.f32 %v2758_v59, %v4888_v0  ;;  %v2812_v20 = vmul.f32 %v4892_v8, %v4892_v8  ;;  %v4897_v21 = vpop.f32.mrb[29].mxu1  ;;  %v2687_v22 = vpop.f32.mrb[31].mxu0  ;;  %v2842_v59 = vld [vmem:[%s5110_s5] sm:$0xff] }
 0x2d9   :  { %v2727_v25 = vpop.f32.mrb[30].mxu1  ;;  %v2813_v31 = vmul.f32 %v4897_v21, %v4897_v21 }
 0x2da   :  { %v2728_v26 = vpop.f32.mrb[31].mxu1  ;;  %v2760_v28 = vadd.f32 %v2759_v18, %v4892_v8  ;;  %v2826_v29 = vadd.f32 %v2825_v14, %v2811_v5 }
 0x2dc   :  { %v2761_v30 = vadd.f32 %v2760_v28, %v4897_v21  ;;  %v2827_v32 = vadd.f32 %v2826_v29, %v2812_v20 }
 0x2de   :  { %2762 = vadd.xlane.f32.xlu0 %v2761_v30  ;;  %v2828_v33 = vadd.f32 %v2827_v32, %v2813_v31 }
 0x2e0   :  { %2829 = vadd.xlane.f32.xlu1 %v2828_v33 }
 0x36b   :  { %v2763_v39 = vpop.xlane.xlu0 %2762 }
 0x36c   :  { %v2764_v41 = vadd.f32 %v2763_v39, %v2746_v36 }
 0x36d   :  { %v2830_v42 = vpop.xlane.xlu1 %2829 }
 0x36e   :  { %v2833_v43 = vmul.f32 0.00024414063, %v2764_v41  ;;  %v2831_v45 = vadd.f32 %v2830_v42, %v2797_v38 }
 0x370   :  { %v2835_v48 = vmul.f32 %v2833_v43, %v2833_v43  ;;  %v2834_v49 = vmul.f32 0.00024414063, %v2831_v45 }
 0x372   :  { %v2836_v51 = vsub.f32 %v2834_v49, %v2835_v48 }
 0x374   :  { %v2837_v6 = vmax.f32 %v2836_v51, 0.0 }
 0x376   :  { %v2838_v53 = vadd.f32 1e-05, %v2837_v6 }
 0x378   :  { %3807 = vrsqrt.f32 %v2838_v53 }
 0x382   :  { %v3808_v55 = vpop.eup %3807 }
 0x383   :  { %v2841_v56 = vmul.f32 %v3808_v55, %v2840_v54 }
 0x385   :  { %2847 = vperm.xlu0 %3549, %v2841_v56   ;;  %v2843_v62 = vmul.f32 %v2841_v56, %v2833_v43 }
 0x387   :  { %v2844_v5 = vsub.f32 %v2842_v59, %v2843_v62 }
 0x389   :  { %2868 = vperm.xlu1 %3550, %v2844_v5  }
 0x404   :  { %v4909_v11 = vpop.permute.xlu0 %2847 }
 0x405   :  { %v2850_v18 = vmul.f32 %v4909_v11, %v4369_v17  ;;  %v2851_v20 = vmul.f32 %v4909_v11, %v4373_v19  ;;  %v2852_v22 = vmul.f32 %v4909_v11, %v4379_v23  ;;  %v2853_v26 = vmul.f32 %v4909_v11, %v4386_v27 }
 0x406   :  { %v2854_v29 = vmul.f32 %v4909_v11, %v4493_v3  ;;  %v2855_v17 = vmul.f32 %v4909_v11, %v4499_v7  ;;  %v2856_v23 = vmul.f32 %v4909_v11, %v4503_v10  ;;  %v2857_v27 = vmul.f32 %v4909_v11, %v4512_v16 }
 0x407   :  { %v2858_v3 = vmul.f32 %v4909_v11, %v4619_v60  ;;  %v2859_v7 = vmul.f32 %v4909_v11, %v4625_v63  ;;  %v2860_v35 = vmul.f32 %v4909_v11, %v4629_v2  ;;  %v2861_v36 = vmul.f32 %v4909_v11, %v4638_v12 }
 0x408   :  { %v4911_v14 = vpop.permute.xlu1 %2868  ;;  %v2862_v38 = vmul.f32 %v4909_v11, %v4745_v57  ;;  %v2863_v39 = vmul.f32 %v4909_v11, %v4751_v61  ;;  %v2864_v41 = vmul.f32 %v4909_v11, %v4755_v1  ;;  %v2865_v42 = vmul.f32 %v4909_v11, %v4764_v13 }
 0x409   :  { %v2871_v25 = vadd.f32 %v4911_v14, %v2850_v18  ;;  %v2872_v28 = vadd.f32 %v4911_v14, %v2851_v20  ;;  %v2873_v30 = vadd.f32 %v4911_v14, %v2852_v22  ;;  %v2874_v19 = vadd.f32 %v4911_v14, %v2853_v26 }
 0x40a   :  { %v2875_v31 = vadd.f32 %v4911_v14, %v2854_v29  ;;  %v2876_v32 = vadd.f32 %v4911_v14, %v2855_v17  ;;  %v2877_v33 = vadd.f32 %v4911_v14, %v2856_v23  ;;  %v2878_v10 = vadd.f32 %v4911_v14, %v2857_v27 }
 0x40b   :  { %3809 = vtanh.f32 %v2871_v25  ;;  %v2879_v16 = vadd.f32 %v4911_v14, %v2858_v3  ;;  %v2880_v60 = vadd.f32 %v4911_v14, %v2859_v7  ;;  %v2881_v63 = vadd.f32 %v4911_v14, %v2860_v35 }
 0x40c   :  { %3811 = vtanh.f32 %v2872_v28  ;;  %v2882_v2 = vadd.f32 %v4911_v14, %v2861_v36  ;;  %v2883_v12 = vadd.f32 %v4911_v14, %v2862_v38  ;;  %v2884_v57 = vadd.f32 %v4911_v14, %v2863_v39 }
 0x40d   :  { %3813 = vtanh.f32 %v2873_v30  ;;  %v2919_v45 = vmul.f32 %v4909_v11, %v4823_v44  ;;  %v2885_v61 = vadd.f32 %v4911_v14, %v2864_v41  ;;  %v2920_v1 = vmul.f32 %v4909_v11, %v4827_v46 }
 0x40e   :  { %3815 = vtanh.f32 %v2874_v19  ;;  %v2886_v49 = vadd.f32 %v4911_v14, %v2865_v42  ;;  %v2921_v51 = vmul.f32 %v4909_v11, %v4833_v50  ;;  %v2922_v46 = vmul.f32 %v4909_v11, %v4837_v52 }
 0x40f   :  { %3817 = vtanh.f32 %v2875_v31  ;;  %v2935_v44 = vadd.f32 %v2919_v45, %v4911_v14  ;;  %v2936_v53 = vadd.f32 %v2920_v1, %v4911_v14  ;;  %v2923_v50 = vmul.f32 %v4909_v11, %v4843_v4 }
 0x410   :  { %3819 = vtanh.f32 %v2876_v32  ;;  %v2937_v55 = vadd.f32 %v2921_v51, %v4911_v14  ;;  %v2924_v52 = vmul.f32 %v4909_v11, %v4848_v9  ;;  %v2938_v59 = vadd.f32 %v2922_v46, %v4911_v14 }
 0x411   :  { %3821 = vtanh.f32 %v2877_v33  ;;  %v2925_v4 = vmul.f32 %v4909_v11, %v4852_v15  ;;  %v2939_v5 = vadd.f32 %v2923_v50, %v4911_v14  ;;  %v2926_v9 = vmul.f32 %v4909_v11, %v4857_v24 }
 0x412   :  { %3823 = vtanh.f32 %v2878_v10  ;;  %v2940_v20 = vadd.f32 %v2924_v52, %v4911_v14  ;;  %v2927_v15 = vmul.f32 %v4909_v11, %v4863_v34  ;;  %v2928_v24 = vmul.f32 %v4909_v11, %v4868_v37 }
 0x413   :  { %3825 = vtanh.f32 %v2879_v16  ;;  %v2941_v25 = vadd.f32 %v2925_v4, %v4911_v14  ;;  %v2942_v28 = vadd.f32 %v2926_v9, %v4911_v14  ;;  %v2929_v34 = vmul.f32 %v4909_v11, %v4872_v40 }
 0x414   :  { %3827 = vtanh.f32 %v2880_v60  ;;  %v2943_v30 = vadd.f32 %v2927_v15, %v4911_v14  ;;  %v2930_v37 = vmul.f32 %v4909_v11, %v4877_v47  ;;  %v2944_v19 = vadd.f32 %v2928_v24, %v4911_v14 }
 0x415   :  { %v3810_v43 = vpop.eup %3809  ;;  %3829 = vtanh.f32 %v2881_v63  ;;  %v2931_v40 = vmul.f32 %v4909_v11, %v4883_v58  ;;  %v2945_v31 = vadd.f32 %v2929_v34, %v4911_v14  ;;  %v2932_v47 = vmul.f32 %v4909_v11, %v4888_v0 }
 0x416   :  { %v3812_v48 = vpop.eup %3811  ;;  %3831 = vtanh.f32 %v2882_v2  ;;  %2903 = vst [vmem:[%s5111_s6] sm:$0xff] %v3810_v43  ;;  %v2946_v32 = vadd.f32 %v2930_v37, %v4911_v14  ;;  %v2933_v58 = vmul.f32 %v4909_v11, %v4892_v8  ;;  %v2934_v0 = vmul.f32 %v4909_v11, %v4897_v21 }
 0x417   :  { %v3814_v13 = vpop.eup %3813  ;;  %3833 = vtanh.f32 %v2883_v12  ;;  %2904 = vst [vmem:[%s5111_s6 + $0x8] sm:$0xff] %v3812_v48  ;;  %v2947_v33 = vadd.f32 %v2931_v40, %v4911_v14  ;;  %v2948_v10 = vadd.f32 %v2932_v47, %v4911_v14 }
 0x418   :  { %v3816_v6 = vpop.eup %3815  ;;  %3835 = vtanh.f32 %v2884_v57  ;;  %2905 = vst [vmem:[%s5111_s6 + $0x10] sm:$0xff] %v3814_v13  ;;  %v2949_v8 = vadd.f32 %v2933_v58, %v4911_v14  ;;  %v2950_v36 = vadd.f32 %v2934_v0, %v4911_v14 }
 0x419   :  { %v3818_v54 = vpop.eup %3817  ;;  %3837 = vtanh.f32 %v2885_v61  ;;  %2906 = vst [vmem:[%s5111_s6 + $0x18] sm:$0xff] %v3816_v6 }
 0x41a   :  { %v3820_v56 = vpop.eup %3819  ;;  %3839 = vtanh.f32 %v2886_v49  ;;  %2907 = vst [vmem:[%s5111_s6 + $0x20] sm:$0xff] %v3818_v54 }
 0x41b   :  { %v3822_v62 = vpop.eup %3821  ;;  %2908 = vst [vmem:[%s5111_s6 + $0x28] sm:$0xff] %v3820_v56  ;;  %3841 = vtanh.f32 %v2935_v44 }
 0x41c   :  { %v3824_v18 = vpop.eup %3823  ;;  %2909 = vst [vmem:[%s5111_s6 + $0x30] sm:$0xff] %v3822_v62  ;;  %3843 = vtanh.f32 %v2936_v53 }
 0x41d   :  { %v3826_v22 = vpop.eup %3825  ;;  %2910 = vst [vmem:[%s5111_s6 + $0x38] sm:$0xff] %v3824_v18  ;;  %3845 = vtanh.f32 %v2937_v55 }
 0x41e   :  { %v3828_v26 = vpop.eup %3827  ;;  %2911 = vst [vmem:[%s5111_s6 + $0x40] sm:$0xff] %v3826_v22  ;;  %3847 = vtanh.f32 %v2938_v59 }
 0x41f   :  { %v3830_v29 = vpop.eup %3829  ;;  %2912 = vst [vmem:[%s5111_s6 + $0x48] sm:$0xff] %v3828_v26  ;;  %3849 = vtanh.f32 %v2939_v5 }
 0x420   :  { %v3832_v17 = vpop.eup %3831  ;;  %2913 = vst [vmem:[%s5111_s6 + $0x50] sm:$0xff] %v3830_v29  ;;  %3851 = vtanh.f32 %v2940_v20 }
 0x421   :  { %v3834_v23 = vpop.eup %3833  ;;  %2914 = vst [vmem:[%s5111_s6 + $0x58] sm:$0xff] %v3832_v17  ;;  %3853 = vtanh.f32 %v2941_v25 }
 0x422   :  { %v3836_v27 = vpop.eup %3835  ;;  %2915 = vst [vmem:[%s5111_s6 + $0x60] sm:$0xff] %v3834_v23  ;;  %3855 = vtanh.f32 %v2942_v28 }
 0x423   :  { %v3838_v3 = vpop.eup %3837  ;;  %2916 = vst [vmem:[%s5111_s6 + $0x68] sm:$0xff] %v3836_v27  ;;  %3857 = vtanh.f32 %v2943_v30 }
 0x424   :  { %v3840_v7 = vpop.eup %3839  ;;  %2917 = vst [vmem:[%s5111_s6 + $0x70] sm:$0xff] %v3838_v3  ;;  %3859 = vtanh.f32 %v2944_v19 }
 0x425   :  { %v3842_v35 = vpop.eup %3841  ;;  %2918 = vst [vmem:[%s5111_s6 + $0x78] sm:$0xff] %v3840_v7  ;;  %3861 = vtanh.f32 %v2945_v31 }
 0x426   :  { %v3844_v16 = vpop.eup %3843  ;;  %3863 = vtanh.f32 %v2946_v32  ;;  %3244 = vst [vmem:[%s5111_s6 + $0x80] sm:$0xff] %v3842_v35 }
 0x427   :  { %v3846_v21 = vpop.eup %3845  ;;  %3865 = vtanh.f32 %v2947_v33  ;;  %3245 = vst [vmem:[%s5111_s6 + $0x88] sm:$0xff] %v3844_v16 }
 0x428   :  { %v3848_v11 = vpop.eup %3847  ;;  %3867 = vtanh.f32 %v2948_v10  ;;  %3246 = vst [vmem:[%s5111_s6 + $0x90] sm:$0xff] %v3846_v21 }
 0x429   :  { %v3850_v60 = vpop.eup %3849  ;;  %3869 = vtanh.f32 %v2949_v8  ;;  %3247 = vst [vmem:[%s5111_s6 + $0x98] sm:$0xff] %v3848_v11 }
 0x42a   :  { %v3852_v14 = vpop.eup %3851  ;;  %3871 = vtanh.f32 %v2950_v36  ;;  %3248 = vst [vmem:[%s5111_s6 + $0xa0] sm:$0xff] %v3850_v60 }
 0x42b   :  { %v3854_v38 = vpop.eup %3853  ;;  %3249 = vst [vmem:[%s5111_s6 + $0xa8] sm:$0xff] %v3852_v14 }
 0x42c   :  { %v3856_v63 = vpop.eup %3855  ;;  %3250 = vst [vmem:[%s5111_s6 + $0xb0] sm:$0xff] %v3854_v38 }
 0x42d   :  { %v3858_v39 = vpop.eup %3857  ;;  %3251 = vst [vmem:[%s5111_s6 + $0xb8] sm:$0xff] %v3856_v63 }
 0x42e   :  { %v3860_v2 = vpop.eup %3859  ;;  %3252 = vst [vmem:[%s5111_s6 + $0xc0] sm:$0xff] %v3858_v39 }
 0x42f   :  { %v3862_v41 = vpop.eup %3861  ;;  %3253 = vst [vmem:[%s5111_s6 + $0xc8] sm:$0xff] %v3860_v2 }
 0x430   :  { %v3864_v12 = vpop.eup %3863  ;;  %3254 = vst [vmem:[%s5111_s6 + $0xd0] sm:$0xff] %v3862_v41 }
 0x431   :  { %v3866_v42 = vpop.eup %3865  ;;  %3255 = vst [vmem:[%s5111_s6 + $0xd8] sm:$0xff] %v3864_v12 }
 0x432   :  { %v3868_v57 = vpop.eup %3867  ;;  %3256 = vst [vmem:[%s5111_s6 + $0xe0] sm:$0xff] %v3866_v42 }
 0x433   :  { %v3870_v43 = vpop.eup %3869  ;;  %3257 = vst [vmem:[%s5111_s6 + $0xe8] sm:$0xff] %v3868_v57 }
 0x434   :  { %v3872_v45 = vpop.eup %3871  ;;  %3258 = vst [vmem:[%s5111_s6 + $0xf0] sm:$0xff] %v3870_v43 }
 0x435   :  { %3259 = vst [vmem:[%s5111_s6 + $0xf8] sm:$0xff] %v3872_v45 }

</bundles_post_ra>
